<compile_context>
chip_gen: v7x
topology: tpu7x:2x2x1
jax: 0.10.0
libtpu: 0.0.40
codegen_flags: <defaults>
</compile_context>

<pallas_src>
import jax
import jax.numpy as jnp
from jax.experimental import pallas as pl
from jax.experimental.pallas import tpu as pltpu

LRELU_SLOPE = 0.2
BN_EPS = 1e-5
# Worst layer needs ~3 MiB (bf16 blocks + f32 accumulator, double-buffered);
# 24 MiB leaves ample headroom and is valid on v5e/v6e/v7x scoped VMEM.
VMEM_LIMIT = 24 * 1024 * 1024


# --------------------------------------------------------------------------
# Kernel 1: GEMM + LeakyReLU, gridded over M (layer 1, no BN).
# --------------------------------------------------------------------------
def _conv_lrelu_kernel(a_ref, w_ref, o_ref):
    y = jnp.dot(a_ref[...], w_ref[...], preferred_element_type=jnp.float32)
    y = jnp.where(y > 0, y, LRELU_SLOPE * y)
    o_ref[...] = y.astype(o_ref.dtype)


def conv_lrelu_layer(a, w, *, tm=256):
    """a: (M, K) bf16 patches, w: (K, N) bf16 weights -> (M, N) bf16."""
    M, K = a.shape
    Kw, N = w.shape
    assert K == Kw
    if M % tm != 0:
        tm = M
    return pl.pallas_call(
        _conv_lrelu_kernel,
        out_shape=jax.ShapeDtypeStruct((M, N), jnp.bfloat16),
        grid=(M // tm,),
        in_specs=[
            pl.BlockSpec((tm, K), lambda i: (i, 0)),
            pl.BlockSpec((K, N), lambda i: (0, 0)),
        ],
        out_specs=pl.BlockSpec((tm, N), lambda i: (i, 0)),
        compiler_params=pltpu.CompilerParams(
            dimension_semantics=("parallel",),
            vmem_limit_bytes=VMEM_LIMIT,
        ),
    )(a, w)


# --------------------------------------------------------------------------
# Kernel 2: K-streamed GEMM -> f32 accumulator -> BatchNorm (batch stats,
# folded to one scale/shift FMA) -> LeakyReLU.  Layers 2-4.
# --------------------------------------------------------------------------
def _conv_bn_lrelu_kernel(a_ref, w_ref, g_ref, b_ref, o_ref, acc_ref):
    k = pl.program_id(0)

    @pl.when(k == 0)
    def _init():
        acc_ref[...] = jnp.zeros_like(acc_ref)

    acc_ref[...] += jnp.dot(a_ref[...], w_ref[...],
                            preferred_element_type=jnp.float32)

    @pl.when(k == pl.num_programs(0) - 1)
    def _finalize():
        y = acc_ref[...]
        # Per-channel batch statistics over rows (== batch * spatial).
        # Two-pass variance (numerically safe), then fold gamma/beta into a
        # single FMA: y * scale + shift.
        mean = jnp.mean(y, axis=0, keepdims=True)
        var = jnp.mean(jnp.square(y - mean), axis=0, keepdims=True)
        scale = g_ref[...] * jax.lax.rsqrt(var + BN_EPS)
        shift = b_ref[...] - mean * scale
        y = y * scale + shift
        y = jnp.where(y > 0, y, LRELU_SLOPE * y)
        o_ref[...] = y.astype(o_ref.dtype)


def conv_bn_lrelu_layer(a, w, gamma, beta, *, tk=1024):
    """a: (M, K) bf16, w: (K, N) bf16, gamma/beta: (1, N) f32 -> (M, N) bf16."""
    M, K = a.shape
    Kw, N = w.shape
    assert K == Kw
    if K % tk != 0:
        tk = K
    nk = K // tk
    return pl.pallas_call(
        _conv_bn_lrelu_kernel,
        out_shape=jax.ShapeDtypeStruct((M, N), jnp.bfloat16),
        grid=(nk,),
        in_specs=[
            pl.BlockSpec((M, tk), lambda k: (0, k)),
            pl.BlockSpec((tk, N), lambda k: (k, 0)),
            pl.BlockSpec((1, N), lambda k: (0, 0)),
            pl.BlockSpec((1, N), lambda k: (0, 0)),
        ],
        out_specs=pl.BlockSpec((M, N), lambda k: (0, 0)),
        scratch_shapes=[pltpu.VMEM((M, N), jnp.float32)],
        compiler_params=pltpu.CompilerParams(
            dimension_semantics=("arbitrary",),
            vmem_limit_bytes=VMEM_LIMIT,
        ),
    )(a, w, gamma, beta)


# --------------------------------------------------------------------------
# JAX glue: NHWC im2col via static strided slices (no gather), bf16.
# Column (K) ordering is (kh, kw, cin), matching conv_weight_matrix below.
# --------------------------------------------------------------------------
def im2col_nhwc(x, kh, kw, stride, pad):
    n, h, w, c = x.shape
    if pad:
        x = jnp.pad(x, ((0, 0), (pad, pad), (pad, pad), (0, 0)))
    oh = (h + 2 * pad - kh) // stride + 1
    ow = (w + 2 * pad - kw) // stride + 1
    cols = []
    for i in range(kh):
        for j in range(kw):
            cols.append(
                jax.lax.slice(
                    x,
                    (0, i, j, 0),
                    (n, i + (oh - 1) * stride + 1, j + (ow - 1) * stride + 1, c),
                    (1, stride, stride, 1),
                )
            )
    patches = jnp.concatenate(cols, axis=-1)          # (n, oh, ow, kh*kw*c)
    return patches.reshape(n * oh * ow, kh * kw * c), oh, ow


def conv_weight_matrix(w):
    """(cout, cin, kh, kw) -> (kh*kw*cin, cout) matching im2col_nhwc ordering."""
    cout, cin, kh, kw = w.shape
    return w.transpose(2, 3, 1, 0).reshape(kh * kw * cin, cout)


# --------------------------------------------------------------------------
# Parameters (deterministic synthetic init; shapes from the PyTorch module).
# All convs are bias=False, matching the reference nn.Sequential.
# --------------------------------------------------------------------------
_CONV_SHAPES = [
    (64, 3, 4, 4),
    (128, 64, 4, 4),
    (256, 128, 4, 4),
    (512, 256, 4, 4),
    (1, 512, 4, 4),
]
_USE_BN = [False, True, True, True, False]


def init_params(key):
    params = []
    for shape, use_bn in zip(_CONV_SHAPES, _USE_BN):
        key, kw_, kg, kb = jax.random.split(key, 4)
        w = 0.02 * jax.random.normal(kw_, shape, dtype=jnp.float32)
        cout = shape[0]
        if use_bn:
            gamma = 1.0 + 0.1 * jax.random.normal(kg, (cout,), dtype=jnp.float32)
            beta = 0.1 * jax.random.normal(kb, (cout,), dtype=jnp.float32)
        else:
            gamma = jnp.ones((cout,), dtype=jnp.float32)
            beta = jnp.zeros((cout,), dtype=jnp.float32)
        params.append({"w": w, "gamma": gamma, "beta": beta})
    return params


def prepare_params(params):
    """One-time conversion to kernel-ready layout (bf16 GEMM weights).

    Done outside jit so the 4 MiB bf16 cast / transpose of the big layer-4
    weight is not repeated per forward call.
    """
    kp = []
    for p in params[:4]:
        w = p["w"]
        cout = w.shape[0]
        kp.append({
            "wmat": conv_weight_matrix(w).astype(jnp.bfloat16),
            "gamma": p["gamma"].reshape(1, cout).astype(jnp.float32),
            "beta": p["beta"].reshape(1, cout).astype(jnp.float32),
        })
    w5 = params[4]["w"]                      # (1, 512, 4, 4)
    kp.append({"w5mat": w5[0].transpose(1, 2, 0).astype(jnp.float32)})  # (4,4,512)
    return kp


# --------------------------------------------------------------------------
# Forward:  Conv/LReLU -> 3x (Conv/BN/LReLU) -> Conv/Sigmoid -> (N,)
# NOTE: K=48 of layer 1 is kept dense (not padded to 128): padding would
# nearly triple the dominant A-patch HBM traffic of a memory-bound layer.
# --------------------------------------------------------------------------
_LAYER_CFGS = [
    dict(stride=2, pad=1, use_bn=False),
    dict(stride=2, pad=1, use_bn=True),
    dict(stride=2, pad=1, use_bn=True),
    dict(stride=2, pad=1, use_bn=True),
]


def discriminator_forward(img, kparams):
    # img: NCHW f32 (PyTorch layout). Convert once; stay NHWC bf16 thereafter.
    x = img.astype(jnp.bfloat16).transpose(0, 2, 3, 1)
    n = x.shape[0]
    for cfg, p in zip(_LAYER_CFGS, kparams[:4]):
        a, oh, ow = im2col_nhwc(x, 4, 4, cfg["stride"], cfg["pad"])
        if cfg["use_bn"]:
            y = conv_bn_lrelu_layer(a, p["wmat"], p["gamma"], p["beta"])
        else:
            y = conv_lrelu_layer(a, p["wmat"])
        cout = p["wmat"].shape[1]
        x = y.reshape(n, oh, ow, cout)       # NHWC, no transpose needed
    # Final Conv2d(512, 1, k=4, s=1, p=0) + Sigmoid == weighted full reduce
    # per image. N=1 output column -> left to XLA per the perf review.
    logits = jnp.einsum("nhwc,hwc->n", x.astype(jnp.float32), kparams[4]["w5mat"])
    # .view(-1, 1).squeeze(1) -> (N,)
    return jax.nn.sigmoid(logits)


if __name__ == "__main__":
    # 64x64 input is what the architecture implies (5 convs reduce 64 -> 1).
    img = jax.random.normal(jax.random.PRNGKey(0), (2, 3, 64, 64),
                            dtype=jnp.float32)
    params = init_params(jax.random.PRNGKey(1))
    kparams = prepare_params(params)
    fwd = jax.jit(discriminator_forward)
    out = jax.block_until_ready(fwd(img, kparams))
    assert out.shape == (2,)
    assert bool(jnp.all(jnp.isfinite(out)))
    assert bool(jnp.all((out >= 0.0) & (out <= 1.0)))  # sigmoid output range
    print("KERNEL_OK")
</pallas_src>

<mosaic_0001>
module attributes {stable_mosaic.version = 11 : i64} {
  func.func @_conv_lrelu_kernel(%arg0: i32, %arg1: memref<256x48xbf16, #tpu.memory_space<vmem>>, %arg2: memref<48x64xbf16, #tpu.memory_space<vmem>>, %arg3: memref<256x64xbf16, #tpu.memory_space<vmem>>) attributes {dimension_semantics = [#tpu.dimension_semantics<parallel>], iteration_bounds = array<i64: 8>, scalar_prefetch = 0 : i64, scratch_operands = 0 : i64, tpu.core_type = #tpu.core_type<tc>, window_params = [{transform_indices = @transform_0, window_bounds = array<i64: 256, 48>}, {pipeline_mode = #tpu.pipeline_mode<synchronous>, transform_indices = @transform_1, window_bounds = array<i64: 48, 64>}, {transform_indices = @transform_2, window_bounds = array<i64: 256, 64>}]} {
    %c0 = arith.constant 0 : index
    %c0_0 = arith.constant 0 : index
    %0 = vector.load %arg1[%c0, %c0_0] : memref<256x48xbf16, #tpu.memory_space<vmem>>, vector<256x48xbf16>
    %c0_1 = arith.constant 0 : index
    %c0_2 = arith.constant 0 : index
    %1 = vector.load %arg2[%c0_1, %c0_2] : memref<48x64xbf16, #tpu.memory_space<vmem>>, vector<48x64xbf16>
    %cst = arith.constant dense<0.000000e+00> : vector<256x64xf32>
    %2 = tpu.matmul %0, %1, %cst {dimension_numbers = #tpu.dot_dimension_numbers<[1], [0], [0], [1], [0, 0, 1, 1], [], []>} : vector<256x48xbf16>, vector<48x64xbf16>, vector<256x64xf32> -> vector<256x64xf32>
    %cst_3 = arith.constant 0.000000e+00 : f32
    %3 = vector.broadcast %cst_3 : f32 to vector<256x64xf32>
    %4 = arith.cmpf ogt, %2, %3 : vector<256x64xf32>
    %cst_4 = arith.constant 2.000000e-01 : f32
    %5 = vector.broadcast %cst_4 : f32 to vector<256x64xf32>
    %6 = arith.mulf %5, %2 : vector<256x64xf32>
    %7 = arith.select %4, %2, %6 : vector<256x64xi1>, vector<256x64xf32>
    %8 = arith.truncf %7 : vector<256x64xf32> to vector<256x64xbf16>
    %c0_5 = arith.constant 0 : index
    %c0_6 = arith.constant 0 : index
    %9 = vector.load %arg3[%c0_5, %c0_6] : memref<256x64xbf16, #tpu.memory_space<vmem>>, vector<256x64xbf16>
    tpu.vector_store %arg3[%c0_5, %c0_6], %8 {strides = array<i32>} : memref<256x64xbf16, #tpu.memory_space<vmem>>, vector<256x64xbf16>,
    return
  }
  func.func @transform_0(%arg0: i32) -> (i32, i32) {
    %c0_i32 = arith.constant 0 : i32
    %c0_i32_0 = arith.constant 0 : i32
    return %arg0, %c0_i32 : i32, i32
  }
  func.func @transform_1(%arg0: i32) -> (i32, i32) {
    %c0_i32 = arith.constant 0 : i32
    %c0_i32_0 = arith.constant 0 : i32
    %c0_i32_1 = arith.constant 0 : i32
    return %c0_i32, %c0_i32_0 : i32, i32
  }
  func.func @transform_2(%arg0: i32) -> (i32, i32) {
    %c0_i32 = arith.constant 0 : i32
    %c0_i32_0 = arith.constant 0 : i32
    return %arg0, %c0_i32 : i32, i32
  }
}

module attributes {stable_mosaic.version = 11 : i64} {
  func.func @_conv_bn_lrelu_kernel(%arg0: i32, %arg1: memref<512x1024xbf16, #tpu.memory_space<vmem>>, %arg2: memref<1024x128xbf16, #tpu.memory_space<vmem>>, %arg3: memref<1x128xf32, #tpu.memory_space<vmem>>, %arg4: memref<1x128xf32, #tpu.memory_space<vmem>>, %arg5: memref<512x128xbf16, #tpu.memory_space<vmem>>, %arg6: memref<512x128xf32, #tpu.memory_space<vmem>>) attributes {dimension_semantics = [#tpu.dimension_semantics<arbitrary>], iteration_bounds = array<i64: 1>, scalar_prefetch = 0 : i64, scratch_operands = 1 : i64, tpu.core_type = #tpu.core_type<tc>, window_params = [{transform_indices = @transform_0, window_bounds = array<i64: 512, 1024>}, {transform_indices = @transform_1, window_bounds = array<i64: 1024, 128>}, {pipeline_mode = #tpu.pipeline_mode<synchronous>, transform_indices = @transform_2, window_bounds = array<i64: 1, 128>}, {pipeline_mode = #tpu.pipeline_mode<synchronous>, transform_indices = @transform_3, window_bounds = array<i64: 1, 128>}, {pipeline_mode = #tpu.pipeline_mode<synchronous>, transform_indices = @transform_4, window_bounds = array<i64: 512, 128>}]} {
    %c0_i32 = arith.constant 0 : i32
    %0 = arith.cmpi eq, %arg0, %c0_i32 : i32
    %1 = arith.extui %0 : i1 to i32
    %c0_i32_0 = arith.constant 0 : i32
    %2 = arith.cmpi ne, %1, %c0_i32_0 : i32
    scf.if %2 {
      %cst_10 = arith.constant 0.000000e+00 : f32
      %12 = vector.broadcast %cst_10 : f32 to vector<512x128xf32>
      %c0_11 = arith.constant 0 : index
      %c0_12 = arith.constant 0 : index
      %13 = vector.load %arg6[%c0_11, %c0_12] : memref<512x128xf32, #tpu.memory_space<vmem>>, vector<512x128xf32>
      tpu.vector_store %arg6[%c0_11, %c0_12], %12 {strides = array<i32>} : memref<512x128xf32, #tpu.memory_space<vmem>>, vector<512x128xf32>,
    } else {
    }
    %c0 = arith.constant 0 : index
    %c0_1 = arith.constant 0 : index
    %3 = vector.load %arg6[%c0, %c0_1] : memref<512x128xf32, #tpu.memory_space<vmem>>, vector<512x128xf32>
    %c0_2 = arith.constant 0 : index
    %c0_3 = arith.constant 0 : index
    %4 = vector.load %arg1[%c0_2, %c0_3] : memref<512x1024xbf16, #tpu.memory_space<vmem>>, vector<512x1024xbf16>
    %c0_4 = arith.constant 0 : index
    %c0_5 = arith.constant 0 : index
    %5 = vector.load %arg2[%c0_4, %c0_5] : memref<1024x128xbf16, #tpu.memory_space<vmem>>, vector<1024x128xbf16>
    %cst = arith.constant dense<0.000000e+00> : vector<512x128xf32>
    %6 = tpu.matmul %4, %5, %cst {dimension_numbers = #tpu.dot_dimension_numbers<[1], [0], [0], [1], [0, 0, 1, 1], [], []>} : vector<512x1024xbf16>, vector<1024x128xbf16>, vector<512x128xf32> -> vector<512x128xf32>
    %7 = arith.addf %3, %6 : vector<512x128xf32>
    %c0_6 = arith.constant 0 : index
    %c0_7 = arith.constant 0 : index
    %8 = vector.load %arg6[%c0_6, %c0_7] : memref<512x128xf32, #tpu.memory_space<vmem>>, vector<512x128xf32>
    tpu.vector_store %arg6[%c0_6, %c0_7], %7 {strides = array<i32>} : memref<512x128xf32, #tpu.memory_space<vmem>>, vector<512x128xf32>,
    %c0_i32_8 = arith.constant 0 : i32
    %9 = arith.cmpi eq, %arg0, %c0_i32_8 : i32
    %10 = arith.extui %9 : i1 to i32
    %c0_i32_9 = arith.constant 0 : i32
    %11 = arith.cmpi ne, %10, %c0_i32_9 : i32
    scf.if %11 {
      %c0_10 = arith.constant 0 : index
      %c0_11 = arith.constant 0 : index
      %12 = vector.load %arg6[%c0_10, %c0_11] : memref<512x128xf32, #tpu.memory_space<vmem>>, vector<512x128xf32>
      %cst_12 = arith.constant dense<0.000000e+00> : vector<128xf32>
      %13 = vector.multi_reduction <add>, %12, %cst_12 [0] : vector<512x128xf32> to vector<128xf32>
      %14 = vector.shape_cast %13 : vector<128xf32> to vector<1x128xf32>
      %cst_13 = arith.constant 5.120000e+02 : f32
      %15 = vector.broadcast %cst_13 : f32 to vector<1x128xf32>
      %16 = arith.divf %14, %15 : vector<1x128xf32>
      %17 = vector.broadcast %16 : vector<1x128xf32> to vector<512x128xf32>
      %18 = arith.subf %12, %17 : vector<512x128xf32>
      %19 = arith.mulf %18, %18 : vector<512x128xf32>
      %cst_14 = arith.constant dense<0.000000e+00> : vector<128xf32>
      %20 = vector.multi_reduction <add>, %19, %cst_14 [0] : vector<512x128xf32> to vector<128xf32>
      %21 = vector.shape_cast %20 : vector<128xf32> to vector<1x128xf32>
      %cst_15 = arith.constant 5.120000e+02 : f32
      %22 = vector.broadcast %cst_15 : f32 to vector<1x128xf32>
      %23 = arith.divf %21, %22 : vector<1x128xf32>
      %c0_16 = arith.constant 0 : index
      %c0_17 = arith.constant 0 : index
      %24 = vector.load %arg3[%c0_16, %c0_17] : memref<1x128xf32, #tpu.memory_space<vmem>>, vector<1x128xf32>
      %cst_18 = arith.constant 9.99999974E-6 : f32
      %25 = vector.broadcast %cst_18 : f32 to vector<1x128xf32>
      %26 = arith.addf %23, %25 : vector<1x128xf32>
      %27 = math.rsqrt %26 : vector<1x128xf32>
      %28 = arith.mulf %24, %27 : vector<1x128xf32>
      %c0_19 = arith.constant 0 : index
      %c0_20 = arith.constant 0 : index
      %29 = vector.load %arg4[%c0_19, %c0_20] : memref<1x128xf32, #tpu.memory_space<vmem>>, vector<1x128xf32>
      %30 = arith.mulf %16, %28 : vector<1x128xf32>
      %31 = arith.subf %29, %30 : vector<1x128xf32>
      %32 = vector.broadcast %28 : vector<1x128xf32> to vector<512x128xf32>
      %33 = arith.mulf %12, %32 : vector<512x128xf32>
      %34 = vector.broadcast %31 : vector<1x128xf32> to vector<512x128xf32>
      %35 = arith.addf %33, %34 : vector<512x128xf32>
      %cst_21 = arith.constant 0.000000e+00 : f32
      %36 = vector.broadcast %cst_21 : f32 to vector<512x128xf32>
      %37 = arith.cmpf ogt, %35, %36 : vector<512x128xf32>
      %cst_22 = arith.constant 2.000000e-01 : f32
      %38 = vector.broadcast %cst_22 : f32 to vector<512x128xf32>
      %39 = arith.mulf %38, %35 : vector<512x128xf32>
      %40 = arith.select %37, %35, %39 : vector<512x128xi1>, vector<512x128xf32>
      %41 = arith.truncf %40 : vector<512x128xf32> to vector<512x128xbf16>
      %c0_23 = arith.constant 0 : index
      %c0_24 = arith.constant 0 : index
      %42 = vector.load %arg5[%c0_23, %c0_24] : memref<512x128xbf16, #tpu.memory_space<vmem>>, vector<512x128xbf16>
      tpu.vector_store %arg5[%c0_23, %c0_24], %41 {strides = array<i32>} : memref<512x128xbf16, #tpu.memory_space<vmem>>, vector<512x128xbf16>,
    } else {
    }
    return
  }
  func.func @transform_0(%arg0: i32) -> (i32, i32) {
    %c0_i32 = arith.constant 0 : i32
    %c0_i32_0 = arith.constant 0 : i32
    return %c0_i32, %arg0 : i32, i32
  }
  func.func @transform_1(%arg0: i32) -> (i32, i32) {
    %c0_i32 = arith.constant 0 : i32
    %c0_i32_0 = arith.constant 0 : i32
    return %arg0, %c0_i32 : i32, i32
  }
  func.func @transform_2(%arg0: i32) -> (i32, i32) {
    %c0_i32 = arith.constant 0 : i32
    %c0_i32_0 = arith.constant 0 : i32
    %c0_i32_1 = arith.constant 0 : i32
    return %c0_i32, %c0_i32_0 : i32, i32
  }
  func.func @transform_3(%arg0: i32) -> (i32, i32) {
    %c0_i32 = arith.constant 0 : i32
    %c0_i32_0 = arith.constant 0 : i32
    %c0_i32_1 = arith.constant 0 : i32
    return %c0_i32, %c0_i32_0 : i32, i32
  }
  func.func @transform_4(%arg0: i32) -> (i32, i32) {
    %c0_i32 = arith.constant 0 : i32
    %c0_i32_0 = arith.constant 0 : i32
    %c0_i32_1 = arith.constant 0 : i32
    return %c0_i32, %c0_i32_0 : i32, i32
  }
}

module attributes {stable_mosaic.version = 11 : i64} {
  func.func @_conv_bn_lrelu_kernel(%arg0: i32, %arg1: memref<128x1024xbf16, #tpu.memory_space<vmem>>, %arg2: memref<1024x256xbf16, #tpu.memory_space<vmem>>, %arg3: memref<1x256xf32, #tpu.memory_space<vmem>>, %arg4: memref<1x256xf32, #tpu.memory_space<vmem>>, %arg5: memref<128x256xbf16, #tpu.memory_space<vmem>>, %arg6: memref<128x256xf32, #tpu.memory_space<vmem>>) attributes {dimension_semantics = [#tpu.dimension_semantics<arbitrary>], iteration_bounds = array<i64: 2>, scalar_prefetch = 0 : i64, scratch_operands = 1 : i64, tpu.core_type = #tpu.core_type<tc>, window_params = [{transform_indices = @transform_0, window_bounds = array<i64: 128, 1024>}, {transform_indices = @transform_1, window_bounds = array<i64: 1024, 256>}, {pipeline_mode = #tpu.pipeline_mode<synchronous>, transform_indices = @transform_2, window_bounds = array<i64: 1, 256>}, {pipeline_mode = #tpu.pipeline_mode<synchronous>, transform_indices = @transform_3, window_bounds = array<i64: 1, 256>}, {pipeline_mode = #tpu.pipeline_mode<synchronous>, transform_indices = @transform_4, window_bounds = array<i64: 128, 256>}]} {
    %c0_i32 = arith.constant 0 : i32
    %0 = arith.cmpi eq, %arg0, %c0_i32 : i32
    %1 = arith.extui %0 : i1 to i32
    %c0_i32_0 = arith.constant 0 : i32
    %2 = arith.cmpi ne, %1, %c0_i32_0 : i32
    scf.if %2 {
      %cst_9 = arith.constant 0.000000e+00 : f32
      %12 = vector.broadcast %cst_9 : f32 to vector<128x256xf32>
      %c0_10 = arith.constant 0 : index
      %c0_11 = arith.constant 0 : index
      %13 = vector.load %arg6[%c0_10, %c0_11] : memref<128x256xf32, #tpu.memory_space<vmem>>, vector<128x256xf32>
      tpu.vector_store %arg6[%c0_10, %c0_11], %12 {strides = array<i32>} : memref<128x256xf32, #tpu.memory_space<vmem>>, vector<128x256xf32>,
    } else {
    }
    %c0 = arith.constant 0 : index
    %c0_1 = arith.constant 0 : index
    %3 = vector.load %arg6[%c0, %c0_1] : memref<128x256xf32, #tpu.memory_space<vmem>>, vector<128x256xf32>
    %c0_2 = arith.constant 0 : index
    %c0_3 = arith.constant 0 : index
    %4 = vector.load %arg1[%c0_2, %c0_3] : memref<128x1024xbf16, #tpu.memory_space<vmem>>, vector<128x1024xbf16>
    %c0_4 = arith.constant 0 : index
    %c0_5 = arith.constant 0 : index
    %5 = vector.load %arg2[%c0_4, %c0_5] : memref<1024x256xbf16, #tpu.memory_space<vmem>>, vector<1024x256xbf16>
    %cst = arith.constant dense<0.000000e+00> : vector<128x256xf32>
    %6 = tpu.matmul %4, %5, %cst {dimension_numbers = #tpu.dot_dimension_numbers<[1], [0], [0], [1], [0, 0, 1, 1], [], []>} : vector<128x1024xbf16>, vector<1024x256xbf16>, vector<128x256xf32> -> vector<128x256xf32>
    %7 = arith.addf %3, %6 : vector<128x256xf32>
    %c0_6 = arith.constant 0 : index
    %c0_7 = arith.constant 0 : index
    %8 = vector.load %arg6[%c0_6, %c0_7] : memref<128x256xf32, #tpu.memory_space<vmem>>, vector<128x256xf32>
    tpu.vector_store %arg6[%c0_6, %c0_7], %7 {strides = array<i32>} : memref<128x256xf32, #tpu.memory_space<vmem>>, vector<128x256xf32>,
    %c1_i32 = arith.constant 1 : i32
    %9 = arith.cmpi eq, %arg0, %c1_i32 : i32
    %10 = arith.extui %9 : i1 to i32
    %c0_i32_8 = arith.constant 0 : i32
    %11 = arith.cmpi ne, %10, %c0_i32_8 : i32
    scf.if %11 {
      %c0_9 = arith.constant 0 : index
      %c0_10 = arith.constant 0 : index
      %12 = vector.load %arg6[%c0_9, %c0_10] : memref<128x256xf32, #tpu.memory_space<vmem>>, vector<128x256xf32>
      %cst_11 = arith.constant dense<0.000000e+00> : vector<256xf32>
      %13 = vector.multi_reduction <add>, %12, %cst_11 [0] : vector<128x256xf32> to vector<256xf32>
      %14 = vector.shape_cast %13 : vector<256xf32> to vector<1x256xf32>
      %cst_12 = arith.constant 1.280000e+02 : f32
      %15 = vector.broadcast %cst_12 : f32 to vector<1x256xf32>
      %16 = arith.divf %14, %15 : vector<1x256xf32>
      %17 = vector.broadcast %16 : vector<1x256xf32> to vector<128x256xf32>
      %18 = arith.subf %12, %17 : vector<128x256xf32>
      %19 = arith.mulf %18, %18 : vector<128x256xf32>
      %cst_13 = arith.constant dense<0.000000e+00> : vector<256xf32>
      %20 = vector.multi_reduction <add>, %19, %cst_13 [0] : vector<128x256xf32> to vector<256xf32>
      %21 = vector.shape_cast %20 : vector<256xf32> to vector<1x256xf32>
      %cst_14 = arith.constant 1.280000e+02 : f32
      %22 = vector.broadcast %cst_14 : f32 to vector<1x256xf32>
      %23 = arith.divf %21, %22 : vector<1x256xf32>
      %c0_15 = arith.constant 0 : index
      %c0_16 = arith.constant 0 : index
      %24 = vector.load %arg3[%c0_15, %c0_16] : memref<1x256xf32, #tpu.memory_space<vmem>>, vector<1x256xf32>
      %cst_17 = arith.constant 9.99999974E-6 : f32
      %25 = vector.broadcast %cst_17 : f32 to vector<1x256xf32>
      %26 = arith.addf %23, %25 : vector<1x256xf32>
      %27 = math.rsqrt %26 : vector<1x256xf32>
      %28 = arith.mulf %24, %27 : vector<1x256xf32>
      %c0_18 = arith.constant 0 : index
      %c0_19 = arith.constant 0 : index
      %29 = vector.load %arg4[%c0_18, %c0_19] : memref<1x256xf32, #tpu.memory_space<vmem>>, vector<1x256xf32>
      %30 = arith.mulf %16, %28 : vector<1x256xf32>
      %31 = arith.subf %29, %30 : vector<1x256xf32>
      %32 = vector.broadcast %28 : vector<1x256xf32> to vector<128x256xf32>
      %33 = arith.mulf %12, %32 : vector<128x256xf32>
      %34 = vector.broadcast %31 : vector<1x256xf32> to vector<128x256xf32>
      %35 = arith.addf %33, %34 : vector<128x256xf32>
      %cst_20 = arith.constant 0.000000e+00 : f32
      %36 = vector.broadcast %cst_20 : f32 to vector<128x256xf32>
      %37 = arith.cmpf ogt, %35, %36 : vector<128x256xf32>
      %cst_21 = arith.constant 2.000000e-01 : f32
      %38 = vector.broadcast %cst_21 : f32 to vector<128x256xf32>
      %39 = arith.mulf %38, %35 : vector<128x256xf32>
      %40 = arith.select %37, %35, %39 : vector<128x256xi1>, vector<128x256xf32>
      %41 = arith.truncf %40 : vector<128x256xf32> to vector<128x256xbf16>
      %c0_22 = arith.constant 0 : index
      %c0_23 = arith.constant 0 : index
      %42 = vector.load %arg5[%c0_22, %c0_23] : memref<128x256xbf16, #tpu.memory_space<vmem>>, vector<128x256xbf16>
      tpu.vector_store %arg5[%c0_22, %c0_23], %41 {strides = array<i32>} : memref<128x256xbf16, #tpu.memory_space<vmem>>, vector<128x256xbf16>,
    } else {
    }
    return
  }
  func.func @transform_0(%arg0: i32) -> (i32, i32) {
    %c0_i32 = arith.constant 0 : i32
    %c0_i32_0 = arith.constant 0 : i32
    return %c0_i32, %arg0 : i32, i32
  }
  func.func @transform_1(%arg0: i32) -> (i32, i32) {
    %c0_i32 = arith.constant 0 : i32
    %c0_i32_0 = arith.constant 0 : i32
    return %arg0, %c0_i32 : i32, i32
  }
  func.func @transform_2(%arg0: i32) -> (i32, i32) {
    %c0_i32 = arith.constant 0 : i32
    %c0_i32_0 = arith.constant 0 : i32
    %c0_i32_1 = arith.constant 0 : i32
    return %c0_i32, %c0_i32_0 : i32, i32
  }
  func.func @transform_3(%arg0: i32) -> (i32, i32) {
    %c0_i32 = arith.constant 0 : i32
    %c0_i32_0 = arith.constant 0 : i32
    %c0_i32_1 = arith.constant 0 : i32
    return %c0_i32, %c0_i32_0 : i32, i32
  }
  func.func @transform_4(%arg0: i32) -> (i32, i32) {
    %c0_i32 = arith.constant 0 : i32
    %c0_i32_0 = arith.constant 0 : i32
    %c0_i32_1 = arith.constant 0 : i32
    return %c0_i32, %c0_i32_0 : i32, i32
  }
}

module attributes {stable_mosaic.version = 11 : i64} {
  func.func @_conv_bn_lrelu_kernel(%arg0: i32, %arg1: memref<32x1024xbf16, #tpu.memory_space<vmem>>, %arg2: memref<1024x512xbf16, #tpu.memory_space<vmem>>, %arg3: memref<1x512xf32, #tpu.memory_space<vmem>>, %arg4: memref<1x512xf32, #tpu.memory_space<vmem>>, %arg5: memref<32x512xbf16, #tpu.memory_space<vmem>>, %arg6: memref<32x512xf32, #tpu.memory_space<vmem>>) attributes {dimension_semantics = [#tpu.dimension_semantics<arbitrary>], iteration_bounds = array<i64: 4>, scalar_prefetch = 0 : i64, scratch_operands = 1 : i64, tpu.core_type = #tpu.core_type<tc>, window_params = [{transform_indices = @transform_0, window_bounds = array<i64: 32, 1024>}, {transform_indices = @transform_1, window_bounds = array<i64: 1024, 512>}, {pipeline_mode = #tpu.pipeline_mode<synchronous>, transform_indices = @transform_2, window_bounds = array<i64: 1, 512>}, {pipeline_mode = #tpu.pipeline_mode<synchronous>, transform_indices = @transform_3, window_bounds = array<i64: 1, 512>}, {pipeline_mode = #tpu.pipeline_mode<synchronous>, transform_indices = @transform_4, window_bounds = array<i64: 32, 512>}]} {
    %c0_i32 = arith.constant 0 : i32
    %0 = arith.cmpi eq, %arg0, %c0_i32 : i32
    %1 = arith.extui %0 : i1 to i32
    %c0_i32_0 = arith.constant 0 : i32
    %2 = arith.cmpi ne, %1, %c0_i32_0 : i32
    scf.if %2 {
      %cst_9 = arith.constant 0.000000e+00 : f32
      %12 = vector.broadcast %cst_9 : f32 to vector<32x512xf32>
      %c0_10 = arith.constant 0 : index
      %c0_11 = arith.constant 0 : index
      %13 = vector.load %arg6[%c0_10, %c0_11] : memref<32x512xf32, #tpu.memory_space<vmem>>, vector<32x512xf32>
      tpu.vector_store %arg6[%c0_10, %c0_11], %12 {strides = array<i32>} : memref<32x512xf32, #tpu.memory_space<vmem>>, vector<32x512xf32>,
    } else {
    }
    %c0 = arith.constant 0 : index
    %c0_1 = arith.constant 0 : index
    %3 = vector.load %arg6[%c0, %c0_1] : memref<32x512xf32, #tpu.memory_space<vmem>>, vector<32x512xf32>
    %c0_2 = arith.constant 0 : index
    %c0_3 = arith.constant 0 : index
    %4 = vector.load %arg1[%c0_2, %c0_3] : memref<32x1024xbf16, #tpu.memory_space<vmem>>, vector<32x1024xbf16>
    %c0_4 = arith.constant 0 : index
    %c0_5 = arith.constant 0 : index
    %5 = vector.load %arg2[%c0_4, %c0_5] : memref<1024x512xbf16, #tpu.memory_space<vmem>>, vector<1024x512xbf16>
    %cst = arith.constant dense<0.000000e+00> : vector<32x512xf32>
    %6 = tpu.matmul %4, %5, %cst {dimension_numbers = #tpu.dot_dimension_numbers<[1], [0], [0], [1], [0, 0, 1, 1], [], []>} : vector<32x1024xbf16>, vector<1024x512xbf16>, vector<32x512xf32> -> vector<32x512xf32>
    %7 = arith.addf %3, %6 : vector<32x512xf32>
    %c0_6 = arith.constant 0 : index
    %c0_7 = arith.constant 0 : index
    %8 = vector.load %arg6[%c0_6, %c0_7] : memref<32x512xf32, #tpu.memory_space<vmem>>, vector<32x512xf32>
    tpu.vector_store %arg6[%c0_6, %c0_7], %7 {strides = array<i32>} : memref<32x512xf32, #tpu.memory_space<vmem>>, vector<32x512xf32>,
    %c3_i32 = arith.constant 3 : i32
    %9 = arith.cmpi eq, %arg0, %c3_i32 : i32
    %10 = arith.extui %9 : i1 to i32
    %c0_i32_8 = arith.constant 0 : i32
    %11 = arith.cmpi ne, %10, %c0_i32_8 : i32
    scf.if %11 {
      %c0_9 = arith.constant 0 : index
      %c0_10 = arith.constant 0 : index
      %12 = vector.load %arg6[%c0_9, %c0_10] : memref<32x512xf32, #tpu.memory_space<vmem>>, vector<32x512xf32>
      %cst_11 = arith.constant dense<0.000000e+00> : vector<512xf32>
      %13 = vector.multi_reduction <add>, %12, %cst_11 [0] : vector<32x512xf32> to vector<512xf32>
      %14 = vector.shape_cast %13 : vector<512xf32> to vector<1x512xf32>
      %cst_12 = arith.constant 3.200000e+01 : f32
      %15 = vector.broadcast %cst_12 : f32 to vector<1x512xf32>
      %16 = arith.divf %14, %15 : vector<1x512xf32>
      %17 = vector.broadcast %16 : vector<1x512xf32> to vector<32x512xf32>
      %18 = arith.subf %12, %17 : vector<32x512xf32>
      %19 = arith.mulf %18, %18 : vector<32x512xf32>
      %cst_13 = arith.constant dense<0.000000e+00> : vector<512xf32>
      %20 = vector.multi_reduction <add>, %19, %cst_13 [0] : vector<32x512xf32> to vector<512xf32>
      %21 = vector.shape_cast %20 : vector<512xf32> to vector<1x512xf32>
      %cst_14 = arith.constant 3.200000e+01 : f32
      %22 = vector.broadcast %cst_14 : f32 to vector<1x512xf32>
      %23 = arith.divf %21, %22 : vector<1x512xf32>
      %c0_15 = arith.constant 0 : index
      %c0_16 = arith.constant 0 : index
      %24 = vector.load %arg3[%c0_15, %c0_16] : memref<1x512xf32, #tpu.memory_space<vmem>>, vector<1x512xf32>
      %cst_17 = arith.constant 9.99999974E-6 : f32
      %25 = vector.broadcast %cst_17 : f32 to vector<1x512xf32>
      %26 = arith.addf %23, %25 : vector<1x512xf32>
      %27 = math.rsqrt %26 : vector<1x512xf32>
      %28 = arith.mulf %24, %27 : vector<1x512xf32>
      %c0_18 = arith.constant 0 : index
      %c0_19 = arith.constant 0 : index
      %29 = vector.load %arg4[%c0_18, %c0_19] : memref<1x512xf32, #tpu.memory_space<vmem>>, vector<1x512xf32>
      %30 = arith.mulf %16, %28 : vector<1x512xf32>
      %31 = arith.subf %29, %30 : vector<1x512xf32>
      %32 = vector.broadcast %28 : vector<1x512xf32> to vector<32x512xf32>
      %33 = arith.mulf %12, %32 : vector<32x512xf32>
      %34 = vector.broadcast %31 : vector<1x512xf32> to vector<32x512xf32>
      %35 = arith.addf %33, %34 : vector<32x512xf32>
      %cst_20 = arith.constant 0.000000e+00 : f32
      %36 = vector.broadcast %cst_20 : f32 to vector<32x512xf32>
      %37 = arith.cmpf ogt, %35, %36 : vector<32x512xf32>
      %cst_21 = arith.constant 2.000000e-01 : f32
      %38 = vector.broadcast %cst_21 : f32 to vector<32x512xf32>
      %39 = arith.mulf %38, %35 : vector<32x512xf32>
      %40 = arith.select %37, %35, %39 : vector<32x512xi1>, vector<32x512xf32>
      %41 = arith.truncf %40 : vector<32x512xf32> to vector<32x512xbf16>
      %c0_22 = arith.constant 0 : index
      %c0_23 = arith.constant 0 : index
      %42 = vector.load %arg5[%c0_22, %c0_23] : memref<32x512xbf16, #tpu.memory_space<vmem>>, vector<32x512xbf16>
      tpu.vector_store %arg5[%c0_22, %c0_23], %41 {strides = array<i32>} : memref<32x512xbf16, #tpu.memory_space<vmem>>, vector<32x512xbf16>,
    } else {
    }
    return
  }
  func.func @transform_0(%arg0: i32) -> (i32, i32) {
    %c0_i32 = arith.constant 0 : i32
    %c0_i32_0 = arith.constant 0 : i32
    return %c0_i32, %arg0 : i32, i32
  }
  func.func @transform_1(%arg0: i32) -> (i32, i32) {
    %c0_i32 = arith.constant 0 : i32
    %c0_i32_0 = arith.constant 0 : i32
    return %arg0, %c0_i32 : i32, i32
  }
  func.func @transform_2(%arg0: i32) -> (i32, i32) {
    %c0_i32 = arith.constant 0 : i32
    %c0_i32_0 = arith.constant 0 : i32
    %c0_i32_1 = arith.constant 0 : i32
    return %c0_i32, %c0_i32_0 : i32, i32
  }
  func.func @transform_3(%arg0: i32) -> (i32, i32) {
    %c0_i32 = arith.constant 0 : i32
    %c0_i32_0 = arith.constant 0 : i32
    %c0_i32_1 = arith.constant 0 : i32
    return %c0_i32, %c0_i32_0 : i32, i32
  }
  func.func @transform_4(%arg0: i32) -> (i32, i32) {
    %c0_i32 = arith.constant 0 : i32
    %c0_i32_0 = arith.constant 0 : i32
    %c0_i32_1 = arith.constant 0 : i32
    return %c0_i32, %c0_i32_0 : i32, i32
  }
}

</mosaic_0001>

<bundles_post_ra>
// kernel: discriminator_forward.4
= control target key start
LH: loop header
LB: loop body
LE: loop exit
PB: predicated region body
PF: predicated region fallthrough
CT: control target
= control target key end

     0   :  { %s1030_s9 = smov 0   ;;  %s1164_s0 = inlined_call_operand.vmem [shape: bf16[2048,48], index: 0, kind: input, shape index: {}]   ;;  %s1165_s1 = inlined_call_operand.vmem [shape: bf16[48,64], index: 1, kind: input, shape index: {}]   ;;  %s1166_s2 = inlined_call_operand.vmem [shape: bf16[2048,64], index: 2, kind: output, shape index: {}]  }
   0x1 LB: > { %s807_s10 = sadd.s32 4294967295, %s1013_s9   ;;  %p811_p0 = scmp.ge.s32.totalorder %s1013_s9, 1  ;;  %s1013_s9 = sphi %s1030_s9, %s12_s9  }
   0x2   : > { %p113_p1 = scmp.lt.s32.totalorder %s1013_s9, 9 }
   0x4   : > { %p114_p2 = pnand %p811_p0, %p113_p1 }
   0x5   : > { %v988_v0 = vld [vmem:[%s1165_s1] sm:$0xff] (!%p114_p2)   ;;  %s812_s13 = sshll.u32 (!%p114_p2), %s807_s10, 5  ;;  %v989_v1 = vld [vmem:[%s1165_s1 + $0x8] sm:$0xff] (!%p114_p2)   ;;  %v990_v2 = vld [vmem:[%s1165_s1 + $0x10] sm:$0xff] (!%p114_p2)   ;;  %vm284_vm0 = vcmask (!%p114_p2), 392192   ;;  %vm718_vm3 = vcmask (!%p114_p2), 519168  }
   0x6   : > { %117 = sbr.rel (%p114_p2) target bundleno = 269 (0x10d), region = 28  ;;  %p136_p3 = scmp.lt.s32.totalorder (!%p114_p2), %s812_s13, 255  ;;  %936 = vmatprep.subr.bf16.mxu0 (!%p114_p2), %v988_v0  ;;  %974 = vmatprep.subr.bf16.mxu1 (!%p114_p2), %v988_v0 }
   0x7   : > { %937 = vmatpush3.bf16.msra.mxu0 (!%p114_p2), %v988_v0  ;;  %977 = vmatpush3.bf16.msra.mxu1 (!%p114_p2), %v988_v0 }
   0x8   : > { %938 = vmatprep.subr.bf16.mxu0 (!%p114_p2), %v989_v1  ;;  %975 = vmatprep.subr.bf16.mxu1 (!%p114_p2), %v989_v1 }
   0xb   : > { %939 = vmatpush3.bf16.msra.mxu0 (!%p114_p2), %v989_v1  ;;  %978 = vmatpush3.bf16.msra.mxu1 (!%p114_p2), %v989_v1 }
   0xc   : > { %940 = vmatprep.subr.bf16.mxu0 (!%p114_p2), %v990_v2  ;;  %976 = vmatprep.subr.bf16.mxu1 (!%p114_p2), %v990_v2 }
   0xd   : > { %s1168_s13 = smov (!%p136_p3, %s812_s13), 255 }
   0xe   : > { %s813_s18 = sshll.u32 %s1168_s13, 2 }
   0xf   : > { %s1055_s21 = scalar_lea.vmem %s1164_s0, %s813_s18  ;;  %941 = vmatpush3.bf16.msra.mxu0 %v990_v2  ;;  %979 = vmatpush3.bf16.msra.mxu1 %v990_v2  ;;  %s1094_s24 = scalar_lea.vmem %s1166_s2, %s813_s18 }
  0x10   : > { %v991_v3 = vld [vmem:[%s1055_s21] sm:$0xff]   ;;  %v993_v5 = vld [vmem:[%s1055_s21 + $0x8] sm:$0xff]   ;;  %v995_v7 = vld [vmem:[%s1055_s21 + $0x10] sm:$0xff]  }
  0x11   : > { %v992_v4 = vld [vmem:[%s1055_s21 + $0x40] sm:$0xff]   ;;  %942 = vmatprep.mubr.msk.bf16.mxu0 %vm284_vm0, %v991_v3  ;;  %v994_v6 = vld [vmem:[%s1055_s21 + $0x48] sm:$0xff]   ;;  %v996_v8 = vld [vmem:[%s1055_s21 + $0x50] sm:$0xff]  }
  0x12   : > { %958 = vmatprep.mubr.msk.bf16.mxu1 %vm284_vm0, %v992_v4  ;;  %943 = vmatmul.mubr.msk.bf16.vlgmr.msra.gmra.mrb[0].mxu0 %vm284_vm0, %v993_v5  ;;  %v997_v9 = vld [vmem:[%s1055_s21 + $0x18] sm:$0xff]   ;;  %v999_v11 = vld [vmem:[%s1055_s21 + $0x20] sm:$0xff]   ;;  %v1001_v13 = vld [vmem:[%s1055_s21 + $0x28] sm:$0xff]  }
  0x13   : > { %959 = vmatmul.mubr.msk.bf16.vlgmr.msra.gmra.mrb[0].mxu1 %vm284_vm0, %v994_v6  ;;  %946 = vmatprep.mubr.msk.bf16.mxu0 %vm284_vm0, %v995_v7  ;;  %v998_v10 = vld [vmem:[%s1055_s21 + $0x58] sm:$0xff]   ;;  %v1000_v12 = vld [vmem:[%s1055_s21 + $0x60] sm:$0xff]   ;;  %v1002_v14 = vld [vmem:[%s1055_s21 + $0x68] sm:$0xff]  }
  0x14   : > { %962 = vmatprep.mubr.msk.bf16.mxu1 %vm284_vm0, %v996_v8  ;;  %v1003_v15 = vld [vmem:[%s1055_s21 + $0x30] sm:$0xff]   ;;  %v1005_v17 = vld [vmem:[%s1055_s21 + $0x38] sm:$0xff]  }
  0x15   : > { %v1004_v16 = vld [vmem:[%s1055_s21 + $0x70] sm:$0xff]   ;;  %v1006_v18 = vld [vmem:[%s1055_s21 + $0x78] sm:$0xff]  }
  0x1a   : > { %947 = vmatmul.mubr.msk.bf16.gmra.mrb[4].mxu0 %vm284_vm0, %v997_v9 }
  0x1b   : > { %963 = vmatmul.mubr.msk.bf16.gmra.mrb[4].mxu1 %vm284_vm0, %v998_v10  ;;  %950 = vmatprep.mubr.msk.bf16.mxu0 %vm284_vm0, %v999_v11 }
  0x1c   : > { %966 = vmatprep.mubr.msk.bf16.mxu1 %vm284_vm0, %v1000_v12 }
  0x22   : > { %951 = vmatmul.mubr.msk.bf16.gmra.mrb[8].mxu0 %vm284_vm0, %v1001_v13 }
  0x23   : > { %967 = vmatmul.mubr.msk.bf16.gmra.mrb[8].mxu1 %vm284_vm0, %v1002_v14  ;;  %954 = vmatprep.mubr.msk.bf16.mxu0 %vm284_vm0, %v1003_v15 }
  0x24   : > { %970 = vmatprep.mubr.msk.bf16.mxu1 %vm284_vm0, %v1004_v16 }
  0x2a   : > { %955 = vmatmul.mubr.msk.bf16.gmra.mrb[12].mxu0 %vm284_vm0, %v1005_v17 }
  0x2b   : > { %971 = vmatmul.mubr.msk.bf16.gmra.mrb[12].mxu1 %vm284_vm0, %v1006_v18 }
  0xe5   : > { %v944_v19 = vpop.f32.mrb[0].mxu0 }
  0xe6   : > { %v960_v20 = vpop.f32.mrb[0].mxu1  ;;  %vm496_vm1 = vcmp.gt.f32.partialorder %v944_v19, 0.0  ;;  %v528_v21 = vmul.f32 0.2, %v944_v19  ;;  %v367_v23 = vpop.f32.mrb[1].mxu0 }
  0xe7   : > { %vm512_vm2 = vcmp.gt.f32.partialorder %v960_v20, 0.0  ;;  %v544_v22 = vmul.f32 0.2, %v960_v20  ;;  %v431_v24 = vpop.f32.mrb[1].mxu1  ;;  %vm494_vm4 = vcmp.gt.f32.partialorder %v367_v23, 0.0  ;;  %v945_v28 = vpop.f32.mrb[2].mxu0 }
  0xe8   : > { %v560_v25 = vsel %vm496_vm1, %v944_v19, %v528_v21  ;;  %v526_v27 = vmul.f32 0.2, %v367_v23  ;;  %v961_v29 = vpop.f32.mrb[2].mxu1  ;;  %vm510_vm5 = vcmp.gt.f32.partialorder %v431_v24, 0.0  ;;  %v542_v32 = vmul.f32 0.2, %v431_v24 }
  0xe9   : > { %v576_v26 = vsel %vm512_vm2, %v960_v20, %v544_v22  ;;  %v887_v30 = vpack.c.bf16 %v560_v25, %v560_v25  ;;  %v370_v33 = vpop.f32.mrb[3].mxu0  ;;  %v434_v34 = vpop.f32.mrb[3].mxu1  ;;  %vm497_vm6 = vcmp.gt.f32.partialorder %v945_v28, 0.0  ;;  %v529_v36 = vmul.f32 0.2, %v945_v28 }
  0xea   : > { %v903_v31 = vpack.c.bf16 %v576_v26, %v576_v26  ;;  %v558_v35 = vsel %vm494_vm4, %v367_v23, %v526_v27  ;;  %vm513_vm7 = vcmp.gt.f32.partialorder %v961_v29, 0.0  ;;  %v574_v38 = vsel %vm510_vm5, %v431_v24, %v542_v32 }
  0xeb   : > { %721 = vst.msk [vmem:[%s1094_s24 + $0x8] sm:$0xf] %vm718_vm3, %v887_v30  ;;  %v885_v37 = vpack.c.bf16 %v558_v35, %v558_v35  ;;  %v545_v39 = vmul.f32 0.2, %v961_v29  ;;  %vm495_vm8 = vcmp.gt.f32.partialorder %v370_v33, 0.0  ;;  %v901_v40 = vpack.c.bf16 %v574_v38, %v574_v38 }
  0xec   : > { %737 = vst.msk [vmem:[%s1094_s24 + $0x48] sm:$0xf] %vm718_vm3, %v903_v31  ;;  %v561_v41 = vsel %vm497_vm6, %v945_v28, %v529_v36  ;;  %v527_v42 = vmul.f32 0.2, %v370_v33  ;;  %vm511_vm9 = vcmp.gt.f32.partialorder %v434_v34, 0.0 }
  0xed   : > { %719 = vst.msk [vmem:[%s1094_s24] sm:$0xf] %vm718_vm3, %v885_v37  ;;  %v888_v43 = vpack.c.bf16 %v561_v41, %v561_v41  ;;  %v577_v44 = vsel %vm513_vm7, %v961_v29, %v545_v39  ;;  %v543_v45 = vmul.f32 0.2, %v434_v34  ;;  %v948_v46 = vpop.f32.mrb[4].mxu0 }
  0xee   : > { %v964_v47 = vpop.f32.mrb[4].mxu1  ;;  %735 = vst.msk [vmem:[%s1094_s24 + $0x40] sm:$0xf] %vm718_vm3, %v901_v40  ;;  %v904_v48 = vpack.c.bf16 %v577_v44, %v577_v44  ;;  %v559_v49 = vsel %vm495_vm8, %v370_v33, %v527_v42  ;;  %vm500_vm10 = vcmp.gt.f32.partialorder %v948_v46, 0.0  ;;  %v532_v50 = vmul.f32 0.2, %v948_v46 }
  0xef   : > { %v383_v51 = vpop.f32.mrb[5].mxu0  ;;  %v447_v52 = vpop.f32.mrb[5].mxu1  ;;  %722 = vst.msk [vmem:[%s1094_s24 + $0xc] sm:$0xf] %vm718_vm3, %v888_v43  ;;  %v886_v53 = vpack.c.bf16 %v559_v49, %v559_v49  ;;  %v575_v54 = vsel %vm511_vm9, %v434_v34, %v543_v45  ;;  %vm516_vm11 = vcmp.gt.f32.partialorder %v964_v47, 0.0 }
  0xf0   : > { %v548_v55 = vmul.f32 0.2, %v964_v47  ;;  %v949_v56 = vpop.f32.mrb[6].mxu0  ;;  %v965_v57 = vpop.f32.mrb[6].mxu1  ;;  %738 = vst.msk [vmem:[%s1094_s24 + $0x4c] sm:$0xf] %vm718_vm3, %v904_v48  ;;  %v902_v58 = vpack.c.bf16 %v575_v54, %v575_v54  ;;  %v564_v59 = vsel %vm500_vm10, %v948_v46, %v532_v50 }
  0xf1   : > { %vm498_vm12 = vcmp.gt.f32.partialorder %v383_v51, 0.0  ;;  %v530_v60 = vmul.f32 0.2, %v383_v51  ;;  %v386_v61 = vpop.f32.mrb[7].mxu0  ;;  %v450_v62 = vpop.f32.mrb[7].mxu1  ;;  %v891_v63 = vpack.c.bf16 %v564_v59, %v564_v59  ;;  %vm514_vm13 = vcmp.gt.f32.partialorder %v447_v52, 0.0 }
  0xf2   : > { %720 = vst.msk [vmem:[%s1094_s24 + $0x4] sm:$0xf] %vm718_vm3, %v886_v53  ;;  %v580_v0 = vsel %vm516_vm11, %v964_v47, %v548_v55  ;;  %v546_v1 = vmul.f32 0.2, %v447_v52  ;;  %736 = vst.msk [vmem:[%s1094_s24 + $0x44] sm:$0xf] %vm718_vm3, %v902_v58 }
  0xf3   : > { %v907_v2 = vpack.c.bf16 %v580_v0, %v580_v0  ;;  %v562_v3 = vsel %vm498_vm12, %v383_v51, %v530_v60  ;;  %vm501_vm14 = vcmp.gt.f32.partialorder %v949_v56, 0.0  ;;  %v533_v4 = vmul.f32 0.2, %v949_v56  ;;  %725 = vst.msk [vmem:[%s1094_s24 + $0x18] sm:$0xf] %vm718_vm3, %v891_v63 }
  0xf4   : > { %v889_v5 = vpack.c.bf16 %v562_v3, %v562_v3  ;;  %v578_v6 = vsel %vm514_vm13, %v447_v52, %v546_v1  ;;  %vm517_vm15 = vcmp.gt.f32.partialorder %v965_v57, 0.0  ;;  %v549_v7 = vmul.f32 0.2, %v965_v57 }
  0xf5   : > { %741 = vst.msk [vmem:[%s1094_s24 + $0x58] sm:$0xf] %vm718_vm3, %v907_v2  ;;  %v905_v8 = vpack.c.bf16 %v578_v6, %v578_v6  ;;  %v565_v9 = vsel %vm501_vm14, %v949_v56, %v533_v4  ;;  %vm499_vm0 = vcmp.gt.f32.partialorder %v386_v61, 0.0  ;;  %v531_v10 = vmul.f32 0.2, %v386_v61  ;;  %v952_v14 = vpop.f32.mrb[8].mxu0 }
  0xf6   : > { %723 = vst.msk [vmem:[%s1094_s24 + $0x10] sm:$0xf] %vm718_vm3, %v889_v5  ;;  %v892_v11 = vpack.c.bf16 %v565_v9, %v565_v9  ;;  %v581_v12 = vsel %vm517_vm15, %v965_v57, %v549_v7  ;;  %vm515_vm1 = vcmp.gt.f32.partialorder %v450_v62, 0.0  ;;  %v547_v13 = vmul.f32 0.2, %v450_v62  ;;  %v968_v15 = vpop.f32.mrb[8].mxu1 }
  0xf7   : > { %739 = vst.msk [vmem:[%s1094_s24 + $0x50] sm:$0xf] %vm718_vm3, %v905_v8  ;;  %v908_v16 = vpack.c.bf16 %v581_v12, %v581_v12  ;;  %v563_v17 = vsel %vm499_vm0, %v386_v61, %v531_v10  ;;  %vm504_vm2 = vcmp.gt.f32.partialorder %v952_v14, 0.0  ;;  %v536_v18 = vmul.f32 0.2, %v952_v14  ;;  %v399_v19 = vpop.f32.mrb[9].mxu0 }
  0xf8   : > { %v463_v20 = vpop.f32.mrb[9].mxu1  ;;  %726 = vst.msk [vmem:[%s1094_s24 + $0x1c] sm:$0xf] %vm718_vm3, %v892_v11  ;;  %v890_v21 = vpack.c.bf16 %v563_v17, %v563_v17  ;;  %v579_v22 = vsel %vm515_vm1, %v450_v62, %v547_v13  ;;  %vm520_vm4 = vcmp.gt.f32.partialorder %v968_v15, 0.0  ;;  %v552_v23 = vmul.f32 0.2, %v968_v15 }
  0xf9   : > { %v953_v24 = vpop.f32.mrb[10].mxu0  ;;  %v969_v25 = vpop.f32.mrb[10].mxu1  ;;  %742 = vst.msk [vmem:[%s1094_s24 + $0x5c] sm:$0xf] %vm718_vm3, %v908_v16  ;;  %v906_v26 = vpack.c.bf16 %v579_v22, %v579_v22  ;;  %v568_v27 = vsel %vm504_vm2, %v952_v14, %v536_v18  ;;  %vm502_vm5 = vcmp.gt.f32.partialorder %v399_v19, 0.0  ;;  %vm518_vm6 = vcmp.gt.f32.partialorder %v463_v20, 0.0 }
  0xfa   : > { %v534_v28 = vmul.f32 0.2, %v399_v19  ;;  %v402_v29 = vpop.f32.mrb[11].mxu0  ;;  %v466_v30 = vpop.f32.mrb[11].mxu1  ;;  %724 = vst.msk [vmem:[%s1094_s24 + $0x14] sm:$0xf] %vm718_vm3, %v890_v21  ;;  %v895_v31 = vpack.c.bf16 %v568_v27, %v568_v27  ;;  %v584_v32 = vsel %vm520_vm4, %v968_v15, %v552_v23 }
  0xfb   : > { %v550_v33 = vmul.f32 0.2, %v463_v20  ;;  %740 = vst.msk [vmem:[%s1094_s24 + $0x54] sm:$0xf] %vm718_vm3, %v906_v26  ;;  %v911_v34 = vpack.c.bf16 %v584_v32, %v584_v32  ;;  %vm505_vm7 = vcmp.gt.f32.partialorder %v953_v24, 0.0  ;;  %vm521_vm8 = vcmp.gt.f32.partialorder %v969_v25, 0.0 }
  0xfc   : > { %v566_v35 = vsel %vm502_vm5, %v399_v19, %v534_v28  ;;  %v537_v36 = vmul.f32 0.2, %v953_v24  ;;  %729 = vst.msk [vmem:[%s1094_s24 + $0x28] sm:$0xf] %vm718_vm3, %v895_v31  ;;  %v553_v39 = vmul.f32 0.2, %v969_v25 }
  0xfd   : > { %v893_v37 = vpack.c.bf16 %v566_v35, %v566_v35  ;;  %v582_v38 = vsel %vm518_vm6, %v463_v20, %v550_v33  ;;  %745 = vst.msk [vmem:[%s1094_s24 + $0x68] sm:$0xf] %vm718_vm3, %v911_v34  ;;  %vm503_vm9 = vcmp.gt.f32.partialorder %v402_v29, 0.0  ;;  %v535_v42 = vmul.f32 0.2, %v402_v29  ;;  %v956_v46 = vpop.f32.mrb[12].mxu0 }
  0xfe   : > { %v909_v40 = vpack.c.bf16 %v582_v38, %v582_v38  ;;  %v569_v41 = vsel %vm505_vm7, %v953_v24, %v537_v36  ;;  %v585_v44 = vsel %vm521_vm8, %v969_v25, %v553_v39  ;;  %vm519_vm10 = vcmp.gt.f32.partialorder %v466_v30, 0.0  ;;  %v972_v47 = vpop.f32.mrb[12].mxu1  ;;  %v415_v51 = vpop.f32.mrb[13].mxu0 }
  0xff   : > { %727 = vst.msk [vmem:[%s1094_s24 + $0x20] sm:$0xf] %vm718_vm3, %v893_v37  ;;  %v896_v43 = vpack.c.bf16 %v569_v41, %v569_v41  ;;  %v551_v45 = vmul.f32 0.2, %v466_v30  ;;  %v912_v48 = vpack.c.bf16 %v585_v44, %v585_v44  ;;  %v567_v49 = vsel %vm503_vm9, %v402_v29, %v535_v42  ;;  %v479_v52 = vpop.f32.mrb[13].mxu1  ;;  %v957_v56 = vpop.f32.mrb[14].mxu0 }
 0x100   : > { %743 = vst.msk [vmem:[%s1094_s24 + $0x60] sm:$0xf] %vm718_vm3, %v909_v40  ;;  %vm508_vm11 = vcmp.gt.f32.partialorder %v956_v46, 0.0  ;;  %v540_v50 = vmul.f32 0.2, %v956_v46  ;;  %v894_v53 = vpack.c.bf16 %v567_v49, %v567_v49  ;;  %vm524_vm12 = vcmp.gt.f32.partialorder %v972_v47, 0.0 }
 0x101   : > { %730 = vst.msk [vmem:[%s1094_s24 + $0x2c] sm:$0xf] %vm718_vm3, %v896_v43  ;;  %v583_v54 = vsel %vm519_vm10, %v466_v30, %v551_v45  ;;  %v556_v55 = vmul.f32 0.2, %v972_v47  ;;  %v973_v57 = vpop.f32.mrb[14].mxu1  ;;  %vm506_vm13 = vcmp.gt.f32.partialorder %v415_v51, 0.0 }
 0x102   : > { %746 = vst.msk [vmem:[%s1094_s24 + $0x6c] sm:$0xf] %vm718_vm3, %v912_v48  ;;  %v910_v58 = vpack.c.bf16 %v583_v54, %v583_v54  ;;  %v572_v59 = vsel %vm508_vm11, %v956_v46, %v540_v50  ;;  %v538_v60 = vmul.f32 0.2, %v415_v51  ;;  %v418_v61 = vpop.f32.mrb[15].mxu0  ;;  %v482_v62 = vpop.f32.mrb[15].mxu1 }
 0x103   : > { %728 = vst.msk [vmem:[%s1094_s24 + $0x24] sm:$0xf] %vm718_vm3, %v894_v53  ;;  %v899_v63 = vpack.c.bf16 %v572_v59, %v572_v59  ;;  %v588_v0 = vsel %vm524_vm12, %v972_v47, %v556_v55  ;;  %vm522_vm14 = vcmp.gt.f32.partialorder %v479_v52, 0.0  ;;  %v554_v1 = vmul.f32 0.2, %v479_v52 }
 0x104   : > { %744 = vst.msk [vmem:[%s1094_s24 + $0x64] sm:$0xf] %vm718_vm3, %v910_v58  ;;  %v915_v2 = vpack.c.bf16 %v588_v0, %v588_v0  ;;  %v570_v3 = vsel %vm506_vm13, %v415_v51, %v538_v60  ;;  %vm509_vm15 = vcmp.gt.f32.partialorder %v957_v56, 0.0  ;;  %v541_v4 = vmul.f32 0.2, %v957_v56 }
 0x105   : > { %733 = vst.msk [vmem:[%s1094_s24 + $0x38] sm:$0xf] %vm718_vm3, %v899_v63  ;;  %v897_v5 = vpack.c.bf16 %v570_v3, %v570_v3  ;;  %v586_v6 = vsel %vm522_vm14, %v479_v52, %v554_v1  ;;  %vm525_vm0 = vcmp.gt.f32.partialorder %v973_v57, 0.0  ;;  %v557_v7 = vmul.f32 0.2, %v973_v57 }
 0x106   : > { %749 = vst.msk [vmem:[%s1094_s24 + $0x78] sm:$0xf] %vm718_vm3, %v915_v2  ;;  %v913_v8 = vpack.c.bf16 %v586_v6, %v586_v6  ;;  %v573_v9 = vsel %vm509_vm15, %v957_v56, %v541_v4  ;;  %vm507_vm1 = vcmp.gt.f32.partialorder %v418_v61, 0.0  ;;  %v539_v10 = vmul.f32 0.2, %v418_v61 }
 0x107   : > { %731 = vst.msk [vmem:[%s1094_s24 + $0x30] sm:$0xf] %vm718_vm3, %v897_v5  ;;  %v900_v11 = vpack.c.bf16 %v573_v9, %v573_v9  ;;  %v589_v12 = vsel %vm525_vm0, %v973_v57, %v557_v7  ;;  %vm523_vm2 = vcmp.gt.f32.partialorder %v482_v62, 0.0  ;;  %v555_v13 = vmul.f32 0.2, %v482_v62 }
 0x108   : > { %747 = vst.msk [vmem:[%s1094_s24 + $0x70] sm:$0xf] %vm718_vm3, %v913_v8  ;;  %v916_v14 = vpack.c.bf16 %v589_v12, %v589_v12  ;;  %v571_v15 = vsel %vm507_vm1, %v418_v61, %v539_v10 }
 0x109   : > { %734 = vst.msk [vmem:[%s1094_s24 + $0x3c] sm:$0xf] %vm718_vm3, %v900_v11  ;;  %v898_v16 = vpack.c.bf16 %v571_v15, %v571_v15  ;;  %v587_v17 = vsel %vm523_vm2, %v482_v62, %v555_v13 }
 0x10a   : > { %750 = vst.msk [vmem:[%s1094_s24 + $0x7c] sm:$0xf] %vm718_vm3, %v916_v14  ;;  %v914_v18 = vpack.c.bf16 %v587_v17, %v587_v17 }
 0x10b   : > { %732 = vst.msk [vmem:[%s1094_s24 + $0x34] sm:$0xf] %vm718_vm3, %v898_v16 }
 0x10c   : > { %748 = vst.msk [vmem:[%s1094_s24 + $0x74] sm:$0xf] %vm718_vm3, %v914_v18 }
 0x10d PF: > { %s12_s9 = sadd.s32 1, %s1013_s9  }
 0x10e   : > { %p9_p4 = scmp.ge.s32.totalorder %s12_s9, 10  }
 0x110   :  { %11 = sbr.rel (!%p9_p4) target bundleno = 1 (0x1), region = 58 }

// kernel: discriminator_forward.5
= control target key start
LH: loop header
LB: loop body
LE: loop exit
PB: predicated region body
PF: predicated region fallthrough
CT: control target
= control target key end

     0   :  { %v5507_v0 = vmov 0   ;;  %s8155_s1 = inlined_call_operand.vmem [shape: bf16[1024,128], index: 1, kind: input, shape index: {}]   ;;  %s8156_s0 = inlined_call_operand.vmem [shape: bf16[512,1024], index: 0, kind: input, shape index: {}]   ;;  %s8157_s2 = inlined_call_operand.vmem [shape: f32[1,128], index: 2, kind: input, shape index: {}]   ;;  %s8158_s3 = inlined_call_operand.vmem [shape: f32[1,128], index: 3, kind: input, shape index: {}]   ;;  %s8159_s4 = inlined_call_operand.vmem [shape: bf16[512,128], index: 4, kind: output, shape index: {}]  }
   0x1   :  { %2198 = vmatprep.subr.bf16.mxu1 %v5507_v0  ;;  %2776 = vmatprep.subr.bf16.mxu0 %v5507_v0  ;;  %v5441_v1 = vld [vmem:[%s8155_s1] sm:$0xff]   ;;  %v5443_v3 = vld [vmem:[%s8155_s1 + $0x8] sm:$0xff]   ;;  %v5445_v5 = vld [vmem:[%s8155_s1 + $0x10] sm:$0xff]  }
   0x2   :  { %v5442_v2 = vld [vmem:[%s8155_s1 + $0x100] sm:$0xff]   ;;  %2199 = vmatpush1.bf16.msra.mxu1 %v5441_v1  ;;  %v5444_v4 = vld [vmem:[%s8155_s1 + $0x108] sm:$0xff]   ;;  %v5446_v6 = vld [vmem:[%s8155_s1 + $0x110] sm:$0xff]  }
   0x3   :  { %2777 = vmatpush1.bf16.msra.mxu0 %v5442_v2  ;;  %2200 = vmatprep.subr.bf16.mxu1 %v5507_v0  ;;  %v5447_v7 = vld [vmem:[%s8155_s1 + $0x18] sm:$0xff]   ;;  %v5449_v9 = vld [vmem:[%s8155_s1 + $0x20] sm:$0xff]   ;;  %v5451_v11 = vld [vmem:[%s8155_s1 + $0x28] sm:$0xff]  }
   0x4   :  { %2778 = vmatprep.subr.bf16.mxu0 %v5507_v0  ;;  %v5448_v8 = vld [vmem:[%s8155_s1 + $0x118] sm:$0xff]   ;;  %v5450_v10 = vld [vmem:[%s8155_s1 + $0x120] sm:$0xff]   ;;  %v5452_v12 = vld [vmem:[%s8155_s1 + $0x128] sm:$0xff]  }
   0x5   :  { %v5453_v13 = vld [vmem:[%s8155_s1 + $0x30] sm:$0xff]   ;;  %v5455_v15 = vld [vmem:[%s8155_s1 + $0x38] sm:$0xff]   ;;  %v5457_v17 = vld [vmem:[%s8155_s1 + $0x40] sm:$0xff]  }
   0x6   :  { %2201 = vmatpush1.bf16.msra.mxu1 %v5443_v3  ;;  %v5454_v14 = vld [vmem:[%s8155_s1 + $0x130] sm:$0xff]   ;;  %v5456_v16 = vld [vmem:[%s8155_s1 + $0x138] sm:$0xff]   ;;  %v5458_v18 = vld [vmem:[%s8155_s1 + $0x140] sm:$0xff]  }
   0x7   :  { %2779 = vmatpush1.bf16.msra.mxu0 %v5444_v4  ;;  %2202 = vmatprep.subr.bf16.mxu1 %v5507_v0  ;;  %v5608_v19 = vld [vmem:[%s8156_s0] sm:$0xff]  ;;  %v5618_v21 = vld [vmem:[%s8156_s0 + $0x10] sm:$0xff]  ;;  %v5459_v24 = vld [vmem:[%s8155_s1 + $0x48] sm:$0xff]  }
   0x8   :  { %2780 = vmatprep.subr.bf16.mxu0 %v5507_v0  ;;  %v5613_v20 = vld [vmem:[%s8156_s0 + $0x20] sm:$0xff]  ;;  %v5625_v23 = vld [vmem:[%s8156_s0 + $0x30] sm:$0xff]  ;;  %v5460_v26 = vld [vmem:[%s8155_s1 + $0x148] sm:$0xff]  }
   0x9   :  { %v4482_v22 = vcombine.high %v5608_v19, %v5613_v20  ;;  %v4486_v25 = vcombine.high %v5618_v21, %v5625_v23  ;;  %v5461_v27 = vld [vmem:[%s8155_s1 + $0x50] sm:$0xff]   ;;  %v5463_v29 = vld [vmem:[%s8155_s1 + $0x58] sm:$0xff]   ;;  %v5465_v31 = vld [vmem:[%s8155_s1 + $0x60] sm:$0xff]   ;;  %v4481_v42 = vcombine.low %v5608_v19, %v5613_v20  ;;  %v4485_v44 = vcombine.low %v5618_v21, %v5625_v23 }
   0xa   :  { %2203 = vmatpush1.bf16.msra.mxu1 %v5445_v5  ;;  %v5462_v28 = vld [vmem:[%s8155_s1 + $0x150] sm:$0xff]   ;;  %v5464_v30 = vld [vmem:[%s8155_s1 + $0x158] sm:$0xff]   ;;  %v5466_v32 = vld [vmem:[%s8155_s1 + $0x160] sm:$0xff]  }
   0xb   :  { %2781 = vmatpush1.bf16.msra.mxu0 %v5446_v6  ;;  %2204 = vmatprep.subr.bf16.mxu1 %v5507_v0  ;;  %v5467_v33 = vld [vmem:[%s8155_s1 + $0x68] sm:$0xff]   ;;  %v5469_v35 = vld [vmem:[%s8155_s1 + $0x70] sm:$0xff]   ;;  %v5471_v37 = vld [vmem:[%s8155_s1 + $0x78] sm:$0xff]  }
   0xc   :  { %2782 = vmatprep.subr.bf16.mxu0 %v5507_v0  ;;  %2230 = vmatprep.mubr.bf16.mxu1 %v4482_v22  ;;  %v5468_v34 = vld [vmem:[%s8155_s1 + $0x168] sm:$0xff]   ;;  %v5470_v36 = vld [vmem:[%s8155_s1 + $0x170] sm:$0xff]   ;;  %v5472_v38 = vld [vmem:[%s8155_s1 + $0x178] sm:$0xff]  }
   0xd   :  { %2808 = vmatprep.mubr.bf16.mxu0 %v4486_v25  ;;  %v158_v39 = vld [vmem:[%s8156_s0 + $0x40] sm:$0xff]  ;;  %v160_v41 = vld [vmem:[%s8156_s0 + $0x50] sm:$0xff]  ;;  %v5475_v51 = vld [vmem:[%s8155_s1 + $0x88] sm:$0xff]  }
   0xe   :  { %2205 = vmatpush1.bf16.msra.mxu1 %v5447_v7  ;;  %v162_v40 = vld [vmem:[%s8156_s0 + $0x60] sm:$0xff]  ;;  %v164_v43 = vld [vmem:[%s8156_s0 + $0x70] sm:$0xff]  ;;  %v5476_v52 = vld [vmem:[%s8155_s1 + $0x188] sm:$0xff]  }
   0xf   :  { %2783 = vmatpush1.bf16.msra.mxu0 %v5448_v8  ;;  %2206 = vmatprep.subr.bf16.mxu1 %v5507_v0  ;;  %v5473_v45 = vld [vmem:[%s8155_s1 + $0x80] sm:$0xff]   ;;  %v4490_v47 = vcombine.high %v158_v39, %v162_v40  ;;  %v4494_v48 = vcombine.high %v160_v41, %v164_v43  ;;  %v168_v53 = vld [vmem:[%s8156_s0 + $0x90] sm:$0xff]  ;;  %v4489_v55 = vcombine.low %v158_v39, %v162_v40  ;;  %v5479_v2 = vld [vmem:[%s8155_s1 + $0x98] sm:$0xff]  }
  0x10   :  { %2784 = vmatprep.subr.bf16.mxu0 %v5507_v0  ;;  %v5474_v46 = vld [vmem:[%s8155_s1 + $0x180] sm:$0xff]   ;;  %v172_v54 = vld [vmem:[%s8156_s0 + $0xb0] sm:$0xff]  ;;  %v4493_v56 = vcombine.low %v160_v41, %v164_v43  ;;  %v5480_v3 = vld [vmem:[%s8155_s1 + $0x198] sm:$0xff]  }
  0x11   :  { %v166_v49 = vld [vmem:[%s8156_s0 + $0x80] sm:$0xff]  ;;  %v4502_v58 = vcombine.high %v168_v53, %v172_v54  ;;  %v5477_v59 = vld [vmem:[%s8155_s1 + $0x90] sm:$0xff]   ;;  %v4501_v6 = vcombine.low %v168_v53, %v172_v54  ;;  %v5492_v39 = vld [vmem:[%s8155_s1 + $0x1c8] sm:$0xff]  }
  0x12   :  { %2207 = vmatpush1.bf16.msra.mxu1 %v5449_v9  ;;  %v170_v50 = vld [vmem:[%s8156_s0 + $0xa0] sm:$0xff]  ;;  %v5478_v60 = vld [vmem:[%s8155_s1 + $0x190] sm:$0xff]   ;;  %v5495_v54 = vld [vmem:[%s8155_s1 + $0xd8] sm:$0xff]  }
  0x13   :  { %2785 = vmatpush1.bf16.msra.mxu0 %v5450_v10  ;;  %2208 = vmatprep.subr.bf16.mxu1 %v5507_v0  ;;  %v4498_v57 = vcombine.high %v166_v49, %v170_v50  ;;  %v174_v61 = vld [vmem:[%s8156_s0 + $0xc0] sm:$0xff]  ;;  %v176_v63 = vld [vmem:[%s8156_s0 + $0xd0] sm:$0xff]  ;;  %v4497_v4 = vcombine.low %v166_v49, %v170_v50 }
  0x14   :  { %2786 = vmatprep.subr.bf16.mxu0 %v5507_v0  ;;  %v178_v62 = vld [vmem:[%s8156_s0 + $0xe0] sm:$0xff]  ;;  %v180_v1 = vld [vmem:[%s8156_s0 + $0xf0] sm:$0xff] }
  0x15   :  { %v5481_v5 = vld [vmem:[%s8155_s1 + $0xa0] sm:$0xff]   ;;  %v4506_v7 = vcombine.high %v174_v61, %v178_v62  ;;  %v4510_v9 = vcombine.high %v176_v63, %v180_v1  ;;  %v5485_v20 = vld [vmem:[%s8155_s1 + $0xb0] sm:$0xff]  }
  0x16   :  { %2209 = vmatpush1.bf16.msra.mxu1 %v5451_v11  ;;  %v5482_v8 = vld [vmem:[%s8155_s1 + $0x1a0] sm:$0xff]   ;;  %v5486_v21 = vld [vmem:[%s8155_s1 + $0x1b0] sm:$0xff]  }
  0x17   :  { %2787 = vmatpush1.bf16.msra.mxu0 %v5452_v12  ;;  %2210 = vmatprep.subr.bf16.mxu1 %v5507_v0  ;;  %v182_v10 = vld [vmem:[%s8156_s0 + $0x100] sm:$0xff]  ;;  %v184_v12 = vld [vmem:[%s8156_s0 + $0x110] sm:$0xff] }
  0x18   :  { %2788 = vmatprep.subr.bf16.mxu0 %v5507_v0  ;;  %v186_v11 = vld [vmem:[%s8156_s0 + $0x120] sm:$0xff]  ;;  %v192_v25 = vld [vmem:[%s8156_s0 + $0x150] sm:$0xff] }
  0x19   :  { %v190_v22 = vld [vmem:[%s8156_s0 + $0x140] sm:$0xff]  ;;  %v212_v49 = vld [vmem:[%s8156_s0 + $0x1f0] sm:$0xff] }
  0x1a   :  { %2211 = vmatpush1.bf16.msra.mxu1 %v5453_v13  ;;  %v188_v13 = vld [vmem:[%s8156_s0 + $0x130] sm:$0xff]  ;;  %v194_v23 = vld [vmem:[%s8156_s0 + $0x160] sm:$0xff] }
  0x1b   :  { %2789 = vmatpush1.bf16.msra.mxu0 %v5454_v14  ;;  %2212 = vmatprep.subr.bf16.mxu1 %v5507_v0  ;;  %v5483_v14 = vld [vmem:[%s8155_s1 + $0xa8] sm:$0xff]   ;;  %v4518_v19 = vcombine.high %v184_v12, %v188_v13  ;;  %v4521_v40 = vcombine.low %v190_v22, %v194_v23 }
  0x1c   :  { %2790 = vmatprep.subr.bf16.mxu0 %v5507_v0 }
  0x1e   :  { %2213 = vmatpush1.bf16.msra.mxu1 %v5455_v15  ;;  %v5484_v15 = vld [vmem:[%s8155_s1 + $0x1a8] sm:$0xff]  }
  0x1f   :  { %2791 = vmatpush1.bf16.msra.mxu0 %v5456_v16  ;;  %2214 = vmatprep.subr.bf16.mxu1 %v5507_v0  ;;  %v4505_v16 = vcombine.low %v174_v61, %v178_v62 }
  0x20   :  { %2792 = vmatprep.subr.bf16.mxu0 %v5507_v0 }
  0x22   :  { %2215 = vmatpush1.bf16.msra.mxu1 %v5457_v17  ;;  %v4509_v17 = vcombine.low %v176_v63, %v180_v1  ;;  %v222_v1 = vld [vmem:[%s8156_s0 + $0x240] sm:$0xff] }
  0x23   :  { %2793 = vmatpush1.bf16.msra.mxu0 %v5458_v18  ;;  %2216 = vmatprep.subr.bf16.mxu1 %v5507_v0  ;;  %v4514_v18 = vcombine.high %v182_v10, %v186_v11 }
  0x24   :  { %2794 = vmatprep.subr.bf16.mxu0 %v5507_v0 }
  0x26   :  { %2217 = vmatpush1.bf16.msra.mxu1 %v5459_v24  ;;  %v5487_v24 = vld [vmem:[%s8155_s1 + $0xb8] sm:$0xff]  }
  0x27   :  { %2795 = vmatpush1.bf16.msra.mxu0 %v5460_v26  ;;  %2218 = vmatprep.subr.bf16.mxu1 %v5507_v0  ;;  %v196_v26 = vld [vmem:[%s8156_s0 + $0x170] sm:$0xff] }
  0x28   :  { %2796 = vmatprep.subr.bf16.mxu0 %v5507_v0  ;;  %v4525_v41 = vcombine.low %v192_v25, %v196_v26 }
  0x2a   :  { %2219 = vmatpush1.bf16.msra.mxu1 %v5461_v27  ;;  %v5488_v27 = vld [vmem:[%s8155_s1 + $0x1b8] sm:$0xff]  }
  0x2b   :  { %2797 = vmatpush1.bf16.msra.mxu0 %v5462_v28  ;;  %2220 = vmatprep.subr.bf16.mxu1 %v5507_v0  ;;  %v4513_v28 = vcombine.low %v182_v10, %v186_v11  ;;  %v5498_v10 = vld [vmem:[%s8155_s1 + $0x1e0] sm:$0xff]  }
  0x2c   :  { %2798 = vmatprep.subr.bf16.mxu0 %v5507_v0  ;;  %v230_v11 = vld [vmem:[%s8156_s0 + $0x280] sm:$0xff] }
  0x2e   :  { %2221 = vmatpush1.bf16.msra.mxu1 %v5463_v29  ;;  %v4517_v29 = vcombine.low %v184_v12, %v188_v13  ;;  %v234_v12 = vld [vmem:[%s8156_s0 + $0x2a0] sm:$0xff]  ;;  %v232_v13 = vld [vmem:[%s8156_s0 + $0x290] sm:$0xff] }
  0x2f   :  { %2799 = vmatpush1.bf16.msra.mxu0 %v5464_v30  ;;  %2222 = vmatprep.subr.bf16.mxu1 %v5507_v0  ;;  %v4522_v30 = vcombine.high %v190_v22, %v194_v23  ;;  %v244_v22 = vld [vmem:[%s8156_s0 + $0x2f0] sm:$0xff]  ;;  %v4561_v23 = vcombine.low %v230_v11, %v234_v12 }
  0x30   :  { %2800 = vmatprep.subr.bf16.mxu0 %v5507_v0 }
  0x32   :  { %2223 = vmatpush1.bf16.msra.mxu1 %v5465_v31  ;;  %v4526_v31 = vcombine.high %v192_v25, %v196_v26 }
  0x33   :  { %2801 = vmatpush1.bf16.msra.mxu0 %v5466_v32  ;;  %2224 = vmatprep.subr.bf16.mxu1 %v5507_v0  ;;  %v5489_v32 = vld [vmem:[%s8155_s1 + $0xc0] sm:$0xff]  }
  0x34   :  { %2802 = vmatprep.subr.bf16.mxu0 %v5507_v0 }
  0x36   :  { %2225 = vmatpush1.bf16.msra.mxu1 %v5467_v33  ;;  %v5490_v33 = vld [vmem:[%s8155_s1 + $0x1c0] sm:$0xff]  }
  0x37   :  { %2803 = vmatpush1.bf16.msra.mxu0 %v5468_v34  ;;  %2226 = vmatprep.subr.bf16.mxu1 %v5507_v0  ;;  %v198_v34 = vld [vmem:[%s8156_s0 + $0x180] sm:$0xff] }
  0x38   :  { %2804 = vmatprep.subr.bf16.mxu0 %v5507_v0 }
  0x3a   :  { %2227 = vmatpush1.bf16.msra.mxu1 %v5469_v35  ;;  %v202_v35 = vld [vmem:[%s8156_s0 + $0x1a0] sm:$0xff] }
  0x3b   :  { %2805 = vmatpush1.bf16.msra.mxu0 %v5470_v36  ;;  %2228 = vmatprep.subr.bf16.mxu1 %v5507_v0  ;;  %v5491_v36 = vld [vmem:[%s8155_s1 + $0xc8] sm:$0xff]   ;;  %v4529_v50 = vcombine.low %v198_v34, %v202_v35 }
  0x3c   :  { %2806 = vmatprep.subr.bf16.mxu0 %v5507_v0 }
  0x3e   :  { %2229 = vmatpush1.bf16.msra.mxu1 %v5471_v37  ;;  %v200_v37 = vld [vmem:[%s8156_s0 + $0x190] sm:$0xff] }
  0x3f   :  { %2807 = vmatpush1.bf16.msra.mxu0 %v5472_v38  ;;  %2487 = vmatprep.subr.bf16.mxu1 %v5507_v0  ;;  %v204_v38 = vld [vmem:[%s8156_s0 + $0x1b0] sm:$0xff] }
  0x40   :  { %3065 = vmatprep.subr.bf16.mxu0 %v5507_v0  ;;  %v4534_v43 = vcombine.high %v200_v37, %v204_v38 }
  0x41   :  { %2231 = vmatmul.mubr.bf16.vlgmr.msra.gmra.mrb[0].mxu1 %v4481_v42  ;;  %v4530_v42 = vcombine.high %v198_v34, %v202_v35 }
  0x42   :  { %2809 = vmatmul.mubr.bf16.vlgmr.msra.gmra.mrb[0].mxu0 %v4485_v44  ;;  %2488 = vmatpush1.bf16.msra.mxu1 %v5473_v45  ;;  %v5493_v44 = vld [vmem:[%s8155_s1 + $0xd0] sm:$0xff]  }
  0x43   :  { %3066 = vmatpush1.bf16.msra.mxu0 %v5474_v46  ;;  %2238 = vmatprep.mubr.bf16.mxu1 %v4490_v47  ;;  %v5494_v45 = vld [vmem:[%s8155_s1 + $0x1d0] sm:$0xff]   ;;  %v206_v46 = vld [vmem:[%s8156_s0 + $0x1c0] sm:$0xff] }
  0x44   :  { %2816 = vmatprep.mubr.bf16.mxu0 %v4494_v48  ;;  %2489 = vmatprep.subr.bf16.mxu1 %v5507_v0  ;;  %v210_v47 = vld [vmem:[%s8156_s0 + $0x1e0] sm:$0xff]  ;;  %v208_v48 = vld [vmem:[%s8156_s0 + $0x1d0] sm:$0xff] }
  0x45   :  { %3067 = vmatprep.subr.bf16.mxu0 %v5507_v0  ;;  %v4542_v53 = vcombine.high %v208_v48, %v212_v49  ;;  %v4541_v61 = vcombine.low %v208_v48, %v212_v49  ;;  %v266_v48 = vld [vmem:[%s8156_s0 + $0x3a0] sm:$0xff]  ;;  %v264_v49 = vld [vmem:[%s8156_s0 + $0x390] sm:$0xff] }
  0x46   :  { %2490 = vmatpush1.bf16.msra.mxu1 %v5475_v51  ;;  %v4533_v51 = vcombine.low %v200_v37, %v204_v38  ;;  %v254_v37 = vld [vmem:[%s8156_s0 + $0x340] sm:$0xff] }
  0x47   :  { %3068 = vmatpush1.bf16.msra.mxu0 %v5476_v52  ;;  %2491 = vmatprep.subr.bf16.mxu1 %v5507_v0  ;;  %v4538_v52 = vcombine.high %v206_v46, %v210_v47  ;;  %v258_v38 = vld [vmem:[%s8156_s0 + $0x360] sm:$0xff] }
  0x48   :  { %3069 = vmatprep.subr.bf16.mxu0 %v5507_v0 }
  0x49   :  { %2239 = vmatmul.mubr.bf16.gmra.mrb[4].mxu1 %v4489_v55  ;;  %v5496_v55 = vld [vmem:[%s8155_s1 + $0x1d8] sm:$0xff]  }
  0x4a   :  { %2817 = vmatmul.mubr.bf16.gmra.mrb[4].mxu0 %v4493_v56  ;;  %2246 = vmatprep.mubr.bf16.mxu1 %v4498_v57  ;;  %v214_v56 = vld [vmem:[%s8156_s0 + $0x200] sm:$0xff] }
  0x4b   :  { %2824 = vmatprep.mubr.bf16.mxu0 %v4502_v58  ;;  %2492 = vmatpush1.bf16.msra.mxu1 %v5477_v59  ;;  %v218_v57 = vld [vmem:[%s8156_s0 + $0x220] sm:$0xff]  ;;  %v216_v58 = vld [vmem:[%s8156_s0 + $0x210] sm:$0xff] }
  0x4c   :  { %3070 = vmatpush1.bf16.msra.mxu0 %v5478_v60  ;;  %2493 = vmatprep.subr.bf16.mxu1 %v5507_v0  ;;  %v220_v59 = vld [vmem:[%s8156_s0 + $0x230] sm:$0xff]  ;;  %v4537_v60 = vcombine.low %v206_v46, %v210_v47  ;;  %v4546_v62 = vcombine.high %v214_v56, %v218_v57  ;;  %v262_v47 = vld [vmem:[%s8156_s0 + $0x380] sm:$0xff] }
  0x4d   :  { %3071 = vmatprep.subr.bf16.mxu0 %v5507_v0  ;;  %v4550_v63 = vcombine.high %v216_v58, %v220_v59  ;;  %v5502_v46 = vld [vmem:[%s8155_s1 + $0x1f0] sm:$0xff]  }
  0x4f   :  { %2494 = vmatpush1.bf16.msra.mxu1 %v5479_v2  ;;  %v226_v2 = vld [vmem:[%s8156_s0 + $0x260] sm:$0xff] }
  0x50   :  { %3072 = vmatpush1.bf16.msra.mxu0 %v5480_v3  ;;  %2495 = vmatprep.subr.bf16.mxu1 %v5507_v0  ;;  %v224_v3 = vld [vmem:[%s8156_s0 + $0x250] sm:$0xff] }
  0x51   :  { %2247 = vmatmul.mubr.bf16.gmra.mrb[8].mxu1 %v4497_v4  ;;  %3073 = vmatprep.subr.bf16.mxu0 %v5507_v0  ;;  %v228_v4 = vld [vmem:[%s8156_s0 + $0x270] sm:$0xff] }
  0x52   :  { %2825 = vmatmul.mubr.bf16.gmra.mrb[8].mxu0 %v4501_v6  ;;  %2254 = vmatprep.mubr.bf16.mxu1 %v4506_v7  ;;  %v4549_v6 = vcombine.low %v216_v58, %v220_v59  ;;  %v4554_v7 = vcombine.high %v222_v1, %v226_v2  ;;  %v4593_v58 = vcombine.low %v262_v47, %v266_v48 }
  0x53   :  { %2832 = vmatprep.mubr.bf16.mxu0 %v4510_v9  ;;  %2496 = vmatpush1.bf16.msra.mxu1 %v5481_v5  ;;  %v4545_v5 = vcombine.low %v214_v56, %v218_v57  ;;  %v5497_v9 = vld [vmem:[%s8155_s1 + $0xe0] sm:$0xff]   ;;  %v272_v57 = vld [vmem:[%s8156_s0 + $0x3d0] sm:$0xff] }
  0x54   :  { %3074 = vmatpush1.bf16.msra.mxu0 %v5482_v8  ;;  %2497 = vmatprep.subr.bf16.mxu1 %v5507_v0  ;;  %v4558_v8 = vcombine.high %v224_v3, %v228_v4  ;;  %v274_v56 = vld [vmem:[%s8156_s0 + $0x3e0] sm:$0xff] }
  0x55   :  { %3075 = vmatprep.subr.bf16.mxu0 %v5507_v0 }
  0x57   :  { %2498 = vmatpush1.bf16.msra.mxu1 %v5483_v14  ;;  %v236_v14 = vld [vmem:[%s8156_s0 + $0x2b0] sm:$0xff] }
  0x58   :  { %3076 = vmatpush1.bf16.msra.mxu0 %v5484_v15  ;;  %2499 = vmatprep.subr.bf16.mxu1 %v5507_v0  ;;  %v4553_v15 = vcombine.low %v222_v1, %v226_v2  ;;  %v278_v1 = vld [vmem:[%s8156_s0 + $0x400] sm:$0xff] }
  0x59   :  { %2255 = vmatmul.mubr.bf16.gmra.mrb[12].mxu1 %v4505_v16  ;;  %3077 = vmatprep.subr.bf16.mxu0 %v5507_v0  ;;  %v4557_v16 = vcombine.low %v224_v3, %v228_v4  ;;  %v282_v2 = vld [vmem:[%s8156_s0 + $0x420] sm:$0xff]  ;;  %v280_v3 = vld [vmem:[%s8156_s0 + $0x410] sm:$0xff] }
  0x5a   :  { %2833 = vmatmul.mubr.bf16.gmra.mrb[12].mxu0 %v4509_v17  ;;  %2262 = vmatprep.mubr.bf16.mxu1 %v4514_v18  ;;  %v4562_v17 = vcombine.high %v230_v11, %v234_v12  ;;  %v4566_v18 = vcombine.high %v232_v13, %v236_v14  ;;  %v284_v4 = vld [vmem:[%s8156_s0 + $0x430] sm:$0xff] }
  0x5b   :  { %2840 = vmatprep.mubr.bf16.mxu0 %v4518_v19  ;;  %2500 = vmatpush1.bf16.msra.mxu1 %v5485_v20  ;;  %v238_v19 = vld [vmem:[%s8156_s0 + $0x2c0] sm:$0xff]  ;;  %v288_v11 = vld [vmem:[%s8156_s0 + $0x450] sm:$0xff] }
  0x5c   :  { %3078 = vmatpush1.bf16.msra.mxu0 %v5486_v21  ;;  %2501 = vmatprep.subr.bf16.mxu1 %v5507_v0  ;;  %v242_v20 = vld [vmem:[%s8156_s0 + $0x2e0] sm:$0xff]  ;;  %v240_v21 = vld [vmem:[%s8156_s0 + $0x2d0] sm:$0xff] }
  0x5d   :  { %3079 = vmatprep.subr.bf16.mxu0 %v5507_v0  ;;  %v4570_v25 = vcombine.high %v238_v19, %v242_v20  ;;  %v4574_v26 = vcombine.high %v240_v21, %v244_v22  ;;  %v4573_v34 = vcombine.low %v240_v21, %v244_v22  ;;  %v292_v12 = vld [vmem:[%s8156_s0 + $0x470] sm:$0xff] }
  0x5e   :  { %v4621_v22 = vcombine.low %v288_v11, %v292_v12 }
  0x5f   :  { %2502 = vmatpush1.bf16.msra.mxu1 %v5487_v24  ;;  %v4565_v24 = vcombine.low %v232_v13, %v236_v14  ;;  %v4609_v13 = vcombine.low %v278_v1, %v282_v2  ;;  %v4613_v14 = vcombine.low %v280_v3, %v284_v4 }
  0x60   :  { %3080 = vmatpush1.bf16.msra.mxu0 %v5488_v27  ;;  %2503 = vmatprep.subr.bf16.mxu1 %v5507_v0  ;;  %v5499_v27 = vld [vmem:[%s8155_s1 + $0xe8] sm:$0xff]  }
  0x61   :  { %2263 = vmatmul.mubr.bf16.gmra.mrb[16].mxu1 %v4513_v28  ;;  %3081 = vmatprep.subr.bf16.mxu0 %v5507_v0  ;;  %v5500_v28 = vld [vmem:[%s8155_s1 + $0x1e8] sm:$0xff]  }
  0x62   :  { %2841 = vmatmul.mubr.bf16.gmra.mrb[16].mxu0 %v4517_v29  ;;  %2270 = vmatprep.mubr.bf16.mxu1 %v4522_v30  ;;  %v246_v29 = vld [vmem:[%s8156_s0 + $0x300] sm:$0xff] }
  0x63   :  { %2848 = vmatprep.mubr.bf16.mxu0 %v4526_v31  ;;  %2504 = vmatpush1.bf16.msra.mxu1 %v5489_v32  ;;  %v250_v30 = vld [vmem:[%s8156_s0 + $0x320] sm:$0xff]  ;;  %v248_v31 = vld [vmem:[%s8156_s0 + $0x310] sm:$0xff] }
  0x64   :  { %3082 = vmatpush1.bf16.msra.mxu0 %v5490_v33  ;;  %2505 = vmatprep.subr.bf16.mxu1 %v5507_v0  ;;  %v252_v32 = vld [vmem:[%s8156_s0 + $0x330] sm:$0xff]  ;;  %v4569_v33 = vcombine.low %v238_v19, %v242_v20  ;;  %v4578_v35 = vcombine.high %v246_v29, %v250_v30 }
  0x65   :  { %3083 = vmatprep.subr.bf16.mxu0 %v5507_v0  ;;  %v296_v19 = vld [vmem:[%s8156_s0 + $0x490] sm:$0xff] }
  0x66   :  { %v300_v20 = vld [vmem:[%s8156_s0 + $0x4b0] sm:$0xff] }
  0x67   :  { %2506 = vmatpush1.bf16.msra.mxu1 %v5491_v36  ;;  %v4582_v36 = vcombine.high %v248_v31, %v252_v32 }
  0x68   :  { %3084 = vmatpush1.bf16.msra.mxu0 %v5492_v39  ;;  %2507 = vmatprep.subr.bf16.mxu1 %v5507_v0  ;;  %v256_v39 = vld [vmem:[%s8156_s0 + $0x350] sm:$0xff] }
  0x69   :  { %2271 = vmatmul.mubr.bf16.gmra.mrb[20].mxu1 %v4521_v40  ;;  %3085 = vmatprep.subr.bf16.mxu0 %v5507_v0  ;;  %v260_v40 = vld [vmem:[%s8156_s0 + $0x370] sm:$0xff] }
  0x6a   :  { %2849 = vmatmul.mubr.bf16.gmra.mrb[20].mxu0 %v4525_v41  ;;  %2278 = vmatprep.mubr.bf16.mxu1 %v4530_v42  ;;  %v4577_v41 = vcombine.low %v246_v29, %v250_v30  ;;  %v4581_v42 = vcombine.low %v248_v31, %v252_v32  ;;  %v4629_v30 = vcombine.low %v296_v19, %v300_v20 }
  0x6b   :  { %2856 = vmatprep.mubr.bf16.mxu0 %v4534_v43  ;;  %2508 = vmatpush1.bf16.msra.mxu1 %v5493_v44  ;;  %v4586_v43 = vcombine.high %v254_v37, %v258_v38  ;;  %v4590_v44 = vcombine.high %v256_v39, %v260_v40 }
  0x6c   :  { %3086 = vmatpush1.bf16.msra.mxu0 %v5494_v45  ;;  %2509 = vmatprep.subr.bf16.mxu1 %v5507_v0  ;;  %v5501_v45 = vld [vmem:[%s8155_s1 + $0xf0] sm:$0xff]  }
  0x6d   :  { %3087 = vmatprep.subr.bf16.mxu0 %v5507_v0 }
  0x6f   :  { %2510 = vmatpush1.bf16.msra.mxu1 %v5495_v54 }
  0x70   :  { %3088 = vmatpush1.bf16.msra.mxu0 %v5496_v55  ;;  %2511 = vmatprep.subr.bf16.mxu1 %v5507_v0  ;;  %v270_v55 = vld [vmem:[%s8156_s0 + $0x3c0] sm:$0xff] }
  0x71   :  { %2279 = vmatmul.mubr.bf16.gmra.mrb[24].mxu1 %v4529_v50  ;;  %3089 = vmatprep.subr.bf16.mxu0 %v5507_v0  ;;  %v268_v50 = vld [vmem:[%s8156_s0 + $0x3b0] sm:$0xff] }
  0x72   :  { %2857 = vmatmul.mubr.bf16.gmra.mrb[24].mxu0 %v4533_v51  ;;  %2286 = vmatprep.mubr.bf16.mxu1 %v4538_v52  ;;  %v4585_v51 = vcombine.low %v254_v37, %v258_v38  ;;  %v4589_v52 = vcombine.low %v256_v39, %v260_v40  ;;  %v4598_v54 = vcombine.high %v264_v49, %v268_v50 }
  0x73   :  { %2864 = vmatprep.mubr.bf16.mxu0 %v4542_v53  ;;  %2512 = vmatpush1.bf16.msra.mxu1 %v5497_v9  ;;  %v4594_v53 = vcombine.high %v262_v47, %v266_v48  ;;  %v4597_v59 = vcombine.low %v264_v49, %v268_v50  ;;  %v286_v9 = vld [vmem:[%s8156_s0 + $0x440] sm:$0xff] }
  0x74   :  { %3090 = vmatpush1.bf16.msra.mxu0 %v5498_v10  ;;  %2513 = vmatprep.subr.bf16.mxu1 %v5507_v0  ;;  %v290_v10 = vld [vmem:[%s8156_s0 + $0x460] sm:$0xff] }
  0x75   :  { %3091 = vmatprep.subr.bf16.mxu0 %v5507_v0  ;;  %v4617_v21 = vcombine.low %v286_v9, %v290_v10  ;;  %v326_v49 = vld [vmem:[%s8156_s0 + $0x580] sm:$0xff] }
  0x76   :  { %v330_v50 = vld [vmem:[%s8156_s0 + $0x5a0] sm:$0xff] }
  0x77   :  { %2514 = vmatpush1.bf16.msra.mxu1 %v5499_v27  ;;  %v304_v27 = vld [vmem:[%s8156_s0 + $0x4d0] sm:$0xff] }
  0x78   :  { %3092 = vmatpush1.bf16.msra.mxu0 %v5500_v28  ;;  %2515 = vmatprep.subr.bf16.mxu1 %v5507_v0  ;;  %v308_v28 = vld [vmem:[%s8156_s0 + $0x4f0] sm:$0xff] }
  0x79   :  { %2287 = vmatmul.mubr.bf16.gmra.mrb[28].mxu1 %v4537_v60  ;;  %3093 = vmatprep.subr.bf16.mxu0 %v5507_v0  ;;  %v4602_v60 = vcombine.high %v270_v55, %v274_v56  ;;  %v4638_v32 = vcombine.high %v304_v27, %v308_v28  ;;  %v4637_v38 = vcombine.low %v304_v27, %v308_v28  ;;  %v368_v27 = vld [vmem:[%s8156_s0 + $0x6d0] sm:$0xff] }
  0x7a   :  { %2865 = vmatmul.mubr.bf16.gmra.mrb[28].mxu0 %v4541_v61  ;;  %2294 = vmatprep.mubr.bf16.mxu1 %v4546_v62  ;;  %v5503_v62 = vld [vmem:[%s8155_s1 + $0xf8] sm:$0xff]   ;;  %v372_v28 = vld [vmem:[%s8156_s0 + $0x6f0] sm:$0xff] }
  0x7b   :  { %2872 = vmatprep.mubr.bf16.mxu0 %v4550_v63  ;;  %2516 = vmatpush1.bf16.msra.mxu1 %v5501_v45  ;;  %v5504_v63 = vld [vmem:[%s8155_s1 + $0x1f8] sm:$0xff]  }
  0x7c   :  { %3094 = vmatpush1.bf16.msra.mxu0 %v5502_v46  ;;  %2517 = vmatprep.subr.bf16.mxu1 %v5507_v0 }
  0x7d   :  { %3095 = vmatprep.subr.bf16.mxu0 %v5507_v0  ;;  %v276_v0 = vld [vmem:[%s8156_s0 + $0x3f0] sm:$0xff] }
  0x7e   :  { %v4606_v61 = vcombine.high %v272_v57, %v276_v0 }
  0x7f   :  { %2518 = vmatpush1.bf16.msra.mxu1 %v5503_v62 }
  0x80   :  { %3096 = vmatpush1.bf16.msra.mxu0 %v5504_v63 }
  0x81   :  { %2295 = vmatmul.mubr.bf16.gmra.mrb[32].mxu1 %v4545_v5  ;;  %v4601_v5 = vcombine.low %v270_v55, %v274_v56  ;;  %v4658_v55 = vcombine.high %v326_v49, %v330_v50 }
  0x82   :  { %2873 = vmatmul.mubr.bf16.gmra.mrb[32].mxu0 %v4549_v6  ;;  %2302 = vmatprep.mubr.bf16.mxu1 %v4554_v7  ;;  %v4605_v6 = vcombine.low %v272_v57, %v276_v0  ;;  %v4610_v7 = vcombine.high %v278_v1, %v282_v2  ;;  %v334_v57 = vld [vmem:[%s8156_s0 + $0x5c0] sm:$0xff] }
  0x83   :  { %2880 = vmatprep.mubr.bf16.mxu0 %v4558_v8  ;;  %v4614_v8 = vcombine.high %v280_v3, %v284_v4  ;;  %v338_v0 = vld [vmem:[%s8156_s0 + $0x5e0] sm:$0xff]  ;;  %v344_v3 = vld [vmem:[%s8156_s0 + $0x610] sm:$0xff] }
  0x84   :  { %v4666_v62 = vcombine.high %v334_v57, %v338_v0  ;;  %v342_v1 = vld [vmem:[%s8156_s0 + $0x600] sm:$0xff]  ;;  %v348_v4 = vld [vmem:[%s8156_s0 + $0x630] sm:$0xff] }
  0x85   :  { %v346_v2 = vld [vmem:[%s8156_s0 + $0x620] sm:$0xff] }
  0x89   :  { %2303 = vmatmul.mubr.bf16.gmra.mrb[36].mxu1 %v4553_v15  ;;  %v4618_v15 = vcombine.high %v286_v9, %v290_v10  ;;  %v350_v9 = vld [vmem:[%s8156_s0 + $0x640] sm:$0xff] }
  0x8a   :  { %2881 = vmatmul.mubr.bf16.gmra.mrb[36].mxu0 %v4557_v16  ;;  %2310 = vmatprep.mubr.bf16.mxu1 %v4562_v17  ;;  %v4622_v16 = vcombine.high %v288_v11, %v292_v12  ;;  %v294_v17 = vld [vmem:[%s8156_s0 + $0x480] sm:$0xff]  ;;  %v352_v11 = vld [vmem:[%s8156_s0 + $0x650] sm:$0xff] }
  0x8b   :  { %2888 = vmatprep.mubr.bf16.mxu0 %v4566_v18  ;;  %v298_v18 = vld [vmem:[%s8156_s0 + $0x4a0] sm:$0xff]  ;;  %v356_v12 = vld [vmem:[%s8156_s0 + $0x670] sm:$0xff] }
  0x8c   :  { %v4625_v29 = vcombine.low %v294_v17, %v298_v18  ;;  %v354_v10 = vld [vmem:[%s8156_s0 + $0x660] sm:$0xff] }
  0x91   :  { %2311 = vmatmul.mubr.bf16.gmra.mrb[40].mxu1 %v4561_v23  ;;  %v4626_v23 = vcombine.high %v294_v17, %v298_v18  ;;  %v358_v17 = vld [vmem:[%s8156_s0 + $0x680] sm:$0xff] }
  0x92   :  { %2889 = vmatmul.mubr.bf16.gmra.mrb[40].mxu0 %v4565_v24  ;;  %2318 = vmatprep.mubr.bf16.mxu1 %v4570_v25  ;;  %v4630_v24 = vcombine.high %v296_v19, %v300_v20  ;;  %v302_v25 = vld [vmem:[%s8156_s0 + $0x4c0] sm:$0xff]  ;;  %v360_v19 = vld [vmem:[%s8156_s0 + $0x690] sm:$0xff] }
  0x93   :  { %2896 = vmatprep.mubr.bf16.mxu0 %v4574_v26  ;;  %v306_v26 = vld [vmem:[%s8156_s0 + $0x4e0] sm:$0xff]  ;;  %v364_v20 = vld [vmem:[%s8156_s0 + $0x6b0] sm:$0xff] }
  0x94   :  { %v4634_v31 = vcombine.high %v302_v25, %v306_v26  ;;  %v4633_v37 = vcombine.low %v302_v25, %v306_v26  ;;  %v362_v18 = vld [vmem:[%s8156_s0 + $0x6a0] sm:$0xff] }
  0x95   :  { %v366_v25 = vld [vmem:[%s8156_s0 + $0x6c0] sm:$0xff] }
  0x96   :  { %v370_v26 = vld [vmem:[%s8156_s0 + $0x6e0] sm:$0xff] }
  0x99   :  { %2319 = vmatmul.mubr.bf16.gmra.mrb[44].mxu1 %v4569_v33  ;;  %v310_v33 = vld [vmem:[%s8156_s0 + $0x500] sm:$0xff] }
  0x9a   :  { %2897 = vmatmul.mubr.bf16.gmra.mrb[44].mxu0 %v4573_v34  ;;  %2326 = vmatprep.mubr.bf16.mxu1 %v4578_v35  ;;  %v314_v34 = vld [vmem:[%s8156_s0 + $0x520] sm:$0xff]  ;;  %v312_v35 = vld [vmem:[%s8156_s0 + $0x510] sm:$0xff] }
  0x9b   :  { %2904 = vmatprep.mubr.bf16.mxu0 %v4582_v36  ;;  %v316_v36 = vld [vmem:[%s8156_s0 + $0x530] sm:$0xff]  ;;  %v4642_v39 = vcombine.high %v310_v33, %v314_v34  ;;  %v4641_v45 = vcombine.low %v310_v33, %v314_v34  ;;  %v374_v33 = vld [vmem:[%s8156_s0 + $0x700] sm:$0xff] }
  0x9c   :  { %v4646_v40 = vcombine.high %v312_v35, %v316_v36  ;;  %v4645_v46 = vcombine.low %v312_v35, %v316_v36  ;;  %v378_v34 = vld [vmem:[%s8156_s0 + $0x720] sm:$0xff]  ;;  %v376_v35 = vld [vmem:[%s8156_s0 + $0x710] sm:$0xff] }
  0x9d   :  { %v380_v36 = vld [vmem:[%s8156_s0 + $0x730] sm:$0xff] }
  0xa1   :  { %2327 = vmatmul.mubr.bf16.gmra.mrb[48].mxu1 %v4577_v41  ;;  %v318_v41 = vld [vmem:[%s8156_s0 + $0x540] sm:$0xff] }
  0xa2   :  { %2905 = vmatmul.mubr.bf16.gmra.mrb[48].mxu0 %v4581_v42  ;;  %2334 = vmatprep.mubr.bf16.mxu1 %v4586_v43  ;;  %v322_v42 = vld [vmem:[%s8156_s0 + $0x560] sm:$0xff]  ;;  %v320_v43 = vld [vmem:[%s8156_s0 + $0x550] sm:$0xff] }
  0xa3   :  { %2912 = vmatprep.mubr.bf16.mxu0 %v4590_v44  ;;  %v324_v44 = vld [vmem:[%s8156_s0 + $0x570] sm:$0xff]  ;;  %v4650_v47 = vcombine.high %v318_v41, %v322_v42 }
  0xa4   :  { %v4654_v48 = vcombine.high %v320_v43, %v324_v44 }
  0xa9   :  { %2335 = vmatmul.mubr.bf16.gmra.mrb[52].mxu1 %v4585_v51  ;;  %v328_v51 = vld [vmem:[%s8156_s0 + $0x590] sm:$0xff] }
  0xaa   :  { %2913 = vmatmul.mubr.bf16.gmra.mrb[52].mxu0 %v4589_v52  ;;  %2342 = vmatprep.mubr.bf16.mxu1 %v4594_v53  ;;  %v332_v52 = vld [vmem:[%s8156_s0 + $0x5b0] sm:$0xff]  ;;  %v4649_v53 = vcombine.low %v318_v41, %v322_v42  ;;  %v382_v41 = vld [vmem:[%s8156_s0 + $0x740] sm:$0xff] }
  0xab   :  { %2920 = vmatprep.mubr.bf16.mxu0 %v4598_v54  ;;  %v4653_v54 = vcombine.low %v320_v43, %v324_v44  ;;  %v4662_v56 = vcombine.high %v328_v51, %v332_v52  ;;  %v386_v42 = vld [vmem:[%s8156_s0 + $0x760] sm:$0xff]  ;;  %v384_v43 = vld [vmem:[%s8156_s0 + $0x750] sm:$0xff] }
  0xac   :  { %v388_v44 = vld [vmem:[%s8156_s0 + $0x770] sm:$0xff] }
  0xb1   :  { %2343 = vmatmul.mubr.bf16.gmra.mrb[56].mxu1 %v4593_v58  ;;  %v336_v58 = vld [vmem:[%s8156_s0 + $0x5d0] sm:$0xff] }
  0xb2   :  { %2921 = vmatmul.mubr.bf16.gmra.mrb[56].mxu0 %v4597_v59  ;;  %2350 = vmatprep.mubr.bf16.mxu1 %v4602_v60  ;;  %v340_v59 = vld [vmem:[%s8156_s0 + $0x5f0] sm:$0xff]  ;;  %v4657_v60 = vcombine.low %v326_v49, %v330_v50  ;;  %v390_v49 = vld [vmem:[%s8156_s0 + $0x780] sm:$0xff] }
  0xb3   :  { %2928 = vmatprep.mubr.bf16.mxu0 %v4606_v61  ;;  %v4661_v61 = vcombine.low %v328_v51, %v332_v52  ;;  %v4670_v63 = vcombine.high %v336_v58, %v340_v59  ;;  %v394_v50 = vld [vmem:[%s8156_s0 + $0x7a0] sm:$0xff]  ;;  %v392_v51 = vld [vmem:[%s8156_s0 + $0x790] sm:$0xff] }
  0xb4   :  { %v396_v52 = vld [vmem:[%s8156_s0 + $0x7b0] sm:$0xff] }
  0xb9   :  { %2351 = vmatmul.mubr.bf16.gmra.mrb[60].mxu1 %v4601_v5  ;;  %v4665_v5 = vcombine.low %v334_v57, %v338_v0  ;;  %v398_v57 = vld [vmem:[%s8156_s0 + $0x7c0] sm:$0xff] }
  0xba   :  { %2929 = vmatmul.mubr.bf16.gmra.mrb[60].mxu0 %v4605_v6  ;;  %2358 = vmatprep.mubr.bf16.mxu1 %v4610_v7  ;;  %v4669_v6 = vcombine.low %v336_v58, %v340_v59  ;;  %v4674_v7 = vcombine.high %v342_v1, %v346_v2  ;;  %v402_v0 = vld [vmem:[%s8156_s0 + $0x7e0] sm:$0xff]  ;;  %v400_v58 = vld [vmem:[%s8156_s0 + $0x7d0] sm:$0xff] }
  0xbb   :  { %2936 = vmatprep.mubr.bf16.mxu0 %v4614_v8  ;;  %v4678_v8 = vcombine.high %v344_v3, %v348_v4  ;;  %v404_v59 = vld [vmem:[%s8156_s0 + $0x7f0] sm:$0xff] }
  0xc1   :  { %2359 = vmatmul.mubr.bf16.gmra.mrb[64].mxu1 %v4609_v13  ;;  %v4673_v13 = vcombine.low %v342_v1, %v346_v2  ;;  %v151_v1 = vld [vmem:[%s8156_s0 + $0x8] sm:$0xff] }
  0xc2   :  { %2937 = vmatmul.mubr.bf16.gmra.mrb[64].mxu0 %v4613_v14  ;;  %2366 = vmatprep.mubr.bf16.mxu1 %v4618_v15  ;;  %v4677_v14 = vcombine.low %v344_v3, %v348_v4  ;;  %v4682_v15 = vcombine.high %v350_v9, %v354_v10  ;;  %v155_v2 = vld [vmem:[%s8156_s0 + $0x28] sm:$0xff]  ;;  %v153_v3 = vld [vmem:[%s8156_s0 + $0x18] sm:$0xff] }
  0xc3   :  { %2944 = vmatprep.mubr.bf16.mxu0 %v4622_v16  ;;  %v4686_v16 = vcombine.high %v352_v11, %v356_v12  ;;  %v157_v4 = vld [vmem:[%s8156_s0 + $0x38] sm:$0xff] }
  0xc9   :  { %2367 = vmatmul.mubr.bf16.gmra.mrb[68].mxu1 %v4617_v21  ;;  %v4681_v21 = vcombine.low %v350_v9, %v354_v10  ;;  %v159_v9 = vld [vmem:[%s8156_s0 + $0x48] sm:$0xff] }
  0xca   :  { %2945 = vmatmul.mubr.bf16.gmra.mrb[68].mxu0 %v4621_v22  ;;  %2374 = vmatprep.mubr.bf16.mxu1 %v4626_v23  ;;  %v4685_v22 = vcombine.low %v352_v11, %v356_v12  ;;  %v4690_v23 = vcombine.high %v358_v17, %v362_v18  ;;  %v163_v10 = vld [vmem:[%s8156_s0 + $0x68] sm:$0xff]  ;;  %v161_v11 = vld [vmem:[%s8156_s0 + $0x58] sm:$0xff] }
  0xcb   :  { %2952 = vmatprep.mubr.bf16.mxu0 %v4630_v24  ;;  %v4694_v24 = vcombine.high %v360_v19, %v364_v20  ;;  %v165_v12 = vld [vmem:[%s8156_s0 + $0x78] sm:$0xff] }
  0xd1   :  { %2375 = vmatmul.mubr.bf16.gmra.mrb[72].mxu1 %v4625_v29  ;;  %v4689_v29 = vcombine.low %v358_v17, %v362_v18  ;;  %v167_v17 = vld [vmem:[%s8156_s0 + $0x88] sm:$0xff] }
  0xd2   :  { %2953 = vmatmul.mubr.bf16.gmra.mrb[72].mxu0 %v4629_v30  ;;  %2382 = vmatprep.mubr.bf16.mxu1 %v4634_v31  ;;  %v4693_v30 = vcombine.low %v360_v19, %v364_v20  ;;  %v4698_v31 = vcombine.high %v366_v25, %v370_v26  ;;  %v171_v18 = vld [vmem:[%s8156_s0 + $0xa8] sm:$0xff]  ;;  %v169_v19 = vld [vmem:[%s8156_s0 + $0x98] sm:$0xff] }
  0xd3   :  { %2960 = vmatprep.mubr.bf16.mxu0 %v4638_v32  ;;  %v4702_v32 = vcombine.high %v368_v27, %v372_v28  ;;  %v173_v20 = vld [vmem:[%s8156_s0 + $0xb8] sm:$0xff] }
  0xd9   :  { %2383 = vmatmul.mubr.bf16.gmra.mrb[76].mxu1 %v4633_v37  ;;  %v4697_v37 = vcombine.low %v366_v25, %v370_v26  ;;  %v175_v25 = vld [vmem:[%s8156_s0 + $0xc8] sm:$0xff] }
  0xda   :  { %2961 = vmatmul.mubr.bf16.gmra.mrb[76].mxu0 %v4637_v38  ;;  %2390 = vmatprep.mubr.bf16.mxu1 %v4642_v39  ;;  %v4701_v38 = vcombine.low %v368_v27, %v372_v28  ;;  %v4706_v39 = vcombine.high %v374_v33, %v378_v34  ;;  %v179_v26 = vld [vmem:[%s8156_s0 + $0xe8] sm:$0xff]  ;;  %v177_v27 = vld [vmem:[%s8156_s0 + $0xd8] sm:$0xff] }
  0xdb   :  { %2968 = vmatprep.mubr.bf16.mxu0 %v4646_v40  ;;  %v4710_v40 = vcombine.high %v376_v35, %v380_v36  ;;  %v181_v28 = vld [vmem:[%s8156_s0 + $0xf8] sm:$0xff] }
  0xe1   :  { %2391 = vmatmul.mubr.bf16.gmra.mrb[80].mxu1 %v4641_v45  ;;  %v4705_v45 = vcombine.low %v374_v33, %v378_v34  ;;  %v183_v33 = vld [vmem:[%s8156_s0 + $0x108] sm:$0xff] }
  0xe2   :  { %2969 = vmatmul.mubr.bf16.gmra.mrb[80].mxu0 %v4645_v46  ;;  %2398 = vmatprep.mubr.bf16.mxu1 %v4650_v47  ;;  %v4709_v46 = vcombine.low %v376_v35, %v380_v36  ;;  %v4714_v47 = vcombine.high %v382_v41, %v386_v42  ;;  %v187_v34 = vld [vmem:[%s8156_s0 + $0x128] sm:$0xff]  ;;  %v185_v35 = vld [vmem:[%s8156_s0 + $0x118] sm:$0xff] }
  0xe3   :  { %2976 = vmatprep.mubr.bf16.mxu0 %v4654_v48  ;;  %v4718_v48 = vcombine.high %v384_v43, %v388_v44  ;;  %v189_v36 = vld [vmem:[%s8156_s0 + $0x138] sm:$0xff] }
  0xe9   :  { %2399 = vmatmul.mubr.bf16.gmra.mrb[84].mxu1 %v4649_v53  ;;  %v4713_v53 = vcombine.low %v382_v41, %v386_v42  ;;  %v191_v41 = vld [vmem:[%s8156_s0 + $0x148] sm:$0xff] }
  0xea   :  { %2977 = vmatmul.mubr.bf16.gmra.mrb[84].mxu0 %v4653_v54  ;;  %2406 = vmatprep.mubr.bf16.mxu1 %v4658_v55  ;;  %v4717_v54 = vcombine.low %v384_v43, %v388_v44  ;;  %v4722_v55 = vcombine.high %v390_v49, %v394_v50  ;;  %v195_v42 = vld [vmem:[%s8156_s0 + $0x168] sm:$0xff]  ;;  %v193_v43 = vld [vmem:[%s8156_s0 + $0x158] sm:$0xff] }
  0xeb   :  { %2984 = vmatprep.mubr.bf16.mxu0 %v4662_v56  ;;  %v4726_v56 = vcombine.high %v392_v51, %v396_v52  ;;  %v197_v44 = vld [vmem:[%s8156_s0 + $0x178] sm:$0xff] }
  0xf1   :  { %2407 = vmatmul.mubr.bf16.gmra.mrb[88].mxu1 %v4657_v60  ;;  %v4721_v60 = vcombine.low %v390_v49, %v394_v50  ;;  %v199_v49 = vld [vmem:[%s8156_s0 + $0x188] sm:$0xff] }
  0xf2   :  { %2985 = vmatmul.mubr.bf16.gmra.mrb[88].mxu0 %v4661_v61  ;;  %2414 = vmatprep.mubr.bf16.mxu1 %v4666_v62  ;;  %v4725_v61 = vcombine.low %v392_v51, %v396_v52  ;;  %v4730_v62 = vcombine.high %v398_v57, %v402_v0  ;;  %v203_v50 = vld [vmem:[%s8156_s0 + $0x1a8] sm:$0xff]  ;;  %v201_v51 = vld [vmem:[%s8156_s0 + $0x198] sm:$0xff] }
  0xf3   :  { %2992 = vmatprep.mubr.bf16.mxu0 %v4670_v63  ;;  %v4734_v63 = vcombine.high %v400_v58, %v404_v59  ;;  %v205_v52 = vld [vmem:[%s8156_s0 + $0x1b8] sm:$0xff] }
  0xf9   :  { %2415 = vmatmul.mubr.bf16.gmra.mrb[92].mxu1 %v4665_v5  ;;  %v4729_v5 = vcombine.low %v398_v57, %v402_v0  ;;  %v207_v57 = vld [vmem:[%s8156_s0 + $0x1c8] sm:$0xff] }
  0xfa   :  { %2993 = vmatmul.mubr.bf16.gmra.mrb[92].mxu0 %v4669_v6  ;;  %2422 = vmatprep.mubr.bf16.mxu1 %v4674_v7  ;;  %v4733_v6 = vcombine.low %v400_v58, %v404_v59  ;;  %v4484_v7 = vcombine.high %v151_v1, %v155_v2  ;;  %v211_v0 = vld [vmem:[%s8156_s0 + $0x1e8] sm:$0xff]  ;;  %v209_v58 = vld [vmem:[%s8156_s0 + $0x1d8] sm:$0xff] }
  0xfb   :  { %3000 = vmatprep.mubr.bf16.mxu0 %v4678_v8  ;;  %v4488_v8 = vcombine.high %v153_v3, %v157_v4  ;;  %v213_v59 = vld [vmem:[%s8156_s0 + $0x1f8] sm:$0xff] }
 0x101   :  { %2423 = vmatmul.mubr.bf16.gmra.mrb[96].mxu1 %v4673_v13  ;;  %v4483_v13 = vcombine.low %v151_v1, %v155_v2  ;;  %v215_v1 = vld [vmem:[%s8156_s0 + $0x208] sm:$0xff] }
 0x102   :  { %3001 = vmatmul.mubr.bf16.gmra.mrb[96].mxu0 %v4677_v14  ;;  %2430 = vmatprep.mubr.bf16.mxu1 %v4682_v15  ;;  %v4487_v14 = vcombine.low %v153_v3, %v157_v4  ;;  %v4492_v15 = vcombine.high %v159_v9, %v163_v10  ;;  %v219_v2 = vld [vmem:[%s8156_s0 + $0x228] sm:$0xff]  ;;  %v217_v3 = vld [vmem:[%s8156_s0 + $0x218] sm:$0xff] }
 0x103   :  { %3008 = vmatprep.mubr.bf16.mxu0 %v4686_v16  ;;  %v4496_v16 = vcombine.high %v161_v11, %v165_v12  ;;  %v221_v4 = vld [vmem:[%s8156_s0 + $0x238] sm:$0xff] }
 0x109   :  { %2431 = vmatmul.mubr.bf16.gmra.mrb[100].mxu1 %v4681_v21  ;;  %v4491_v21 = vcombine.low %v159_v9, %v163_v10  ;;  %v223_v9 = vld [vmem:[%s8156_s0 + $0x248] sm:$0xff] }
 0x10a   :  { %3009 = vmatmul.mubr.bf16.gmra.mrb[100].mxu0 %v4685_v22  ;;  %2438 = vmatprep.mubr.bf16.mxu1 %v4690_v23  ;;  %v4495_v22 = vcombine.low %v161_v11, %v165_v12  ;;  %v4500_v23 = vcombine.high %v167_v17, %v171_v18  ;;  %v227_v10 = vld [vmem:[%s8156_s0 + $0x268] sm:$0xff]  ;;  %v225_v11 = vld [vmem:[%s8156_s0 + $0x258] sm:$0xff] }
 0x10b   :  { %3016 = vmatprep.mubr.bf16.mxu0 %v4694_v24  ;;  %v4504_v24 = vcombine.high %v169_v19, %v173_v20  ;;  %v229_v12 = vld [vmem:[%s8156_s0 + $0x278] sm:$0xff] }
 0x111   :  { %2439 = vmatmul.mubr.bf16.gmra.mrb[104].mxu1 %v4689_v29  ;;  %v4499_v29 = vcombine.low %v167_v17, %v171_v18  ;;  %v231_v17 = vld [vmem:[%s8156_s0 + $0x288] sm:$0xff] }
 0x112   :  { %3017 = vmatmul.mubr.bf16.gmra.mrb[104].mxu0 %v4693_v30  ;;  %2446 = vmatprep.mubr.bf16.mxu1 %v4698_v31  ;;  %v4503_v30 = vcombine.low %v169_v19, %v173_v20  ;;  %v4508_v31 = vcombine.high %v175_v25, %v179_v26  ;;  %v235_v18 = vld [vmem:[%s8156_s0 + $0x2a8] sm:$0xff]  ;;  %v233_v19 = vld [vmem:[%s8156_s0 + $0x298] sm:$0xff] }
 0x113   :  { %3024 = vmatprep.mubr.bf16.mxu0 %v4702_v32  ;;  %v4512_v32 = vcombine.high %v177_v27, %v181_v28  ;;  %v237_v20 = vld [vmem:[%s8156_s0 + $0x2b8] sm:$0xff] }
 0x119   :  { %2447 = vmatmul.mubr.bf16.gmra.mrb[108].mxu1 %v4697_v37  ;;  %v4507_v37 = vcombine.low %v175_v25, %v179_v26  ;;  %v239_v25 = vld [vmem:[%s8156_s0 + $0x2c8] sm:$0xff] }
 0x11a   :  { %3025 = vmatmul.mubr.bf16.gmra.mrb[108].mxu0 %v4701_v38  ;;  %2454 = vmatprep.mubr.bf16.mxu1 %v4706_v39  ;;  %v4511_v38 = vcombine.low %v177_v27, %v181_v28  ;;  %v4516_v39 = vcombine.high %v183_v33, %v187_v34  ;;  %v243_v26 = vld [vmem:[%s8156_s0 + $0x2e8] sm:$0xff]  ;;  %v241_v27 = vld [vmem:[%s8156_s0 + $0x2d8] sm:$0xff] }
 0x11b   :  { %3032 = vmatprep.mubr.bf16.mxu0 %v4710_v40  ;;  %v4520_v40 = vcombine.high %v185_v35, %v189_v36  ;;  %v245_v28 = vld [vmem:[%s8156_s0 + $0x2f8] sm:$0xff] }
 0x121   :  { %2455 = vmatmul.mubr.bf16.gmra.mrb[112].mxu1 %v4705_v45  ;;  %v4515_v45 = vcombine.low %v183_v33, %v187_v34  ;;  %v247_v33 = vld [vmem:[%s8156_s0 + $0x308] sm:$0xff] }
 0x122   :  { %3033 = vmatmul.mubr.bf16.gmra.mrb[112].mxu0 %v4709_v46  ;;  %2462 = vmatprep.mubr.bf16.mxu1 %v4714_v47  ;;  %v4519_v46 = vcombine.low %v185_v35, %v189_v36  ;;  %v4524_v47 = vcombine.high %v191_v41, %v195_v42  ;;  %v251_v34 = vld [vmem:[%s8156_s0 + $0x328] sm:$0xff]  ;;  %v249_v35 = vld [vmem:[%s8156_s0 + $0x318] sm:$0xff] }
 0x123   :  { %3040 = vmatprep.mubr.bf16.mxu0 %v4718_v48  ;;  %v4528_v48 = vcombine.high %v193_v43, %v197_v44  ;;  %v253_v36 = vld [vmem:[%s8156_s0 + $0x338] sm:$0xff] }
 0x129   :  { %2463 = vmatmul.mubr.bf16.gmra.mrb[116].mxu1 %v4713_v53  ;;  %v4523_v53 = vcombine.low %v191_v41, %v195_v42  ;;  %v255_v41 = vld [vmem:[%s8156_s0 + $0x348] sm:$0xff] }
 0x12a   :  { %3041 = vmatmul.mubr.bf16.gmra.mrb[116].mxu0 %v4717_v54  ;;  %2470 = vmatprep.mubr.bf16.mxu1 %v4722_v55  ;;  %v4527_v54 = vcombine.low %v193_v43, %v197_v44  ;;  %v4532_v55 = vcombine.high %v199_v49, %v203_v50  ;;  %v259_v42 = vld [vmem:[%s8156_s0 + $0x368] sm:$0xff]  ;;  %v257_v43 = vld [vmem:[%s8156_s0 + $0x358] sm:$0xff] }
 0x12b   :  { %3048 = vmatprep.mubr.bf16.mxu0 %v4726_v56  ;;  %v4536_v56 = vcombine.high %v201_v51, %v205_v52  ;;  %v261_v44 = vld [vmem:[%s8156_s0 + $0x378] sm:$0xff] }
 0x131   :  { %2471 = vmatmul.mubr.bf16.gmra.mrb[120].mxu1 %v4721_v60  ;;  %v4531_v60 = vcombine.low %v199_v49, %v203_v50  ;;  %v263_v49 = vld [vmem:[%s8156_s0 + $0x388] sm:$0xff] }
 0x132   :  { %3049 = vmatmul.mubr.bf16.gmra.mrb[120].mxu0 %v4725_v61  ;;  %2478 = vmatprep.mubr.bf16.mxu1 %v4730_v62  ;;  %v4535_v61 = vcombine.low %v201_v51, %v205_v52  ;;  %v4540_v62 = vcombine.high %v207_v57, %v211_v0  ;;  %v267_v50 = vld [vmem:[%s8156_s0 + $0x3a8] sm:$0xff]  ;;  %v265_v51 = vld [vmem:[%s8156_s0 + $0x398] sm:$0xff] }
 0x133   :  { %3056 = vmatprep.mubr.bf16.mxu0 %v4734_v63  ;;  %v4544_v63 = vcombine.high %v209_v58, %v213_v59  ;;  %v269_v52 = vld [vmem:[%s8156_s0 + $0x3b8] sm:$0xff] }
 0x139   :  { %2479 = vmatmul.mubr.bf16.gmra.mrb[124].mxu1 %v4729_v5  ;;  %v4539_v5 = vcombine.low %v207_v57, %v211_v0  ;;  %v271_v57 = vld [vmem:[%s8156_s0 + $0x3c8] sm:$0xff] }
 0x13a   :  { %3057 = vmatmul.mubr.bf16.gmra.mrb[124].mxu0 %v4733_v6  ;;  %2519 = vmatprep.mubr.bf16.mxu1 %v4484_v7  ;;  %v4543_v6 = vcombine.low %v209_v58, %v213_v59  ;;  %v4548_v7 = vcombine.high %v215_v1, %v219_v2  ;;  %v275_v0 = vld [vmem:[%s8156_s0 + $0x3e8] sm:$0xff]  ;;  %v273_v58 = vld [vmem:[%s8156_s0 + $0x3d8] sm:$0xff] }
 0x13b   :  { %3097 = vmatprep.mubr.bf16.mxu0 %v4488_v8  ;;  %v4552_v8 = vcombine.high %v217_v3, %v221_v4  ;;  %v277_v59 = vld [vmem:[%s8156_s0 + $0x3f8] sm:$0xff] }
 0x141   :  { %2520 = vmatmul.mubr.bf16.vlgmr.msra.gmra.mrb[0].mxu1 %v4483_v13  ;;  %v4547_v13 = vcombine.low %v215_v1, %v219_v2  ;;  %v279_v1 = vld [vmem:[%s8156_s0 + $0x408] sm:$0xff] }
 0x142   :  { %3098 = vmatmul.mubr.bf16.vlgmr.msra.gmra.mrb[0].mxu0 %v4487_v14  ;;  %2527 = vmatprep.mubr.bf16.mxu1 %v4492_v15  ;;  %v4551_v14 = vcombine.low %v217_v3, %v221_v4  ;;  %v4556_v15 = vcombine.high %v223_v9, %v227_v10  ;;  %v283_v2 = vld [vmem:[%s8156_s0 + $0x428] sm:$0xff]  ;;  %v281_v3 = vld [vmem:[%s8156_s0 + $0x418] sm:$0xff] }
 0x143   :  { %3105 = vmatprep.mubr.bf16.mxu0 %v4496_v16  ;;  %v4560_v16 = vcombine.high %v225_v11, %v229_v12  ;;  %v285_v4 = vld [vmem:[%s8156_s0 + $0x438] sm:$0xff] }
 0x149   :  { %2528 = vmatmul.mubr.bf16.gmra.mrb[4].mxu1 %v4491_v21  ;;  %v4555_v21 = vcombine.low %v223_v9, %v227_v10  ;;  %v287_v9 = vld [vmem:[%s8156_s0 + $0x448] sm:$0xff] }
 0x14a   :  { %3106 = vmatmul.mubr.bf16.gmra.mrb[4].mxu0 %v4495_v22  ;;  %2535 = vmatprep.mubr.bf16.mxu1 %v4500_v23  ;;  %v4559_v22 = vcombine.low %v225_v11, %v229_v12  ;;  %v4564_v23 = vcombine.high %v231_v17, %v235_v18  ;;  %v291_v10 = vld [vmem:[%s8156_s0 + $0x468] sm:$0xff]  ;;  %v289_v11 = vld [vmem:[%s8156_s0 + $0x458] sm:$0xff] }
 0x14b   :  { %3113 = vmatprep.mubr.bf16.mxu0 %v4504_v24  ;;  %v4568_v24 = vcombine.high %v233_v19, %v237_v20  ;;  %v293_v12 = vld [vmem:[%s8156_s0 + $0x478] sm:$0xff] }
 0x151   :  { %2536 = vmatmul.mubr.bf16.gmra.mrb[8].mxu1 %v4499_v29  ;;  %v4563_v29 = vcombine.low %v231_v17, %v235_v18  ;;  %v295_v17 = vld [vmem:[%s8156_s0 + $0x488] sm:$0xff] }
 0x152   :  { %3114 = vmatmul.mubr.bf16.gmra.mrb[8].mxu0 %v4503_v30  ;;  %2543 = vmatprep.mubr.bf16.mxu1 %v4508_v31  ;;  %v4567_v30 = vcombine.low %v233_v19, %v237_v20  ;;  %v4572_v31 = vcombine.high %v239_v25, %v243_v26  ;;  %v299_v18 = vld [vmem:[%s8156_s0 + $0x4a8] sm:$0xff]  ;;  %v297_v19 = vld [vmem:[%s8156_s0 + $0x498] sm:$0xff] }
 0x153   :  { %3121 = vmatprep.mubr.bf16.mxu0 %v4512_v32  ;;  %v4576_v32 = vcombine.high %v241_v27, %v245_v28  ;;  %v301_v20 = vld [vmem:[%s8156_s0 + $0x4b8] sm:$0xff] }
 0x159   :  { %2544 = vmatmul.mubr.bf16.gmra.mrb[12].mxu1 %v4507_v37  ;;  %v4571_v37 = vcombine.low %v239_v25, %v243_v26  ;;  %v303_v25 = vld [vmem:[%s8156_s0 + $0x4c8] sm:$0xff] }
 0x15a   :  { %3122 = vmatmul.mubr.bf16.gmra.mrb[12].mxu0 %v4511_v38  ;;  %2551 = vmatprep.mubr.bf16.mxu1 %v4516_v39  ;;  %v4575_v38 = vcombine.low %v241_v27, %v245_v28  ;;  %v4580_v39 = vcombine.high %v247_v33, %v251_v34  ;;  %v307_v26 = vld [vmem:[%s8156_s0 + $0x4e8] sm:$0xff]  ;;  %v305_v27 = vld [vmem:[%s8156_s0 + $0x4d8] sm:$0xff] }
 0x15b   :  { %3129 = vmatprep.mubr.bf16.mxu0 %v4520_v40  ;;  %v4584_v40 = vcombine.high %v249_v35, %v253_v36  ;;  %v309_v28 = vld [vmem:[%s8156_s0 + $0x4f8] sm:$0xff] }
 0x161   :  { %2552 = vmatmul.mubr.bf16.gmra.mrb[16].mxu1 %v4515_v45  ;;  %v4579_v45 = vcombine.low %v247_v33, %v251_v34  ;;  %v311_v33 = vld [vmem:[%s8156_s0 + $0x508] sm:$0xff] }
 0x162   :  { %3130 = vmatmul.mubr.bf16.gmra.mrb[16].mxu0 %v4519_v46  ;;  %2559 = vmatprep.mubr.bf16.mxu1 %v4524_v47  ;;  %v4583_v46 = vcombine.low %v249_v35, %v253_v36  ;;  %v4588_v47 = vcombine.high %v255_v41, %v259_v42  ;;  %v315_v34 = vld [vmem:[%s8156_s0 + $0x528] sm:$0xff]  ;;  %v313_v35 = vld [vmem:[%s8156_s0 + $0x518] sm:$0xff] }
 0x163   :  { %3137 = vmatprep.mubr.bf16.mxu0 %v4528_v48  ;;  %v4592_v48 = vcombine.high %v257_v43, %v261_v44  ;;  %v317_v36 = vld [vmem:[%s8156_s0 + $0x538] sm:$0xff] }
 0x169   :  { %2560 = vmatmul.mubr.bf16.gmra.mrb[20].mxu1 %v4523_v53  ;;  %v4587_v53 = vcombine.low %v255_v41, %v259_v42  ;;  %v319_v41 = vld [vmem:[%s8156_s0 + $0x548] sm:$0xff] }
 0x16a   :  { %3138 = vmatmul.mubr.bf16.gmra.mrb[20].mxu0 %v4527_v54  ;;  %2567 = vmatprep.mubr.bf16.mxu1 %v4532_v55  ;;  %v4591_v54 = vcombine.low %v257_v43, %v261_v44  ;;  %v4596_v55 = vcombine.high %v263_v49, %v267_v50  ;;  %v323_v42 = vld [vmem:[%s8156_s0 + $0x568] sm:$0xff]  ;;  %v321_v43 = vld [vmem:[%s8156_s0 + $0x558] sm:$0xff] }
 0x16b   :  { %3145 = vmatprep.mubr.bf16.mxu0 %v4536_v56  ;;  %v4600_v56 = vcombine.high %v265_v51, %v269_v52  ;;  %v325_v44 = vld [vmem:[%s8156_s0 + $0x578] sm:$0xff] }
 0x171   :  { %2568 = vmatmul.mubr.bf16.gmra.mrb[24].mxu1 %v4531_v60  ;;  %v4595_v60 = vcombine.low %v263_v49, %v267_v50  ;;  %v327_v49 = vld [vmem:[%s8156_s0 + $0x588] sm:$0xff] }
 0x172   :  { %3146 = vmatmul.mubr.bf16.gmra.mrb[24].mxu0 %v4535_v61  ;;  %2575 = vmatprep.mubr.bf16.mxu1 %v4540_v62  ;;  %v4599_v61 = vcombine.low %v265_v51, %v269_v52  ;;  %v4604_v62 = vcombine.high %v271_v57, %v275_v0  ;;  %v331_v50 = vld [vmem:[%s8156_s0 + $0x5a8] sm:$0xff]  ;;  %v329_v51 = vld [vmem:[%s8156_s0 + $0x598] sm:$0xff] }
 0x173   :  { %3153 = vmatprep.mubr.bf16.mxu0 %v4544_v63  ;;  %v4608_v63 = vcombine.high %v273_v58, %v277_v59  ;;  %v333_v52 = vld [vmem:[%s8156_s0 + $0x5b8] sm:$0xff] }
 0x179   :  { %2576 = vmatmul.mubr.bf16.gmra.mrb[28].mxu1 %v4539_v5  ;;  %v4603_v5 = vcombine.low %v271_v57, %v275_v0  ;;  %v335_v57 = vld [vmem:[%s8156_s0 + $0x5c8] sm:$0xff] }
 0x17a   :  { %3154 = vmatmul.mubr.bf16.gmra.mrb[28].mxu0 %v4543_v6  ;;  %2583 = vmatprep.mubr.bf16.mxu1 %v4548_v7  ;;  %v4607_v6 = vcombine.low %v273_v58, %v277_v59  ;;  %v4612_v7 = vcombine.high %v279_v1, %v283_v2  ;;  %v339_v0 = vld [vmem:[%s8156_s0 + $0x5e8] sm:$0xff]  ;;  %v337_v58 = vld [vmem:[%s8156_s0 + $0x5d8] sm:$0xff] }
 0x17b   :  { %3161 = vmatprep.mubr.bf16.mxu0 %v4552_v8  ;;  %v4616_v8 = vcombine.high %v281_v3, %v285_v4  ;;  %v341_v59 = vld [vmem:[%s8156_s0 + $0x5f8] sm:$0xff] }
 0x181   :  { %2584 = vmatmul.mubr.bf16.gmra.mrb[32].mxu1 %v4547_v13  ;;  %v4611_v13 = vcombine.low %v279_v1, %v283_v2  ;;  %v343_v1 = vld [vmem:[%s8156_s0 + $0x608] sm:$0xff] }
 0x182   :  { %3162 = vmatmul.mubr.bf16.gmra.mrb[32].mxu0 %v4551_v14  ;;  %2591 = vmatprep.mubr.bf16.mxu1 %v4556_v15  ;;  %v4615_v14 = vcombine.low %v281_v3, %v285_v4  ;;  %v4620_v15 = vcombine.high %v287_v9, %v291_v10  ;;  %v347_v2 = vld [vmem:[%s8156_s0 + $0x628] sm:$0xff]  ;;  %v345_v3 = vld [vmem:[%s8156_s0 + $0x618] sm:$0xff] }
 0x183   :  { %3169 = vmatprep.mubr.bf16.mxu0 %v4560_v16  ;;  %v4624_v16 = vcombine.high %v289_v11, %v293_v12  ;;  %v349_v4 = vld [vmem:[%s8156_s0 + $0x638] sm:$0xff] }
 0x189   :  { %2592 = vmatmul.mubr.bf16.gmra.mrb[36].mxu1 %v4555_v21  ;;  %v4619_v21 = vcombine.low %v287_v9, %v291_v10  ;;  %v351_v9 = vld [vmem:[%s8156_s0 + $0x648] sm:$0xff] }
 0x18a   :  { %3170 = vmatmul.mubr.bf16.gmra.mrb[36].mxu0 %v4559_v22  ;;  %2599 = vmatprep.mubr.bf16.mxu1 %v4564_v23  ;;  %v4623_v22 = vcombine.low %v289_v11, %v293_v12  ;;  %v4628_v23 = vcombine.high %v295_v17, %v299_v18  ;;  %v355_v10 = vld [vmem:[%s8156_s0 + $0x668] sm:$0xff]  ;;  %v353_v11 = vld [vmem:[%s8156_s0 + $0x658] sm:$0xff] }
 0x18b   :  { %3177 = vmatprep.mubr.bf16.mxu0 %v4568_v24  ;;  %v4632_v24 = vcombine.high %v297_v19, %v301_v20  ;;  %v357_v12 = vld [vmem:[%s8156_s0 + $0x678] sm:$0xff] }
 0x191   :  { %2600 = vmatmul.mubr.bf16.gmra.mrb[40].mxu1 %v4563_v29  ;;  %v4627_v29 = vcombine.low %v295_v17, %v299_v18  ;;  %v359_v17 = vld [vmem:[%s8156_s0 + $0x688] sm:$0xff] }
 0x192   :  { %3178 = vmatmul.mubr.bf16.gmra.mrb[40].mxu0 %v4567_v30  ;;  %2607 = vmatprep.mubr.bf16.mxu1 %v4572_v31  ;;  %v4631_v30 = vcombine.low %v297_v19, %v301_v20  ;;  %v4636_v31 = vcombine.high %v303_v25, %v307_v26  ;;  %v363_v18 = vld [vmem:[%s8156_s0 + $0x6a8] sm:$0xff]  ;;  %v361_v19 = vld [vmem:[%s8156_s0 + $0x698] sm:$0xff] }
 0x193   :  { %3185 = vmatprep.mubr.bf16.mxu0 %v4576_v32  ;;  %v4640_v32 = vcombine.high %v305_v27, %v309_v28  ;;  %v365_v20 = vld [vmem:[%s8156_s0 + $0x6b8] sm:$0xff] }
 0x199   :  { %2608 = vmatmul.mubr.bf16.gmra.mrb[44].mxu1 %v4571_v37  ;;  %v4635_v37 = vcombine.low %v303_v25, %v307_v26  ;;  %v367_v25 = vld [vmem:[%s8156_s0 + $0x6c8] sm:$0xff] }
 0x19a   :  { %3186 = vmatmul.mubr.bf16.gmra.mrb[44].mxu0 %v4575_v38  ;;  %2615 = vmatprep.mubr.bf16.mxu1 %v4580_v39  ;;  %v4639_v38 = vcombine.low %v305_v27, %v309_v28  ;;  %v4644_v39 = vcombine.high %v311_v33, %v315_v34  ;;  %v371_v26 = vld [vmem:[%s8156_s0 + $0x6e8] sm:$0xff]  ;;  %v369_v27 = vld [vmem:[%s8156_s0 + $0x6d8] sm:$0xff] }
 0x19b   :  { %3193 = vmatprep.mubr.bf16.mxu0 %v4584_v40  ;;  %v4648_v40 = vcombine.high %v313_v35, %v317_v36  ;;  %v373_v28 = vld [vmem:[%s8156_s0 + $0x6f8] sm:$0xff] }
 0x1a1   :  { %2616 = vmatmul.mubr.bf16.gmra.mrb[48].mxu1 %v4579_v45  ;;  %v4643_v45 = vcombine.low %v311_v33, %v315_v34  ;;  %v375_v33 = vld [vmem:[%s8156_s0 + $0x708] sm:$0xff] }
 0x1a2   :  { %3194 = vmatmul.mubr.bf16.gmra.mrb[48].mxu0 %v4583_v46  ;;  %2623 = vmatprep.mubr.bf16.mxu1 %v4588_v47  ;;  %v4647_v46 = vcombine.low %v313_v35, %v317_v36  ;;  %v4652_v47 = vcombine.high %v319_v41, %v323_v42  ;;  %v379_v34 = vld [vmem:[%s8156_s0 + $0x728] sm:$0xff]  ;;  %v377_v36 = vld [vmem:[%s8156_s0 + $0x718] sm:$0xff] }
 0x1a3   :  { %3201 = vmatprep.mubr.bf16.mxu0 %v4592_v48  ;;  %v4656_v48 = vcombine.high %v321_v43, %v325_v44 }
 0x1a9   :  { %2624 = vmatmul.mubr.bf16.gmra.mrb[52].mxu1 %v4587_v53  ;;  %v4651_v53 = vcombine.low %v319_v41, %v323_v42 }
 0x1aa   :  { %3202 = vmatmul.mubr.bf16.gmra.mrb[52].mxu0 %v4591_v54  ;;  %2631 = vmatprep.mubr.bf16.mxu1 %v4596_v55  ;;  %v4655_v54 = vcombine.low %v321_v43, %v325_v44  ;;  %v4660_v55 = vcombine.high %v327_v49, %v331_v50  ;;  %v4703_v44 = vcombine.low %v369_v27, %v373_v28 }
 0x1ab   :  { %3209 = vmatprep.mubr.bf16.mxu0 %v4600_v56  ;;  %v4664_v56 = vcombine.high %v329_v51, %v333_v52 }
 0x1b1   :  { %2632 = vmatmul.mubr.bf16.gmra.mrb[56].mxu1 %v4595_v60  ;;  %v4659_v60 = vcombine.low %v327_v49, %v331_v50 }
 0x1b2   :  { %3210 = vmatmul.mubr.bf16.gmra.mrb[56].mxu0 %v4599_v61  ;;  %2639 = vmatprep.mubr.bf16.mxu1 %v4604_v62  ;;  %v4663_v61 = vcombine.low %v329_v51, %v333_v52  ;;  %v4668_v62 = vcombine.high %v335_v57, %v339_v0  ;;  %v383_v51 = vld [vmem:[%s8156_s0 + $0x748] sm:$0xff] }
 0x1b3   :  { %3217 = vmatprep.mubr.bf16.mxu0 %v4608_v63  ;;  %v4672_v63 = vcombine.high %v337_v58, %v341_v59  ;;  %v387_v52 = vld [vmem:[%s8156_s0 + $0x768] sm:$0xff] }
 0x1b9   :  { %2640 = vmatmul.mubr.bf16.gmra.mrb[60].mxu1 %v4603_v5  ;;  %v4667_v5 = vcombine.low %v335_v57, %v339_v0  ;;  %v4707_v0 = vcombine.low %v375_v33, %v379_v34 }
 0x1ba   :  { %3218 = vmatmul.mubr.bf16.gmra.mrb[60].mxu0 %v4607_v6  ;;  %2647 = vmatprep.mubr.bf16.mxu1 %v4612_v7  ;;  %v4671_v6 = vcombine.low %v337_v58, %v341_v59  ;;  %v4676_v7 = vcombine.high %v343_v1, %v347_v2 }
 0x1bb   :  { %3225 = vmatprep.mubr.bf16.mxu0 %v4616_v8  ;;  %v4680_v8 = vcombine.high %v345_v3, %v349_v4 }
 0x1c1   :  { %2648 = vmatmul.mubr.bf16.gmra.mrb[64].mxu1 %v4611_v13  ;;  %v4675_v13 = vcombine.low %v343_v1, %v347_v2 }
 0x1c2   :  { %3226 = vmatmul.mubr.bf16.gmra.mrb[64].mxu0 %v4615_v14  ;;  %2655 = vmatprep.mubr.bf16.mxu1 %v4620_v15  ;;  %v4679_v14 = vcombine.low %v345_v3, %v349_v4  ;;  %v4684_v15 = vcombine.high %v351_v9, %v355_v10 }
 0x1c3   :  { %3233 = vmatprep.mubr.bf16.mxu0 %v4624_v16  ;;  %v4688_v16 = vcombine.high %v353_v11, %v357_v12 }
 0x1c9   :  { %2656 = vmatmul.mubr.bf16.gmra.mrb[68].mxu1 %v4619_v21  ;;  %v4683_v21 = vcombine.low %v351_v9, %v355_v10  ;;  %v397_v9 = vld [vmem:[%s8156_s0 + $0x7b8] sm:$0xff] }
 0x1ca   :  { %3234 = vmatmul.mubr.bf16.gmra.mrb[68].mxu0 %v4623_v22  ;;  %2663 = vmatprep.mubr.bf16.mxu1 %v4628_v23  ;;  %v4687_v22 = vcombine.low %v353_v11, %v357_v12  ;;  %v4692_v23 = vcombine.high %v359_v17, %v363_v18  ;;  %v4715_v12 = vcombine.low %v383_v51, %v387_v52 }
 0x1cb   :  { %3241 = vmatprep.mubr.bf16.mxu0 %v4632_v24  ;;  %v4696_v24 = vcombine.high %v361_v19, %v365_v20 }
 0x1d1   :  { %2664 = vmatmul.mubr.bf16.gmra.mrb[72].mxu1 %v4627_v29  ;;  %v4691_v29 = vcombine.low %v359_v17, %v363_v18 }
 0x1d2   :  { %3242 = vmatmul.mubr.bf16.gmra.mrb[72].mxu0 %v4631_v30  ;;  %2671 = vmatprep.mubr.bf16.mxu1 %v4636_v31  ;;  %v4695_v30 = vcombine.low %v361_v19, %v365_v20  ;;  %v4700_v31 = vcombine.high %v367_v25, %v371_v26 }
 0x1d3   :  { %3249 = vmatprep.mubr.bf16.mxu0 %v4640_v32  ;;  %v4704_v32 = vcombine.high %v369_v27, %v373_v28  ;;  %v405_v27 = vld [vmem:[%s8156_s0 + $0x7f8] sm:$0xff] }
 0x1d9   :  { %2672 = vmatmul.mubr.bf16.gmra.mrb[76].mxu1 %v4635_v37  ;;  %v381_v37 = vld [vmem:[%s8156_s0 + $0x738] sm:$0xff] }
 0x1da   :  { %3250 = vmatmul.mubr.bf16.gmra.mrb[76].mxu0 %v4639_v38  ;;  %2679 = vmatprep.mubr.bf16.mxu1 %v4644_v39 }
 0x1db   :  { %3257 = vmatprep.mubr.bf16.mxu0 %v4648_v40  ;;  %v4699_v40 = vcombine.low %v367_v25, %v371_v26  ;;  %v401_v26 = vld [vmem:[%s8156_s0 + $0x7d8] sm:$0xff] }
 0x1e1   :  { %2680 = vmatmul.mubr.bf16.gmra.mrb[80].mxu1 %v4643_v45  ;;  %v4708_v45 = vcombine.high %v375_v33, %v379_v34 }
 0x1e2   :  { %3258 = vmatmul.mubr.bf16.gmra.mrb[80].mxu0 %v4647_v46  ;;  %2687 = vmatprep.mubr.bf16.mxu1 %v4652_v47 }
 0x1e3   :  { %3265 = vmatprep.mubr.bf16.mxu0 %v4656_v48  ;;  %v4712_v48 = vcombine.high %v377_v36, %v381_v37 }
 0x1e9   :  { %2688 = vmatmul.mubr.bf16.gmra.mrb[84].mxu1 %v4651_v53 }
 0x1ea   :  { %3266 = vmatmul.mubr.bf16.gmra.mrb[84].mxu0 %v4655_v54  ;;  %2695 = vmatprep.mubr.bf16.mxu1 %v4660_v55  ;;  %v385_v54 = vld [vmem:[%s8156_s0 + $0x758] sm:$0xff] }
 0x1eb   :  { %3273 = vmatprep.mubr.bf16.mxu0 %v4664_v56  ;;  %v389_v55 = vld [vmem:[%s8156_s0 + $0x778] sm:$0xff] }
 0x1ec   :  { %v4720_v2 = vcombine.high %v385_v54, %v389_v55 }
 0x1f1   :  { %2696 = vmatmul.mubr.bf16.gmra.mrb[88].mxu1 %v4659_v60 }
 0x1f2   :  { %3274 = vmatmul.mubr.bf16.gmra.mrb[88].mxu0 %v4663_v61  ;;  %2703 = vmatprep.mubr.bf16.mxu1 %v4668_v62  ;;  %v4711_v61 = vcombine.low %v377_v36, %v381_v37  ;;  %v4716_v62 = vcombine.high %v383_v51, %v387_v52 }
 0x1f3   :  { %3281 = vmatprep.mubr.bf16.mxu0 %v4672_v63 }
 0x1f9   :  { %2704 = vmatmul.mubr.bf16.gmra.mrb[92].mxu1 %v4667_v5  ;;  %v391_v5 = vld [vmem:[%s8156_s0 + $0x788] sm:$0xff] }
 0x1fa   :  { %3282 = vmatmul.mubr.bf16.gmra.mrb[92].mxu0 %v4671_v6  ;;  %2711 = vmatprep.mubr.bf16.mxu1 %v4676_v7  ;;  %v395_v6 = vld [vmem:[%s8156_s0 + $0x7a8] sm:$0xff] }
 0x1fb   :  { %3289 = vmatprep.mubr.bf16.mxu0 %v4680_v8  ;;  %v393_v8 = vld [vmem:[%s8156_s0 + $0x798] sm:$0xff]  ;;  %v4724_v17 = vcombine.high %v391_v5, %v395_v6 }
 0x1fc   :  { %v4728_v20 = vcombine.high %v393_v8, %v397_v9  ;;  %v4727_v34 = vcombine.low %v393_v8, %v397_v9 }
 0x201   :  { %2712 = vmatmul.mubr.bf16.gmra.mrb[96].mxu1 %v4675_v13 }
 0x202   :  { %3290 = vmatmul.mubr.bf16.gmra.mrb[96].mxu0 %v4679_v14  ;;  %2719 = vmatprep.mubr.bf16.mxu1 %v4684_v15 }
 0x203   :  { %3297 = vmatprep.mubr.bf16.mxu0 %v4688_v16  ;;  %v4719_v16 = vcombine.low %v385_v54, %v389_v55 }
 0x209   :  { %2720 = vmatmul.mubr.bf16.gmra.mrb[100].mxu1 %v4683_v21 }
 0x20a   :  { %3298 = vmatmul.mubr.bf16.gmra.mrb[100].mxu0 %v4687_v22  ;;  %2727 = vmatprep.mubr.bf16.mxu1 %v4692_v23  ;;  %v399_v23 = vld [vmem:[%s8156_s0 + $0x7c8] sm:$0xff] }
 0x20b   :  { %3305 = vmatprep.mubr.bf16.mxu0 %v4696_v24  ;;  %v403_v24 = vld [vmem:[%s8156_s0 + $0x7e8] sm:$0xff] }
 0x211   :  { %2728 = vmatmul.mubr.bf16.gmra.mrb[104].mxu1 %v4691_v29 }
 0x212   :  { %3306 = vmatmul.mubr.bf16.gmra.mrb[104].mxu0 %v4695_v30  ;;  %2735 = vmatprep.mubr.bf16.mxu1 %v4700_v31  ;;  %v4723_v30 = vcombine.low %v391_v5, %v395_v6 }
 0x213   :  { %3313 = vmatprep.mubr.bf16.mxu0 %v4704_v32 }
 0x214   :  { %v2521_v35 = vpop.f32.mrb[0].mxu1 }
 0x215   :  { %v3099_v38 = vpop.f32.mrb[0].mxu0  ;;  %v2523_v39 = vpop.f32.mrb[1].mxu1 }
 0x216   :  { %v6537_v41 = vadd.f32 %v3099_v38, %v2521_v35  ;;  %v3101_v42 = vpop.f32.mrb[1].mxu0  ;;  %v2524_v43 = vpop.f32.mrb[2].mxu1  ;;  %v4732_v35 = vcombine.high %v399_v23, %v403_v24  ;;  %v4736_v38 = vcombine.high %v401_v26, %v405_v27 }
 0x217   :  { %v3102_v46 = vpop.f32.mrb[2].mxu0  ;;  %v2526_v47 = vpop.f32.mrb[3].mxu1 }
 0x218   :  { %v6539_v49 = vadd.f32 %v3102_v46, %v2524_v43  ;;  %v3104_v50 = vpop.f32.mrb[3].mxu0 }
 0x219   :  { %2736 = vmatmul.mubr.bf16.gmra.mrb[108].mxu1 %v4699_v40  ;;  %v4735_v50 = vcombine.low %v401_v26, %v405_v27 }
 0x21a   :  { %3314 = vmatmul.mubr.bf16.gmra.mrb[108].mxu0 %v4703_v44  ;;  %2743 = vmatprep.mubr.bf16.mxu1 %v4708_v45  ;;  %v4731_v45 = vcombine.low %v399_v23, %v403_v24 }
 0x21b   :  { %3321 = vmatprep.mubr.bf16.mxu0 %v4712_v48 }
 0x21c   :  { %v2529_v53 = vpop.f32.mrb[4].mxu1 }
 0x21d   :  { %v3107_v56 = vpop.f32.mrb[4].mxu0  ;;  %v2531_v57 = vpop.f32.mrb[5].mxu1 }
 0x21e   :  { %v6553_v58 = vadd.f32 %v3107_v56, %v2529_v53  ;;  %v3109_v59 = vpop.f32.mrb[5].mxu0  ;;  %v2532_v60 = vpop.f32.mrb[6].mxu1 }
 0x21f   :  { %v3110_v63 = vpop.f32.mrb[6].mxu0  ;;  %v2534_v1 = vpop.f32.mrb[7].mxu1 }
 0x220   :  { %v6555_v3 = vadd.f32 %v3110_v63, %v2532_v60  ;;  %v3112_v4 = vpop.f32.mrb[7].mxu0 }
 0x221   :  { %2744 = vmatmul.mubr.bf16.gmra.mrb[112].mxu1 %v4707_v0 }
 0x222   :  { %8238 = vst [vmem:[#allocation3_spill] sm:$0xff] %v6555_v3  ;;  %3322 = vmatmul.mubr.bf16.gmra.mrb[112].mxu0 %v4711_v61  ;;  %2751 = vmatprep.mubr.bf16.mxu1 %v4716_v62 }
 0x223   :  { %3329 = vmatprep.mubr.bf16.mxu0 %v4720_v2 }
 0x224   :  { %v2537_v7 = vpop.f32.mrb[8].mxu1 }
 0x225   :  { %v3115_v10 = vpop.f32.mrb[8].mxu0  ;;  %v2539_v11 = vpop.f32.mrb[9].mxu1 }
 0x226   :  { %v6569_v13 = vadd.f32 %v3115_v10, %v2537_v7  ;;  %v3117_v14 = vpop.f32.mrb[9].mxu0  ;;  %v2540_v15 = vpop.f32.mrb[10].mxu1 }
 0x227   :  { %v3118_v18 = vpop.f32.mrb[10].mxu0  ;;  %v2542_v19 = vpop.f32.mrb[11].mxu1 }
 0x228   :  { %8239 = vst [vmem:[#allocation4_spill] sm:$0xff] %v6569_v13  ;;  %v6571_v21 = vadd.f32 %v3118_v18, %v2540_v15  ;;  %v3120_v22 = vpop.f32.mrb[11].mxu0 }
 0x229   :  { %2752 = vmatmul.mubr.bf16.gmra.mrb[116].mxu1 %v4715_v12 }
 0x22a   :  { %3330 = vmatmul.mubr.bf16.gmra.mrb[116].mxu0 %v4719_v16  ;;  %2759 = vmatprep.mubr.bf16.mxu1 %v4724_v17 }
 0x22b   :  { %3337 = vmatprep.mubr.bf16.mxu0 %v4728_v20 }
 0x22c   :  { %v2545_v25 = vpop.f32.mrb[12].mxu1 }
 0x22d   :  { %v3123_v28 = vpop.f32.mrb[12].mxu0  ;;  %v2547_v29 = vpop.f32.mrb[13].mxu1 }
 0x22e   :  { %v6585_v31 = vadd.f32 %v3123_v28, %v2545_v25  ;;  %v3125_v32 = vpop.f32.mrb[13].mxu0  ;;  %v2548_v33 = vpop.f32.mrb[14].mxu1 }
 0x22f   :  { %v3126_v36 = vpop.f32.mrb[14].mxu0  ;;  %v2550_v37 = vpop.f32.mrb[15].mxu1 }
 0x230   :  { %v6587_v39 = vadd.f32 %v3126_v36, %v2548_v33  ;;  %v3128_v40 = vpop.f32.mrb[15].mxu0 }
 0x231   :  { %2760 = vmatmul.mubr.bf16.gmra.mrb[120].mxu1 %v4723_v30 }
 0x232   :  { %3338 = vmatmul.mubr.bf16.gmra.mrb[120].mxu0 %v4727_v34  ;;  %2767 = vmatprep.mubr.bf16.mxu1 %v4732_v35 }
 0x233   :  { %3345 = vmatprep.mubr.bf16.mxu0 %v4736_v38 }
 0x234   :  { %v2553_v42 = vpop.f32.mrb[16].mxu1 }
 0x235   :  { %v3131_v43 = vpop.f32.mrb[16].mxu0  ;;  %v2555_v44 = vpop.f32.mrb[17].mxu1 }
 0x236   :  { %v6589_v46 = vadd.f32 %v3131_v43, %v2553_v42  ;;  %v3133_v47 = vpop.f32.mrb[17].mxu0  ;;  %v2556_v48 = vpop.f32.mrb[18].mxu1 }
 0x237   :  { %v3134_v51 = vpop.f32.mrb[18].mxu0  ;;  %v2558_v52 = vpop.f32.mrb[19].mxu1  ;;  %v3549_v47 = vadd.f32 %v6539_v49, %v6537_v41 }
 0x238   :  { %v6591_v53 = vadd.f32 %v3134_v51, %v2556_v48  ;;  %v3136_v54 = vpop.f32.mrb[19].mxu0 }
 0x239   :  { %2768 = vmatmul.mubr.bf16.gmra.mrb[124].mxu1 %v4731_v45  ;;  %v3550_v51 = vadd.f32 %v6553_v58, %v3549_v47 }
 0x23a   :  { %3346 = vmatmul.mubr.bf16.gmra.mrb[124].mxu0 %v4735_v50 }
 0x23c   :  { %v2561_v55 = vpop.f32.mrb[20].mxu1 }
 0x23d   :  { %v3139_v56 = vpop.f32.mrb[20].mxu0  ;;  %v2563_v57 = vpop.f32.mrb[21].mxu1 }
 0x23e   :  { %v6593_v0 = vadd.f32 %v3139_v56, %v2561_v55  ;;  %v3141_v59 = vpop.f32.mrb[21].mxu0  ;;  %v2564_v60 = vpop.f32.mrb[22].mxu1  ;;  %v3551_v56 = vadd.f32 %v6555_v3, %v3550_v51 }
 0x23f   :  { %v3142_v61 = vpop.f32.mrb[22].mxu0  ;;  %v2566_v62 = vpop.f32.mrb[23].mxu1 }
 0x240   :  { %v6595_v63 = vadd.f32 %v3142_v61, %v2564_v60  ;;  %v3144_v1 = vpop.f32.mrb[23].mxu0 }
 0x241   :  { %v3552_v1 = vadd.f32 %v6569_v13, %v3551_v56 }
 0x244   :  { %v2569_v2 = vpop.f32.mrb[24].mxu1 }
 0x245   :  { %v3147_v4 = vpop.f32.mrb[24].mxu0  ;;  %v2571_v5 = vpop.f32.mrb[25].mxu1 }
 0x246   :  { %v6597_v6 = vadd.f32 %v3147_v4, %v2569_v2  ;;  %v3149_v7 = vpop.f32.mrb[25].mxu0  ;;  %v2572_v8 = vpop.f32.mrb[26].mxu1  ;;  %v3553_v5 = vadd.f32 %v6571_v21, %v3552_v1 }
 0x247   :  { %v3150_v9 = vpop.f32.mrb[26].mxu0  ;;  %v2574_v10 = vpop.f32.mrb[27].mxu1 }
 0x248   :  { %v6599_v11 = vadd.f32 %v3150_v9, %v2572_v8  ;;  %v3152_v12 = vpop.f32.mrb[27].mxu0  ;;  %v3554_v10 = vadd.f32 %v6585_v31, %v3553_v5 }
 0x24c   :  { %v2577_v14 = vpop.f32.mrb[28].mxu1 }
 0x24d   :  { %v3155_v15 = vpop.f32.mrb[28].mxu0  ;;  %v2579_v16 = vpop.f32.mrb[29].mxu1 }
 0x24e   :  { %v6601_v17 = vadd.f32 %v3155_v15, %v2577_v14  ;;  %v3157_v18 = vpop.f32.mrb[29].mxu0  ;;  %v2580_v19 = vpop.f32.mrb[30].mxu1 }
 0x24f   :  { %v3158_v20 = vpop.f32.mrb[30].mxu0  ;;  %v2582_v22 = vpop.f32.mrb[31].mxu1 }
 0x250   :  { %v6603_v23 = vadd.f32 %v3158_v20, %v2580_v19  ;;  %v3160_v24 = vpop.f32.mrb[31].mxu0  ;;  %v3555_v22 = vadd.f32 %v6587_v39, %v3554_v10 }
 0x252   :  { %v3556_v24 = vadd.f32 %v6589_v46, %v3555_v22 }
 0x254   :  { %v2585_v25 = vpop.f32.mrb[32].mxu1 }
 0x255   :  { %v3163_v26 = vpop.f32.mrb[32].mxu0  ;;  %v2587_v27 = vpop.f32.mrb[33].mxu1 }
 0x256   :  { %v6605_v28 = vadd.f32 %v3163_v26, %v2585_v25  ;;  %v3165_v29 = vpop.f32.mrb[33].mxu0  ;;  %v2588_v30 = vpop.f32.mrb[34].mxu1 }
 0x257   :  { %v3166_v32 = vpop.f32.mrb[34].mxu0  ;;  %v2590_v33 = vpop.f32.mrb[35].mxu1 }
 0x258   :  { %v6607_v34 = vadd.f32 %v3166_v32, %v2588_v30  ;;  %v3168_v35 = vpop.f32.mrb[35].mxu0 }
 0x25c   :  { %v2593_v36 = vpop.f32.mrb[36].mxu1 }
 0x25d   :  { %v3171_v37 = vpop.f32.mrb[36].mxu0  ;;  %v2595_v38 = vpop.f32.mrb[37].mxu1 }
 0x25e   :  { %v6609_v40 = vadd.f32 %v3171_v37, %v2593_v36  ;;  %v3173_v42 = vpop.f32.mrb[37].mxu0  ;;  %v2596_v43 = vpop.f32.mrb[38].mxu1  ;;  %v3557_v36 = vadd.f32 %v6591_v53, %v3556_v24 }
 0x25f   :  { %v3174_v44 = vpop.f32.mrb[38].mxu0  ;;  %v2598_v45 = vpop.f32.mrb[39].mxu1 }
 0x260   :  { %v6613_v48 = vadd.f32 %v3174_v44, %v2596_v43  ;;  %v3176_v50 = vpop.f32.mrb[39].mxu0  ;;  %v3558_v42 = vadd.f32 %v6593_v0, %v3557_v36 }
 0x262   :  { %v3559_v47 = vadd.f32 %v6595_v63, %v3558_v42 }
 0x264   :  { %v2601_v52 = vpop.f32.mrb[40].mxu1  ;;  %v3560_v56 = vadd.f32 %v6597_v6, %v3559_v47 }
 0x265   :  { %v3179_v54 = vpop.f32.mrb[40].mxu0  ;;  %v2603_v55 = vpop.f32.mrb[41].mxu1 }
 0x266   :  { %v6617_v57 = vadd.f32 %v3179_v54, %v2601_v52  ;;  %v3181_v59 = vpop.f32.mrb[41].mxu0  ;;  %v2604_v60 = vpop.f32.mrb[42].mxu1 }
 0x267   :  { %v3182_v61 = vpop.f32.mrb[42].mxu0  ;;  %v2606_v62 = vpop.f32.mrb[43].mxu1 }
 0x268   :  { %v6620_v2 = vadd.f32 %v3182_v61, %v2604_v60  ;;  %v3184_v4 = vpop.f32.mrb[43].mxu0  ;;  %v3561_v61 = vadd.f32 %v6599_v11, %v3560_v56 }
 0x26a   :  { %v3562_v5 = vadd.f32 %v6601_v17, %v3561_v61 }
 0x26c   :  { %v2609_v7 = vpop.f32.mrb[44].mxu1 }
 0x26d   :  { %v3187_v8 = vpop.f32.mrb[44].mxu0  ;;  %v2611_v9 = vpop.f32.mrb[45].mxu1 }
 0x26e   :  { %v6624_v12 = vadd.f32 %v3187_v8, %v2609_v7  ;;  %v3189_v14 = vpop.f32.mrb[45].mxu0  ;;  %v2612_v15 = vpop.f32.mrb[46].mxu1 }
 0x26f   :  { %v3190_v16 = vpop.f32.mrb[46].mxu0  ;;  %v2614_v18 = vpop.f32.mrb[47].mxu1 }
 0x270   :  { %v6626_v19 = vadd.f32 %v3190_v16, %v2612_v15  ;;  %v3192_v20 = vpop.f32.mrb[47].mxu0  ;;  %v3563_v18 = vadd.f32 %v6603_v23, %v3562_v5 }
 0x272   :  { %v3564_v20 = vadd.f32 %v6605_v28, %v3563_v18 }
 0x274   :  { %v2617_v25 = vpop.f32.mrb[48].mxu1 }
 0x275   :  { %v3195_v26 = vpop.f32.mrb[48].mxu0  ;;  %v2619_v27 = vpop.f32.mrb[49].mxu1 }
 0x276   :  { %v6630_v29 = vadd.f32 %v3195_v26, %v2617_v25  ;;  %v3197_v30 = vpop.f32.mrb[49].mxu0  ;;  %v2620_v32 = vpop.f32.mrb[50].mxu1 }
 0x277   :  { %v3198_v33 = vpop.f32.mrb[50].mxu0  ;;  %v2622_v35 = vpop.f32.mrb[51].mxu1 }
 0x278   :  { %v6633_v37 = vadd.f32 %v3198_v33, %v2620_v32  ;;  %v3200_v38 = vpop.f32.mrb[51].mxu0  ;;  %v3565_v35 = vadd.f32 %v6607_v34, %v3564_v20 }
 0x27a   :  { %v3566_v42 = vadd.f32 %v6609_v40, %v3565_v35 }
 0x27c   :  { %v2625_v43 = vpop.f32.mrb[52].mxu1  ;;  %v3567_v47 = vadd.f32 %v6613_v48, %v3566_v42 }
 0x27d   :  { %v3203_v44 = vpop.f32.mrb[52].mxu0  ;;  %v2627_v45 = vpop.f32.mrb[53].mxu1 }
 0x27e   :  { %v6637_v50 = vadd.f32 %v3203_v44, %v2625_v43  ;;  %v3205_v51 = vpop.f32.mrb[53].mxu0  ;;  %v2628_v52 = vpop.f32.mrb[54].mxu1 }
 0x27f   :  { %v3206_v54 = vpop.f32.mrb[54].mxu0  ;;  %v2630_v55 = vpop.f32.mrb[55].mxu1 }
 0x280   :  { %v6640_v59 = vadd.f32 %v3206_v54, %v2628_v52  ;;  %v3208_v60 = vpop.f32.mrb[55].mxu0 }
 0x281   :  { %v3568_v60 = vadd.f32 %v6617_v57, %v3567_v47 }
 0x284   :  { %v2633_v62 = vpop.f32.mrb[56].mxu1 }
 0x285   :  { %v3211_v1 = vpop.f32.mrb[56].mxu0  ;;  %v2635_v4 = vpop.f32.mrb[57].mxu1 }
 0x286   :  { %v6644_v7 = vadd.f32 %v3211_v1, %v2633_v62  ;;  %v3213_v8 = vpop.f32.mrb[57].mxu0  ;;  %v2636_v9 = vpop.f32.mrb[58].mxu1  ;;  %v3569_v1 = vadd.f32 %v6620_v2, %v3568_v60 }
 0x287   :  { %v3214_v10 = vpop.f32.mrb[58].mxu0  ;;  %v2638_v14 = vpop.f32.mrb[59].mxu1 }
 0x288   :  { %v6646_v15 = vadd.f32 %v3214_v10, %v2636_v9  ;;  %v3216_v16 = vpop.f32.mrb[59].mxu0  ;;  %v3570_v9 = vadd.f32 %v6624_v12, %v3569_v1 }
 0x28c   :  { %v2641_v22 = vpop.f32.mrb[60].mxu1 }
 0x28d   :  { %v3219_v24 = vpop.f32.mrb[60].mxu0  ;;  %v2643_v25 = vpop.f32.mrb[61].mxu1 }
 0x28e   :  { %v6650_v26 = vadd.f32 %v3219_v24, %v2641_v22  ;;  %v3221_v27 = vpop.f32.mrb[61].mxu0  ;;  %v2644_v30 = vpop.f32.mrb[62].mxu1  ;;  %v3571_v25 = vadd.f32 %v6626_v19, %v3570_v9 }
 0x28f   :  { %v3222_v32 = vpop.f32.mrb[62].mxu0  ;;  %v2646_v33 = vpop.f32.mrb[63].mxu1 }
 0x290   :  { %v6653_v36 = vadd.f32 %v3222_v32, %v2644_v30  ;;  %v3224_v38 = vpop.f32.mrb[63].mxu0  ;;  %v3572_v27 = vadd.f32 %v6630_v29, %v3571_v25 }
 0x294   :  { %v2649_v43 = vpop.f32.mrb[64].mxu1 }
 0x295   :  { %v3227_v44 = vpop.f32.mrb[64].mxu0  ;;  %v2651_v45 = vpop.f32.mrb[65].mxu1 }
 0x296   :  { %v6657_v51 = vadd.f32 %v3227_v44, %v2649_v43  ;;  %v3229_v52 = vpop.f32.mrb[65].mxu0  ;;  %v2652_v54 = vpop.f32.mrb[66].mxu1  ;;  %v3573_v45 = vadd.f32 %v6633_v37, %v3572_v27 }
 0x297   :  { %v3230_v55 = vpop.f32.mrb[66].mxu0  ;;  %v2654_v56 = vpop.f32.mrb[67].mxu1 }
 0x298   :  { %v6660_v61 = vadd.f32 %v3230_v55, %v2652_v54  ;;  %v3232_v62 = vpop.f32.mrb[67].mxu0  ;;  %v3574_v54 = vadd.f32 %v6637_v50, %v3573_v45 }
 0x29a   :  { %v3575_v62 = vadd.f32 %v6640_v59, %v3574_v54 }
 0x29c   :  { %v2657_v4 = vpop.f32.mrb[68].mxu1 }
 0x29d   :  { %v3235_v5 = vpop.f32.mrb[68].mxu0  ;;  %v2659_v8 = vpop.f32.mrb[69].mxu1 }
 0x29e   :  { %v6664_v10 = vadd.f32 %v3235_v5, %v2657_v4  ;;  %v3237_v14 = vpop.f32.mrb[69].mxu0  ;;  %v2660_v16 = vpop.f32.mrb[70].mxu1 }
 0x29f   :  { %v3238_v18 = vpop.f32.mrb[70].mxu0  ;;  %v2662_v20 = vpop.f32.mrb[71].mxu1  ;;  %v3576_v14 = vadd.f32 %v6644_v7, %v3575_v62 }
 0x2a0   :  { %8240 = vst [vmem:[#allocation5_spill] sm:$0xff] %v6664_v10  ;;  %v6666_v22 = vadd.f32 %v3238_v18, %v2660_v16  ;;  %v3240_v24 = vpop.f32.mrb[71].mxu0 }
 0x2a1   :  { %v3577_v20 = vadd.f32 %v6646_v15, %v3576_v14 }
 0x2a2   :  { %8241 = vst [vmem:[#allocation6_spill] sm:$0xff] %v6666_v22 }
 0x2a4   :  { %v2665_v30 = vpop.f32.mrb[72].mxu1 }
 0x2a5   :  { %v3243_v32 = vpop.f32.mrb[72].mxu0  ;;  %v2667_v33 = vpop.f32.mrb[73].mxu1 }
 0x2a6   :  { %v6670_v35 = vadd.f32 %v3243_v32, %v2665_v30  ;;  %v3245_v38 = vpop.f32.mrb[73].mxu0  ;;  %v2668_v42 = vpop.f32.mrb[74].mxu1  ;;  %v3578_v30 = vadd.f32 %v6650_v26, %v3577_v20 }
 0x2a7   :  { %v3246_v43 = vpop.f32.mrb[74].mxu0  ;;  %v2670_v44 = vpop.f32.mrb[75].mxu1 }
 0x2a8   :  { %8242 = vst [vmem:[#allocation7_spill] sm:$0xff] %v6670_v35  ;;  %v6673_v47 = vadd.f32 %v3246_v43, %v2668_v42  ;;  %v3248_v52 = vpop.f32.mrb[75].mxu0 }
 0x2a9   :  { %v3579_v52 = vadd.f32 %v6653_v36, %v3578_v30 }
 0x2ab   :  { %v3580_v54 = vadd.f32 %v6657_v51, %v3579_v52 }
 0x2ac   :  { %v2673_v55 = vpop.f32.mrb[76].mxu1 }
 0x2ad   :  { %v3251_v56 = vpop.f32.mrb[76].mxu0  ;;  %v2675_v60 = vpop.f32.mrb[77].mxu1  ;;  %v3581_v14 = vadd.f32 %v6660_v61, %v3580_v54 }
 0x2ae   :  { %v6677_v1 = vadd.f32 %v3251_v56, %v2673_v55  ;;  %v3253_v4 = vpop.f32.mrb[77].mxu0  ;;  %v2676_v5 = vpop.f32.mrb[78].mxu1 }
 0x2af   :  { %v3254_v8 = vpop.f32.mrb[78].mxu0  ;;  %v2678_v9 = vpop.f32.mrb[79].mxu1 }
 0x2b0   :  { %8243 = vst [vmem:[#allocation8_spill] sm:$0xff] %v6677_v1  ;;  %v6680_v16 = vadd.f32 %v3254_v8, %v2676_v5  ;;  %v3256_v18 = vpop.f32.mrb[79].mxu0 }
 0x2b2   :  { %8244 = vst [vmem:[#allocation9_spill] sm:$0xff] %v6680_v16 }
 0x2b4   :  { %v2681_v24 = vpop.f32.mrb[80].mxu1 }
 0x2b5   :  { %v3259_v25 = vpop.f32.mrb[80].mxu0  ;;  %v2683_v27 = vpop.f32.mrb[81].mxu1 }
 0x2b6   :  { %v6684_v32 = vadd.f32 %v3259_v25, %v2681_v24  ;;  %v3261_v33 = vpop.f32.mrb[81].mxu0  ;;  %v2684_v38 = vpop.f32.mrb[82].mxu1  ;;  %v3582_v24 = vadd.f32 %v6664_v10, %v3581_v14 }
 0x2b7   :  { %v3262_v42 = vpop.f32.mrb[82].mxu0  ;;  %v2686_v43 = vpop.f32.mrb[83].mxu1 }
 0x2b8   :  { %8245 = vst [vmem:[#allocation10_spill] sm:$0xff] %v6684_v32  ;;  %v6686_v44 = vadd.f32 %v3262_v42, %v2684_v38  ;;  %v3264_v45 = vpop.f32.mrb[83].mxu0  ;;  %v3583_v33 = vadd.f32 %v6666_v22, %v3582_v24 }
 0x2ba   :  { %8246 = vst [vmem:[#allocation11_spill] sm:$0xff] %v6686_v44 }
 0x2bc   :  { %v2689_v55 = vpop.f32.mrb[84].mxu1 }
 0x2bd   :  { %v3267_v56 = vpop.f32.mrb[84].mxu0  ;;  %v2691_v60 = vpop.f32.mrb[85].mxu1 }
 0x2be   :  { %v6690_v62 = vadd.f32 %v3267_v56, %v2689_v55  ;;  %v3269_v4 = vpop.f32.mrb[85].mxu0  ;;  %v2692_v5 = vpop.f32.mrb[86].mxu1  ;;  %v3584_v55 = vadd.f32 %v6670_v35, %v3583_v33 }
 0x2bf   :  { %v3270_v8 = vpop.f32.mrb[86].mxu0  ;;  %v2694_v9 = vpop.f32.mrb[87].mxu1 }
 0x2c0   :  { %8247 = vst [vmem:[#allocation12_spill] sm:$0xff] %v6690_v62  ;;  %v6693_v18 = vadd.f32 %v3270_v8, %v2692_v5  ;;  %v3272_v20 = vpop.f32.mrb[87].mxu0  ;;  %v3585_v60 = vadd.f32 %v6673_v47, %v3584_v55 }
 0x2c2   :  { %8248 = vst [vmem:[#allocation13_spill] sm:$0xff] %v6693_v18  ;;  %v3586_v9 = vadd.f32 %v6677_v1, %v3585_v60 }
 0x2c4   :  { %v2697_v25 = vpop.f32.mrb[88].mxu1  ;;  %v3587_v33 = vadd.f32 %v6680_v16, %v3586_v9 }
 0x2c5   :  { %v3275_v27 = vpop.f32.mrb[88].mxu0  ;;  %v2699_v30 = vpop.f32.mrb[89].mxu1 }
 0x2c6   :  { %v6697_v38 = vadd.f32 %v3275_v27, %v2697_v25  ;;  %v3277_v42 = vpop.f32.mrb[89].mxu0  ;;  %v2700_v43 = vpop.f32.mrb[90].mxu1 }
 0x2c7   :  { %v3278_v45 = vpop.f32.mrb[90].mxu0  ;;  %v2702_v52 = vpop.f32.mrb[91].mxu1 }
 0x2c8   :  { %8249 = vst [vmem:[#allocation14_spill] sm:$0xff] %v6697_v38  ;;  %v6700_v56 = vadd.f32 %v3278_v45, %v2700_v43  ;;  %v3280_v54 = vpop.f32.mrb[91].mxu0  ;;  %v3588_v43 = vadd.f32 %v6684_v32, %v3587_v33 }
 0x2ca   :  { %8250 = vst [vmem:[#allocation15_spill] sm:$0xff] %v6700_v56 }
 0x2cc   :  { %v2705_v4 = vpop.f32.mrb[92].mxu1 }
 0x2cd   :  { %v3283_v5 = vpop.f32.mrb[92].mxu0  ;;  %v2707_v8 = vpop.f32.mrb[93].mxu1 }
 0x2ce   :  { %v6704_v14 = vadd.f32 %v3283_v5, %v2705_v4  ;;  %v3285_v20 = vpop.f32.mrb[93].mxu0  ;;  %v2708_v24 = vpop.f32.mrb[94].mxu1 }
 0x2cf   :  { %v3286_v25 = vpop.f32.mrb[94].mxu0  ;;  %v2710_v27 = vpop.f32.mrb[95].mxu1  ;;  %v3589_v20 = vadd.f32 %v6686_v44, %v3588_v43 }
 0x2d0   :  { %8251 = vst [vmem:[#allocation16_spill] sm:$0xff] %v6704_v14  ;;  %v6706_v30 = vadd.f32 %v3286_v25, %v2708_v24  ;;  %v3288_v42 = vpop.f32.mrb[95].mxu0 }
 0x2d1   :  { %v3590_v25 = vadd.f32 %v6690_v62, %v3589_v20 }
 0x2d2   :  { %8252 = vst [vmem:[#allocation17_spill] sm:$0xff] %v6706_v30 }
 0x2d3   :  { %v3591_v33 = vadd.f32 %v6693_v18, %v3590_v25 }
 0x2d4   :  { %v2713_v45 = vpop.f32.mrb[96].mxu1 }
 0x2d5   :  { %v3291_v52 = vpop.f32.mrb[96].mxu0  ;;  %v2715_v55 = vpop.f32.mrb[97].mxu1 }
 0x2d6   :  { %v6710_v54 = vadd.f32 %v3291_v52, %v2713_v45  ;;  %v3293_v8 = vpop.f32.mrb[97].mxu0  ;;  %v2716_v60 = vpop.f32.mrb[98].mxu1 }
 0x2d7   :  { %v3294_v4 = vpop.f32.mrb[98].mxu0  ;;  %v2718_v5 = vpop.f32.mrb[99].mxu1 }
 0x2d8   :  { %8253 = vst [vmem:[#allocation18_spill] sm:$0xff] %v6710_v54  ;;  %v6713_v1 = vadd.f32 %v3294_v4, %v2716_v60  ;;  %v3296_v24 = vpop.f32.mrb[99].mxu0  ;;  %v3592_v5 = vadd.f32 %v6697_v38, %v3591_v33 }
 0x2da   :  { %8254 = vst [vmem:[#allocation19_spill] sm:$0xff] %v6713_v1  ;;  %v3593_v60 = vadd.f32 %v6700_v56, %v3592_v5 }
 0x2dc   :  { %v2721_v27 = vpop.f32.mrb[100].mxu1 }
 0x2dd   :  { %v3299_v9 = vpop.f32.mrb[100].mxu0  ;;  %v2723_v42 = vpop.f32.mrb[101].mxu1 }
 0x2de   :  { %v6717_v32 = vadd.f32 %v3299_v9, %v2721_v27  ;;  %v3301_v45 = vpop.f32.mrb[101].mxu0  ;;  %v2724_v52 = vpop.f32.mrb[102].mxu1  ;;  %v3594_v42 = vadd.f32 %v6704_v14, %v3593_v60 }
 0x2df   :  { %v3302_v55 = vpop.f32.mrb[102].mxu0  ;;  %v2726_v8 = vpop.f32.mrb[103].mxu1 }
 0x2e0   :  { %8255 = vst [vmem:[#allocation20_spill] sm:$0xff] %v6717_v32  ;;  %v6720_v16 = vadd.f32 %v3302_v55, %v2724_v52  ;;  %v3304_v43 = vpop.f32.mrb[103].mxu0  ;;  %v3595_v33 = vadd.f32 %v6706_v30, %v3594_v42 }
 0x2e2   :  { %8256 = vst [vmem:[#allocation21_spill] sm:$0xff] %v6720_v16  ;;  %v3596_v52 = vadd.f32 %v6710_v54, %v3595_v33 }
 0x2e4   :  { %v2729_v4 = vpop.f32.mrb[104].mxu1 }
 0x2e5   :  { %v3307_v20 = vpop.f32.mrb[104].mxu0  ;;  %v2731_v24 = vpop.f32.mrb[105].mxu1 }
 0x2e6   :  { %v6724_v62 = vadd.f32 %v3307_v20, %v2729_v4  ;;  %v3309_v25 = vpop.f32.mrb[105].mxu0  ;;  %v2732_v27 = vpop.f32.mrb[106].mxu1 }
 0x2e7   :  { %v3310_v9 = vpop.f32.mrb[106].mxu0  ;;  %v2734_v45 = vpop.f32.mrb[107].mxu1  ;;  %v3597_v25 = vadd.f32 %v6713_v1, %v3596_v52 }
 0x2e8   :  { %8257 = vst [vmem:[#allocation22_spill] sm:$0xff] %v6724_v62  ;;  %v6726_v18 = vadd.f32 %v3310_v9, %v2732_v27  ;;  %v3312_v8 = vpop.f32.mrb[107].mxu0 }
 0x2e9   :  { %v3598_v9 = vadd.f32 %v6717_v32, %v3597_v25 }
 0x2ea   :  { %8258 = vst [vmem:[#allocation23_spill] sm:$0xff] %v6726_v18 }
 0x2eb   :  { %v3599_v33 = vadd.f32 %v6720_v16, %v3598_v9 }
 0x2ec   :  { %v2737_v55 = vpop.f32.mrb[108].mxu1 }
 0x2ed   :  { %v3315_v5 = vpop.f32.mrb[108].mxu0  ;;  %v2739_v43 = vpop.f32.mrb[109].mxu1 }
 0x2ee   :  { %v6730_v56 = vadd.f32 %v3315_v5, %v2737_v55  ;;  %v3317_v24 = vpop.f32.mrb[109].mxu0  ;;  %v2740_v60 = vpop.f32.mrb[110].mxu1 }
 0x2ef   :  { %v3318_v4 = vpop.f32.mrb[110].mxu0  ;;  %v2742_v20 = vpop.f32.mrb[111].mxu1 }
 0x2f0   :  { %8259 = vst [vmem:[#allocation24_spill] sm:$0xff] %v6730_v56  ;;  %v6733_v14 = vadd.f32 %v3318_v4, %v2740_v60  ;;  %v3320_v27 = vpop.f32.mrb[111].mxu0  ;;  %v3600_v20 = vadd.f32 %v6724_v62, %v3599_v33 }
 0x2f2   :  { %8260 = vst [vmem:[#allocation25_spill] sm:$0xff] %v6733_v14  ;;  %v3601_v60 = vadd.f32 %v6726_v18, %v3600_v20 }
 0x2f4   :  { %v2745_v45 = vpop.f32.mrb[112].mxu1 }
 0x2f5   :  { %v3323_v42 = vpop.f32.mrb[112].mxu0  ;;  %v2747_v8 = vpop.f32.mrb[113].mxu1 }
 0x2f6   :  { %v6737_v54 = vadd.f32 %v3323_v42, %v2745_v45  ;;  %v3325_v55 = vpop.f32.mrb[113].mxu0  ;;  %v2748_v5 = vpop.f32.mrb[114].mxu1  ;;  %v3602_v8 = vadd.f32 %v6730_v56, %v3601_v60 }
 0x2f7   :  { %v3326_v43 = vpop.f32.mrb[114].mxu0  ;;  %v2750_v24 = vpop.f32.mrb[115].mxu1 }
 0x2f8   :  { %8261 = vst [vmem:[#allocation26_spill] sm:$0xff] %v6737_v54  ;;  %v6740_v30 = vadd.f32 %v3326_v43, %v2748_v5  ;;  %v3328_v52 = vpop.f32.mrb[115].mxu0  ;;  %v3603_v33 = vadd.f32 %v6733_v14, %v3602_v8 }
 0x2fa   :  { %8262 = vst [vmem:[#allocation27_spill] sm:$0xff] %v6740_v30  ;;  %v3604_v5 = vadd.f32 %v6737_v54, %v3603_v33 }
 0x2fc   :  { %v2753_v4 = vpop.f32.mrb[116].mxu1 }
 0x2fd   :  { %v3331_v25 = vpop.f32.mrb[116].mxu0  ;;  %v2755_v27 = vpop.f32.mrb[117].mxu1 }
 0x2fe   :  { %v6744_v32 = vadd.f32 %v3331_v25, %v2753_v4  ;;  %v3333_v9 = vpop.f32.mrb[117].mxu0  ;;  %v2756_v45 = vpop.f32.mrb[118].mxu1 }
 0x2ff   :  { %v3334_v42 = vpop.f32.mrb[118].mxu0  ;;  %v2758_v55 = vpop.f32.mrb[119].mxu1  ;;  %v3605_v9 = vadd.f32 %v6740_v30, %v3604_v5 }
 0x300   :  { %8263 = vst [vmem:[#allocation28_spill] sm:$0xff] %v6744_v32  ;;  %v6746_v16 = vadd.f32 %v3334_v42, %v2756_v45  ;;  %v3336_v24 = vpop.f32.mrb[119].mxu0 }
 0x301   :  { %v3606_v42 = vadd.f32 %v6744_v32, %v3605_v9 }
 0x302   :  { %8264 = vst [vmem:[#allocation29_spill] sm:$0xff] %v6746_v16 }
 0x303   :  { %v3607_v33 = vadd.f32 %v6746_v16, %v3606_v42 }
 0x304   :  { %v2761_v43 = vpop.f32.mrb[120].mxu1 }
 0x305   :  { %v3339_v20 = vpop.f32.mrb[120].mxu0  ;;  %v2763_v52 = vpop.f32.mrb[121].mxu1 }
 0x306   :  { %v6750_v18 = vadd.f32 %v3339_v20, %v2761_v43  ;;  %v3341_v27 = vpop.f32.mrb[121].mxu0  ;;  %v2764_v60 = vpop.f32.mrb[122].mxu1 }
 0x307   :  { %v3342_v4 = vpop.f32.mrb[122].mxu0  ;;  %v2766_v25 = vpop.f32.mrb[123].mxu1 }
 0x308   :  { %8265 = vst [vmem:[#allocation30_spill] sm:$0xff] %v6750_v18  ;;  %v6753_v56 = vadd.f32 %v3342_v4, %v2764_v60  ;;  %v3344_v45 = vpop.f32.mrb[123].mxu0  ;;  %v3608_v25 = vadd.f32 %v6750_v18, %v3607_v33 }
 0x30a   :  { %8266 = vst [vmem:[#allocation31_spill] sm:$0xff] %v6753_v56  ;;  %v3609_v60 = vadd.f32 %v6753_v56, %v3608_v25 }
 0x30c   :  { %v2769_v55 = vpop.f32.mrb[124].mxu1 }
 0x30d   :  { %v3347_v8 = vpop.f32.mrb[124].mxu0  ;;  %v2771_v24 = vpop.f32.mrb[125].mxu1 }
 0x30e   :  { %v6757_v54 = vadd.f32 %v3347_v8, %v2769_v55  ;;  %v3349_v43 = vpop.f32.mrb[125].mxu0  ;;  %v2772_v20 = vpop.f32.mrb[126].mxu1 }
 0x30f   :  { %v3350_v52 = vpop.f32.mrb[126].mxu0  ;;  %v2774_v27 = vpop.f32.mrb[127].mxu1 }
 0x310   :  { %8267 = vst [vmem:[#allocation32_spill] sm:$0xff] %v6757_v54  ;;  %v6760_v14 = vadd.f32 %v3350_v52, %v2772_v20  ;;  %v3352_v5 = vpop.f32.mrb[127].mxu0  ;;  %v3610_v4 = vadd.f32 %v6757_v54, %v3609_v60 }
 0x312   :  { %v3611_v9 = vadd.f32 %v6760_v14, %v3610_v4 }
 0x314   :  { %v3612_v45 = vrot.slane %v3611_v9, 4 }
 0x316   :  { %v3613_v24 = vadd.f32 %v3612_v45, %v3611_v9 }
 0x318   :  { %v3614_v42 = vrot.slane %v3613_v24, 2 }
 0x31a   :  { %v3615_v55 = vadd.f32 %v3614_v42, %v3613_v24 }
 0x31c   :  { %v3616_v8 = vrot.slane %v3615_v55, 1 }
 0x31e   :  { %v3617_v43 = vadd.f32 %v3616_v8, %v3615_v55 }
 0x320   :  { %v6765_v16 = vmul.f32 0.001953125, %v3617_v43 }
 0x322   :  { %v3620_v33 = vsub.f32 %v6537_v41, %v6765_v16  ;;  %v3621_v20 = vsub.f32 %v6539_v49, %v6765_v16  ;;  %v3622_v52 = vsub.f32 %v6553_v58, %v6765_v16  ;;  %v3623_v5 = vsub.f32 %v6555_v3, %v6765_v16 }
 0x323   :  { %v3624_v60 = vsub.f32 %v6569_v13, %v6765_v16  ;;  %v3625_v45 = vsub.f32 %v6571_v21, %v6765_v16  ;;  %v3626_v55 = vsub.f32 %v6585_v31, %v6765_v16  ;;  %v3628_v13 = vsub.f32 %v6589_v46, %v6765_v16 }
 0x324   :  { %v3684_v27 = vmul.f32 %v3620_v33, %v3620_v33  ;;  %v3685_v25 = vmul.f32 %v3621_v20, %v3621_v20  ;;  %v3686_v4 = vmul.f32 %v3622_v52, %v3622_v52  ;;  %v3687_v24 = vmul.f32 %v3623_v5, %v3623_v5 }
 0x325   :  { %v3688_v8 = vmul.f32 %v3624_v60, %v3624_v60  ;;  %v3627_v33 = vsub.f32 %v6587_v39, %v6765_v16  ;;  %v3689_v20 = vmul.f32 %v3625_v45, %v3625_v45  ;;  %v3690_v52 = vmul.f32 %v3626_v55, %v3626_v55 }
 0x326   :  { %v3748_v9 = vadd.f32 %v3685_v25, %v3684_v27  ;;  %v3629_v25 = vsub.f32 %v6591_v53, %v6765_v16  ;;  %v3692_v60 = vmul.f32 %v3628_v13, %v3628_v13 }
 0x327   :  { %v3691_v5 = vmul.f32 %v3627_v33, %v3627_v33 }
 0x328   :  { %v3749_v42 = vadd.f32 %v3748_v9, %v3686_v4  ;;  %v3630_v9 = vsub.f32 %v6593_v0, %v6765_v16  ;;  %v3693_v45 = vmul.f32 %v3629_v25, %v3629_v25 }
 0x32a   :  { %v3750_v43 = vadd.f32 %v3749_v42, %v3687_v24  ;;  %v3631_v42 = vsub.f32 %v6595_v63, %v6765_v16  ;;  %v3694_v55 = vmul.f32 %v3630_v9, %v3630_v9 }
 0x32c   :  { %v3751_v3 = vadd.f32 %v3750_v43, %v3688_v8  ;;  %v3632_v43 = vsub.f32 %v6597_v6, %v6765_v16  ;;  %v3695_v33 = vmul.f32 %v3631_v42, %v3631_v42 }
 0x32e   :  { %v3752_v27 = vadd.f32 %v3751_v3, %v3689_v20  ;;  %v3633_v20 = vsub.f32 %v6599_v11, %v6765_v16  ;;  %v3696_v13 = vmul.f32 %v3632_v43, %v3632_v43 }
 0x330   :  { %v3753_v4 = vadd.f32 %v3752_v27, %v3690_v52  ;;  %v3634_v27 = vsub.f32 %v6601_v17, %v6765_v16  ;;  %v3697_v25 = vmul.f32 %v3633_v20, %v3633_v20 }
 0x332   :  { %v3754_v24 = vadd.f32 %v3753_v4, %v3691_v5  ;;  %v3635_v4 = vsub.f32 %v6603_v23, %v6765_v16  ;;  %v3698_v9 = vmul.f32 %v3634_v27, %v3634_v27 }
 0x334   :  { %v3755_v8 = vadd.f32 %v3754_v24, %v3692_v60  ;;  %v3636_v24 = vsub.f32 %v6605_v28, %v6765_v16  ;;  %v3699_v42 = vmul.f32 %v3635_v4, %v3635_v4 }
 0x336   :  { %v3756_v3 = vadd.f32 %v3755_v8, %v3693_v45  ;;  %v3637_v8 = vsub.f32 %v6607_v34, %v6765_v16  ;;  %v3700_v43 = vmul.f32 %v3636_v24, %v3636_v24 }
 0x338   :  { %v3757_v52 = vadd.f32 %v3756_v3, %v3694_v55  ;;  %v3638_v3 = vsub.f32 %v6609_v40, %v6765_v16  ;;  %v3701_v20 = vmul.f32 %v3637_v8, %v3637_v8 }
 0x33a   :  { %v3758_v5 = vadd.f32 %v3757_v52, %v3695_v33  ;;  %v3639_v52 = vsub.f32 %v6613_v48, %v6765_v16  ;;  %v3702_v27 = vmul.f32 %v3638_v3, %v3638_v3 }
 0x33c   :  { %v3759_v60 = vadd.f32 %v3758_v5, %v3696_v13  ;;  %v3640_v5 = vsub.f32 %v6617_v57, %v6765_v16  ;;  %v3703_v4 = vmul.f32 %v3639_v52, %v3639_v52 }
 0x33e   :  { %v3760_v45 = vadd.f32 %v3759_v60, %v3697_v25  ;;  %v3641_v60 = vsub.f32 %v6620_v2, %v6765_v16  ;;  %v3704_v24 = vmul.f32 %v3640_v5, %v3640_v5 }
 0x340   :  { %v3761_v55 = vadd.f32 %v3760_v45, %v3698_v9  ;;  %v3642_v45 = vsub.f32 %v6624_v12, %v6765_v16  ;;  %v3705_v8 = vmul.f32 %v3641_v60, %v3641_v60 }
 0x342   :  { %v3762_v33 = vadd.f32 %v3761_v55, %v3699_v42  ;;  %v3643_v55 = vsub.f32 %v6626_v19, %v6765_v16  ;;  %v3706_v3 = vmul.f32 %v3642_v45, %v3642_v45 }
 0x344   :  { %v3763_v13 = vadd.f32 %v3762_v33, %v3700_v43  ;;  %v3644_v33 = vsub.f32 %v6630_v29, %v6765_v16  ;;  %v3707_v52 = vmul.f32 %v3643_v55, %v3643_v55 }
 0x346   :  { %v3764_v25 = vadd.f32 %v3763_v13, %v3701_v20  ;;  %v3645_v13 = vsub.f32 %v6633_v37, %v6765_v16  ;;  %v3708_v5 = vmul.f32 %v3644_v33, %v3644_v33 }
 0x348   :  { %v3765_v9 = vadd.f32 %v3764_v25, %v3702_v27  ;;  %v3646_v25 = vsub.f32 %v6637_v50, %v6765_v16  ;;  %v3709_v60 = vmul.f32 %v3645_v13, %v3645_v13 }
 0x34a   :  { %v3766_v42 = vadd.f32 %v3765_v9, %v3703_v4  ;;  %v3647_v9 = vsub.f32 %v6640_v59, %v6765_v16  ;;  %v3710_v45 = vmul.f32 %v3646_v25, %v3646_v25 }
 0x34c   :  { %v3767_v43 = vadd.f32 %v3766_v42, %v3704_v24  ;;  %v3648_v42 = vsub.f32 %v6644_v7, %v6765_v16  ;;  %v3711_v55 = vmul.f32 %v3647_v9, %v3647_v9 }
 0x34e   :  { %v3768_v20 = vadd.f32 %v3767_v43, %v3705_v8  ;;  %v3649_v43 = vsub.f32 %v6646_v15, %v6765_v16  ;;  %v3712_v33 = vmul.f32 %v3648_v42, %v3648_v42 }
 0x350   :  { %v3769_v27 = vadd.f32 %v3768_v20, %v3706_v3  ;;  %v3650_v20 = vsub.f32 %v6650_v26, %v6765_v16  ;;  %v3713_v13 = vmul.f32 %v3649_v43, %v3649_v43 }
 0x352   :  { %v3770_v4 = vadd.f32 %v3769_v27, %v3707_v52  ;;  %v3651_v27 = vsub.f32 %v6653_v36, %v6765_v16  ;;  %v3714_v25 = vmul.f32 %v3650_v20, %v3650_v20 }
 0x354   :  { %v3771_v24 = vadd.f32 %v3770_v4, %v3708_v5  ;;  %v3652_v4 = vsub.f32 %v6657_v51, %v6765_v16  ;;  %v3715_v9 = vmul.f32 %v3651_v27, %v3651_v27 }
 0x356   :  { %v3772_v8 = vadd.f32 %v3771_v24, %v3709_v60  ;;  %v3653_v24 = vsub.f32 %v6660_v61, %v6765_v16  ;;  %v3716_v42 = vmul.f32 %v3652_v4, %v3652_v4 }
 0x358   :  { %v3773_v3 = vadd.f32 %v3772_v8, %v3710_v45  ;;  %v3654_v8 = vsub.f32 %v6664_v10, %v6765_v16  ;;  %v3717_v43 = vmul.f32 %v3653_v24, %v3653_v24 }
 0x35a   :  { %v3774_v52 = vadd.f32 %v3773_v3, %v3711_v55  ;;  %v3655_v3 = vsub.f32 %v6666_v22, %v6765_v16  ;;  %v3718_v20 = vmul.f32 %v3654_v8, %v3654_v8 }
 0x35c   :  { %v3775_v5 = vadd.f32 %v3774_v52, %v3712_v33  ;;  %v3656_v52 = vsub.f32 %v6670_v35, %v6765_v16  ;;  %v3719_v27 = vmul.f32 %v3655_v3, %v3655_v3 }
 0x35e   :  { %v3776_v60 = vadd.f32 %v3775_v5, %v3713_v13  ;;  %v3657_v5 = vsub.f32 %v6673_v47, %v6765_v16  ;;  %v3720_v4 = vmul.f32 %v3656_v52, %v3656_v52 }
 0x360   :  { %v3777_v45 = vadd.f32 %v3776_v60, %v3714_v25  ;;  %v8268_v60 = vld [vmem:[#allocation8_spill] sm:$0xff]  ;;  %v3721_v24 = vmul.f32 %v3657_v5, %v3657_v5 }
 0x361   :  { %v3658_v10 = vsub.f32 %v8268_v60, %v6765_v16 }
 0x362   :  { %v3778_v55 = vadd.f32 %v3777_v45, %v3715_v9  ;;  %v8269_v45 = vld [vmem:[#allocation9_spill] sm:$0xff] }
 0x363   :  { %v3659_v22 = vsub.f32 %v8269_v45, %v6765_v16  ;;  %v3722_v8 = vmul.f32 %v3658_v10, %v3658_v10 }
 0x364   :  { %v3779_v33 = vadd.f32 %v3778_v55, %v3716_v42  ;;  %v8270_v55 = vld [vmem:[#allocation10_spill] sm:$0xff] }
 0x365   :  { %v3660_v35 = vsub.f32 %v8270_v55, %v6765_v16  ;;  %v3723_v3 = vmul.f32 %v3659_v22, %v3659_v22 }
 0x366   :  { %v3780_v13 = vadd.f32 %v3779_v33, %v3717_v43  ;;  %v3661_v33 = vsub.f32 %v6686_v44, %v6765_v16 }
 0x367   :  { %v3724_v52 = vmul.f32 %v3660_v35, %v3660_v35 }
 0x368   :  { %v3781_v25 = vadd.f32 %v3780_v13, %v3718_v20  ;;  %v8271_v13 = vld [vmem:[#allocation12_spill] sm:$0xff]  ;;  %v3725_v5 = vmul.f32 %v3661_v33, %v3661_v33 }
 0x369   :  { %v3662_v60 = vsub.f32 %v8271_v13, %v6765_v16 }
 0x36a   :  { %v3782_v9 = vadd.f32 %v3781_v25, %v3719_v27  ;;  %v8272_v25 = vld [vmem:[#allocation13_spill] sm:$0xff] }
 0x36b   :  { %v3663_v45 = vsub.f32 %v8272_v25, %v6765_v16  ;;  %v3726_v10 = vmul.f32 %v3662_v60, %v3662_v60 }
 0x36c   :  { %v3783_v42 = vadd.f32 %v3782_v9, %v3720_v4  ;;  %v3664_v9 = vsub.f32 %v6697_v38, %v6765_v16 }
 0x36d   :  { %v3727_v22 = vmul.f32 %v3663_v45, %v3663_v45 }
 0x36e   :  { %v3784_v43 = vadd.f32 %v3783_v42, %v3721_v24  ;;  %v8273_v42 = vld [vmem:[#allocation15_spill] sm:$0xff]  ;;  %v3728_v35 = vmul.f32 %v3664_v9, %v3664_v9 }
 0x36f   :  { %v3665_v44 = vsub.f32 %v8273_v42, %v6765_v16 }
 0x370   :  { %v3785_v20 = vadd.f32 %v3784_v43, %v3722_v8  ;;  %v8274_v43 = vld [vmem:[#allocation16_spill] sm:$0xff] }
 0x371   :  { %v3666_v13 = vsub.f32 %v8274_v43, %v6765_v16  ;;  %v3729_v33 = vmul.f32 %v3665_v44, %v3665_v44 }
 0x372   :  { %v3786_v27 = vadd.f32 %v3785_v20, %v3723_v3  ;;  %v8275_v20 = vld [vmem:[#allocation17_spill] sm:$0xff] }
 0x373   :  { %v3667_v25 = vsub.f32 %v8275_v20, %v6765_v16  ;;  %v3730_v60 = vmul.f32 %v3666_v13, %v3666_v13 }
 0x374   :  { %v3787_v4 = vadd.f32 %v3786_v27, %v3724_v52  ;;  %v8276_v27 = vld [vmem:[#allocation18_spill] sm:$0xff] }
 0x375   :  { %v3668_v38 = vsub.f32 %v8276_v27, %v6765_v16  ;;  %v3731_v45 = vmul.f32 %v3667_v25, %v3667_v25 }
 0x376   :  { %v3788_v24 = vadd.f32 %v3787_v4, %v3725_v5  ;;  %v3669_v4 = vsub.f32 %v6713_v1, %v6765_v16 }
 0x377   :  { %v3732_v9 = vmul.f32 %v3668_v38, %v3668_v38 }
 0x378   :  { %v3789_v8 = vadd.f32 %v3788_v24, %v3726_v10  ;;  %v8277_v24 = vld [vmem:[#allocation20_spill] sm:$0xff]  ;;  %v3733_v44 = vmul.f32 %v3669_v4, %v3669_v4 }
 0x379   :  { %v3670_v43 = vsub.f32 %v8277_v24, %v6765_v16 }
 0x37a   :  { %v3790_v3 = vadd.f32 %v3789_v8, %v3727_v22  ;;  %v8278_v8 = vld [vmem:[#allocation21_spill] sm:$0xff] }
 0x37b   :  { %v3671_v20 = vsub.f32 %v8278_v8, %v6765_v16  ;;  %v3734_v13 = vmul.f32 %v3670_v43, %v3670_v43 }
 0x37c   :  { %v3791_v52 = vadd.f32 %v3790_v3, %v3728_v35  ;;  %v3672_v3 = vsub.f32 %v6724_v62, %v6765_v16 }
 0x37d   :  { %v3735_v25 = vmul.f32 %v3671_v20, %v3671_v20 }
 0x37e   :  { %v3792_v5 = vadd.f32 %v3791_v52, %v3729_v33  ;;  %v8279_v52 = vld [vmem:[#allocation23_spill] sm:$0xff]  ;;  %v3736_v38 = vmul.f32 %v3672_v3, %v3672_v3 }
 0x37f   :  { %v3673_v1 = vsub.f32 %v8279_v52, %v6765_v16 }
 0x380   :  { %v3793_v10 = vadd.f32 %v3792_v5, %v3730_v60  ;;  %v8280_v5 = vld [vmem:[#allocation24_spill] sm:$0xff] }
 0x381   :  { %v3674_v24 = vsub.f32 %v8280_v5, %v6765_v16  ;;  %v3737_v4 = vmul.f32 %v3673_v1, %v3673_v1 }
 0x382   :  { %v3794_v22 = vadd.f32 %v3793_v10, %v3731_v45  ;;  %v8281_v10 = vld [vmem:[#allocation25_spill] sm:$0xff] }
 0x383   :  { %v3675_v8 = vsub.f32 %v8281_v10, %v6765_v16  ;;  %v3738_v43 = vmul.f32 %v3674_v24, %v3674_v24 }
 0x384   :  { %v3795_v35 = vadd.f32 %v3794_v22, %v3732_v9  ;;  %v8282_v22 = vld [vmem:[#allocation26_spill] sm:$0xff] }
 0x385   :  { %v3676_v62 = vsub.f32 %v8282_v22, %v6765_v16  ;;  %v3739_v20 = vmul.f32 %v3675_v8, %v3675_v8 }
 0x386   :  { %v3796_v33 = vadd.f32 %v3795_v35, %v3733_v44  ;;  %v3677_v35 = vsub.f32 %v6740_v30, %v6765_v16 }
 0x387   :  { %v3740_v3 = vmul.f32 %v3676_v62, %v3676_v62 }
 0x388   :  { %v3797_v60 = vadd.f32 %v3796_v33, %v3734_v13  ;;  %v3678_v33 = vsub.f32 %v6744_v32, %v6765_v16  ;;  %v3741_v1 = vmul.f32 %v3677_v35, %v3677_v35 }
 0x38a   :  { %v3798_v45 = vadd.f32 %v3797_v60, %v3735_v25  ;;  %v8283_v60 = vld [vmem:[#allocation29_spill] sm:$0xff]  ;;  %v3742_v24 = vmul.f32 %v3678_v33, %v3678_v33 }
 0x38b   :  { %v3679_v10 = vsub.f32 %v8283_v60, %v6765_v16 }
 0x38c   :  { %v3799_v9 = vadd.f32 %v3798_v45, %v3736_v38  ;;  %v3680_v45 = vsub.f32 %v6750_v18, %v6765_v16 }
 0x38d   :  { %v3743_v8 = vmul.f32 %v3679_v10, %v3679_v10 }
 0x38e   :  { %v3800_v44 = vadd.f32 %v3799_v9, %v3737_v4  ;;  %v3681_v9 = vsub.f32 %v6753_v56, %v6765_v16  ;;  %v3744_v62 = vmul.f32 %v3680_v45, %v3680_v45  ;;  %v3826_v45 = vlaneseq }
 0x390   :  { %v3801_v13 = vadd.f32 %v3800_v44, %v3738_v43  ;;  %v3682_v44 = vsub.f32 %v6757_v54, %v6765_v16  ;;  %v3745_v35 = vmul.f32 %v3681_v9, %v3681_v9  ;;  %v3818_v9 = vld [vmem:[%s8157_s2] sm:$0x1] }
 0x392   :  { %v3802_v25 = vadd.f32 %v3801_v13, %v3739_v20  ;;  %v3683_v13 = vsub.f32 %v6760_v14, %v6765_v16 }
 0x394   :  { %v3803_v38 = vadd.f32 %v3802_v25, %v3740_v3  ;;  %v3746_v25 = vmul.f32 %v3682_v44, %v3682_v44  ;;  %v3747_v18 = vmul.f32 %v3683_v13, %v3683_v13 }
 0x396   :  { %v3804_v4 = vadd.f32 %v3803_v38, %v3741_v1 }
 0x398   :  { %v3805_v43 = vadd.f32 %v3804_v4, %v3742_v24 }
 0x39a   :  { %v3806_v20 = vadd.f32 %v3805_v43, %v3743_v8  ;;  %v3827_v43 = vshrl.u32 %v3826_v45, 7 }
 0x39c   :  { %v3807_v3 = vadd.f32 %v3806_v20, %v3744_v62  ;;  %v3828_v62 = vsub.s32 0, %v3827_v43 }
 0x39e   :  { %v3808_v60 = vadd.f32 %v3807_v3, %v3745_v35  ;;  %v8285_v35 = vld [vmem:[#allocation4_spill] sm:$0xff] }
 0x3a0   :  { %v3809_v33 = vadd.f32 %v3808_v60, %v3746_v25 }
 0x3a2   :  { %v3810_v1 = vadd.f32 %v3809_v33, %v3747_v18 }
 0x3a4   :  { %v3811_v38 = vrot.slane %v3810_v1, 4 }
 0x3a6   :  { %v3812_v32 = vadd.f32 %v3811_v38, %v3810_v1  ;;  %v8286_v1 = vld [vmem:[#allocation5_spill] sm:$0xff]  ;;  %v8287_v38 = vld [vmem:[#allocation6_spill] sm:$0xff] }
 0x3a8   :  { %v3813_v56 = vrot.slane %v3812_v32, 2 }
 0x3aa   :  { %v3814_v10 = vadd.f32 %v3813_v56, %v3812_v32  ;;  %v3822_v32 = vld [vmem:[%s8158_s3] sm:$0x1] }
 0x3ac   :  { %v3815_v24 = vrot.slane %v3814_v10, 1 }
 0x3ae   :  { %v3816_v4 = vadd.f32 %v3815_v24, %v3814_v10  ;;  %v8288_v10 = vld [vmem:[#allocation7_spill] sm:$0xff]  ;;  %v8289_v24 = vld [vmem:[#allocation8_spill] sm:$0xff] }
 0x3b0   :  { %v3817_v30 = vmul.f32 0.001953125, %v3816_v4  ;;  %v8290_v4 = vld [vmem:[#allocation9_spill] sm:$0xff] }
 0x3b2   :  { %v3819_v54 = vadd.f32 1e-05, %v3817_v30 }
 0x3b4   :  { %5505 = vrsqrt.f32 %v3819_v54 }
 0x3be   :  { %v5506_v8 = vpop.eup %5505 }
 0x3bf   :  { %v3821_v44 = vmul.f32 %v5506_v8, %v3818_v9  ;;  %v8291_v9 = vld [vmem:[#allocation11_spill] sm:$0xff] }
 0x3c1   :  { %v3823_v18 = vmul.f32 %v3821_v44, %v6765_v16  ;;  %v6902_v56 = vrot.slane %v3821_v44, %v3828_v62  ;;  %v8284_v16 = vld [vmem:[#allocation3_spill] sm:$0xff]  ;;  %v8292_v44 = vld [vmem:[#allocation12_spill] sm:$0xff] }
 0x3c3   :  { %v3824_v60 = vsub.f32 %v3822_v32, %v3823_v18  ;;  %v6906_v30 = vmul.f32 %v6537_v41, %v6902_v56  ;;  %v6910_v54 = vmul.f32 %v6539_v49, %v6902_v56  ;;  %v6914_v20 = vmul.f32 %v6553_v58, %v6902_v56  ;;  %v8293_v18 = vld [vmem:[#allocation13_spill] sm:$0xff] }
 0x3c4   :  { %v6918_v13 = vmul.f32 %v8284_v16, %v6902_v56  ;;  %v6922_v3 = vmul.f32 %v8285_v35, %v6902_v56  ;;  %v6926_v41 = vmul.f32 %v6571_v21, %v6902_v56  ;;  %v6930_v49 = vmul.f32 %v6585_v31, %v6902_v56  ;;  %v8294_v16 = vld [vmem:[#allocation14_spill] sm:$0xff] }
 0x3c5   :  { %v6934_v58 = vmul.f32 %v6587_v39, %v6902_v56  ;;  %v6938_v25 = vmul.f32 %v6589_v46, %v6902_v56  ;;  %v6942_v33 = vmul.f32 %v6591_v53, %v6902_v56  ;;  %v6946_v21 = vmul.f32 %v6593_v0, %v6902_v56 }
 0x3c6   :  { %v6950_v31 = vmul.f32 %v6595_v63, %v6902_v56  ;;  %v6954_v39 = vmul.f32 %v6597_v6, %v6902_v56  ;;  %v6958_v46 = vmul.f32 %v6599_v11, %v6902_v56  ;;  %v6962_v53 = vmul.f32 %v6601_v17, %v6902_v56 }
 0x3c7   :  { %v6966_v0 = vmul.f32 %v6603_v23, %v6902_v56  ;;  %v6970_v63 = vmul.f32 %v6605_v28, %v6902_v56  ;;  %v6974_v6 = vmul.f32 %v6607_v34, %v6902_v56  ;;  %v6978_v11 = vmul.f32 %v6609_v40, %v6902_v56 }
 0x3c8   :  { %v6982_v17 = vmul.f32 %v6613_v48, %v6902_v56  ;;  %v6986_v23 = vmul.f32 %v6617_v57, %v6902_v56  ;;  %v6990_v28 = vmul.f32 %v6620_v2, %v6902_v56  ;;  %v6994_v34 = vmul.f32 %v6624_v12, %v6902_v56 }
 0x3c9   :  { %v6998_v40 = vmul.f32 %v6626_v19, %v6902_v56  ;;  %v7002_v48 = vmul.f32 %v6630_v29, %v6902_v56  ;;  %v7006_v57 = vmul.f32 %v6633_v37, %v6902_v56  ;;  %v7010_v2 = vmul.f32 %v6637_v50, %v6902_v56 }
 0x3ca   :  { %v7014_v12 = vmul.f32 %v6640_v59, %v6902_v56  ;;  %v7018_v19 = vmul.f32 %v6644_v7, %v6902_v56  ;;  %v7022_v29 = vmul.f32 %v6646_v15, %v6902_v56  ;;  %v7026_v37 = vmul.f32 %v6650_v26, %v6902_v56 }
 0x3cb   :  { %v7030_v50 = vmul.f32 %v6653_v36, %v6902_v56  ;;  %v7034_v59 = vmul.f32 %v6657_v51, %v6902_v56  ;;  %v7038_v7 = vmul.f32 %v6660_v61, %v6902_v56  ;;  %v7042_v15 = vmul.f32 %v8286_v1, %v6902_v56  ;;  %v8295_v1 = vld [vmem:[#allocation16_spill] sm:$0xff] }
 0x3cc   :  { %v7046_v26 = vmul.f32 %v8287_v38, %v6902_v56  ;;  %v7050_v36 = vmul.f32 %v8288_v10, %v6902_v56  ;;  %v7054_v51 = vmul.f32 %v6673_v47, %v6902_v56  ;;  %v7058_v61 = vmul.f32 %v8289_v24, %v6902_v56  ;;  %v8297_v10 = vld [vmem:[#allocation17_spill] sm:$0xff] }
 0x3cd   :  { %v7062_v45 = vmul.f32 %v8290_v4, %v6902_v56  ;;  %v7066_v8 = vmul.f32 %v8270_v55, %v6902_v56  ;;  %v7070_v43 = vmul.f32 %v8291_v9, %v6902_v56  ;;  %v7074_v47 = vmul.f32 %v8292_v44, %v6902_v56  ;;  %v8299_v9 = vld [vmem:[#allocation19_spill] sm:$0xff] }
 0x3ce   :  { %v7078_v32 = vmul.f32 %v8293_v18, %v6902_v56  ;;  %v7082_v35 = vmul.f32 %v8294_v16, %v6902_v56  ;;  %v7086_v55 = vmul.f32 %v8273_v42, %v6902_v56  ;;  %v7090_v38 = vmul.f32 %v8295_v1, %v6902_v56  ;;  %v8300_v18 = vld [vmem:[#allocation20_spill] sm:$0xff]  ;;  %v8301_v1 = vld [vmem:[#allocation21_spill] sm:$0xff] }
 0x3cf   :  { %v7094_v24 = vmul.f32 %v8297_v10, %v6902_v56  ;;  %v7098_v4 = vmul.f32 %v8276_v27, %v6902_v56  ;;  %v7102_v44 = vmul.f32 %v8299_v9, %v6902_v56  ;;  %v7106_v42 = vmul.f32 %v8300_v18, %v6902_v56  ;;  %v8302_v10 = vld [vmem:[#allocation22_spill] sm:$0xff]  ;;  %v8306_v18 = vld [vmem:[#allocation25_spill] sm:$0xff] }
 0x3d0   :  { %8296 = vst [vmem:[#allocation10_spill] sm:$0xff] %v7090_v38  ;;  %v7108_v16 = vrot.slane %v3824_v60, %v3828_v62  ;;  %v7112_v38 = vmul.f32 %v8301_v1, %v6902_v56  ;;  %v7120_v27 = vmul.f32 %v8279_v52, %v6902_v56  ;;  %v7124_v9 = vmul.f32 %v8280_v5, %v6902_v56  ;;  %v8309_v1 = vld [vmem:[#allocation27_spill] sm:$0xff] }
 0x3d1   :  { %8298 = vst [vmem:[#allocation15_spill] sm:$0xff] %v7094_v24  ;;  %v7116_v24 = vmul.f32 %v8302_v10, %v6902_v56  ;;  %v7128_v62 = vmul.f32 %v8306_v18, %v6902_v56  ;;  %v7132_v60 = vmul.f32 %v8282_v22, %v6902_v56  ;;  %v7136_v10 = vmul.f32 %v8309_v1, %v6902_v56 }
 0x3d2   :  { %8304 = vst [vmem:[#allocation23_spill] sm:$0xff] %v7120_v27  ;;  %8305 = vst [vmem:[#allocation24_spill] sm:$0xff] %v7124_v9  ;;  %v8311_v27 = vld [vmem:[#allocation29_spill] sm:$0xff]  ;;  %v8312_v9 = vld [vmem:[#allocation30_spill] sm:$0xff] }
 0x3d3   :  { %8303 = vst [vmem:[#allocation18_spill] sm:$0xff] %v7116_v24  ;;  %8307 = vst [vmem:[#allocation26_spill] sm:$0xff] %v7128_v62  ;;  %v8310_v24 = vld [vmem:[#allocation28_spill] sm:$0xff]  ;;  %v7144_v5 = vmul.f32 %v8311_v27, %v6902_v56  ;;  %v7148_v18 = vmul.f32 %v8312_v9, %v6902_v56  ;;  %v8313_v62 = vld [vmem:[#allocation31_spill] sm:$0xff]  ;;  %v7164_v27 = vadd.f32 %v7108_v16, %v6906_v30 }
 0x3d4   :  { %8308 = vst [vmem:[#allocation3_spill] sm:$0xff] %v7132_v60  ;;  %v7140_v52 = vmul.f32 %v8310_v24, %v6902_v56  ;;  %v7152_v22 = vmul.f32 %v8313_v62, %v6902_v56  ;;  %v8314_v60 = vld [vmem:[#allocation32_spill] sm:$0xff]  ;;  %v7160_v24 = vmul.f32 %v6760_v14, %v6902_v56  ;;  %v7168_v9 = vadd.f32 %v7108_v16, %v6910_v54 }
 0x3d5   :  { %v7156_v1 = vmul.f32 %v8314_v60, %v6902_v56  ;;  %v7172_v62 = vadd.f32 %v7108_v16, %v6914_v20  ;;  %v7176_v60 = vadd.f32 %v7108_v16, %v6918_v13  ;;  %v7180_v14 = vadd.f32 %v7108_v16, %v6922_v3 }
 0x3d6   :  { %v7184_v56 = vadd.f32 %v7108_v16, %v6926_v41  ;;  %v7188_v30 = vadd.f32 %v7108_v16, %v6930_v49  ;;  %v7192_v54 = vadd.f32 %v7108_v16, %v6934_v58  ;;  %v7196_v20 = vadd.f32 %v7108_v16, %v6938_v25 }
 0x3d7   :  { %v7200_v13 = vadd.f32 %v7108_v16, %v6942_v33  ;;  %v7204_v3 = vadd.f32 %v7108_v16, %v6946_v21  ;;  %v7208_v41 = vadd.f32 %v7108_v16, %v6950_v31  ;;  %v7212_v49 = vadd.f32 %v7108_v16, %v6954_v39 }
 0x3d8   :  { %v7216_v58 = vadd.f32 %v7108_v16, %v6958_v46  ;;  %v7220_v25 = vadd.f32 %v7108_v16, %v6962_v53  ;;  %v7224_v33 = vadd.f32 %v7108_v16, %v6966_v0  ;;  %v7228_v21 = vadd.f32 %v7108_v16, %v6970_v63 }
 0x3d9   :  { %v7232_v31 = vadd.f32 %v7108_v16, %v6974_v6  ;;  %v7236_v39 = vadd.f32 %v7108_v16, %v6978_v11  ;;  %v7240_v46 = vadd.f32 %v7108_v16, %v6982_v17  ;;  %v7244_v53 = vadd.f32 %v7108_v16, %v6986_v23 }
 0x3da   :  { %v7248_v0 = vadd.f32 %v7108_v16, %v6990_v28  ;;  %v7252_v63 = vadd.f32 %v7108_v16, %v6994_v34  ;;  %v7256_v6 = vadd.f32 %v7108_v16, %v6998_v40  ;;  %v7260_v11 = vadd.f32 %v7108_v16, %v7002_v48 }
 0x3db   :  { %v7264_v17 = vadd.f32 %v7108_v16, %v7006_v57  ;;  %v7268_v23 = vadd.f32 %v7108_v16, %v7010_v2  ;;  %v7272_v28 = vadd.f32 %v7108_v16, %v7014_v12  ;;  %v7276_v34 = vadd.f32 %v7108_v16, %v7018_v19 }
 0x3dc   :  { %v7280_v40 = vadd.f32 %v7108_v16, %v7022_v29  ;;  %v7284_v48 = vadd.f32 %v7108_v16, %v7026_v37  ;;  %v7288_v57 = vadd.f32 %v7108_v16, %v7030_v50  ;;  %v7292_v2 = vadd.f32 %v7108_v16, %v7034_v59 }
 0x3dd   :  { %v7296_v12 = vadd.f32 %v7108_v16, %v7038_v7  ;;  %v7300_v19 = vadd.f32 %v7108_v16, %v7042_v15  ;;  %v7304_v29 = vadd.f32 %v7108_v16, %v7046_v26  ;;  %v7308_v37 = vadd.f32 %v7108_v16, %v7050_v36 }
 0x3de   :  { %v7312_v50 = vadd.f32 %v7108_v16, %v7054_v51  ;;  %v7316_v59 = vadd.f32 %v7108_v16, %v7058_v61  ;;  %v7320_v7 = vadd.f32 %v7108_v16, %v7062_v45  ;;  %v7324_v15 = vadd.f32 %v7108_v16, %v7066_v8  ;;  %v8316_v8 = vld [vmem:[#allocation10_spill] sm:$0xff] }
 0x3df   :  { %v7328_v26 = vadd.f32 %v7108_v16, %v7070_v43  ;;  %v7332_v36 = vadd.f32 %v7108_v16, %v7074_v47  ;;  %v7336_v51 = vadd.f32 %v7108_v16, %v7078_v32  ;;  %v7340_v61 = vadd.f32 %v7108_v16, %v7082_v35 }
 0x3e0   :  { %v7344_v45 = vadd.f32 %v7108_v16, %v7086_v55  ;;  %v7348_v43 = vadd.f32 %v7108_v16, %v8316_v8  ;;  %v7356_v32 = vadd.f32 %v7108_v16, %v7098_v4  ;;  %v7360_v35 = vadd.f32 %v7108_v16, %v7102_v44 }
 0x3e1   :  { %8315 = vst [vmem:[#allocation4_spill] sm:$0xff] %v7328_v26  ;;  %v8318_v26 = vld [vmem:[#allocation15_spill] sm:$0xff]  ;;  %v7364_v55 = vadd.f32 %v7108_v16, %v7106_v42  ;;  %v7368_v8 = vadd.f32 %v7108_v16, %v7112_v38  ;;  %vm3965_vm0 = vcmp.gt.f32.partialorder %v7164_v27, 0.0  ;;  %vm3966_vm1 = vcmp.gt.f32.partialorder %v7168_v9, 0.0 }
 0x3e2   :  { %8317 = vst [vmem:[#allocation5_spill] sm:$0xff] %v7348_v43  ;;  %v7352_v47 = vadd.f32 %v7108_v16, %v8318_v26  ;;  %8320 = vst [vmem:[#allocation7_spill] sm:$0xff] %v7356_v32  ;;  %v8324_v43 = vld [vmem:[#allocation18_spill] sm:$0xff]  ;;  %v8328_v32 = vld [vmem:[#allocation24_spill] sm:$0xff]  ;;  %vm3967_vm2 = vcmp.gt.f32.partialorder %v7172_v62, 0.0  ;;  %vm3968_vm3 = vcmp.gt.f32.partialorder %v7176_v60, 0.0 }
 0x3e3   :  { %8321 = vst [vmem:[#allocation8_spill] sm:$0xff] %v7360_v35  ;;  %8322 = vst [vmem:[#allocation9_spill] sm:$0xff] %v7364_v55  ;;  %v7372_v26 = vadd.f32 %v7108_v16, %v8324_v43  ;;  %v7380_v44 = vadd.f32 %v7108_v16, %v8328_v32  ;;  %v8330_v35 = vld [vmem:[#allocation26_spill] sm:$0xff]  ;;  %v8332_v55 = vld [vmem:[#allocation3_spill] sm:$0xff]  ;;  %v7392_v43 = vadd.f32 %v7108_v16, %v7136_v10  ;;  %vm3969_vm4 = vcmp.gt.f32.partialorder %v7180_v14, 0.0 }
 0x3e4   :  { %8319 = vst [vmem:[#allocation6_spill] sm:$0xff] %v7352_v47  ;;  %8323 = vst [vmem:[#allocation11_spill] sm:$0xff] %v7368_v8  ;;  %v8326_v47 = vld [vmem:[#allocation23_spill] sm:$0xff]  ;;  %v7384_v42 = vadd.f32 %v7108_v16, %v8330_v35  ;;  %v7388_v38 = vadd.f32 %v7108_v16, %v8332_v55  ;;  %v7400_v32 = vadd.f32 %v7108_v16, %v7144_v5  ;;  %vm3970_vm5 = vcmp.gt.f32.partialorder %v7184_v56, 0.0 }
 0x3e5   :  { %8325 = vst [vmem:[#allocation12_spill] sm:$0xff] %v7372_v26  ;;  %v7376_v4 = vadd.f32 %v7108_v16, %v8326_v47  ;;  %8329 = vst [vmem:[#allocation14_spill] sm:$0xff] %v7380_v44  ;;  %v7396_v47 = vadd.f32 %v7108_v16, %v7140_v52  ;;  %v7404_v35 = vadd.f32 %v7108_v16, %v7148_v18  ;;  %vm3971_vm6 = vcmp.gt.f32.partialorder %v7188_v30, 0.0 }
 0x3e6   :  { %8331 = vst [vmem:[#allocation16_spill] sm:$0xff] %v7384_v42  ;;  %8333 = vst [vmem:[#allocation17_spill] sm:$0xff] %v7388_v38  ;;  %v7408_v55 = vadd.f32 %v7108_v16, %v7152_v22  ;;  %vm3972_vm7 = vcmp.gt.f32.partialorder %v7192_v54, 0.0  ;;  %vm3973_vm8 = vcmp.gt.f32.partialorder %v7196_v20, 0.0  ;;  %v7421_v10 = vadd.f32 %v7108_v16, %v7156_v1 }
 0x3e7   :  { %8327 = vst [vmem:[#allocation13_spill] sm:$0xff] %v7376_v4  ;;  %8334 = vst [vmem:[#allocation19_spill] sm:$0xff] %v7392_v43  ;;  %vm3974_vm9 = vcmp.gt.f32.partialorder %v7200_v13, 0.0  ;;  %v4029_v52 = vmul.f32 0.2, %v7164_v27  ;;  %v7429_v22 = vadd.f32 %v7108_v16, %v7160_v24  ;;  %vm3975_vm10 = vcmp.gt.f32.partialorder %v7204_v3, 0.0 }
 0x3e8   :  { %8335 = vst [vmem:[#allocation20_spill] sm:$0xff] %v7396_v47  ;;  %8336 = vst [vmem:[#allocation21_spill] sm:$0xff] %v7400_v32  ;;  %v4030_v5 = vmul.f32 0.2, %v7168_v9  ;;  %v4031_v18 = vmul.f32 0.2, %v7172_v62 }
 0x3e9   :  { %8337 = vst [vmem:[#allocation22_spill] sm:$0xff] %v7404_v35  ;;  %8338 = vst [vmem:[#allocation25_spill] sm:$0xff] %v7408_v55  ;;  %v4032_v55 = vmul.f32 0.2, %v7176_v60  ;;  %v4033_v35 = vmul.f32 0.2, %v7180_v14  ;;  %v7442_v16 = vsel %vm3965_vm0, %v7164_v27, %v4029_v52 }
 0x3ea   :  { %8339 = vst [vmem:[#allocation27_spill] sm:$0xff] %v7421_v10  ;;  %8340 = vst [vmem:[#allocation28_spill] sm:$0xff] %v7429_v22  ;;  %v4034_v1 = vmul.f32 0.2, %v7184_v56  ;;  %vm3976_vm11 = vcmp.gt.f32.partialorder %v7208_v41, 0.0  ;;  %vm3977_vm12 = vcmp.gt.f32.partialorder %v7212_v49, 0.0  ;;  %v7453_v38 = vsel %vm3966_vm1, %v7168_v9, %v4030_v5 }
 0x3eb   :  { %v4035_v10 = vmul.f32 0.2, %v7188_v30  ;;  %v4036_v32 = vmul.f32 0.2, %v7192_v54  ;;  %v4037_v47 = vmul.f32 0.2, %v7196_v20  ;;  %v7483_v44 = vsel %vm3968_vm3, %v7176_v60, %v4032_v55 }
 0x3ec   :  { %8341 = vst [vmem:[#allocation29_spill] sm:$0xff] %v7442_v16  ;;  %v4038_v24 = vmul.f32 0.2, %v7200_v13  ;;  %v4039_v22 = vmul.f32 0.2, %v7204_v3  ;;  %8342 = vst [vmem:[#allocation30_spill] sm:$0xff] %v7453_v38  ;;  %v7468_v16 = vsel %vm3967_vm2, %v7172_v62, %v4031_v18 }
 0x3ed   :  { %v7448_v43 = vmul.f32 0.2, %v7208_v41  ;;  %vm3978_vm13 = vcmp.gt.f32.partialorder %v7216_v58, 0.0  ;;  %v7457_v42 = vmul.f32 0.2, %v7212_v49  ;;  %8343 = vst [vmem:[#allocation31_spill] sm:$0xff] %v7468_v16 }
 0x3ee   :  { %v7460_v27 = vmul.f32 0.2, %v7216_v58  ;;  %v7463_v52 = vmul.f32 0.2, %v7220_v25  ;;  %vm3979_vm14 = vcmp.gt.f32.partialorder %v7220_v25, 0.0  ;;  %8345 = vst [vmem:[#allocation10_spill] sm:$0xff] %v7483_v44 }
 0x3ef   :  { %v7472_v9 = vmul.f32 0.2, %v7224_v33  ;;  %v7475_v5 = vmul.f32 0.2, %v7228_v21  ;;  %v7478_v38 = vmul.f32 0.2, %v7232_v31 }
 0x3f0   :  { %vm3980_vm15 = vcmp.gt.f32.partialorder %v7224_v33, 0.0  ;;  %v7487_v62 = vmul.f32 0.2, %v7236_v39  ;;  %v7490_v18 = vmul.f32 0.2, %v7240_v46  ;;  %vm3981_vm0 = vcmp.gt.f32.partialorder %v7228_v21, 0.0 }
 0x3f1   :  { %8344 = vst [vmem:[#allocation32_spill] sm:$0xff] %v7478_v38  ;;  %v7493_v16 = vmul.f32 0.2, %v7244_v53  ;;  %v7498_v38 = vsel %vm3969_vm4, %v7180_v14, %v4033_v35  ;;  %v7502_v60 = vmul.f32 0.2, %v7248_v0  ;;  %vm3982_vm1 = vcmp.gt.f32.partialorder %v7232_v31, 0.0 }
 0x3f2   :  { %8347 = vst [vmem:[#allocation18_spill] sm:$0xff] %v7498_v38  ;;  %v7505_v55 = vmul.f32 0.2, %v7252_v63  ;;  %v7508_v44 = vmul.f32 0.2, %v7256_v6  ;;  %vm3983_vm2 = vcmp.gt.f32.partialorder %v7236_v39, 0.0 }
 0x3f3   :  { %8346 = vst [vmem:[#allocation15_spill] sm:$0xff] %v7493_v16  ;;  %v7513_v16 = vsel %vm3970_vm5, %v7184_v56, %v4034_v1  ;;  %v7517_v14 = vmul.f32 0.2, %v7260_v11  ;;  %v7520_v35 = vmul.f32 0.2, %v7264_v17  ;;  %vm3984_vm3 = vcmp.gt.f32.partialorder %v7240_v46, 0.0 }
 0x3f4   :  { %8348 = vst [vmem:[#allocation23_spill] sm:$0xff] %v7508_v44  ;;  %8349 = vst [vmem:[#allocation24_spill] sm:$0xff] %v7513_v16  ;;  %v7523_v38 = vmul.f32 0.2, %v7268_v23  ;;  %v7528_v44 = vsel %vm3971_vm6, %v7188_v30, %v4035_v10  ;;  %v7532_v56 = vmul.f32 0.2, %v7272_v28 }
 0x3f5   :  { %8351 = vst [vmem:[#allocation3_spill] sm:$0xff] %v7528_v44  ;;  %v7535_v1 = vmul.f32 0.2, %v7276_v34  ;;  %v7538_v16 = vmul.f32 0.2, %v7280_v40  ;;  %vm3987_vm6 = vcmp.gt.f32.partialorder %v7252_v63, 0.0 }
 0x3f6   :  { %8350 = vst [vmem:[#allocation26_spill] sm:$0xff] %v7523_v38  ;;  %v7543_v38 = vsel %vm3972_vm7, %v7192_v54, %v4036_v32  ;;  %v7549_v30 = vmul.f32 0.2, %v7284_v48  ;;  %v7552_v10 = vmul.f32 0.2, %v7288_v57  ;;  %v7560_v54 = vsel %vm3973_vm8, %v7196_v20, %v4037_v47 }
 0x3f7   :  { %8352 = vst [vmem:[#allocation33_spill] sm:$0xff] %v7543_v38  ;;  %v7555_v44 = vmul.f32 0.2, %v7292_v2  ;;  %8354 = vst [vmem:[#allocation35_spill] sm:$0xff] %v7560_v54  ;;  %v7567_v32 = vmul.f32 0.2, %v7296_v12  ;;  %v7578_v20 = vsel %vm3974_vm9, %v7200_v13, %v4038_v24  ;;  %v7596_v13 = vsel %vm3975_vm10, %v7204_v3, %v4039_v22 }
 0x3f8   :  { %v7570_v38 = vmul.f32 0.2, %v7300_v19  ;;  %8356 = vst [vmem:[#allocation37_spill] sm:$0xff] %v7578_v20  ;;  %vm3991_vm8 = vcmp.gt.f32.partialorder %v7268_v23, 0.0  ;;  %v7585_v47 = vmul.f32 0.2, %v7308_v37  ;;  %v7615_v3 = vsel %vm3976_vm11, %v7208_v41, %v7448_v43 }
 0x3f9   :  { %8353 = vst [vmem:[#allocation34_spill] sm:$0xff] %v7555_v44  ;;  %v7573_v44 = vmul.f32 0.2, %v7304_v29  ;;  %v7588_v54 = vmul.f32 0.2, %v7312_v50  ;;  %8359 = vst [vmem:[#allocation40_spill] sm:$0xff] %v7596_v13  ;;  %v7634_v41 = vsel %vm3977_vm12, %v7212_v49, %v7457_v42  ;;  %v7653_v49 = vsel %vm3978_vm13, %v7216_v58, %v7460_v27 }
 0x3fa   :  { %vm3995_vm9 = vcmp.gt.f32.partialorder %v7284_v48, 0.0  ;;  %v7603_v24 = vmul.f32 0.2, %v7320_v7  ;;  %v7606_v20 = vmul.f32 0.2, %v7324_v15  ;;  %8362 = vst [vmem:[#allocation42_spill] sm:$0xff] %v7615_v3  ;;  %v7672_v58 = vsel %vm3979_vm14, %v7220_v25, %v7463_v52 }
 0x3fb   :  { %8355 = vst [vmem:[#allocation36_spill] sm:$0xff] %v7573_v44  ;;  %8357 = vst [vmem:[#allocation38_spill] sm:$0xff] %v7588_v54  ;;  %v7591_v44 = vmul.f32 0.2, %v7316_v59  ;;  %vm3999_vm10 = vcmp.gt.f32.partialorder %v7300_v19, 0.0  ;;  %vm4003_vm11 = vcmp.gt.f32.partialorder %v7316_v59, 0.0  ;;  %v7691_v25 = vsel %vm3980_vm15, %v7224_v33, %v7472_v9 }
 0x3fc   :  { %v7622_v22 = vmul.f32 0.2, %v7332_v36  ;;  %v7625_v13 = vmul.f32 0.2, %v7336_v51  ;;  %8366 = vst [vmem:[#allocation46_spill] sm:$0xff] %v7634_v41  ;;  %v8368_v3 = vld [vmem:[#allocation5_spill] sm:$0xff]  ;;  %v7704_v33 = vsel %vm3981_vm0, %v7228_v21, %v7475_v5 }
 0x3fd   :  { %8358 = vst [vmem:[#allocation39_spill] sm:$0xff] %v7591_v44  ;;  %v8360_v44 = vld [vmem:[#allocation4_spill] sm:$0xff]  ;;  %v7641_v43 = vmul.f32 0.2, %v7344_v45  ;;  %8372 = vst [vmem:[#allocation48_spill] sm:$0xff] %v7653_v49  ;;  %vm4007_vm12 = vcmp.gt.f32.partialorder %v7332_v36, 0.0 }
 0x3fe   :  { %v7609_v54 = vmul.f32 0.2, %v8360_v44  ;;  %8363 = vst [vmem:[#allocation43_spill] sm:$0xff] %v7622_v22  ;;  %8364 = vst [vmem:[#allocation44_spill] sm:$0xff] %v7625_v13  ;;  %v7644_v13 = vmul.f32 0.2, %v8368_v3 }
 0x3ff   :  { %8367 = vst [vmem:[#allocation47_spill] sm:$0xff] %v7641_v43  ;;  %v8373_v42 = vld [vmem:[#allocation7_spill] sm:$0xff]  ;;  %8378 = vst [vmem:[#allocation50_spill] sm:$0xff] %v7672_v58  ;;  %vm4011_vm13 = vcmp.gt.f32.partialorder %v8368_v3, 0.0  ;;  %v7679_v27 = vmul.f32 0.2, %v7368_v8 }
 0x400   :  { %8361 = vst [vmem:[#allocation41_spill] sm:$0xff] %v7609_v54  ;;  %v7628_v54 = vmul.f32 0.2, %v7340_v61  ;;  %8369 = vst [vmem:[#allocation5_spill] sm:$0xff] %v7644_v13  ;;  %v7660_v41 = vmul.f32 0.2, %v8373_v42 }
 0x401   :  { %v8374_v13 = vld [vmem:[#allocation8_spill] sm:$0xff]  ;;  %8379 = vst [vmem:[#allocation51_spill] sm:$0xff] %v7679_v27  ;;  %v7682_v49 = vmul.f32 0.2, %v7372_v26  ;;  %8382 = vst [vmem:[#allocation54_spill] sm:$0xff] %v7691_v25  ;;  %v8383_v52 = vld [vmem:[#allocation14_spill] sm:$0xff] }
 0x402   :  { %8365 = vst [vmem:[#allocation45_spill] sm:$0xff] %v7628_v54  ;;  %v8370_v54 = vld [vmem:[#allocation6_spill] sm:$0xff]  ;;  %v7663_v43 = vmul.f32 0.2, %v8374_v13  ;;  %v4083_v58 = vmul.f32 0.2, %v8383_v52 }
 0x403   :  { %v7647_v22 = vmul.f32 0.2, %v8370_v54  ;;  %8380 = vst [vmem:[#allocation52_spill] sm:$0xff] %v7682_v49  ;;  %v8384_v49 = vld [vmem:[#allocation16_spill] sm:$0xff]  ;;  %v8385_v13 = vld [vmem:[#allocation17_spill] sm:$0xff]  ;;  %8386 = vst [vmem:[#allocation55_spill] sm:$0xff] %v7704_v33 }
 0x404   :  { %8375 = vst [vmem:[#allocation7_spill] sm:$0xff] %v7663_v43  ;;  %v4084_v27 = vmul.f32 0.2, %v8384_v49  ;;  %vm4019_vm15 = vcmp.gt.f32.partialorder %v8383_v52, 0.0  ;;  %v8387_v9 = vld [vmem:[#allocation19_spill] sm:$0xff]  ;;  %v8389_v8 = vld [vmem:[#allocation21_spill] sm:$0xff] }
 0x405   :  { %8371 = vst [vmem:[#allocation6_spill] sm:$0xff] %v7647_v22  ;;  %v8376_v22 = vld [vmem:[#allocation9_spill] sm:$0xff]  ;;  %v4086_v25 = vmul.f32 0.2, %v8387_v9  ;;  %v8390_v43 = vld [vmem:[#allocation32_spill] sm:$0xff]  ;;  %v8392_v5 = vld [vmem:[#allocation22_spill] sm:$0xff] }
 0x406   :  { %v7666_v44 = vmul.f32 0.2, %v8376_v22  ;;  %vm4015_vm14 = vcmp.gt.f32.partialorder %v8376_v22, 0.0  ;;  %v4088_v22 = vmul.f32 0.2, %v8389_v8  ;;  %v7717_v21 = vsel %vm3982_vm1, %v7232_v31, %v8390_v43  ;;  %v8393_v33 = vld [vmem:[#allocation25_spill] sm:$0xff] }
 0x407   :  { %vm4025_vm4 = vcmp.gt.f32.partialorder %v8392_v5, 0.0  ;;  %v4089_v9 = vmul.f32 0.2, %v8392_v5  ;;  %v8394_v49 = vld [vmem:[#allocation27_spill] sm:$0xff]  ;;  %v7730_v31 = vsel %vm3983_vm2, %v7236_v39, %v7487_v62  ;;  %v8395_v43 = vld [vmem:[#allocation28_spill] sm:$0xff]  ;;  %v7739_v5 = vsel %vm3984_vm3, %v7240_v46, %v7490_v18 }
 0x408   :  { %8377 = vst [vmem:[#allocation49_spill] sm:$0xff] %v7666_v44  ;;  %v7685_v44 = vmul.f32 0.2, %v7376_v4  ;;  %v8388_v4 = vld [vmem:[#allocation20_spill] sm:$0xff]  ;;  %v4091_v52 = vmul.f32 0.2, %v8394_v49  ;;  %v7757_v62 = vsel %vm3987_vm6, %v7252_v63, %v7505_v55 }
 0x409   :  { %v4087_v26 = vmul.f32 0.2, %v8388_v4  ;;  %8391 = vst [vmem:[#allocation20_spill] sm:$0xff] %v7717_v21  ;;  %vm4023_vm0 = vcmp.gt.f32.partialorder %v8388_v4, 0.0  ;;  %vm4027_vm1 = vcmp.gt.f32.partialorder %v8394_v49, 0.0  ;;  %vm4028_vm5 = vcmp.gt.f32.partialorder %v8395_v43, 0.0 }
 0x40a   :  { %8381 = vst [vmem:[#allocation53_spill] sm:$0xff] %v7685_v44  ;;  %v4085_v44 = vmul.f32 0.2, %v8385_v13  ;;  %v4090_v13 = vmul.f32 0.2, %v8393_v33  ;;  %v8396_v33 = vld [vmem:[#allocation15_spill] sm:$0xff] }
 0x40b   :  { %v4092_v21 = vmul.f32 0.2, %v8395_v43  ;;  %vm8397_vm7 = vcmp.gt.f32.partialorder %v7244_v53, 0.0  ;;  %vm8398_vm2 = vcmp.gt.f32.partialorder %v7248_v0, 0.0  ;;  %v8399_v46 = vld [vmem:[#allocation23_spill] sm:$0xff]  ;;  %vm8400_vm3 = vcmp.gt.f32.partialorder %v7256_v6, 0.0 }
 0x40c   :  { %v7745_v8 = vsel %vm8397_vm7, %v7244_v53, %v8396_v33  ;;  %v7751_v39 = vsel %vm8398_vm2, %v7248_v0, %v7502_v60  ;;  %v7763_v18 = vsel %vm8400_vm3, %v7256_v6, %v8399_v46  ;;  %vm8401_vm7 = vcmp.gt.f32.partialorder %v7260_v11, 0.0  ;;  %v8403_v63 = vld [vmem:[#allocation26_spill] sm:$0xff]  ;;  %v8434_v33 = vld [vmem:[#allocation8_spill] sm:$0xff] }
 0x40d   :  { %v7769_v53 = vsel %vm8401_vm7, %v7260_v11, %v7517_v14  ;;  %vm8402_vm2 = vcmp.gt.f32.partialorder %v7264_v17, 0.0  ;;  %v7781_v60 = vsel %vm3991_vm8, %v7268_v23, %v8403_v63  ;;  %vm8404_vm6 = vcmp.gt.f32.partialorder %v7272_v28, 0.0  ;;  %v8437_v63 = vld [vmem:[#allocation9_spill] sm:$0xff] }
 0x40e   :  { %v7775_v0 = vsel %vm8402_vm2, %v7264_v17, %v7520_v35  ;;  %v7787_v6 = vsel %vm8404_vm6, %v7272_v28, %v7532_v56  ;;  %vm8405_vm3 = vcmp.gt.f32.partialorder %v7276_v34, 0.0  ;;  %vm8406_vm7 = vcmp.gt.f32.partialorder %v7280_v40, 0.0  ;;  %v8420_v35 = vld [vmem:[#allocation4_spill] sm:$0xff] }
 0x40f   :  { %v7793_v11 = vsel %vm8405_vm3, %v7276_v34, %v7535_v1  ;;  %v7799_v17 = vsel %vm8406_vm7, %v7280_v40, %v7538_v16  ;;  %v7805_v23 = vsel %vm3995_vm9, %v7284_v48, %v7549_v30  ;;  %vm8407_vm8 = vcmp.gt.f32.partialorder %v7288_v57, 0.0  ;;  %v8408_v34 = vld [vmem:[#allocation34_spill] sm:$0xff] }
 0x410   :  { %v7811_v28 = vsel %vm8407_vm8, %v7288_v57, %v7552_v10  ;;  %vm8409_vm2 = vcmp.gt.f32.partialorder %v7292_v2, 0.0  ;;  %vm8410_vm6 = vcmp.gt.f32.partialorder %v7296_v12, 0.0  ;;  %v7829_v48 = vsel %vm3999_vm10, %v7300_v19, %v7570_v38  ;;  %v8411_v57 = vld [vmem:[#allocation36_spill] sm:$0xff]  ;;  %v8416_v19 = vld [vmem:[#allocation39_spill] sm:$0xff] }
 0x411   :  { %v7817_v55 = vsel %vm8409_vm2, %v7292_v2, %v8408_v34  ;;  %v7823_v40 = vsel %vm8410_vm6, %v7296_v12, %v7567_v32  ;;  %vm8412_vm9 = vcmp.gt.f32.partialorder %v7304_v29, 0.0  ;;  %vm8413_vm3 = vcmp.gt.f32.partialorder %v7308_v37, 0.0  ;;  %v8414_v12 = vld [vmem:[#allocation38_spill] sm:$0xff]  ;;  %v8427_v32 = vld [vmem:[#allocation47_spill] sm:$0xff] }
 0x412   :  { %v7835_v16 = vsel %vm8412_vm9, %v7304_v29, %v8411_v57  ;;  %v7841_v2 = vsel %vm8413_vm3, %v7308_v37, %v7585_v47  ;;  %vm8415_vm7 = vcmp.gt.f32.partialorder %v7312_v50, 0.0  ;;  %v7853_v38 = vsel %vm4003_vm11, %v7316_v59, %v8416_v19  ;;  %v8422_v59 = vld [vmem:[#allocation43_spill] sm:$0xff] }
 0x413   :  { %v7847_v14 = vsel %vm8415_vm7, %v7312_v50, %v8414_v12  ;;  %vm8417_vm10 = vcmp.gt.f32.partialorder %v7320_v7, 0.0  ;;  %vm8418_vm8 = vcmp.gt.f32.partialorder %v7324_v15, 0.0  ;;  %v8419_v50 = vld [vmem:[#allocation41_spill] sm:$0xff]  ;;  %vm8421_vm2 = vcmp.gt.f32.partialorder %v8420_v35, 0.0  ;;  %v8439_v57 = vld [vmem:[#allocation11_spill] sm:$0xff] }
 0x414   :  { %v7859_v29 = vsel %vm8417_vm10, %v7320_v7, %v7603_v24  ;;  %v7865_v37 = vsel %vm8418_vm8, %v7324_v15, %v7606_v20  ;;  %v7871_v56 = vsel %vm8421_vm2, %v8420_v35, %v8419_v50  ;;  %v7877_v1 = vsel %vm4007_vm12, %v7332_v36, %v8422_v59  ;;  %v8423_v7 = vld [vmem:[#allocation44_spill] sm:$0xff]  ;;  %v8425_v15 = vld [vmem:[#allocation45_spill] sm:$0xff] }
 0x415   :  { %vm8424_vm11 = vcmp.gt.f32.partialorder %v7336_v51, 0.0  ;;  %vm8426_vm6 = vcmp.gt.f32.partialorder %v7340_v61, 0.0  ;;  %vm8428_vm9 = vcmp.gt.f32.partialorder %v7344_v45, 0.0  ;;  %v8429_v36 = vld [vmem:[#allocation5_spill] sm:$0xff]  ;;  %vm8431_vm12 = vcmp.gt.f32.partialorder %v8370_v54, 0.0 }
 0x416   :  { %v7883_v30 = vsel %vm8424_vm11, %v7336_v51, %v8423_v7  ;;  %v7889_v10 = vsel %vm8426_vm6, %v7340_v61, %v8425_v15  ;;  %v7895_v20 = vsel %vm8428_vm9, %v7344_v45, %v8427_v32  ;;  %v7901_v47 = vsel %vm4011_vm13, %v8368_v3, %v8429_v36  ;;  %v8430_v51 = vld [vmem:[#allocation6_spill] sm:$0xff]  ;;  %v8433_v45 = vld [vmem:[#allocation7_spill] sm:$0xff]  ;;  %v8436_v3 = vld [vmem:[#allocation49_spill] sm:$0xff] }
 0x417   :  { %v7907_v24 = vsel %vm8431_vm12, %v8370_v54, %v8430_v51  ;;  %vm8432_vm3 = vcmp.gt.f32.partialorder %v8373_v42, 0.0  ;;  %vm8435_vm7 = vcmp.gt.f32.partialorder %v8434_v33, 0.0  ;;  %v7925_v34 = vsel %vm4015_vm14, %v8437_v63, %v8436_v3  ;;  %v8438_v54 = vld [vmem:[#allocation51_spill] sm:$0xff]  ;;  %v8444_v50 = vld [vmem:[#allocation53_spill] sm:$0xff]  ;;  %v8447_v7 = vld [vmem:[#allocation14_spill] sm:$0xff] }
 0x418   :  { %v7913_v61 = vsel %vm8432_vm3, %v8373_v42, %v7660_v41  ;;  %v7919_v46 = vsel %vm8435_vm7, %v8434_v33, %v8433_v45  ;;  %vm8440_vm13 = vcmp.gt.f32.partialorder %v8439_v57, 0.0  ;;  %v8441_v41 = vld [vmem:[#allocation52_spill] sm:$0xff]  ;;  %v8445_v35 = vld [vmem:[#allocation13_spill] sm:$0xff]  ;;  %v7948_v15 = vsel %vm4019_vm15, %v8447_v7, %v4083_v58  ;;  %v8452_v33 = vld [vmem:[#allocation19_spill] sm:$0xff] }
 0x419   :  { %v7931_v12 = vsel %vm8440_vm13, %v8439_v57, %v8438_v54  ;;  %v8442_v42 = vld [vmem:[#allocation12_spill] sm:$0xff]  ;;  %vm8446_vm8 = vcmp.gt.f32.partialorder %v8445_v35, 0.0  ;;  %v8450_v51 = vld [vmem:[#allocation17_spill] sm:$0xff]  ;;  %vm8453_vm11 = vcmp.gt.f32.partialorder %v8452_v33, 0.0  ;;  %v7968_v58 = vsel %vm4023_vm0, %v8388_v4, %v4087_v26  ;;  %v8456_v54 = vld [vmem:[#allocation22_spill] sm:$0xff] }
 0x41a   :  { %vm8443_vm10 = vcmp.gt.f32.partialorder %v8442_v42, 0.0  ;;  %v7943_v59 = vsel %vm8446_vm8, %v8445_v35, %v8444_v50  ;;  %v8448_v32 = vld [vmem:[#allocation16_spill] sm:$0xff]  ;;  %vm8451_vm2 = vcmp.gt.f32.partialorder %v8450_v51, 0.0  ;;  %v7963_v3 = vsel %vm8453_vm11, %v8452_v33, %v4086_v25  ;;  %v8454_v63 = vld [vmem:[#allocation21_spill] sm:$0xff]  ;;  %v8464_v50 = vld [vmem:[#allocation10_spill] sm:$0xff] }
 0x41b   :  { %v7937_v19 = vsel %vm8443_vm10, %v8442_v42, %v8441_v41  ;;  %vm8449_vm14 = vcmp.gt.f32.partialorder %v8448_v32, 0.0  ;;  %v7958_v45 = vsel %vm8451_vm2, %v8450_v51, %v4085_v44  ;;  %vm8455_vm15 = vcmp.gt.f32.partialorder %v8454_v63, 0.0  ;;  %v8457_v57 = vld [vmem:[#allocation25_spill] sm:$0xff]  ;;  %v8462_v41 = vld [vmem:[#allocation30_spill] sm:$0xff]  ;;  %v8467_v51 = vld [vmem:[#allocation3_spill] sm:$0xff] }
 0x41c   :  { %v7953_v36 = vsel %vm8449_vm14, %v8448_v32, %v4084_v27  ;;  %v7973_v27 = vsel %vm8455_vm15, %v8454_v63, %v4088_v22  ;;  %v7978_v44 = vsel %vm4025_vm4, %v8456_v54, %v4089_v9  ;;  %vm8458_vm6 = vcmp.gt.f32.partialorder %v8457_v57, 0.0  ;;  %v8461_v22 = vld [vmem:[#allocation29_spill] sm:$0xff]  ;;  %v8463_v9 = vld [vmem:[#allocation31_spill] sm:$0xff]  ;;  %v8465_v7 = vld [vmem:[#allocation18_spill] sm:$0xff] }
 0x41d   :  { %v7983_v25 = vsel %vm8458_vm6, %v8457_v57, %v4090_v13  ;;  %v7988_v26 = vsel %vm4027_vm1, %v8394_v49, %v4091_v52  ;;  %v7993_v4 = vsel %vm4028_vm5, %v8395_v43, %v4092_v21  ;;  %v4932_v42 = vpack.c.bf16 %v8462_v41, %v8461_v22  ;;  %v8466_v32 = vld [vmem:[#allocation24_spill] sm:$0xff]  ;;  %v8468_v33 = vld [vmem:[#allocation33_spill] sm:$0xff]  ;;  %v8469_v54 = vld [vmem:[#allocation35_spill] sm:$0xff] }
 0x41e   :  { %8459 = vst [vmem:[#allocation32_spill] sm:$0xff] %v7983_v25  ;;  %8460 = vst [vmem:[#allocation27_spill] sm:$0xff] %v7988_v26  ;;  %v4937_v35 = vpack.c.bf16 %v8464_v50, %v8463_v9  ;;  %v4942_v13 = vpack.c.bf16 %v8466_v32, %v8465_v7  ;;  %v4947_v63 = vpack.c.bf16 %v8468_v33, %v8467_v51  ;;  %v8470_v49 = vld [vmem:[#allocation37_spill] sm:$0xff]  ;;  %v8471_v57 = vld [vmem:[#allocation40_spill] sm:$0xff] }
 0x41f   :  { %v4952_v52 = vpack.c.bf16 %v8470_v49, %v8469_v54  ;;  %v8472_v26 = vld [vmem:[#allocation42_spill] sm:$0xff]  ;;  %4933 = vst [vmem:[%s8159_s4] sm:$0xff] %v4932_v42   ;;  %v8474_v43 = vld [vmem:[#allocation48_spill] sm:$0xff]  ;;  %v8477_v7 = vld [vmem:[#allocation55_spill] sm:$0xff]  ;;  %v4982_v42 = vpack.c.bf16 %v7751_v39, %v7745_v8  ;;  %v5002_v8 = vpack.c.bf16 %v7799_v17, %v7793_v11  ;;  %v5007_v39 = vpack.c.bf16 %v7811_v28, %v7805_v23 }
 0x420   :  { %v4957_v25 = vpack.c.bf16 %v8472_v26, %v8471_v57  ;;  %5089 = vst [vmem:[%s8159_s4 + $0x8] sm:$0xff] %v4937_v35   ;;  %v8473_v21 = vld [vmem:[#allocation46_spill] sm:$0xff]  ;;  %v8478_v32 = vld [vmem:[#allocation20_spill] sm:$0xff]  ;;  %v4977_v26 = vpack.c.bf16 %v7739_v5, %v7730_v31  ;;  %5090 = vst [vmem:[%s8159_s4 + $0x10] sm:$0xff] %v4942_v13   ;;  %v4987_v5 = vpack.c.bf16 %v7763_v18, %v7757_v62 }
 0x421   :  { %v4962_v22 = vpack.c.bf16 %v8474_v43, %v8473_v21  ;;  %v8475_v41 = vld [vmem:[#allocation50_spill] sm:$0xff]  ;;  %v4972_v51 = vpack.c.bf16 %v8478_v32, %v8477_v7  ;;  %5091 = vst [vmem:[%s8159_s4 + $0x18] sm:$0xff] %v4947_v63   ;;  %5092 = vst [vmem:[%s8159_s4 + $0x20] sm:$0xff] %v4952_v52   ;;  %v4992_v31 = vpack.c.bf16 %v7775_v0, %v7769_v53 }
 0x422   :  { %v8476_v9 = vld [vmem:[#allocation54_spill] sm:$0xff]  ;;  %5093 = vst [vmem:[%s8159_s4 + $0x28] sm:$0xff] %v4957_v25   ;;  %v4997_v35 = vpack.c.bf16 %v7787_v6, %v7781_v60  ;;  %5097 = vst [vmem:[%s8159_s4 + $0x48] sm:$0xff] %v4977_v26   ;;  %v5012_v62 = vpack.c.bf16 %v7823_v40, %v7817_v55  ;;  %v5017_v18 = vpack.c.bf16 %v7835_v16, %v7829_v48 }
 0x423   :  { %v4967_v50 = vpack.c.bf16 %v8476_v9, %v8475_v41  ;;  %5094 = vst [vmem:[%s8159_s4 + $0x30] sm:$0xff] %v4962_v22   ;;  %5096 = vst [vmem:[%s8159_s4 + $0x40] sm:$0xff] %v4972_v51   ;;  %v5022_v53 = vpack.c.bf16 %v7847_v14, %v7841_v2  ;;  %v5027_v0 = vpack.c.bf16 %v7859_v29, %v7853_v38 }
 0x424   :  { %5098 = vst [vmem:[%s8159_s4 + $0x50] sm:$0xff] %v4982_v42   ;;  %5099 = vst [vmem:[%s8159_s4 + $0x58] sm:$0xff] %v4987_v5   ;;  %v5032_v60 = vpack.c.bf16 %v7871_v56, %v7865_v37  ;;  %v5037_v6 = vpack.c.bf16 %v7883_v30, %v7877_v1  ;;  %v5042_v11 = vpack.c.bf16 %v7895_v20, %v7889_v10 }
 0x425   :  { %5095 = vst [vmem:[%s8159_s4 + $0x38] sm:$0xff] %v4967_v50   ;;  %5100 = vst [vmem:[%s8159_s4 + $0x60] sm:$0xff] %v4992_v31   ;;  %v5047_v17 = vpack.c.bf16 %v7907_v24, %v7901_v47  ;;  %v5052_v23 = vpack.c.bf16 %v7919_v46, %v7913_v61  ;;  %v5057_v28 = vpack.c.bf16 %v7931_v12, %v7925_v34  ;;  %v8479_v2 = vld [vmem:[#allocation32_spill] sm:$0xff]  ;;  %v8480_v38 = vld [vmem:[#allocation27_spill] sm:$0xff] }
 0x426   :  { %5101 = vst [vmem:[%s8159_s4 + $0x68] sm:$0xff] %v4997_v35   ;;  %5102 = vst [vmem:[%s8159_s4 + $0x70] sm:$0xff] %v5002_v8   ;;  %v5062_v55 = vpack.c.bf16 %v7943_v59, %v7937_v19  ;;  %v5067_v40 = vpack.c.bf16 %v7953_v36, %v7948_v15  ;;  %v5072_v48 = vpack.c.bf16 %v7963_v3, %v7958_v45 }
 0x427   :  { %5103 = vst [vmem:[%s8159_s4 + $0x78] sm:$0xff] %v5007_v39   ;;  %5104 = vst [vmem:[%s8159_s4 + $0x80] sm:$0xff] %v5012_v62   ;;  %v5077_v16 = vpack.c.bf16 %v7973_v27, %v7968_v58  ;;  %v5082_v14 = vpack.c.bf16 %v8479_v2, %v7978_v44  ;;  %v5087_v29 = vpack.c.bf16 %v7993_v4, %v8480_v38 }
 0x428   :  { %5105 = vst [vmem:[%s8159_s4 + $0x88] sm:$0xff] %v5017_v18   ;;  %5106 = vst [vmem:[%s8159_s4 + $0x90] sm:$0xff] %v5022_v53  }
 0x429   :  { %5107 = vst [vmem:[%s8159_s4 + $0x98] sm:$0xff] %v5027_v0   ;;  %5108 = vst [vmem:[%s8159_s4 + $0xa0] sm:$0xff] %v5032_v60  }
 0x42a   :  { %5109 = vst [vmem:[%s8159_s4 + $0xa8] sm:$0xff] %v5037_v6   ;;  %5110 = vst [vmem:[%s8159_s4 + $0xb0] sm:$0xff] %v5042_v11  }
 0x42b   :  { %5111 = vst [vmem:[%s8159_s4 + $0xb8] sm:$0xff] %v5047_v17   ;;  %5112 = vst [vmem:[%s8159_s4 + $0xc0] sm:$0xff] %v5052_v23  }
 0x42c   :  { %5113 = vst [vmem:[%s8159_s4 + $0xc8] sm:$0xff] %v5057_v28   ;;  %5114 = vst [vmem:[%s8159_s4 + $0xd0] sm:$0xff] %v5062_v55  }
 0x42d   :  { %5115 = vst [vmem:[%s8159_s4 + $0xd8] sm:$0xff] %v5067_v40   ;;  %5116 = vst [vmem:[%s8159_s4 + $0xe0] sm:$0xff] %v5072_v48  }
 0x42e   :  { %5117 = vst [vmem:[%s8159_s4 + $0xe8] sm:$0xff] %v5077_v16   ;;  %5118 = vst [vmem:[%s8159_s4 + $0xf0] sm:$0xff] %v5082_v14  }
 0x42f   :  { %5119 = vst [vmem:[%s8159_s4 + $0xf8] sm:$0xff] %v5087_v29  }

// kernel: discriminator_forward.6
= control target key start
LH: loop header
LB: loop body
LE: loop exit
PB: predicated region body
PF: predicated region fallthrough
CT: control target
= control target key end

     0   :  { %s3276_s15 = smov 0   ;;  %s3278_s16 = smov 0   ;;  %s4010_s0 = inlined_call_operand.vmem [shape: bf16[128,2048], index: 0, kind: input, shape index: {}]   ;;  %s4011_s1 = inlined_call_operand.vmem [shape: bf16[2048,256], index: 1, kind: input, shape index: {}]   ;;  %s4012_s2 = inlined_call_operand.vmem [shape: f32[1,256], index: 2, kind: input, shape index: {}]   ;;  %s4013_s3 = inlined_call_operand.vmem [shape: f32[1,256], index: 3, kind: input, shape index: {}]   ;;  %s4014_s4 = inlined_call_operand.vmem [shape: bf16[128,256], index: 4, kind: output, shape index: {}]  }
   0x1   :  { %s3280_s17 = smov 0  }
   0x2 LB: > { %s3292_s18 = sadd.s32 4294967295, %s3247_s17   ;;  %s3295_s19 = sadd.s32 1, %s3247_s17   ;;  %s3247_s17 = sphi %s3280_s17, %s4023_s17   ;;  %s3243_s16 = sphi %s3278_s16, %s4022_s16   ;;  %s3239_s15 = sphi %s3276_s15, %s4021_s15  }
   0x3   : > { %s18_s20 = ssub.s32 %s3247_s17, %s3295_s19  ;;  %s21_s21 = sadd.s32 1, %s3243_s16 }
   0x4   : > { %p19_p0 = scmp.eq.s32.totalorder %s18_s20, 0  ;;  %p28_p1 = scmp.ne.s32.totalorder %s3243_s16, %s3239_s15 }
   0x5   : > { %p29_p2 = scmp.eq.s32.totalorder %s3247_s17, 0  ;;  %p2668_p4 = scmp.ge.s32.totalorder %s3247_s17, 2 }
   0x6   : > { %s3304_s22 = scalar_select %p19_p0, %s3243_s16, %s21_s21  }
   0x7   : > { %p30_p3 = por %p29_p2, %p28_p1  ;;  %149 = sbr.rel (%p2668_p4) target bundleno = 50 (0x32), region = 24 }
   0xe   : > { %152 = sbr.rel (!%p30_p3) target bundleno = 50 (0x32), region = 28  ;;  %s154_s23 = sand.u32 (%p30_p3), 1, %s3243_s16  }
   0xf   : > { %s2889_s24 = sshll.u32 (%p30_p3), %s3247_s17, 5  ;;  %s2669_s25 = sshll.u32 (%p30_p3), %s154_s23, 9 }
  0x10   : > { %s3312_s28 = scalar_lea.vmem (%p30_p3), %s4010_s0, %s2889_s24  ;;  %s3317_s29 = scalar_lea.vmem (%p30_p3), [#allocation3], %s2669_s25 }
  0x11   : > { %v172_v0 = vld [vmem:[%s3312_s28] sm:$0xff] (%p30_p3)  ;;  %v174_v1 = vld [vmem:[%s3312_s28 + $0x8] sm:$0xff] (%p30_p3)  ;;  %v176_v2 = vld [vmem:[%s3312_s28 + $0x10] sm:$0xff] (%p30_p3) }
  0x12   : > { %173 = vst [vmem:[%s3317_s29] sm:$0xff] (%p30_p3), %v172_v0  ;;  %175 = vst [vmem:[%s3317_s29 + $0x8] sm:$0xff] (%p30_p3), %v174_v1  ;;  %v178_v3 = vld [vmem:[%s3312_s28 + $0x18] sm:$0xff] (%p30_p3)  ;;  %v180_v4 = vld [vmem:[%s3312_s28 + $0x40] sm:$0xff] (%p30_p3) }
  0x13   : > { %177 = vst [vmem:[%s3317_s29 + $0x10] sm:$0xff] (%p30_p3), %v176_v2  ;;  %v182_v5 = vld [vmem:[%s3312_s28 + $0x48] sm:$0xff] (%p30_p3)  ;;  %179 = vst [vmem:[%s3317_s29 + $0x18] sm:$0xff] (%p30_p3), %v178_v3  ;;  %v184_v6 = vld [vmem:[%s3312_s28 + $0x50] sm:$0xff] (%p30_p3) }
  0x14   : > { %181 = vst [vmem:[%s3317_s29 + $0x20] sm:$0xff] (%p30_p3), %v180_v4  ;;  %183 = vst [vmem:[%s3317_s29 + $0x28] sm:$0xff] (%p30_p3), %v182_v5  ;;  %v186_v7 = vld [vmem:[%s3312_s28 + $0x58] sm:$0xff] (%p30_p3)  ;;  %v188_v8 = vld [vmem:[%s3312_s28 + $0x80] sm:$0xff] (%p30_p3) }
  0x15   : > { %185 = vst [vmem:[%s3317_s29 + $0x30] sm:$0xff] %v184_v6  ;;  %187 = vst [vmem:[%s3317_s29 + $0x38] sm:$0xff] %v186_v7  ;;  %v190_v9 = vld [vmem:[%s3312_s28 + $0x88] sm:$0xff]  ;;  %v192_v10 = vld [vmem:[%s3312_s28 + $0x90] sm:$0xff] }
  0x16   : > { %189 = vst [vmem:[%s3317_s29 + $0x40] sm:$0xff] %v188_v8  ;;  %v194_v11 = vld [vmem:[%s3312_s28 + $0x98] sm:$0xff]  ;;  %191 = vst [vmem:[%s3317_s29 + $0x48] sm:$0xff] %v190_v9  ;;  %v196_v12 = vld [vmem:[%s3312_s28 + $0xc0] sm:$0xff] }
  0x17   : > { %193 = vst [vmem:[%s3317_s29 + $0x50] sm:$0xff] %v192_v10  ;;  %195 = vst [vmem:[%s3317_s29 + $0x58] sm:$0xff] %v194_v11  ;;  %v198_v13 = vld [vmem:[%s3312_s28 + $0xc8] sm:$0xff]  ;;  %v200_v14 = vld [vmem:[%s3312_s28 + $0xd0] sm:$0xff] }
  0x18   : > { %197 = vst [vmem:[%s3317_s29 + $0x60] sm:$0xff] %v196_v12  ;;  %199 = vst [vmem:[%s3317_s29 + $0x68] sm:$0xff] %v198_v13  ;;  %v202_v15 = vld [vmem:[%s3312_s28 + $0xd8] sm:$0xff]  ;;  %v204_v16 = vld [vmem:[%s3312_s28 + $0x100] sm:$0xff] }
  0x19   : > { %201 = vst [vmem:[%s3317_s29 + $0x70] sm:$0xff] %v200_v14  ;;  %v206_v17 = vld [vmem:[%s3312_s28 + $0x108] sm:$0xff]  ;;  %203 = vst [vmem:[%s3317_s29 + $0x78] sm:$0xff] %v202_v15  ;;  %v208_v18 = vld [vmem:[%s3312_s28 + $0x110] sm:$0xff] }
  0x1a   : > { %205 = vst [vmem:[%s3317_s29 + $0x80] sm:$0xff] %v204_v16  ;;  %207 = vst [vmem:[%s3317_s29 + $0x88] sm:$0xff] %v206_v17  ;;  %v210_v19 = vld [vmem:[%s3312_s28 + $0x118] sm:$0xff]  ;;  %v212_v20 = vld [vmem:[%s3312_s28 + $0x140] sm:$0xff] }
  0x1b   : > { %209 = vst [vmem:[%s3317_s29 + $0x90] sm:$0xff] %v208_v18  ;;  %211 = vst [vmem:[%s3317_s29 + $0x98] sm:$0xff] %v210_v19  ;;  %v214_v21 = vld [vmem:[%s3312_s28 + $0x148] sm:$0xff]  ;;  %v216_v22 = vld [vmem:[%s3312_s28 + $0x150] sm:$0xff] }
  0x1c   : > { %213 = vst [vmem:[%s3317_s29 + $0xa0] sm:$0xff] %v212_v20  ;;  %v218_v23 = vld [vmem:[%s3312_s28 + $0x158] sm:$0xff]  ;;  %215 = vst [vmem:[%s3317_s29 + $0xa8] sm:$0xff] %v214_v21  ;;  %v220_v24 = vld [vmem:[%s3312_s28 + $0x180] sm:$0xff] }
  0x1d   : > { %217 = vst [vmem:[%s3317_s29 + $0xb0] sm:$0xff] %v216_v22  ;;  %219 = vst [vmem:[%s3317_s29 + $0xb8] sm:$0xff] %v218_v23  ;;  %v222_v25 = vld [vmem:[%s3312_s28 + $0x188] sm:$0xff]  ;;  %v224_v26 = vld [vmem:[%s3312_s28 + $0x190] sm:$0xff] }
  0x1e   : > { %221 = vst [vmem:[%s3317_s29 + $0xc0] sm:$0xff] %v220_v24  ;;  %223 = vst [vmem:[%s3317_s29 + $0xc8] sm:$0xff] %v222_v25  ;;  %v226_v27 = vld [vmem:[%s3312_s28 + $0x198] sm:$0xff]  ;;  %v228_v28 = vld [vmem:[%s3312_s28 + $0x1c0] sm:$0xff] }
  0x1f   : > { %225 = vst [vmem:[%s3317_s29 + $0xd0] sm:$0xff] %v224_v26  ;;  %v230_v29 = vld [vmem:[%s3312_s28 + $0x1c8] sm:$0xff]  ;;  %227 = vst [vmem:[%s3317_s29 + $0xd8] sm:$0xff] %v226_v27  ;;  %v232_v30 = vld [vmem:[%s3312_s28 + $0x1d0] sm:$0xff] }
  0x20   : > { %229 = vst [vmem:[%s3317_s29 + $0xe0] sm:$0xff] %v228_v28  ;;  %231 = vst [vmem:[%s3317_s29 + $0xe8] sm:$0xff] %v230_v29  ;;  %v234_v31 = vld [vmem:[%s3312_s28 + $0x1d8] sm:$0xff]  ;;  %v236_v32 = vld [vmem:[%s3312_s28 + $0x200] sm:$0xff] }
  0x21   : > { %233 = vst [vmem:[%s3317_s29 + $0xf0] sm:$0xff] %v232_v30  ;;  %235 = vst [vmem:[%s3317_s29 + $0xf8] sm:$0xff] %v234_v31  ;;  %v238_v33 = vld [vmem:[%s3312_s28 + $0x208] sm:$0xff]  ;;  %v240_v34 = vld [vmem:[%s3312_s28 + $0x210] sm:$0xff] }
  0x22   : > { %237 = vst [vmem:[%s3317_s29 + $0x100] sm:$0xff] %v236_v32  ;;  %v242_v35 = vld [vmem:[%s3312_s28 + $0x218] sm:$0xff]  ;;  %239 = vst [vmem:[%s3317_s29 + $0x108] sm:$0xff] %v238_v33  ;;  %v244_v36 = vld [vmem:[%s3312_s28 + $0x240] sm:$0xff] }
  0x23   : > { %241 = vst [vmem:[%s3317_s29 + $0x110] sm:$0xff] %v240_v34  ;;  %243 = vst [vmem:[%s3317_s29 + $0x118] sm:$0xff] %v242_v35  ;;  %v246_v37 = vld [vmem:[%s3312_s28 + $0x248] sm:$0xff]  ;;  %v248_v38 = vld [vmem:[%s3312_s28 + $0x250] sm:$0xff] }
  0x24   : > { %245 = vst [vmem:[%s3317_s29 + $0x120] sm:$0xff] %v244_v36  ;;  %247 = vst [vmem:[%s3317_s29 + $0x128] sm:$0xff] %v246_v37  ;;  %v250_v39 = vld [vmem:[%s3312_s28 + $0x258] sm:$0xff]  ;;  %v252_v40 = vld [vmem:[%s3312_s28 + $0x280] sm:$0xff] }
  0x25   : > { %249 = vst [vmem:[%s3317_s29 + $0x130] sm:$0xff] %v248_v38  ;;  %v254_v41 = vld [vmem:[%s3312_s28 + $0x288] sm:$0xff]  ;;  %251 = vst [vmem:[%s3317_s29 + $0x138] sm:$0xff] %v250_v39  ;;  %v256_v42 = vld [vmem:[%s3312_s28 + $0x290] sm:$0xff] }
  0x26   : > { %253 = vst [vmem:[%s3317_s29 + $0x140] sm:$0xff] %v252_v40  ;;  %255 = vst [vmem:[%s3317_s29 + $0x148] sm:$0xff] %v254_v41  ;;  %v258_v43 = vld [vmem:[%s3312_s28 + $0x298] sm:$0xff]  ;;  %v260_v44 = vld [vmem:[%s3312_s28 + $0x2c0] sm:$0xff] }
  0x27   : > { %257 = vst [vmem:[%s3317_s29 + $0x150] sm:$0xff] %v256_v42  ;;  %259 = vst [vmem:[%s3317_s29 + $0x158] sm:$0xff] %v258_v43  ;;  %v262_v45 = vld [vmem:[%s3312_s28 + $0x2c8] sm:$0xff]  ;;  %v264_v46 = vld [vmem:[%s3312_s28 + $0x2d0] sm:$0xff] }
  0x28   : > { %261 = vst [vmem:[%s3317_s29 + $0x160] sm:$0xff] %v260_v44  ;;  %v266_v47 = vld [vmem:[%s3312_s28 + $0x2d8] sm:$0xff]  ;;  %263 = vst [vmem:[%s3317_s29 + $0x168] sm:$0xff] %v262_v45  ;;  %v268_v48 = vld [vmem:[%s3312_s28 + $0x300] sm:$0xff] }
  0x29   : > { %265 = vst [vmem:[%s3317_s29 + $0x170] sm:$0xff] %v264_v46  ;;  %267 = vst [vmem:[%s3317_s29 + $0x178] sm:$0xff] %v266_v47  ;;  %v270_v49 = vld [vmem:[%s3312_s28 + $0x308] sm:$0xff]  ;;  %v272_v50 = vld [vmem:[%s3312_s28 + $0x310] sm:$0xff] }
  0x2a   : > { %269 = vst [vmem:[%s3317_s29 + $0x180] sm:$0xff] %v268_v48  ;;  %271 = vst [vmem:[%s3317_s29 + $0x188] sm:$0xff] %v270_v49  ;;  %v274_v51 = vld [vmem:[%s3312_s28 + $0x318] sm:$0xff]  ;;  %v276_v52 = vld [vmem:[%s3312_s28 + $0x340] sm:$0xff] }
  0x2b   : > { %273 = vst [vmem:[%s3317_s29 + $0x190] sm:$0xff] %v272_v50  ;;  %v278_v53 = vld [vmem:[%s3312_s28 + $0x348] sm:$0xff]  ;;  %275 = vst [vmem:[%s3317_s29 + $0x198] sm:$0xff] %v274_v51  ;;  %v280_v54 = vld [vmem:[%s3312_s28 + $0x350] sm:$0xff] }
  0x2c   : > { %277 = vst [vmem:[%s3317_s29 + $0x1a0] sm:$0xff] %v276_v52  ;;  %279 = vst [vmem:[%s3317_s29 + $0x1a8] sm:$0xff] %v278_v53  ;;  %v282_v55 = vld [vmem:[%s3312_s28 + $0x358] sm:$0xff]  ;;  %v284_v56 = vld [vmem:[%s3312_s28 + $0x380] sm:$0xff] }
  0x2d   : > { %281 = vst [vmem:[%s3317_s29 + $0x1b0] sm:$0xff] %v280_v54  ;;  %283 = vst [vmem:[%s3317_s29 + $0x1b8] sm:$0xff] %v282_v55  ;;  %v286_v57 = vld [vmem:[%s3312_s28 + $0x388] sm:$0xff]  ;;  %v288_v58 = vld [vmem:[%s3312_s28 + $0x390] sm:$0xff] }
  0x2e   : > { %285 = vst [vmem:[%s3317_s29 + $0x1c0] sm:$0xff] %v284_v56  ;;  %v290_v59 = vld [vmem:[%s3312_s28 + $0x398] sm:$0xff]  ;;  %287 = vst [vmem:[%s3317_s29 + $0x1c8] sm:$0xff] %v286_v57  ;;  %v292_v60 = vld [vmem:[%s3312_s28 + $0x3c0] sm:$0xff] }
  0x2f   : > { %289 = vst [vmem:[%s3317_s29 + $0x1d0] sm:$0xff] %v288_v58  ;;  %291 = vst [vmem:[%s3317_s29 + $0x1d8] sm:$0xff] %v290_v59  ;;  %v294_v61 = vld [vmem:[%s3312_s28 + $0x3c8] sm:$0xff]  ;;  %v296_v62 = vld [vmem:[%s3312_s28 + $0x3d0] sm:$0xff] }
  0x30   : > { %293 = vst [vmem:[%s3317_s29 + $0x1e0] sm:$0xff] %v292_v60  ;;  %295 = vst [vmem:[%s3317_s29 + $0x1e8] sm:$0xff] %v294_v61  ;;  %v298_v63 = vld [vmem:[%s3312_s28 + $0x3d8] sm:$0xff] }
  0x31   : > { %297 = vst [vmem:[%s3317_s29 + $0x1f0] sm:$0xff] %v296_v62  ;;  %299 = vst [vmem:[%s3317_s29 + $0x1f8] sm:$0xff] %v298_v63 }
  0x32 PF: > { %p2672_p5 = scmp.ge.s32.totalorder %s3247_s17, 1  ;;  %p314_p6 = scmp.lt.s32.totalorder %s3247_s17, 3 }
  0x34   : > { %p315_p7 = pnand %p2672_p5, %p314_p6 }
  0x35   : > { %s321_s30 = sand.u32 (!%p315_p7), 1, %s3239_s15   ;;  %s2674_s5 = sshll.u32 (!%p315_p7), %s3292_s18, 7 }
  0x36   : > { %318 = sbr.rel (%p315_p7) target bundleno = 656 (0x290), region = 55  ;;  %s2673_s6 = sshll.u32 (!%p315_p7), %s321_s30, 9 }
  0x37   : > { %p349_p8 = scmp.lt.s32.totalorder (!%p315_p7), %s2674_s5, 255  ;;  %s3453_s11 = scalar_lea.vmem (!%p315_p7), [#allocation3], %s2673_s6 }
  0x38   : > { %p2677_p9 = scmp.ne.s32.totalorder (!%p315_p7), %s3292_s18, 0 }
  0x3d   : > { %s4025_s5 = smov (!%p349_p8, %s2674_s5), 255  ;;  %358 = sbr.rel (%p2677_p9) target bundleno = 79 (0x4f), region = 63 }
  0x3e   : > { %s2890_s7 = sshll.u32 %s4025_s5, 3  ;;  %v3249_v0 = vmov (!%p2677_p9), 0.0  }
  0x3f   : > { %s3451_s10 = scalar_lea.vmem %s4011_s1, %s2890_s7  ;;  %359 = vst [vmem:[#allocation2] sm:$0xff] (!%p2677_p9), %v3249_v0  ;;  %360 = vst [vmem:[#allocation2 + $0x8] sm:$0xff] (!%p2677_p9), %v3249_v0 }
  0x40   : > { %361 = vst [vmem:[#allocation2 + $0x10] sm:$0xff] (!%p2677_p9), %v3249_v0  ;;  %362 = vst [vmem:[#allocation2 + $0x18] sm:$0xff] (!%p2677_p9), %v3249_v0 }
  0x41   : > { %363 = vst [vmem:[#allocation2 + $0x20] sm:$0xff] (!%p2677_p9), %v3249_v0  ;;  %364 = vst [vmem:[#allocation2 + $0x28] sm:$0xff] (!%p2677_p9), %v3249_v0 }
  0x42   : > { %365 = vst [vmem:[#allocation2 + $0x30] sm:$0xff] (!%p2677_p9), %v3249_v0  ;;  %366 = vst [vmem:[#allocation2 + $0x38] sm:$0xff] (!%p2677_p9), %v3249_v0 }
  0x43   : > { %367 = vst [vmem:[#allocation2 + $0x40] sm:$0xff] (!%p2677_p9), %v3249_v0  ;;  %368 = vst [vmem:[#allocation2 + $0x48] sm:$0xff] (!%p2677_p9), %v3249_v0 }
  0x44   : > { %369 = vst [vmem:[#allocation2 + $0x50] sm:$0xff] %v3249_v0  ;;  %370 = vst [vmem:[#allocation2 + $0x58] sm:$0xff] %v3249_v0 }
  0x45   : > { %371 = vst [vmem:[#allocation2 + $0x60] sm:$0xff] %v3249_v0  ;;  %372 = vst [vmem:[#allocation2 + $0x68] sm:$0xff] %v3249_v0 }
  0x46   : > { %373 = vst [vmem:[#allocation2 + $0x70] sm:$0xff] %v3249_v0  ;;  %374 = vst [vmem:[#allocation2 + $0x78] sm:$0xff] %v3249_v0 }
  0x47   : > { %375 = vst [vmem:[#allocation2 + $0x80] sm:$0xff] %v3249_v0  ;;  %376 = vst [vmem:[#allocation2 + $0x88] sm:$0xff] %v3249_v0 }
  0x48   : > { %377 = vst [vmem:[#allocation2 + $0x90] sm:$0xff] %v3249_v0  ;;  %378 = vst [vmem:[#allocation2 + $0x98] sm:$0xff] %v3249_v0 }
  0x49   : > { %379 = vst [vmem:[#allocation2 + $0xa0] sm:$0xff] %v3249_v0  ;;  %380 = vst [vmem:[#allocation2 + $0xa8] sm:$0xff] %v3249_v0 }
  0x4a   : > { %381 = vst [vmem:[#allocation2 + $0xb0] sm:$0xff] %v3249_v0  ;;  %382 = vst [vmem:[#allocation2 + $0xb8] sm:$0xff] %v3249_v0 }
  0x4b   : > { %383 = vst [vmem:[#allocation2 + $0xc0] sm:$0xff] %v3249_v0  ;;  %384 = vst [vmem:[#allocation2 + $0xc8] sm:$0xff] %v3249_v0 }
  0x4c   : > { %385 = vst [vmem:[#allocation2 + $0xd0] sm:$0xff] %v3249_v0  ;;  %386 = vst [vmem:[#allocation2 + $0xd8] sm:$0xff] %v3249_v0 }
  0x4d   : > { %387 = vst [vmem:[#allocation2 + $0xe0] sm:$0xff] %v3249_v0  ;;  %388 = vst [vmem:[#allocation2 + $0xe8] sm:$0xff] %v3249_v0 }
  0x4e   : > { %389 = vst [vmem:[#allocation2 + $0xf0] sm:$0xff] %v3249_v0  ;;  %390 = vst [vmem:[#allocation2 + $0xf8] sm:$0xff] %v3249_v0 }
  0x4f PF: > { %v3029_v1 = vld [vmem:[%s3451_s10 + $0x4] ss:$8 sps:$4 sm:$0xff]   ;;  %v3033_v3 = vld [vmem:[%s3451_s10] ss:$8 sps:$4 sm:$0xff]   ;;  %v3035_v5 = vld [vmem:[%s3451_s10 + $0x14] ss:$8 sps:$4 sm:$0xff]  }
  0x50   : > { %v3031_v2 = vld [vmem:[%s3451_s10 + $0x204] ss:$8 sps:$4 sm:$0xff]   ;;  %1575 = vmatprep.subr.bf16.mxu1 %v3029_v1  ;;  %v3034_v4 = vld [vmem:[%s3451_s10 + $0x200] ss:$8 sps:$4 sm:$0xff]   ;;  %v3037_v6 = vld [vmem:[%s3451_s10 + $0x214] ss:$8 sps:$4 sm:$0xff]  }
  0x51   : > { %1801 = vmatprep.subr.bf16.mxu0 %v3031_v2  ;;  %1576 = vmatpush1.bf16.msra.mxu1 %v3033_v3  ;;  %v3039_v7 = vld [vmem:[%s3451_s10 + $0x10] ss:$8 sps:$4 sm:$0xff]   ;;  %v3041_v9 = vld [vmem:[%s3451_s10 + $0x24] ss:$8 sps:$4 sm:$0xff]   ;;  %v3045_v11 = vld [vmem:[%s3451_s10 + $0x20] ss:$8 sps:$4 sm:$0xff]  }
  0x52   : > { %1802 = vmatpush1.bf16.msra.mxu0 %v3034_v4  ;;  %1577 = vmatprep.subr.bf16.mxu1 %v3035_v5  ;;  %v3040_v8 = vld [vmem:[%s3451_s10 + $0x210] ss:$8 sps:$4 sm:$0xff]   ;;  %v3043_v10 = vld [vmem:[%s3451_s10 + $0x224] ss:$8 sps:$4 sm:$0xff]   ;;  %v3046_v12 = vld [vmem:[%s3451_s10 + $0x220] ss:$8 sps:$4 sm:$0xff]  }
  0x53   : > { %1803 = vmatprep.subr.bf16.mxu0 %v3037_v6  ;;  %v3047_v13 = vld [vmem:[%s3451_s10 + $0x34] ss:$8 sps:$4 sm:$0xff]   ;;  %v3051_v15 = vld [vmem:[%s3451_s10 + $0x30] ss:$8 sps:$4 sm:$0xff]   ;;  %v3053_v17 = vld [vmem:[%s3451_s10 + $0x44] ss:$8 sps:$4 sm:$0xff]  }
  0x54   : > { %v3049_v14 = vld [vmem:[%s3451_s10 + $0x234] ss:$8 sps:$4 sm:$0xff]   ;;  %v3052_v16 = vld [vmem:[%s3451_s10 + $0x230] ss:$8 sps:$4 sm:$0xff]   ;;  %v3055_v18 = vld [vmem:[%s3451_s10 + $0x244] ss:$8 sps:$4 sm:$0xff]  }
  0x55   : > { %1578 = vmatpush1.bf16.msra.mxu1 %v3039_v7  ;;  %v3057_v19 = vld [vmem:[%s3451_s10 + $0x40] ss:$8 sps:$4 sm:$0xff]   ;;  %v3059_v21 = vld [vmem:[%s3451_s10 + $0x54] ss:$8 sps:$4 sm:$0xff]   ;;  %v3063_v23 = vld [vmem:[%s3451_s10 + $0x50] ss:$8 sps:$4 sm:$0xff]  }
  0x56   : > { %1804 = vmatpush1.bf16.msra.mxu0 %v3040_v8  ;;  %1579 = vmatprep.subr.bf16.mxu1 %v3041_v9  ;;  %v3058_v20 = vld [vmem:[%s3451_s10 + $0x240] ss:$8 sps:$4 sm:$0xff]   ;;  %v3061_v22 = vld [vmem:[%s3451_s10 + $0x254] ss:$8 sps:$4 sm:$0xff]   ;;  %v3064_v24 = vld [vmem:[%s3451_s10 + $0x250] ss:$8 sps:$4 sm:$0xff]  }
  0x57   : > { %1805 = vmatprep.subr.bf16.mxu0 %v3043_v10  ;;  %v3065_v25 = vld [vmem:[%s3451_s10 + $0x64] ss:$8 sps:$4 sm:$0xff]   ;;  %v3069_v27 = vld [vmem:[%s3451_s10 + $0x60] ss:$8 sps:$4 sm:$0xff]   ;;  %v3071_v29 = vld [vmem:[%s3451_s10 + $0x74] ss:$8 sps:$4 sm:$0xff]  }
  0x58   : > { %v3067_v26 = vld [vmem:[%s3451_s10 + $0x264] ss:$8 sps:$4 sm:$0xff]   ;;  %v3070_v28 = vld [vmem:[%s3451_s10 + $0x260] ss:$8 sps:$4 sm:$0xff]   ;;  %v3073_v30 = vld [vmem:[%s3451_s10 + $0x274] ss:$8 sps:$4 sm:$0xff]  }
  0x59   : > { %1580 = vmatpush1.bf16.msra.mxu1 %v3045_v11  ;;  %v3075_v31 = vld [vmem:[%s3451_s10 + $0x70] ss:$8 sps:$4 sm:$0xff]   ;;  %v3077_v33 = vld [vmem:[%s3451_s10 + $0x84] ss:$8 sps:$4 sm:$0xff]   ;;  %v3081_v35 = vld [vmem:[%s3451_s10 + $0x80] ss:$8 sps:$4 sm:$0xff]  }
  0x5a   : > { %1806 = vmatpush1.bf16.msra.mxu0 %v3046_v12  ;;  %1581 = vmatprep.subr.bf16.mxu1 %v3047_v13  ;;  %v3076_v32 = vld [vmem:[%s3451_s10 + $0x270] ss:$8 sps:$4 sm:$0xff]   ;;  %v3079_v34 = vld [vmem:[%s3451_s10 + $0x284] ss:$8 sps:$4 sm:$0xff]   ;;  %v3082_v36 = vld [vmem:[%s3451_s10 + $0x280] ss:$8 sps:$4 sm:$0xff]  }
  0x5b   : > { %1807 = vmatprep.subr.bf16.mxu0 %v3049_v14  ;;  %v3083_v37 = vld [vmem:[%s3451_s10 + $0x94] ss:$8 sps:$4 sm:$0xff]   ;;  %v3087_v39 = vld [vmem:[%s3451_s10 + $0x90] ss:$8 sps:$4 sm:$0xff]   ;;  %v3089_v41 = vld [vmem:[%s3451_s10 + $0xa4] ss:$8 sps:$4 sm:$0xff]  }
  0x5c   : > { %v3085_v38 = vld [vmem:[%s3451_s10 + $0x294] ss:$8 sps:$4 sm:$0xff]   ;;  %v3088_v40 = vld [vmem:[%s3451_s10 + $0x290] ss:$8 sps:$4 sm:$0xff]   ;;  %v3091_v42 = vld [vmem:[%s3451_s10 + $0x2a4] ss:$8 sps:$4 sm:$0xff]  }
  0x5d   : > { %1582 = vmatpush1.bf16.msra.mxu1 %v3051_v15  ;;  %v3093_v43 = vld [vmem:[%s3451_s10 + $0xa0] ss:$8 sps:$4 sm:$0xff]   ;;  %v3095_v45 = vld [vmem:[%s3451_s10 + $0xb4] ss:$8 sps:$4 sm:$0xff]   ;;  %v3099_v47 = vld [vmem:[%s3451_s10 + $0xb0] ss:$8 sps:$4 sm:$0xff]  }
  0x5e   : > { %1808 = vmatpush1.bf16.msra.mxu0 %v3052_v16  ;;  %1583 = vmatprep.subr.bf16.mxu1 %v3053_v17  ;;  %v3094_v44 = vld [vmem:[%s3451_s10 + $0x2a0] ss:$8 sps:$4 sm:$0xff]   ;;  %v3097_v46 = vld [vmem:[%s3451_s10 + $0x2b4] ss:$8 sps:$4 sm:$0xff]   ;;  %v3100_v48 = vld [vmem:[%s3451_s10 + $0x2b0] ss:$8 sps:$4 sm:$0xff]  }
  0x5f   : > { %1809 = vmatprep.subr.bf16.mxu0 %v3055_v18  ;;  %v423_v49 = vld [vmem:[%s3453_s11] sm:$0xff]  ;;  %v425_v51 = vld [vmem:[%s3453_s11 + $0x10] sm:$0xff]  ;;  %p2870_p10 = scmp.ne.s32.totalorder %s3292_s18, 1 }
  0x60   : > { %v427_v50 = vld [vmem:[%s3453_s11 + $0x20] sm:$0xff]  ;;  %v429_v52 = vld [vmem:[%s3453_s11 + $0x30] sm:$0xff] }
  0x61   : > { %1584 = vmatpush1.bf16.msra.mxu1 %v3057_v19  ;;  %v3101_v53 = vld [vmem:[%s3451_s10 + $0xc4] ss:$8 sps:$4 sm:$0xff]   ;;  %v2679_v54 = vcombine.high %v423_v49, %v427_v50  ;;  %v2683_v56 = vcombine.high %v425_v51, %v429_v52  ;;  %v3105_v57 = vld [vmem:[%s3451_s10 + $0xc0] ss:$8 sps:$4 sm:$0xff]   ;;  %v3107_v59 = vld [vmem:[%s3451_s10 + $0xd4] ss:$8 sps:$4 sm:$0xff]   ;;  %v2678_v12 = vcombine.low %v423_v49, %v427_v50  ;;  %v2682_v13 = vcombine.low %v425_v51, %v429_v52 }
  0x62   : > { %1810 = vmatpush1.bf16.msra.mxu0 %v3058_v20  ;;  %1585 = vmatprep.subr.bf16.mxu1 %v3059_v21  ;;  %v3103_v55 = vld [vmem:[%s3451_s10 + $0x2c4] ss:$8 sps:$4 sm:$0xff]   ;;  %v3106_v58 = vld [vmem:[%s3451_s10 + $0x2c0] ss:$8 sps:$4 sm:$0xff]   ;;  %v3109_v60 = vld [vmem:[%s3451_s10 + $0x2d4] ss:$8 sps:$4 sm:$0xff]  }
  0x63   : > { %1811 = vmatprep.subr.bf16.mxu0 %v3061_v22  ;;  %1607 = vmatprep.mubr.bf16.mxu1 %v2679_v54  ;;  %v3111_v61 = vld [vmem:[%s3451_s10 + $0xd0] ss:$8 sps:$4 sm:$0xff]   ;;  %v3113_v63 = vld [vmem:[%s3451_s10 + $0xe4] ss:$8 sps:$4 sm:$0xff]   ;;  %v3117_v1 = vld [vmem:[%s3451_s10 + $0xe0] ss:$8 sps:$4 sm:$0xff]  }
  0x64   : > { %1833 = vmatprep.mubr.bf16.mxu0 %v2683_v56  ;;  %v3112_v62 = vld [vmem:[%s3451_s10 + $0x2d0] ss:$8 sps:$4 sm:$0xff]   ;;  %v3115_v0 = vld [vmem:[%s3451_s10 + $0x2e4] ss:$8 sps:$4 sm:$0xff]   ;;  %v3118_v2 = vld [vmem:[%s3451_s10 + $0x2e0] ss:$8 sps:$4 sm:$0xff]  }
  0x65   : > { %1586 = vmatpush1.bf16.msra.mxu1 %v3063_v23  ;;  %v3119_v3 = vld [vmem:[%s3451_s10 + $0xf4] ss:$8 sps:$4 sm:$0xff]   ;;  %v3123_v5 = vld [vmem:[%s3451_s10 + $0xf0] ss:$8 sps:$4 sm:$0xff]   ;;  %v3127_v7 = vld [vmem:[%s3451_s10 + $0x104] ss:$8 sps:$4 sm:$0xff]  }
  0x66   : > { %1812 = vmatpush1.bf16.msra.mxu0 %v3064_v24  ;;  %1587 = vmatprep.subr.bf16.mxu1 %v3065_v25  ;;  %v3121_v4 = vld [vmem:[%s3451_s10 + $0x2f4] ss:$8 sps:$4 sm:$0xff]   ;;  %v3124_v6 = vld [vmem:[%s3451_s10 + $0x2f0] ss:$8 sps:$4 sm:$0xff]   ;;  %v3130_v8 = vld [vmem:[%s3451_s10 + $0x304] ss:$8 sps:$4 sm:$0xff]  }
  0x67   : > { %1813 = vmatprep.subr.bf16.mxu0 %v3067_v26  ;;  %v3125_v9 = vld [vmem:[%s3451_s10 + $0x100] ss:$8 sps:$4 sm:$0xff]   ;;  %v433_v15 = vld [vmem:[%s3453_s11 + $0x50] sm:$0xff]  ;;  %v3139_v23 = vld [vmem:[%s3451_s10 + $0x124] ss:$8 sps:$4 sm:$0xff]  }
  0x68   : > { %v3128_v10 = vld [vmem:[%s3451_s10 + $0x300] ss:$8 sps:$4 sm:$0xff]   ;;  %v437_v16 = vld [vmem:[%s3453_s11 + $0x70] sm:$0xff]  ;;  %v3142_v24 = vld [vmem:[%s3451_s10 + $0x324] ss:$8 sps:$4 sm:$0xff]  }
  0x69   : > { %1588 = vmatpush1.bf16.msra.mxu1 %v3069_v27  ;;  %v431_v11 = vld [vmem:[%s3453_s11 + $0x40] sm:$0xff]  ;;  %v3133_v17 = vld [vmem:[%s3451_s10 + $0x114] ss:$8 sps:$4 sm:$0xff]   ;;  %v2691_v20 = vcombine.high %v433_v15, %v437_v16  ;;  %v3131_v21 = vld [vmem:[%s3451_s10 + $0x110] ss:$8 sps:$4 sm:$0xff]  }
  0x6a   : > { %1814 = vmatpush1.bf16.msra.mxu0 %v3070_v28  ;;  %1589 = vmatprep.subr.bf16.mxu1 %v3071_v29  ;;  %v435_v14 = vld [vmem:[%s3453_s11 + $0x60] sm:$0xff]  ;;  %v3136_v18 = vld [vmem:[%s3451_s10 + $0x314] ss:$8 sps:$4 sm:$0xff]   ;;  %v3134_v22 = vld [vmem:[%s3451_s10 + $0x310] ss:$8 sps:$4 sm:$0xff]  }
  0x6b   : > { %1815 = vmatprep.subr.bf16.mxu0 %v3073_v30  ;;  %v2687_v19 = vcombine.high %v431_v11, %v435_v14  ;;  %v3137_v25 = vld [vmem:[%s3451_s10 + $0x120] ss:$8 sps:$4 sm:$0xff]   ;;  %v2686_v29 = vcombine.low %v431_v11, %v435_v14  ;;  %v2690_v30 = vcombine.low %v433_v15, %v437_v16  ;;  %v3157_v49 = vld [vmem:[%s3451_s10 + $0x154] ss:$8 sps:$4 sm:$0xff]   ;;  %v3158_v54 = vld [vmem:[%s3451_s10 + $0x350] ss:$8 sps:$4 sm:$0xff]  }
  0x6c   : > { %v3140_v26 = vld [vmem:[%s3451_s10 + $0x320] ss:$8 sps:$4 sm:$0xff]   ;;  %v3160_v50 = vld [vmem:[%s3451_s10 + $0x354] ss:$8 sps:$4 sm:$0xff]   ;;  %v3166_v56 = vld [vmem:[%s3451_s10 + $0x364] ss:$8 sps:$4 sm:$0xff]  }
  0x6d   : > { %1590 = vmatpush1.bf16.msra.mxu1 %v3075_v31  ;;  %v439_v27 = vld [vmem:[%s3453_s11 + $0x80] sm:$0xff]  ;;  %v441_v31 = vld [vmem:[%s3453_s11 + $0x90] sm:$0xff] }
  0x6e   : > { %1816 = vmatpush1.bf16.msra.mxu0 %v3076_v32  ;;  %1591 = vmatprep.subr.bf16.mxu1 %v3077_v33  ;;  %v443_v28 = vld [vmem:[%s3453_s11 + $0xa0] sm:$0xff]  ;;  %v445_v32 = vld [vmem:[%s3453_s11 + $0xb0] sm:$0xff] }
  0x6f   : > { %1817 = vmatprep.subr.bf16.mxu0 %v3079_v34  ;;  %v3145_v33 = vld [vmem:[%s3451_s10 + $0x134] ss:$8 sps:$4 sm:$0xff]   ;;  %v3173_v15 = vld [vmem:[%s3451_s10 + $0x180] ss:$8 sps:$4 sm:$0xff]  }
  0x70   : > { %v3148_v34 = vld [vmem:[%s3451_s10 + $0x334] ss:$8 sps:$4 sm:$0xff]   ;;  %v3176_v16 = vld [vmem:[%s3451_s10 + $0x380] ss:$8 sps:$4 sm:$0xff]  }
  0x71   : > { %1592 = vmatpush1.bf16.msra.mxu1 %v3081_v35  ;;  %v2695_v35 = vcombine.high %v439_v27, %v443_v28  ;;  %v469_v14 = vld [vmem:[%s3453_s11 + $0x170] sm:$0xff] }
  0x72   : > { %1818 = vmatpush1.bf16.msra.mxu0 %v3082_v36  ;;  %1593 = vmatprep.subr.bf16.mxu1 %v3083_v37  ;;  %v2699_v36 = vcombine.high %v441_v31, %v445_v32  ;;  %v3143_v37 = vld [vmem:[%s3451_s10 + $0x130] ss:$8 sps:$4 sm:$0xff]  }
  0x73   : > { %1819 = vmatprep.subr.bf16.mxu0 %v3085_v38  ;;  %v3146_v38 = vld [vmem:[%s3451_s10 + $0x330] ss:$8 sps:$4 sm:$0xff]  }
  0x75   : > { %1594 = vmatpush1.bf16.msra.mxu1 %v3087_v39  ;;  %v3151_v39 = vld [vmem:[%s3451_s10 + $0x144] ss:$8 sps:$4 sm:$0xff]  }
  0x76   : > { %1820 = vmatpush1.bf16.msra.mxu0 %v3088_v40  ;;  %1595 = vmatprep.subr.bf16.mxu1 %v3089_v41  ;;  %v3154_v40 = vld [vmem:[%s3451_s10 + $0x344] ss:$8 sps:$4 sm:$0xff]   ;;  %v3149_v41 = vld [vmem:[%s3451_s10 + $0x140] ss:$8 sps:$4 sm:$0xff]  }
  0x77   : > { %1821 = vmatprep.subr.bf16.mxu0 %v3091_v42  ;;  %v3152_v42 = vld [vmem:[%s3451_s10 + $0x340] ss:$8 sps:$4 sm:$0xff]  }
  0x79   : > { %1596 = vmatpush1.bf16.msra.mxu1 %v3093_v43  ;;  %v447_v43 = vld [vmem:[%s3453_s11 + $0xc0] sm:$0xff] }
  0x7a   : > { %1822 = vmatpush1.bf16.msra.mxu0 %v3094_v44  ;;  %1597 = vmatprep.subr.bf16.mxu1 %v3095_v45  ;;  %v451_v44 = vld [vmem:[%s3453_s11 + $0xe0] sm:$0xff]  ;;  %v2694_v45 = vcombine.low %v439_v27, %v443_v28 }
  0x7b   : > { %1823 = vmatprep.subr.bf16.mxu0 %v3097_v46  ;;  %v2698_v46 = vcombine.low %v441_v31, %v445_v32  ;;  %v2703_v51 = vcombine.high %v447_v43, %v451_v44  ;;  %v475_v28 = vld [vmem:[%s3453_s11 + $0x1a0] sm:$0xff] }
  0x7c   : > { %v3185_v31 = vld [vmem:[%s3451_s10 + $0x1a0] ss:$8 sps:$4 sm:$0xff]  }
  0x7d   : > { %1598 = vmatpush1.bf16.msra.mxu1 %v3099_v47  ;;  %v449_v47 = vld [vmem:[%s3453_s11 + $0xd0] sm:$0xff]  ;;  %v3188_v32 = vld [vmem:[%s3451_s10 + $0x3a0] ss:$8 sps:$4 sm:$0xff]  }
  0x7e   : > { %1824 = vmatpush1.bf16.msra.mxu0 %v3100_v48  ;;  %1599 = vmatprep.subr.bf16.mxu1 %v3101_v53  ;;  %v453_v48 = vld [vmem:[%s3453_s11 + $0xf0] sm:$0xff] }
  0x7f   : > { %1825 = vmatprep.subr.bf16.mxu0 %v3103_v55  ;;  %v2707_v52 = vcombine.high %v449_v47, %v453_v48  ;;  %v3155_v53 = vld [vmem:[%s3451_s10 + $0x150] ss:$8 sps:$4 sm:$0xff]   ;;  %v3163_v55 = vld [vmem:[%s3451_s10 + $0x164] ss:$8 sps:$4 sm:$0xff]  }
  0x81   : > { %1600 = vmatpush1.bf16.msra.mxu1 %v3105_v57  ;;  %v3161_v57 = vld [vmem:[%s3451_s10 + $0x160] ss:$8 sps:$4 sm:$0xff]  }
  0x82   : > { %1826 = vmatpush1.bf16.msra.mxu0 %v3106_v58  ;;  %1601 = vmatprep.subr.bf16.mxu1 %v3107_v59  ;;  %v455_v58 = vld [vmem:[%s3453_s11 + $0x100] sm:$0xff] }
  0x83   : > { %1827 = vmatprep.subr.bf16.mxu0 %v3109_v60  ;;  %v459_v59 = vld [vmem:[%s3453_s11 + $0x120] sm:$0xff]  ;;  %v2702_v60 = vcombine.low %v447_v43, %v451_v44 }
  0x84   : > { %v2710_v11 = vcombine.low %v455_v58, %v459_v59  ;;  %v483_v44 = vld [vmem:[%s3453_s11 + $0x1e0] sm:$0xff] }
  0x85   : > { %1602 = vmatpush1.bf16.msra.mxu1 %v3111_v61  ;;  %v2706_v61 = vcombine.low %v449_v47, %v453_v48  ;;  %v3197_v47 = vld [vmem:[%s3451_s10 + $0x1c0] ss:$8 sps:$4 sm:$0xff]  }
  0x86   : > { %1828 = vmatpush1.bf16.msra.mxu0 %v3112_v62  ;;  %1603 = vmatprep.subr.bf16.mxu1 %v3113_v63  ;;  %v457_v62 = vld [vmem:[%s3453_s11 + $0x110] sm:$0xff]  ;;  %v3200_v48 = vld [vmem:[%s3451_s10 + $0x3c0] ss:$8 sps:$4 sm:$0xff]  }
  0x87   : > { %1829 = vmatprep.subr.bf16.mxu0 %v3115_v0  ;;  %v461_v63 = vld [vmem:[%s3453_s11 + $0x130] sm:$0xff]  ;;  %v3164_v0 = vld [vmem:[%s3451_s10 + $0x360] ss:$8 sps:$4 sm:$0xff]  }
  0x89   : > { %1604 = vmatpush1.bf16.msra.mxu1 %v3117_v1  ;;  %v3169_v1 = vld [vmem:[%s3451_s10 + $0x174] ss:$8 sps:$4 sm:$0xff]  }
  0x8a   : > { %1830 = vmatpush1.bf16.msra.mxu0 %v3118_v2  ;;  %1605 = vmatprep.subr.bf16.mxu1 %v3119_v3  ;;  %v3172_v2 = vld [vmem:[%s3451_s10 + $0x374] ss:$8 sps:$4 sm:$0xff]   ;;  %v2711_v3 = vcombine.high %v455_v58, %v459_v59 }
  0x8b   : > { %1831 = vmatprep.subr.bf16.mxu0 %v3121_v4  ;;  %v2715_v4 = vcombine.high %v457_v62, %v461_v63 }
  0x8d   : > { %1606 = vmatpush1.bf16.msra.mxu1 %v3123_v5  ;;  %v3167_v5 = vld [vmem:[%s3451_s10 + $0x170] ss:$8 sps:$4 sm:$0xff]  }
  0x8e   : > { %1832 = vmatpush1.bf16.msra.mxu0 %v3124_v6  ;;  %1688 = vmatprep.subr.bf16.mxu1 %v3127_v7  ;;  %v3170_v6 = vld [vmem:[%s3451_s10 + $0x370] ss:$8 sps:$4 sm:$0xff]   ;;  %v3175_v7 = vld [vmem:[%s3451_s10 + $0x184] ss:$8 sps:$4 sm:$0xff]  }
  0x8f   : > { %1914 = vmatprep.subr.bf16.mxu0 %v3130_v8  ;;  %v3178_v8 = vld [vmem:[%s3451_s10 + $0x384] ss:$8 sps:$4 sm:$0xff]  }
  0x90   : > { %1608 = vmatmul.mubr.bf16.vlgmr.msra.gmra.mrb[0].mxu1 %v2678_v12  ;;  %v2714_v12 = vcombine.low %v457_v62, %v461_v63  ;;  %v430_v62 = vld [vmem:[%s3453_s11 + $0x38] sm:$0xff]  ;;  %v3209_v63 = vld [vmem:[%s3451_s10 + $0x1e0] ss:$8 sps:$4 sm:$0xff]  }
  0x91   : > { %1834 = vmatmul.mubr.bf16.vlgmr.msra.gmra.mrb[0].mxu0 %v2682_v13  ;;  %1689 = vmatpush1.bf16.msra.mxu1 %v3125_v9  ;;  %v463_v9 = vld [vmem:[%s3453_s11 + $0x140] sm:$0xff]  ;;  %v465_v13 = vld [vmem:[%s3453_s11 + $0x150] sm:$0xff] }
  0x92   : > { %1915 = vmatpush1.bf16.msra.mxu0 %v3128_v10  ;;  %1690 = vmatprep.subr.bf16.mxu1 %v3133_v17  ;;  %v467_v10 = vld [vmem:[%s3453_s11 + $0x160] sm:$0xff]  ;;  %v3181_v17 = vld [vmem:[%s3451_s10 + $0x194] ss:$8 sps:$4 sm:$0xff]   ;;  %v2722_v27 = vcombine.low %v465_v13, %v469_v14 }
  0x93   : > { %1916 = vmatprep.subr.bf16.mxu0 %v3136_v18  ;;  %1617 = vmatprep.mubr.bf16.mxu1 %v2687_v19  ;;  %v3184_v18 = vld [vmem:[%s3451_s10 + $0x394] ss:$8 sps:$4 sm:$0xff]   ;;  %v2719_v19 = vcombine.high %v463_v9, %v467_v10 }
  0x94   : > { %1843 = vmatprep.mubr.bf16.mxu0 %v2691_v20  ;;  %v2723_v20 = vcombine.high %v465_v13, %v469_v14 }
  0x95   : > { %1691 = vmatpush1.bf16.msra.mxu1 %v3131_v21  ;;  %v3179_v21 = vld [vmem:[%s3451_s10 + $0x190] ss:$8 sps:$4 sm:$0xff]  }
  0x96   : > { %1917 = vmatpush1.bf16.msra.mxu0 %v3134_v22  ;;  %1692 = vmatprep.subr.bf16.mxu1 %v3139_v23  ;;  %v3182_v22 = vld [vmem:[%s3451_s10 + $0x390] ss:$8 sps:$4 sm:$0xff]   ;;  %v3187_v23 = vld [vmem:[%s3451_s10 + $0x1a4] ss:$8 sps:$4 sm:$0xff]  }
  0x97   : > { %1918 = vmatprep.subr.bf16.mxu0 %v3142_v24  ;;  %v3190_v24 = vld [vmem:[%s3451_s10 + $0x3a4] ss:$8 sps:$4 sm:$0xff]  }
  0x98   : > { %1618 = vmatmul.mubr.bf16.gmra.mrb[4].mxu1 %v2686_v29  ;;  %v473_v29 = vld [vmem:[%s3453_s11 + $0x190] sm:$0xff] }
  0x99   : > { %1844 = vmatmul.mubr.bf16.gmra.mrb[4].mxu0 %v2690_v30  ;;  %1693 = vmatpush1.bf16.msra.mxu1 %v3137_v25  ;;  %v471_v25 = vld [vmem:[%s3453_s11 + $0x180] sm:$0xff]  ;;  %v477_v30 = vld [vmem:[%s3453_s11 + $0x1b0] sm:$0xff] }
  0x9a   : > { %1919 = vmatpush1.bf16.msra.mxu0 %v3140_v26  ;;  %1694 = vmatprep.subr.bf16.mxu1 %v3145_v33  ;;  %v2718_v26 = vcombine.low %v463_v9, %v467_v10  ;;  %v3193_v33 = vld [vmem:[%s3451_s10 + $0x1b4] ss:$8 sps:$4 sm:$0xff]   ;;  %v2730_v43 = vcombine.low %v473_v29, %v477_v30 }
  0x9b   : > { %1920 = vmatprep.subr.bf16.mxu0 %v3148_v34  ;;  %1627 = vmatprep.mubr.bf16.mxu1 %v2695_v35  ;;  %v3196_v34 = vld [vmem:[%s3451_s10 + $0x3b4] ss:$8 sps:$4 sm:$0xff]   ;;  %v2727_v35 = vcombine.high %v471_v25, %v475_v28 }
  0x9c   : > { %1853 = vmatprep.mubr.bf16.mxu0 %v2699_v36  ;;  %v2731_v36 = vcombine.high %v473_v29, %v477_v30  ;;  %v434_v9 = vld [vmem:[%s3453_s11 + $0x58] sm:$0xff] }
  0x9d   : > { %1695 = vmatpush1.bf16.msra.mxu1 %v3143_v37  ;;  %v3191_v37 = vld [vmem:[%s3451_s10 + $0x1b0] ss:$8 sps:$4 sm:$0xff]  }
  0x9e   : > { %1921 = vmatpush1.bf16.msra.mxu0 %v3146_v38  ;;  %1696 = vmatprep.subr.bf16.mxu1 %v3151_v39  ;;  %v3194_v38 = vld [vmem:[%s3451_s10 + $0x3b0] ss:$8 sps:$4 sm:$0xff]   ;;  %v3199_v39 = vld [vmem:[%s3451_s10 + $0x1c4] ss:$8 sps:$4 sm:$0xff]  }
  0x9f   : > { %1922 = vmatprep.subr.bf16.mxu0 %v3154_v40  ;;  %v3202_v40 = vld [vmem:[%s3451_s10 + $0x3c4] ss:$8 sps:$4 sm:$0xff]   ;;  %v438_v10 = vld [vmem:[%s3453_s11 + $0x78] sm:$0xff] }
  0xa0   : > { %1628 = vmatmul.mubr.bf16.gmra.mrb[8].mxu1 %v2694_v45  ;;  %v481_v45 = vld [vmem:[%s3453_s11 + $0x1d0] sm:$0xff]  ;;  %v2693_v14 = vcombine.high %v434_v9, %v438_v10 }
  0xa1   : > { %1854 = vmatmul.mubr.bf16.gmra.mrb[8].mxu0 %v2698_v46  ;;  %1697 = vmatpush1.bf16.msra.mxu1 %v3149_v41  ;;  %v479_v41 = vld [vmem:[%s3453_s11 + $0x1c0] sm:$0xff]  ;;  %v485_v46 = vld [vmem:[%s3453_s11 + $0x1f0] sm:$0xff] }
  0xa2   : > { %1923 = vmatpush1.bf16.msra.mxu0 %v3152_v42  ;;  %1698 = vmatprep.subr.bf16.mxu1 %v3157_v49  ;;  %v2726_v42 = vcombine.low %v471_v25, %v475_v28  ;;  %v3205_v49 = vld [vmem:[%s3451_s10 + $0x1d4] ss:$8 sps:$4 sm:$0xff]   ;;  %v2734_v58 = vcombine.low %v479_v41, %v483_v44  ;;  %v2738_v59 = vcombine.low %v481_v45, %v485_v46 }
  0xa3   : > { %1924 = vmatprep.subr.bf16.mxu0 %v3160_v50  ;;  %1637 = vmatprep.mubr.bf16.mxu1 %v2703_v51  ;;  %v3208_v50 = vld [vmem:[%s3451_s10 + $0x3d4] ss:$8 sps:$4 sm:$0xff]   ;;  %v2735_v51 = vcombine.high %v479_v41, %v483_v44 }
  0xa4   : > { %1863 = vmatprep.mubr.bf16.mxu0 %v2707_v52  ;;  %v2739_v52 = vcombine.high %v481_v45, %v485_v46  ;;  %v450_v25 = vld [vmem:[%s3453_s11 + $0xd8] sm:$0xff] }
  0xa5   : > { %1699 = vmatpush1.bf16.msra.mxu1 %v3155_v53  ;;  %v3203_v53 = vld [vmem:[%s3451_s10 + $0x1d0] ss:$8 sps:$4 sm:$0xff]  }
  0xa6   : > { %1925 = vmatpush1.bf16.msra.mxu0 %v3158_v54  ;;  %1700 = vmatprep.subr.bf16.mxu1 %v3163_v55  ;;  %v3206_v54 = vld [vmem:[%s3451_s10 + $0x3d0] ss:$8 sps:$4 sm:$0xff]   ;;  %v3211_v55 = vld [vmem:[%s3451_s10 + $0x1e4] ss:$8 sps:$4 sm:$0xff]  }
  0xa7   : > { %1926 = vmatprep.subr.bf16.mxu0 %v3166_v56  ;;  %v3214_v56 = vld [vmem:[%s3451_s10 + $0x3e4] ss:$8 sps:$4 sm:$0xff]   ;;  %v466_v41 = vld [vmem:[%s3453_s11 + $0x158] sm:$0xff] }
  0xa8   : > { %1638 = vmatmul.mubr.bf16.gmra.mrb[12].mxu1 %v2702_v60  ;;  %v428_v60 = vld [vmem:[%s3453_s11 + $0x28] sm:$0xff] }
  0xa9   : > { %1864 = vmatmul.mubr.bf16.gmra.mrb[12].mxu0 %v2706_v61  ;;  %1701 = vmatpush1.bf16.msra.mxu1 %v3161_v57  ;;  %v424_v57 = vld [vmem:[%s3453_s11 + $0x8] sm:$0xff]  ;;  %v426_v61 = vld [vmem:[%s3453_s11 + $0x18] sm:$0xff] }
  0xaa   : > { %1927 = vmatpush1.bf16.msra.mxu0 %v3164_v0  ;;  %1702 = vmatprep.subr.bf16.mxu1 %v3169_v1  ;;  %v3212_v0 = vld [vmem:[%s3451_s10 + $0x3e0] ss:$8 sps:$4 sm:$0xff]   ;;  %v3217_v1 = vld [vmem:[%s3451_s10 + $0x1f4] ss:$8 sps:$4 sm:$0xff]  }
  0xab   : > { %1928 = vmatprep.subr.bf16.mxu0 %v3172_v2  ;;  %1647 = vmatprep.mubr.bf16.mxu1 %v2711_v3  ;;  %v3220_v2 = vld [vmem:[%s3451_s10 + $0x3f4] ss:$8 sps:$4 sm:$0xff]   ;;  %v2681_v3 = vcombine.high %v424_v57, %v428_v60 }
  0xac   : > { %1873 = vmatprep.mubr.bf16.mxu0 %v2715_v4  ;;  %v2685_v4 = vcombine.high %v426_v61, %v430_v62 }
  0xad   : > { %1703 = vmatpush1.bf16.msra.mxu1 %v3167_v5  ;;  %v3215_v5 = vld [vmem:[%s3451_s10 + $0x1f0] ss:$8 sps:$4 sm:$0xff]  }
  0xae   : > { %1929 = vmatpush1.bf16.msra.mxu0 %v3170_v6  ;;  %1704 = vmatprep.subr.bf16.mxu1 %v3175_v7  ;;  %v3218_v6 = vld [vmem:[%s3451_s10 + $0x3f0] ss:$8 sps:$4 sm:$0xff]   ;;  %v432_v7 = vld [vmem:[%s3453_s11 + $0x48] sm:$0xff] }
  0xaf   : > { %1930 = vmatprep.subr.bf16.mxu0 %v3178_v8  ;;  %v436_v8 = vld [vmem:[%s3453_s11 + $0x68] sm:$0xff] }
  0xb0   : > { %1648 = vmatmul.mubr.bf16.gmra.mrb[16].mxu1 %v2710_v11  ;;  %v2680_v11 = vcombine.low %v424_v57, %v428_v60  ;;  %v2689_v13 = vcombine.high %v432_v7, %v436_v8  ;;  %v482_v57 = vld [vmem:[%s3453_s11 + $0x1d8] sm:$0xff] }
  0xb1   : > { %1874 = vmatmul.mubr.bf16.gmra.mrb[16].mxu0 %v2714_v12  ;;  %1705 = vmatpush1.bf16.msra.mxu1 %v3173_v15  ;;  %v2684_v12 = vcombine.low %v426_v61, %v430_v62  ;;  %v440_v15 = vld [vmem:[%s3453_s11 + $0x88] sm:$0xff] }
  0xb2   : > { %1931 = vmatpush1.bf16.msra.mxu0 %v3176_v16  ;;  %1706 = vmatprep.subr.bf16.mxu1 %v3181_v17  ;;  %v444_v16 = vld [vmem:[%s3453_s11 + $0xa8] sm:$0xff]  ;;  %v442_v17 = vld [vmem:[%s3453_s11 + $0x98] sm:$0xff] }
  0xb3   : > { %1932 = vmatprep.subr.bf16.mxu0 %v3184_v18  ;;  %1657 = vmatprep.mubr.bf16.mxu1 %v2719_v19  ;;  %v446_v18 = vld [vmem:[%s3453_s11 + $0xb8] sm:$0xff]  ;;  %v2688_v19 = vcombine.low %v432_v7, %v436_v8 }
  0xb4   : > { %1883 = vmatprep.mubr.bf16.mxu0 %v2723_v20  ;;  %v2692_v20 = vcombine.low %v434_v9, %v438_v10  ;;  %v2700_v28 = vcombine.low %v442_v17, %v446_v18  ;;  %v393_v10 = vld [vmem:[#allocation2 + $0x10] sm:$0xff] }
  0xb5   : > { %1707 = vmatpush1.bf16.msra.mxu1 %v3179_v21  ;;  %v2697_v21 = vcombine.high %v440_v15, %v444_v16 }
  0xb6   : > { %1933 = vmatpush1.bf16.msra.mxu0 %v3182_v22  ;;  %1708 = vmatprep.subr.bf16.mxu1 %v3187_v23  ;;  %v2701_v22 = vcombine.high %v442_v17, %v446_v18  ;;  %v448_v23 = vld [vmem:[%s3453_s11 + $0xc8] sm:$0xff] }
  0xb7   : > { %1934 = vmatprep.subr.bf16.mxu0 %v3190_v24  ;;  %v452_v24 = vld [vmem:[%s3453_s11 + $0xe8] sm:$0xff] }
  0xb8   : > { %1658 = vmatmul.mubr.bf16.gmra.mrb[20].mxu1 %v2718_v26  ;;  %v454_v26 = vld [vmem:[%s3453_s11 + $0xf8] sm:$0xff]  ;;  %v2705_v29 = vcombine.high %v448_v23, %v452_v24 }
  0xb9   : > { %1884 = vmatmul.mubr.bf16.gmra.mrb[20].mxu0 %v2722_v27  ;;  %1709 = vmatpush1.bf16.msra.mxu1 %v3185_v31  ;;  %v2696_v27 = vcombine.low %v440_v15, %v444_v16  ;;  %v2709_v30 = vcombine.high %v450_v25, %v454_v26  ;;  %v456_v31 = vld [vmem:[%s3453_s11 + $0x108] sm:$0xff]  ;;  %v394_v15 = vld [vmem:[#allocation2 + $0x18] sm:$0xff] }
  0xba   : > { %1935 = vmatpush1.bf16.msra.mxu0 %v3188_v32  ;;  %1710 = vmatprep.subr.bf16.mxu1 %v3193_v33  ;;  %v460_v32 = vld [vmem:[%s3453_s11 + $0x128] sm:$0xff]  ;;  %v458_v33 = vld [vmem:[%s3453_s11 + $0x118] sm:$0xff] }
  0xbb   : > { %1936 = vmatprep.subr.bf16.mxu0 %v3196_v34  ;;  %1667 = vmatprep.mubr.bf16.mxu1 %v2727_v35  ;;  %v462_v34 = vld [vmem:[%s3453_s11 + $0x138] sm:$0xff]  ;;  %v2704_v35 = vcombine.low %v448_v23, %v452_v24 }
  0xbc   : > { %1893 = vmatprep.mubr.bf16.mxu0 %v2731_v36  ;;  %v2708_v36 = vcombine.low %v450_v25, %v454_v26  ;;  %v2716_v44 = vcombine.low %v458_v33, %v462_v34  ;;  %v396_v26 = vld [vmem:[#allocation2 + $0x28] sm:$0xff] }
  0xbd   : > { %1711 = vmatpush1.bf16.msra.mxu1 %v3191_v37  ;;  %v2713_v37 = vcombine.high %v456_v31, %v460_v32 }
  0xbe   : > { %1937 = vmatpush1.bf16.msra.mxu0 %v3194_v38  ;;  %1712 = vmatprep.subr.bf16.mxu1 %v3199_v39  ;;  %v2717_v38 = vcombine.high %v458_v33, %v462_v34  ;;  %v464_v39 = vld [vmem:[%s3453_s11 + $0x148] sm:$0xff] }
  0xbf   : > { %1938 = vmatprep.subr.bf16.mxu0 %v3202_v40  ;;  %v468_v40 = vld [vmem:[%s3453_s11 + $0x168] sm:$0xff] }
  0xc0   : > { %1668 = vmatmul.mubr.bf16.gmra.mrb[24].mxu1 %v2726_v42  ;;  %v470_v42 = vld [vmem:[%s3453_s11 + $0x178] sm:$0xff]  ;;  %v2721_v45 = vcombine.high %v464_v39, %v468_v40 }
  0xc1   : > { %1894 = vmatmul.mubr.bf16.gmra.mrb[24].mxu0 %v2730_v43  ;;  %1713 = vmatpush1.bf16.msra.mxu1 %v3197_v47  ;;  %v2712_v43 = vcombine.low %v456_v31, %v460_v32  ;;  %v2725_v46 = vcombine.high %v466_v41, %v470_v42  ;;  %v472_v47 = vld [vmem:[%s3453_s11 + $0x188] sm:$0xff] }
  0xc2   : > { %1939 = vmatpush1.bf16.msra.mxu0 %v3200_v48  ;;  %1714 = vmatprep.subr.bf16.mxu1 %v3205_v49  ;;  %v476_v48 = vld [vmem:[%s3453_s11 + $0x1a8] sm:$0xff]  ;;  %v474_v49 = vld [vmem:[%s3453_s11 + $0x198] sm:$0xff] }
  0xc3   : > { %1940 = vmatprep.subr.bf16.mxu0 %v3208_v50  ;;  %1677 = vmatprep.mubr.bf16.mxu1 %v2735_v51  ;;  %v478_v50 = vld [vmem:[%s3453_s11 + $0x1b8] sm:$0xff]  ;;  %v2720_v51 = vcombine.low %v464_v39, %v468_v40 }
  0xc4   : > { %1903 = vmatprep.mubr.bf16.mxu0 %v2739_v52  ;;  %v2724_v52 = vcombine.low %v466_v41, %v470_v42  ;;  %v2732_v60 = vcombine.low %v474_v49, %v478_v50  ;;  %v399_v42 = vld [vmem:[#allocation2 + $0x40] sm:$0xff] }
  0xc5   : > { %1715 = vmatpush1.bf16.msra.mxu1 %v3203_v53  ;;  %v2729_v53 = vcombine.high %v472_v47, %v476_v48 }
  0xc6   : > { %1941 = vmatpush1.bf16.msra.mxu0 %v3206_v54  ;;  %1716 = vmatprep.subr.bf16.mxu1 %v3211_v55  ;;  %v2733_v54 = vcombine.high %v474_v49, %v478_v50  ;;  %v480_v55 = vld [vmem:[%s3453_s11 + $0x1c8] sm:$0xff]  ;;  %v401_v50 = vld [vmem:[#allocation2 + $0x50] sm:$0xff] }
  0xc7   : > { %1942 = vmatprep.subr.bf16.mxu0 %v3214_v56  ;;  %v484_v56 = vld [vmem:[%s3453_s11 + $0x1e8] sm:$0xff] }
  0xc8   : > { %1678 = vmatmul.mubr.bf16.gmra.mrb[28].mxu1 %v2734_v58  ;;  %v486_v58 = vld [vmem:[%s3453_s11 + $0x1f8] sm:$0xff]  ;;  %v2737_v61 = vcombine.high %v480_v55, %v484_v56 }
  0xc9   : > { %1904 = vmatmul.mubr.bf16.gmra.mrb[28].mxu0 %v2738_v59  ;;  %1717 = vmatpush1.bf16.msra.mxu1 %v3209_v63  ;;  %v2728_v59 = vcombine.low %v472_v47, %v476_v48  ;;  %v2741_v62 = vcombine.high %v482_v57, %v486_v58  ;;  %v2736_v63 = vcombine.low %v480_v55, %v484_v56  ;;  %v402_v55 = vld [vmem:[#allocation2 + $0x58] sm:$0xff] }
  0xca   : > { %1943 = vmatpush1.bf16.msra.mxu0 %v3212_v0  ;;  %1718 = vmatprep.subr.bf16.mxu1 %v3217_v1  ;;  %v2740_v0 = vcombine.low %v482_v57, %v486_v58 }
  0xcb   : > { %1944 = vmatprep.subr.bf16.mxu0 %v3220_v2  ;;  %1720 = vmatprep.mubr.bf16.mxu1 %v2681_v3  ;;  %v391_v2 = vld [vmem:[#allocation2] sm:$0xff] }
  0xcc   : > { %1946 = vmatprep.mubr.bf16.mxu0 %v2685_v4 }
  0xcd   : > { %1719 = vmatpush1.bf16.msra.mxu1 %v3215_v5 }
  0xce   : > { %1945 = vmatpush1.bf16.msra.mxu0 %v3218_v6  ;;  %v392_v6 = vld [vmem:[#allocation2 + $0x8] sm:$0xff] }
  0xd0   : > { %1721 = vmatmul.mubr.bf16.vlgmr.msra.gmra.mrb[0].mxu1 %v2680_v11 }
  0xd1   : > { %1947 = vmatmul.mubr.bf16.vlgmr.msra.gmra.mrb[0].mxu0 %v2684_v12  ;;  %1730 = vmatprep.mubr.bf16.mxu1 %v2689_v13 }
  0xd2   : > { %1956 = vmatprep.mubr.bf16.mxu0 %v2693_v14 }
  0xd8   : > { %1731 = vmatmul.mubr.bf16.gmra.mrb[4].mxu1 %v2688_v19 }
  0xd9   : > { %1957 = vmatmul.mubr.bf16.gmra.mrb[4].mxu0 %v2692_v20  ;;  %1740 = vmatprep.mubr.bf16.mxu1 %v2697_v21 }
  0xda   : > { %1966 = vmatprep.mubr.bf16.mxu0 %v2701_v22  ;;  %v395_v22 = vld [vmem:[#allocation2 + $0x20] sm:$0xff] }
  0xe0   : > { %1741 = vmatmul.mubr.bf16.gmra.mrb[8].mxu1 %v2696_v27 }
  0xe1   : > { %1967 = vmatmul.mubr.bf16.gmra.mrb[8].mxu0 %v2700_v28  ;;  %1750 = vmatprep.mubr.bf16.mxu1 %v2705_v29 }
  0xe2   : > { %1976 = vmatprep.mubr.bf16.mxu0 %v2709_v30  ;;  %v397_v30 = vld [vmem:[#allocation2 + $0x30] sm:$0xff] }
  0xe8   : > { %1751 = vmatmul.mubr.bf16.gmra.mrb[12].mxu1 %v2704_v35  ;;  %v398_v35 = vld [vmem:[#allocation2 + $0x38] sm:$0xff] }
  0xe9   : > { %1977 = vmatmul.mubr.bf16.gmra.mrb[12].mxu0 %v2708_v36  ;;  %1760 = vmatprep.mubr.bf16.mxu1 %v2713_v37 }
  0xea   : > { %1986 = vmatprep.mubr.bf16.mxu0 %v2717_v38 }
  0xf0   : > { %1761 = vmatmul.mubr.bf16.gmra.mrb[16].mxu1 %v2712_v43 }
  0xf1   : > { %1987 = vmatmul.mubr.bf16.gmra.mrb[16].mxu0 %v2716_v44  ;;  %1770 = vmatprep.mubr.bf16.mxu1 %v2721_v45 }
  0xf2   : > { %1996 = vmatprep.mubr.bf16.mxu0 %v2725_v46  ;;  %v400_v46 = vld [vmem:[#allocation2 + $0x48] sm:$0xff] }
  0xf8   : > { %1771 = vmatmul.mubr.bf16.gmra.mrb[20].mxu1 %v2720_v51 }
  0xf9   : > { %1997 = vmatmul.mubr.bf16.gmra.mrb[20].mxu0 %v2724_v52  ;;  %1780 = vmatprep.mubr.bf16.mxu1 %v2729_v53 }
  0xfa   : > { %2006 = vmatprep.mubr.bf16.mxu0 %v2733_v54 }
 0x100   : > { %1781 = vmatmul.mubr.bf16.gmra.mrb[24].mxu1 %v2728_v59 }
 0x101   : > { %2007 = vmatmul.mubr.bf16.gmra.mrb[24].mxu0 %v2732_v60  ;;  %1790 = vmatprep.mubr.bf16.mxu1 %v2737_v61 }
 0x102   : > { %2016 = vmatprep.mubr.bf16.mxu0 %v2741_v62  ;;  %v403_v62 = vld [vmem:[#allocation2 + $0x60] sm:$0xff] }
 0x108   : > { %1791 = vmatmul.mubr.bf16.gmra.mrb[28].mxu1 %v2736_v63 }
 0x109   : > { %2017 = vmatmul.mubr.bf16.gmra.mrb[28].mxu0 %v2740_v0 }
 0x1a3   : > { %v1722_v1 = vpop.f32.mrb[0].mxu1 }
 0x1a4   : > { %v1948_v3 = vpop.f32.mrb[0].mxu0  ;;  %v1724_v5 = vpop.f32.mrb[1].mxu1 }
 0x1a5   : > { %v2907_v4 = vadd.f32 %v1948_v3, %v1722_v1  ;;  %v1950_v7 = vpop.f32.mrb[1].mxu0  ;;  %v1726_v9 = vpop.f32.mrb[2].mxu1 }
 0x1a6   : > { %v2908_v8 = vadd.f32 %v1950_v7, %v1724_v5  ;;  %v1952_v11 = vpop.f32.mrb[2].mxu0  ;;  %v1728_v14 = vpop.f32.mrb[3].mxu1 }
 0x1a7   : > { %v2027_v12 = vadd.f32 %v2907_v4, %v391_v2  ;;  %v2909_v13 = vadd.f32 %v1952_v11, %v1726_v9  ;;  %v1954_v16 = vpop.f32.mrb[3].mxu0  ;;  %v404_v2 = vld [vmem:[#allocation2 + $0x68] sm:$0xff]  ;;  %v406_v11 = vld [vmem:[#allocation2 + $0x78] sm:$0xff] }
 0x1a8   : > { %v2028_v17 = vadd.f32 %v2908_v8, %v392_v6  ;;  %v2910_v18 = vadd.f32 %v1954_v16, %v1728_v14  ;;  %v405_v6 = vld [vmem:[#allocation2 + $0x70] sm:$0xff] }
 0x1a9   : > { %2059 = vst [vmem:[#allocation2] sm:$0xff] %v2027_v12  ;;  %v2029_v19 = vadd.f32 %v2909_v13, %v393_v10 }
 0x1aa   : > { %2060 = vst [vmem:[#allocation2 + $0x8] sm:$0xff] %v2028_v17  ;;  %v2030_v20 = vadd.f32 %v2910_v18, %v394_v15  ;;  %v407_v18 = vld [vmem:[#allocation2 + $0x80] sm:$0xff] }
 0x1ab   : > { %2061 = vst [vmem:[#allocation2 + $0x10] sm:$0xff] %v2029_v19  ;;  %v1732_v21 = vpop.f32.mrb[4].mxu1 }
 0x1ac   : > { %2062 = vst [vmem:[#allocation2 + $0x18] sm:$0xff] %v2030_v20  ;;  %v1958_v23 = vpop.f32.mrb[4].mxu0  ;;  %v1734_v25 = vpop.f32.mrb[5].mxu1 }
 0x1ad   : > { %v2911_v24 = vadd.f32 %v1958_v23, %v1732_v21  ;;  %v1960_v27 = vpop.f32.mrb[5].mxu0  ;;  %v1736_v29 = vpop.f32.mrb[6].mxu1 }
 0x1ae   : > { %v2912_v28 = vadd.f32 %v1960_v27, %v1734_v25  ;;  %v1962_v31 = vpop.f32.mrb[6].mxu0  ;;  %v1738_v34 = vpop.f32.mrb[7].mxu1 }
 0x1af   : > { %v2031_v32 = vadd.f32 %v2911_v24, %v395_v22  ;;  %v2913_v33 = vadd.f32 %v1962_v31, %v1736_v29  ;;  %v1964_v36 = vpop.f32.mrb[7].mxu0  ;;  %v408_v22 = vld [vmem:[#allocation2 + $0x88] sm:$0xff]  ;;  %v410_v31 = vld [vmem:[#allocation2 + $0x98] sm:$0xff] }
 0x1b0   : > { %v2032_v37 = vadd.f32 %v2912_v28, %v396_v26  ;;  %v2914_v38 = vadd.f32 %v1964_v36, %v1738_v34  ;;  %v409_v26 = vld [vmem:[#allocation2 + $0x90] sm:$0xff] }
 0x1b1   : > { %2063 = vst [vmem:[#allocation2 + $0x20] sm:$0xff] %v2031_v32  ;;  %v2033_v39 = vadd.f32 %v2913_v33, %v397_v30 }
 0x1b2   : > { %2064 = vst [vmem:[#allocation2 + $0x28] sm:$0xff] %v2032_v37  ;;  %v2034_v40 = vadd.f32 %v2914_v38, %v398_v35  ;;  %v411_v38 = vld [vmem:[#allocation2 + $0xa0] sm:$0xff] }
 0x1b3   : > { %2065 = vst [vmem:[#allocation2 + $0x30] sm:$0xff] %v2033_v39  ;;  %v1742_v41 = vpop.f32.mrb[8].mxu1 }
 0x1b4   : > { %2066 = vst [vmem:[#allocation2 + $0x38] sm:$0xff] %v2034_v40  ;;  %v1968_v43 = vpop.f32.mrb[8].mxu0  ;;  %v1744_v45 = vpop.f32.mrb[9].mxu1 }
 0x1b5   : > { %v2915_v44 = vadd.f32 %v1968_v43, %v1742_v41  ;;  %v1970_v47 = vpop.f32.mrb[9].mxu0  ;;  %v1746_v49 = vpop.f32.mrb[10].mxu1 }
 0x1b6   : > { %v2916_v48 = vadd.f32 %v1970_v47, %v1744_v45  ;;  %v1972_v51 = vpop.f32.mrb[10].mxu0  ;;  %v1748_v54 = vpop.f32.mrb[11].mxu1 }
 0x1b7   : > { %v2035_v52 = vadd.f32 %v2915_v44, %v399_v42  ;;  %v2917_v53 = vadd.f32 %v1972_v51, %v1746_v49  ;;  %v1974_v56 = vpop.f32.mrb[11].mxu0  ;;  %v412_v42 = vld [vmem:[#allocation2 + $0xa8] sm:$0xff]  ;;  %v414_v51 = vld [vmem:[#allocation2 + $0xb8] sm:$0xff] }
 0x1b8   : > { %v2036_v57 = vadd.f32 %v2916_v48, %v400_v46  ;;  %v2918_v58 = vadd.f32 %v1974_v56, %v1748_v54  ;;  %v413_v46 = vld [vmem:[#allocation2 + $0xb0] sm:$0xff] }
 0x1b9   : > { %2067 = vst [vmem:[#allocation2 + $0x40] sm:$0xff] %v2035_v52  ;;  %v2037_v59 = vadd.f32 %v2917_v53, %v401_v50 }
 0x1ba   : > { %2068 = vst [vmem:[#allocation2 + $0x48] sm:$0xff] %v2036_v57  ;;  %v2038_v60 = vadd.f32 %v2918_v58, %v402_v55  ;;  %v415_v58 = vld [vmem:[#allocation2 + $0xc0] sm:$0xff] }
 0x1bb   : > { %2069 = vst [vmem:[#allocation2 + $0x50] sm:$0xff] %v2037_v59  ;;  %v1752_v61 = vpop.f32.mrb[12].mxu1 }
 0x1bc   : > { %2070 = vst [vmem:[#allocation2 + $0x58] sm:$0xff] %v2038_v60  ;;  %v1978_v63 = vpop.f32.mrb[12].mxu0  ;;  %v1754_v1 = vpop.f32.mrb[13].mxu1 }
 0x1bd   : > { %v2919_v0 = vadd.f32 %v1978_v63, %v1752_v61  ;;  %v1980_v3 = vpop.f32.mrb[13].mxu0  ;;  %v1756_v5 = vpop.f32.mrb[14].mxu1 }
 0x1be   : > { %v2920_v4 = vadd.f32 %v1980_v3, %v1754_v1  ;;  %v1982_v7 = vpop.f32.mrb[14].mxu0  ;;  %v1758_v10 = vpop.f32.mrb[15].mxu1 }
 0x1bf   : > { %v2039_v8 = vadd.f32 %v2919_v0, %v403_v62  ;;  %v2921_v9 = vadd.f32 %v1982_v7, %v1756_v5  ;;  %v1984_v12 = vpop.f32.mrb[15].mxu0  ;;  %v416_v62 = vld [vmem:[#allocation2 + $0xc8] sm:$0xff]  ;;  %v418_v7 = vld [vmem:[#allocation2 + $0xd8] sm:$0xff] }
 0x1c0   : > { %v2040_v13 = vadd.f32 %v2920_v4, %v404_v2  ;;  %v2922_v14 = vadd.f32 %v1984_v12, %v1758_v10  ;;  %v417_v2 = vld [vmem:[#allocation2 + $0xd0] sm:$0xff] }
 0x1c1   : > { %2071 = vst [vmem:[#allocation2 + $0x60] sm:$0xff] %v2039_v8  ;;  %v2041_v15 = vadd.f32 %v2921_v9, %v405_v6 }
 0x1c2   : > { %2072 = vst [vmem:[#allocation2 + $0x68] sm:$0xff] %v2040_v13  ;;  %v2042_v16 = vadd.f32 %v2922_v14, %v406_v11  ;;  %v419_v14 = vld [vmem:[#allocation2 + $0xe0] sm:$0xff] }
 0x1c3   : > { %2073 = vst [vmem:[#allocation2 + $0x70] sm:$0xff] %v2041_v15  ;;  %v1762_v17 = vpop.f32.mrb[16].mxu1 }
 0x1c4   : > { %2074 = vst [vmem:[#allocation2 + $0x78] sm:$0xff] %v2042_v16  ;;  %v1988_v19 = vpop.f32.mrb[16].mxu0  ;;  %v1764_v21 = vpop.f32.mrb[17].mxu1 }
 0x1c5   : > { %v2923_v20 = vadd.f32 %v1988_v19, %v1762_v17  ;;  %v1990_v23 = vpop.f32.mrb[17].mxu0  ;;  %v1766_v25 = vpop.f32.mrb[18].mxu1 }
 0x1c6   : > { %v2924_v24 = vadd.f32 %v1990_v23, %v1764_v21  ;;  %v1992_v27 = vpop.f32.mrb[18].mxu0  ;;  %v1768_v30 = vpop.f32.mrb[19].mxu1 }
 0x1c7   : > { %v2043_v28 = vadd.f32 %v2923_v20, %v407_v18  ;;  %v2925_v29 = vadd.f32 %v1992_v27, %v1766_v25  ;;  %v1994_v32 = vpop.f32.mrb[19].mxu0  ;;  %v420_v18 = vld [vmem:[#allocation2 + $0xe8] sm:$0xff]  ;;  %v422_v27 = vld [vmem:[#allocation2 + $0xf8] sm:$0xff] }
 0x1c8   : > { %v2044_v33 = vadd.f32 %v2924_v24, %v408_v22  ;;  %v2926_v34 = vadd.f32 %v1994_v32, %v1768_v30  ;;  %v421_v22 = vld [vmem:[#allocation2 + $0xf0] sm:$0xff] }
 0x1c9   : > { %2075 = vst [vmem:[#allocation2 + $0x80] sm:$0xff] %v2043_v28  ;;  %v2045_v35 = vadd.f32 %v2925_v29, %v409_v26 }
 0x1ca   : > { %2076 = vst [vmem:[#allocation2 + $0x88] sm:$0xff] %v2044_v33  ;;  %v2046_v36 = vadd.f32 %v2926_v34, %v410_v31 }
 0x1cb   : > { %2077 = vst [vmem:[#allocation2 + $0x90] sm:$0xff] %v2045_v35  ;;  %v1772_v37 = vpop.f32.mrb[20].mxu1 }
 0x1cc   : > { %2078 = vst [vmem:[#allocation2 + $0x98] sm:$0xff] %v2046_v36  ;;  %v1998_v39 = vpop.f32.mrb[20].mxu0  ;;  %v1774_v41 = vpop.f32.mrb[21].mxu1 }
 0x1cd   : > { %v2927_v40 = vadd.f32 %v1998_v39, %v1772_v37  ;;  %v2000_v43 = vpop.f32.mrb[21].mxu0  ;;  %v1776_v45 = vpop.f32.mrb[22].mxu1 }
 0x1ce   : > { %v2928_v44 = vadd.f32 %v2000_v43, %v1774_v41  ;;  %v2002_v47 = vpop.f32.mrb[22].mxu0  ;;  %v1778_v50 = vpop.f32.mrb[23].mxu1 }
 0x1cf   : > { %v2047_v48 = vadd.f32 %v2927_v40, %v411_v38  ;;  %v2929_v49 = vadd.f32 %v2002_v47, %v1776_v45  ;;  %v2004_v52 = vpop.f32.mrb[23].mxu0 }
 0x1d0   : > { %v2048_v53 = vadd.f32 %v2928_v44, %v412_v42  ;;  %v2930_v54 = vadd.f32 %v2004_v52, %v1778_v50 }
 0x1d1   : > { %2079 = vst [vmem:[#allocation2 + $0xa0] sm:$0xff] %v2047_v48  ;;  %v2049_v55 = vadd.f32 %v2929_v49, %v413_v46 }
 0x1d2   : > { %2080 = vst [vmem:[#allocation2 + $0xa8] sm:$0xff] %v2048_v53  ;;  %v2050_v56 = vadd.f32 %v2930_v54, %v414_v51 }
 0x1d3   : > { %2081 = vst [vmem:[#allocation2 + $0xb0] sm:$0xff] %v2049_v55  ;;  %v1782_v57 = vpop.f32.mrb[24].mxu1 }
 0x1d4   : > { %2082 = vst [vmem:[#allocation2 + $0xb8] sm:$0xff] %v2050_v56  ;;  %v2008_v59 = vpop.f32.mrb[24].mxu0  ;;  %v1784_v61 = vpop.f32.mrb[25].mxu1 }
 0x1d5   : > { %v2931_v60 = vadd.f32 %v2008_v59, %v1782_v57  ;;  %v2010_v63 = vpop.f32.mrb[25].mxu0  ;;  %v1786_v1 = vpop.f32.mrb[26].mxu1 }
 0x1d6   : > { %v2932_v0 = vadd.f32 %v2010_v63, %v1784_v61  ;;  %v2012_v3 = vpop.f32.mrb[26].mxu0  ;;  %v1788_v6 = vpop.f32.mrb[27].mxu1 }
 0x1d7   : > { %v2051_v4 = vadd.f32 %v2931_v60, %v415_v58  ;;  %v2933_v5 = vadd.f32 %v2012_v3, %v1786_v1  ;;  %v2014_v8 = vpop.f32.mrb[27].mxu0 }
 0x1d8   : > { %v2052_v9 = vadd.f32 %v2932_v0, %v416_v62  ;;  %v2934_v10 = vadd.f32 %v2014_v8, %v1788_v6 }
 0x1d9   : > { %2083 = vst [vmem:[#allocation2 + $0xc0] sm:$0xff] %v2051_v4  ;;  %v2053_v11 = vadd.f32 %v2933_v5, %v417_v2 }
 0x1da   : > { %2084 = vst [vmem:[#allocation2 + $0xc8] sm:$0xff] %v2052_v9  ;;  %v2054_v12 = vadd.f32 %v2934_v10, %v418_v7 }
 0x1db   : > { %2085 = vst [vmem:[#allocation2 + $0xd0] sm:$0xff] %v2053_v11  ;;  %v1792_v13 = vpop.f32.mrb[28].mxu1 }
 0x1dc   : > { %2086 = vst [vmem:[#allocation2 + $0xd8] sm:$0xff] %v2054_v12  ;;  %v2018_v15 = vpop.f32.mrb[28].mxu0  ;;  %v1794_v17 = vpop.f32.mrb[29].mxu1 }
 0x1dd   : > { %v2935_v16 = vadd.f32 %v2018_v15, %v1792_v13  ;;  %v2020_v19 = vpop.f32.mrb[29].mxu0  ;;  %v1796_v21 = vpop.f32.mrb[30].mxu1 }
 0x1de   : > { %v2936_v20 = vadd.f32 %v2020_v19, %v1794_v17  ;;  %v2022_v23 = vpop.f32.mrb[30].mxu0  ;;  %v1798_v26 = vpop.f32.mrb[31].mxu1  ;;  %2094 = sbr.rel (%p2870_p10) target bundleno = 656 (0x290), region = 67 }
 0x1df   : > { %v2055_v24 = vadd.f32 %v2935_v16, %v419_v14  ;;  %v2937_v25 = vadd.f32 %v2022_v23, %v1796_v21  ;;  %v2024_v28 = vpop.f32.mrb[31].mxu0 }
 0x1e0   : > { %v2056_v29 = vadd.f32 %v2936_v20, %v420_v18  ;;  %v2938_v30 = vadd.f32 %v2024_v28, %v1798_v26 }
 0x1e1   : > { %2087 = vst [vmem:[#allocation2 + $0xe0] sm:$0xff] %v2055_v24  ;;  %v2057_v31 = vadd.f32 %v2937_v25, %v421_v22 }
 0x1e2   : > { %2088 = vst [vmem:[#allocation2 + $0xe8] sm:$0xff] %v2056_v29  ;;  %v2058_v32 = vadd.f32 %v2938_v30, %v422_v27 }
 0x1e3   : > { %2089 = vst [vmem:[#allocation2 + $0xf0] sm:$0xff] %v2057_v31 }
 0x1e4   : > { %2090 = vst [vmem:[#allocation2 + $0xf8] sm:$0xff] %v2058_v32 }
 0x1e5   : > { %v3649_v33 = vld [vmem:[#allocation2] sm:$0xff]  ;;  %v3651_v34 = vld [vmem:[#allocation2 + $0x8] sm:$0xff]  ;;  %v3653_v35 = vld [vmem:[#allocation2 + $0x10] sm:$0xff] }
 0x1e6   : > { %v3655_v36 = vld [vmem:[#allocation2 + $0x18] sm:$0xff]  ;;  %v3657_v37 = vld [vmem:[#allocation2 + $0x20] sm:$0xff]  ;;  %v3659_v38 = vld [vmem:[#allocation2 + $0x28] sm:$0xff]  ;;  %v2127_v39 = vadd.f32 %v3653_v35, %v3649_v33 }
 0x1e7   : > { %v3663_v40 = vld [vmem:[#allocation2 + $0x30] sm:$0xff]  ;;  %v2148_v41 = vadd.f32 %v3655_v36, %v3651_v34  ;;  %v3667_v42 = vld [vmem:[#allocation2 + $0x38] sm:$0xff]  ;;  %v3670_v44 = vld [vmem:[#allocation2 + $0x40] sm:$0xff] }
 0x1e8   : > { %v2128_v43 = vadd.f32 %v2127_v39, %v3657_v37  ;;  %v3673_v46 = vld [vmem:[#allocation2 + $0x48] sm:$0xff]  ;;  %v3676_v48 = vld [vmem:[#allocation2 + $0x50] sm:$0xff]  ;;  %v3679_v50 = vld [vmem:[#allocation2 + $0x58] sm:$0xff] }
 0x1e9   : > { %v2149_v45 = vadd.f32 %v2148_v41, %v3659_v38  ;;  %v3682_v52 = vld [vmem:[#allocation2 + $0x60] sm:$0xff]  ;;  %v3685_v54 = vld [vmem:[#allocation2 + $0x68] sm:$0xff]  ;;  %v3688_v56 = vld [vmem:[#allocation2 + $0x70] sm:$0xff] }
 0x1ea   : > { %v2129_v47 = vadd.f32 %v2128_v43, %v3663_v40  ;;  %v3691_v58 = vld [vmem:[#allocation2 + $0x78] sm:$0xff]  ;;  %v3694_v60 = vld [vmem:[#allocation2 + $0x80] sm:$0xff]  ;;  %v3697_v62 = vld [vmem:[#allocation2 + $0x88] sm:$0xff] }
 0x1eb   : > { %v2150_v49 = vadd.f32 %v2149_v45, %v3667_v42  ;;  %v3700_v0 = vld [vmem:[#allocation2 + $0x90] sm:$0xff]  ;;  %v3703_v2 = vld [vmem:[#allocation2 + $0x98] sm:$0xff]  ;;  %v3706_v4 = vld [vmem:[#allocation2 + $0xa0] sm:$0xff] }
 0x1ec   : > { %v2130_v51 = vadd.f32 %v2129_v47, %v3670_v44  ;;  %v3709_v6 = vld [vmem:[#allocation2 + $0xa8] sm:$0xff]  ;;  %v3712_v8 = vld [vmem:[#allocation2 + $0xb0] sm:$0xff]  ;;  %v3715_v10 = vld [vmem:[#allocation2 + $0xb8] sm:$0xff] }
 0x1ed   : > { %v2151_v53 = vadd.f32 %v2150_v49, %v3673_v46  ;;  %v3718_v12 = vld [vmem:[#allocation2 + $0xc0] sm:$0xff]  ;;  %v3721_v14 = vld [vmem:[#allocation2 + $0xc8] sm:$0xff]  ;;  %v3724_v16 = vld [vmem:[#allocation2 + $0xd0] sm:$0xff] }
 0x1ee   : > { %v2131_v55 = vadd.f32 %v2130_v51, %v3676_v48  ;;  %v3727_v18 = vld [vmem:[#allocation2 + $0xd8] sm:$0xff]  ;;  %v3730_v20 = vld [vmem:[#allocation2 + $0xe0] sm:$0xff]  ;;  %v3733_v22 = vld [vmem:[#allocation2 + $0xe8] sm:$0xff] }
 0x1ef   : > { %v2152_v57 = vadd.f32 %v2151_v53, %v3679_v50  ;;  %v3736_v24 = vld [vmem:[#allocation2 + $0xf0] sm:$0xff]  ;;  %v3739_v26 = vld [vmem:[#allocation2 + $0xf8] sm:$0xff] }
 0x1f0   : > { %v2132_v59 = vadd.f32 %v2131_v55, %v3682_v52  ;;  %4017 = vst [vmem:[#allocation4_spill] sm:$0xff] %v3736_v24  ;;  %4018 = vst [vmem:[#allocation5_spill] sm:$0xff] %v3739_v26 }
 0x1f1   : > { %v2153_v61 = vadd.f32 %v2152_v57, %v3685_v54 }
 0x1f2   : > { %v2133_v63 = vadd.f32 %v2132_v59, %v3688_v56 }
 0x1f3   : > { %v2154_v1 = vadd.f32 %v2153_v61, %v3691_v58 }
 0x1f4   : > { %v2134_v3 = vadd.f32 %v2133_v63, %v3694_v60 }
 0x1f5   : > { %v2155_v5 = vadd.f32 %v2154_v1, %v3697_v62 }
 0x1f6   : > { %v2135_v7 = vadd.f32 %v2134_v3, %v3700_v0 }
 0x1f7   : > { %v2156_v9 = vadd.f32 %v2155_v5, %v3703_v2 }
 0x1f8   : > { %v2136_v11 = vadd.f32 %v2135_v7, %v3706_v4 }
 0x1f9   : > { %v2157_v13 = vadd.f32 %v2156_v9, %v3709_v6 }
 0x1fa   : > { %v2137_v15 = vadd.f32 %v2136_v11, %v3712_v8 }
 0x1fb   : > { %v2158_v17 = vadd.f32 %v2157_v13, %v3715_v10 }
 0x1fc   : > { %v2138_v19 = vadd.f32 %v2137_v15, %v3718_v12 }
 0x1fd   : > { %v2159_v21 = vadd.f32 %v2158_v17, %v3721_v14 }
 0x1fe   : > { %v2139_v23 = vadd.f32 %v2138_v19, %v3724_v16 }
 0x1ff   : > { %v2160_v25 = vadd.f32 %v2159_v21, %v3727_v18 }
 0x200   : > { %v2140_v27 = vadd.f32 %v2139_v23, %v3730_v20 }
 0x201   : > { %v2161_v28 = vadd.f32 %v2160_v25, %v3733_v22 }
 0x202   : > { %v2141_v29 = vadd.f32 %v2140_v27, %v3736_v24 }
 0x203   : > { %v2162_v30 = vadd.f32 %v2161_v28, %v3739_v26 }
 0x204   : > { %v2142_v31 = vrot.slane %v2141_v29, 4 }
 0x205   : > { %v2163_v32 = vrot.slane %v2162_v30, 4 }
 0x206   : > { %v2143_v39 = vadd.f32 %v2142_v31, %v2141_v29 }
 0x207   : > { %v2164_v41 = vadd.f32 %v2163_v32, %v2162_v30 }
 0x208   : > { %v2144_v43 = vrot.slane %v2143_v39, 2 }
 0x209   : > { %v2165_v45 = vrot.slane %v2164_v41, 2 }
 0x20a   : > { %v2145_v47 = vadd.f32 %v2144_v43, %v2143_v39 }
 0x20b   : > { %v2166_v49 = vadd.f32 %v2165_v45, %v2164_v41 }
 0x20c   : > { %v2146_v51 = vrot.slane %v2145_v47, 1 }
 0x20d   : > { %v2167_v53 = vrot.slane %v2166_v49, 1 }
 0x20e   : > { %v2147_v55 = vadd.f32 %v2146_v51, %v2145_v47 }
 0x20f   : > { %v2168_v57 = vadd.f32 %v2167_v53, %v2166_v49 }
 0x210   : > { %v3745_v59 = vmul.f32 0.0078125, %v2147_v55 }
 0x211   : > { %v3747_v61 = vmul.f32 0.0078125, %v2168_v57 }
 0x212   : > { %v2172_v63 = vsub.f32 %v3649_v33, %v3745_v59  ;;  %v2174_v3 = vsub.f32 %v3653_v35, %v3745_v59  ;;  %v2176_v7 = vsub.f32 %v3657_v37, %v3745_v59  ;;  %v2178_v11 = vsub.f32 %v3663_v40, %v3745_v59 }
 0x213   : > { %v2173_v1 = vsub.f32 %v3651_v34, %v3747_v61  ;;  %v2175_v5 = vsub.f32 %v3655_v36, %v3747_v61  ;;  %v2177_v9 = vsub.f32 %v3659_v38, %v3747_v61  ;;  %v2179_v13 = vsub.f32 %v3667_v42, %v3747_v61 }
 0x214   : > { %v2204_v15 = vmul.f32 %v2172_v63, %v2172_v63  ;;  %v2206_v19 = vmul.f32 %v2174_v3, %v2174_v3  ;;  %v2180_v23 = vsub.f32 %v3670_v44, %v3745_v59  ;;  %v2181_v25 = vsub.f32 %v3673_v46, %v3747_v61 }
 0x215   : > { %v2205_v17 = vmul.f32 %v2173_v1, %v2173_v1  ;;  %v2207_v21 = vmul.f32 %v2175_v5, %v2175_v5  ;;  %v2208_v27 = vmul.f32 %v2176_v7, %v2176_v7  ;;  %v2209_v28 = vmul.f32 %v2177_v9, %v2177_v9 }
 0x216   : > { %v2182_v29 = vsub.f32 %v3676_v48, %v3745_v59  ;;  %v2183_v30 = vsub.f32 %v3679_v50, %v3747_v61  ;;  %v2210_v31 = vmul.f32 %v2178_v11, %v2178_v11  ;;  %v2211_v32 = vmul.f32 %v2179_v13, %v2179_v13 }
 0x217   : > { %v2236_v39 = vadd.f32 %v2206_v19, %v2204_v15  ;;  %v2257_v41 = vadd.f32 %v2207_v21, %v2205_v17  ;;  %v2184_v43 = vsub.f32 %v3682_v52, %v3745_v59  ;;  %v2185_v45 = vsub.f32 %v3685_v54, %v3747_v61 }
 0x218   : > { %v2212_v47 = vmul.f32 %v2180_v23, %v2180_v23  ;;  %v2213_v49 = vmul.f32 %v2181_v25, %v2181_v25  ;;  %v2186_v55 = vsub.f32 %v3688_v56, %v3745_v59  ;;  %v2187_v57 = vsub.f32 %v3691_v58, %v3747_v61 }
 0x219   : > { %v2237_v51 = vadd.f32 %v2236_v39, %v2208_v27  ;;  %v2258_v53 = vadd.f32 %v2257_v41, %v2209_v28  ;;  %v2214_v63 = vmul.f32 %v2182_v29, %v2182_v29  ;;  %v2215_v1 = vmul.f32 %v2183_v30, %v2183_v30 }
 0x21a   : > { %v2188_v7 = vsub.f32 %v3694_v60, %v3745_v59  ;;  %v2189_v9 = vsub.f32 %v3697_v62, %v3747_v61  ;;  %v2216_v11 = vmul.f32 %v2184_v43, %v2184_v43  ;;  %v2217_v13 = vmul.f32 %v2185_v45, %v2185_v45 }
 0x21b   : > { %v2238_v3 = vadd.f32 %v2237_v51, %v2210_v31  ;;  %v2259_v5 = vadd.f32 %v2258_v53, %v2211_v32  ;;  %v2190_v19 = vsub.f32 %v3700_v0, %v3745_v59  ;;  %v2191_v21 = vsub.f32 %v3703_v2, %v3747_v61 }
 0x21c   : > { %v2218_v23 = vmul.f32 %v2186_v55, %v2186_v55  ;;  %v2219_v25 = vmul.f32 %v2187_v57, %v2187_v57  ;;  %v2192_v29 = vsub.f32 %v3706_v4, %v3745_v59  ;;  %v2193_v30 = vsub.f32 %v3709_v6, %v3747_v61 }
 0x21d   : > { %v2239_v15 = vadd.f32 %v2238_v3, %v2212_v47  ;;  %v2260_v17 = vadd.f32 %v2259_v5, %v2213_v49  ;;  %v2220_v31 = vmul.f32 %v2188_v7, %v2188_v7  ;;  %v2221_v32 = vmul.f32 %v2189_v9, %v2189_v9 }
 0x21e   : > { %v2194_v43 = vsub.f32 %v3712_v8, %v3745_v59  ;;  %v2195_v45 = vsub.f32 %v3715_v10, %v3747_v61  ;;  %v2222_v47 = vmul.f32 %v2190_v19, %v2190_v19  ;;  %v2223_v49 = vmul.f32 %v2191_v21, %v2191_v21 }
 0x21f   : > { %v2240_v27 = vadd.f32 %v2239_v15, %v2214_v63  ;;  %v2261_v28 = vadd.f32 %v2260_v17, %v2215_v1  ;;  %v2196_v55 = vsub.f32 %v3718_v12, %v3745_v59  ;;  %v2197_v57 = vsub.f32 %v3721_v14, %v3747_v61 }
 0x220   : > { %v2224_v63 = vmul.f32 %v2192_v29, %v2192_v29  ;;  %v2225_v1 = vmul.f32 %v2193_v30, %v2193_v30  ;;  %v2198_v7 = vsub.f32 %v3724_v16, %v3745_v59  ;;  %v2199_v9 = vsub.f32 %v3727_v18, %v3747_v61 }
 0x221   : > { %v2241_v39 = vadd.f32 %v2240_v27, %v2216_v11  ;;  %v2262_v41 = vadd.f32 %v2261_v28, %v2217_v13  ;;  %v2226_v11 = vmul.f32 %v2194_v43, %v2194_v43  ;;  %v2227_v13 = vmul.f32 %v2195_v45, %v2195_v45 }
 0x222   : > { %v2200_v19 = vsub.f32 %v3730_v20, %v3745_v59  ;;  %v2201_v21 = vsub.f32 %v3733_v22, %v3747_v61  ;;  %v2202_v29 = vsub.f32 %v3736_v24, %v3745_v59  ;;  %v2203_v30 = vsub.f32 %v3739_v26, %v3747_v61 }
 0x223   : > { %v2242_v51 = vadd.f32 %v2241_v39, %v2218_v23  ;;  %v2263_v53 = vadd.f32 %v2262_v41, %v2219_v25  ;;  %v2228_v23 = vmul.f32 %v2196_v55, %v2196_v55  ;;  %v2229_v25 = vmul.f32 %v2197_v57, %v2197_v57 }
 0x224   : > { %v2232_v43 = vmul.f32 %v2200_v19, %v2200_v19  ;;  %v2233_v45 = vmul.f32 %v2201_v21, %v2201_v21 }
 0x225   : > { %v2243_v3 = vadd.f32 %v2242_v51, %v2220_v31  ;;  %v2264_v5 = vadd.f32 %v2263_v53, %v2221_v32  ;;  %v2230_v31 = vmul.f32 %v2198_v7, %v2198_v7  ;;  %v2231_v32 = vmul.f32 %v2199_v9, %v2199_v9 }
 0x226   : > { %v2234_v51 = vmul.f32 %v2202_v29, %v2202_v29  ;;  %v2235_v53 = vmul.f32 %v2203_v30, %v2203_v30 }
 0x227   : > { %v2244_v15 = vadd.f32 %v2243_v3, %v2222_v47  ;;  %v2265_v17 = vadd.f32 %v2264_v5, %v2223_v49 }
 0x229   : > { %v2245_v27 = vadd.f32 %v2244_v15, %v2224_v63  ;;  %v2266_v28 = vadd.f32 %v2265_v17, %v2225_v1 }
 0x22b   : > { %v2246_v39 = vadd.f32 %v2245_v27, %v2226_v11  ;;  %v2267_v41 = vadd.f32 %v2266_v28, %v2227_v13 }
 0x22d   : > { %v2247_v47 = vadd.f32 %v2246_v39, %v2228_v23  ;;  %v2268_v49 = vadd.f32 %v2267_v41, %v2229_v25  ;;  %v2291_v39 = vlaneseq }
 0x22f   : > { %v2248_v55 = vadd.f32 %v2247_v47, %v2230_v31  ;;  %v2269_v57 = vadd.f32 %v2268_v49, %v2231_v32  ;;  %v3250_v31 = vmov 1966171168  }
 0x230   : > { %v2289_v32 = vunpack.c.l.s4 %v3250_v31 }
 0x231   : > { %v2249_v63 = vadd.f32 %v2248_v55, %v2232_v43  ;;  %v2270_v1 = vadd.f32 %v2269_v57, %v2233_v45  ;;  %v2292_v43 = vshrl.u32 %v2291_v39, 7 }
 0x232   : > { %v2290_v41 = vunpack.c.0.s8 %v2289_v32 }
 0x233   : > { %v2250_v3 = vadd.f32 %v2249_v63, %v2234_v51  ;;  %v2271_v5 = vadd.f32 %v2270_v1, %v2235_v53  ;;  %v2280_v51 = vld [vmem:[%s4012_s2] sm:$0x3]  ;;  %v2308_v55 = vsub.s32 0, %v2292_v43  ;;  %v2312_v57 = vsub.s32 1, %v2292_v43 }
 0x234   : > { %v2293_v47 = vsub.s32 %v2290_v41, %v2292_v43 }
 0x235   : > { %v2251_v15 = vrot.slane %v2250_v3, 4  ;;  %v2272_v17 = vrot.slane %v2271_v5, 4 }
 0x237   : > { %v2252_v24 = vadd.f32 %v2251_v15, %v2250_v3  ;;  %v2273_v26 = vadd.f32 %v2272_v17, %v2271_v5 }
 0x239   : > { %v2253_v7 = vrot.slane %v2252_v24, 2  ;;  %v2274_v9 = vrot.slane %v2273_v26, 2 }
 0x23b   : > { %v2254_v11 = vadd.f32 %v2253_v7, %v2252_v24  ;;  %v2275_v13 = vadd.f32 %v2274_v9, %v2273_v26 }
 0x23d   : > { %v2255_v19 = vrot.slane %v2254_v11, 1  ;;  %v2276_v21 = vrot.slane %v2275_v13, 1 }
 0x23f   : > { %v2256_v23 = vadd.f32 %v2255_v19, %v2254_v11  ;;  %v2277_v25 = vadd.f32 %v2276_v21, %v2275_v13 }
 0x241   : > { %v2278_v27 = vmul.f32 0.0078125, %v2256_v23  ;;  %v2279_v28 = vmul.f32 0.0078125, %v2277_v25 }
 0x243   : > { %v2281_v29 = vadd.f32 1e-05, %v2278_v27  ;;  %v2282_v30 = vadd.f32 1e-05, %v2279_v28 }
 0x245   : > { %3221 = vrsqrt.f32 %v2281_v29 }
 0x246   : > { %3223 = vrsqrt.f32 %v2282_v30 }
 0x24f   : > { %v3222_v45 = vpop.eup %3221 }
 0x250   : > { %v3224_v49 = vpop.eup %3223 }
 0x251   : > { %v2287_v24 = vcombine.low %v3222_v45, %v3224_v49 }
 0x253   : > { %v2294_v26 = vrot.slane %v2287_v24, %v2293_v47 }
 0x255   : > { %v2301_v53 = vrot.slane %v2294_v26, %v2293_v47 }
 0x257   : > { %v2303_v63 = vmul.f32 %v2301_v53, %v2280_v51 }
 0x259   : > { %v2309_v1 = vrot.slane %v2303_v63, %v2308_v55  ;;  %v2313_v3 = vrot.slane %v2303_v63, %v2312_v57 }
 0x25b   : > { %v2316_v5 = vmul.f32 %v2309_v1, %v3745_v59  ;;  %v2317_v15 = vmul.f32 %v2313_v3, %v3747_v61  ;;  %v2337_v7 = vmul.f32 %v2309_v1, %v3649_v33  ;;  %v2338_v9 = vmul.f32 %v2313_v3, %v3651_v34  ;;  %v2304_v61 = vld [vmem:[%s4013_s3] sm:$0x3] }
 0x25c   : > { %v2339_v11 = vmul.f32 %v2309_v1, %v3653_v35  ;;  %v2340_v13 = vmul.f32 %v2313_v3, %v3655_v36  ;;  %v2341_v19 = vmul.f32 %v2309_v1, %v3657_v37  ;;  %v2342_v23 = vmul.f32 %v2313_v3, %v3659_v38 }
 0x25d   : > { %v2320_v17 = vcombine.low %v2316_v5, %v2317_v15  ;;  %v2343_v25 = vmul.f32 %v2309_v1, %v3663_v40  ;;  %v2344_v59 = vmul.f32 %v2313_v3, %v3667_v42  ;;  %v2345_v33 = vmul.f32 %v2309_v1, %v3670_v44 }
 0x25e   : > { %v3831_v34 = vmul.f32 %v2313_v3, %v3673_v46  ;;  %v2347_v35 = vmul.f32 %v2309_v1, %v3676_v48  ;;  %v2348_v36 = vmul.f32 %v2313_v3, %v3679_v50  ;;  %v3836_v38 = vmul.f32 %v2309_v1, %v3682_v52 }
 0x25f   : > { %v2327_v21 = vrot.slane %v2320_v17, %v2293_v47  ;;  %v3839_v40 = vmul.f32 %v2313_v3, %v3685_v54  ;;  %v3842_v42 = vmul.f32 %v2309_v1, %v3688_v56  ;;  %v3845_v27 = vmul.f32 %v2313_v3, %v3691_v58 }
 0x260   : > { %v3848_v44 = vmul.f32 %v2309_v1, %v3694_v60  ;;  %v3851_v46 = vmul.f32 %v2313_v3, %v3697_v62  ;;  %v3854_v48 = vmul.f32 %v2309_v1, %v3700_v0  ;;  %v3857_v52 = vmul.f32 %v2313_v3, %v3703_v2 }
 0x261   : > { %v2334_v37 = vrot.slane %v2327_v21, %v2293_v47  ;;  %v3860_v54 = vmul.f32 %v2309_v1, %v3706_v4  ;;  %v3863_v56 = vmul.f32 %v2313_v3, %v3709_v6  ;;  %v3866_v58 = vmul.f32 %v2309_v1, %v3712_v8 }
 0x262   : > { %v3869_v60 = vmul.f32 %v2313_v3, %v3715_v10  ;;  %v3872_v62 = vmul.f32 %v2309_v1, %v3718_v12  ;;  %v3875_v0 = vmul.f32 %v2313_v3, %v3721_v14  ;;  %v3882_v4 = vmul.f32 %v2309_v1, %v3724_v16  ;;  %v4019_v12 = vld [vmem:[#allocation4_spill] sm:$0xff]  ;;  %v4020_v14 = vld [vmem:[#allocation5_spill] sm:$0xff] }
 0x263   : > { %v2336_v50 = vsub.f32 %v2304_v61, %v2334_v37  ;;  %v3885_v6 = vmul.f32 %v2313_v3, %v3727_v18  ;;  %v3888_v8 = vmul.f32 %v2309_v1, %v3730_v20  ;;  %v3891_v10 = vmul.f32 %v2313_v3, %v3733_v22 }
 0x264   : > { %v3894_v29 = vmul.f32 %v2309_v1, %v4019_v12  ;;  %v3897_v30 = vmul.f32 %v2313_v3, %v4020_v14 }
 0x265   : > { %v3877_v2 = vrot.slane %v2336_v50, %v2308_v55  ;;  %v3879_v28 = vrot.slane %v2336_v50, %v2312_v57 }
 0x267   : > { %v2380_v31 = vadd.f32 %v3877_v2, %v2337_v7  ;;  %v2381_v16 = vadd.f32 %v3879_v28, %v2338_v9  ;;  %v2382_v32 = vadd.f32 %v3877_v2, %v2339_v11  ;;  %v2383_v18 = vadd.f32 %v3879_v28, %v2340_v13 }
 0x268   : > { %v2384_v20 = vadd.f32 %v3877_v2, %v2341_v19  ;;  %v2385_v39 = vadd.f32 %v3879_v28, %v2342_v23  ;;  %v2386_v22 = vadd.f32 %v3877_v2, %v2343_v25  ;;  %v2387_v41 = vadd.f32 %v3879_v28, %v2344_v59 }
 0x269   : > { %vm2412_vm0 = vcmp.gt.f32.partialorder %v2380_v31, 0.0  ;;  %vm2413_vm1 = vcmp.gt.f32.partialorder %v2381_v16, 0.0  ;;  %v2444_v43 = vmul.f32 0.2, %v2380_v31  ;;  %v2445_v45 = vmul.f32 0.2, %v2381_v16 }
 0x26a   : > { %vm2414_vm2 = vcmp.gt.f32.partialorder %v2382_v32, 0.0  ;;  %vm2415_vm3 = vcmp.gt.f32.partialorder %v2383_v18, 0.0  ;;  %v2446_v47 = vmul.f32 0.2, %v2382_v32  ;;  %v2447_v49 = vmul.f32 0.2, %v2383_v18 }
 0x26b   : > { %v2476_v24 = vsel %vm2412_vm0, %v2380_v31, %v2444_v43  ;;  %v2477_v26 = vsel %vm2413_vm1, %v2381_v16, %v2445_v45  ;;  %vm2416_vm4 = vcmp.gt.f32.partialorder %v2384_v20, 0.0  ;;  %vm2417_vm5 = vcmp.gt.f32.partialorder %v2385_v39, 0.0 }
 0x26c   : > { %v2891_v51 = vpack.c.bf16 %v2477_v26, %v2476_v24  ;;  %v2478_v53 = vsel %vm2414_vm2, %v2382_v32, %v2446_v47  ;;  %v2479_v55 = vsel %vm2415_vm3, %v2383_v18, %v2447_v49  ;;  %v2448_v57 = vmul.f32 0.2, %v2384_v20 }
 0x26d   : > { %v2892_v63 = vpack.c.bf16 %v2479_v55, %v2478_v53  ;;  %v2449_v1 = vmul.f32 0.2, %v2385_v39  ;;  %vm2418_vm6 = vcmp.gt.f32.partialorder %v2386_v22, 0.0  ;;  %vm2419_vm7 = vcmp.gt.f32.partialorder %v2387_v41, 0.0 }
 0x26e   : > { %2604 = vst [vmem:[%s4014_s4] sm:$0xff] %v2891_v51  ;;  %v2480_v3 = vsel %vm2416_vm4, %v2384_v20, %v2448_v57  ;;  %v2450_v5 = vmul.f32 0.2, %v2386_v22  ;;  %v2451_v15 = vmul.f32 0.2, %v2387_v41  ;;  %v2388_v17 = vadd.f32 %v3877_v2, %v2345_v33 }
 0x26f   : > { %2605 = vst [vmem:[%s4014_s4 + $0x8] sm:$0xff] %v2892_v63  ;;  %v2481_v7 = vsel %vm2417_vm5, %v2385_v39, %v2449_v1  ;;  %v2389_v9 = vadd.f32 %v3879_v28, %v3831_v34  ;;  %v2390_v11 = vadd.f32 %v3877_v2, %v2347_v35  ;;  %v2391_v13 = vadd.f32 %v3879_v28, %v2348_v36 }
 0x270   : > { %v2893_v19 = vpack.c.bf16 %v2481_v7, %v2480_v3  ;;  %v2482_v21 = vsel %vm2418_vm6, %v2386_v22, %v2450_v5  ;;  %v2483_v23 = vsel %vm2419_vm7, %v2387_v41, %v2451_v15  ;;  %vm2420_vm8 = vcmp.gt.f32.partialorder %v2388_v17, 0.0 }
 0x271   : > { %v2894_v25 = vpack.c.bf16 %v2483_v23, %v2482_v21  ;;  %vm2421_vm9 = vcmp.gt.f32.partialorder %v2389_v9, 0.0  ;;  %v2452_v59 = vmul.f32 0.2, %v2388_v17  ;;  %v2453_v61 = vmul.f32 0.2, %v2389_v9 }
 0x272   : > { %2606 = vst [vmem:[%s4014_s4 + $0x10] sm:$0xff] %v2893_v19  ;;  %vm2422_vm10 = vcmp.gt.f32.partialorder %v2390_v11, 0.0  ;;  %vm2423_vm11 = vcmp.gt.f32.partialorder %v2391_v13, 0.0  ;;  %v2454_v33 = vmul.f32 0.2, %v2390_v11  ;;  %v2392_v37 = vadd.f32 %v3877_v2, %v3836_v38 }
 0x273   : > { %v2455_v34 = vmul.f32 0.2, %v2391_v13  ;;  %2607 = vst [vmem:[%s4014_s4 + $0x18] sm:$0xff] %v2894_v25  ;;  %v2484_v35 = vsel %vm2420_vm8, %v2388_v17, %v2452_v59  ;;  %v2485_v36 = vsel %vm2421_vm9, %v2389_v9, %v2453_v61  ;;  %v2393_v50 = vadd.f32 %v3879_v28, %v3839_v40 }
 0x274   : > { %v2895_v12 = vpack.c.bf16 %v2485_v36, %v2484_v35  ;;  %v2486_v14 = vsel %vm2422_vm10, %v2390_v11, %v2454_v33  ;;  %v2394_v16 = vadd.f32 %v3877_v2, %v3842_v42  ;;  %vm2424_vm12 = vcmp.gt.f32.partialorder %v2392_v37, 0.0 }
 0x275   : > { %v2487_v31 = vsel %vm2423_vm11, %v2391_v13, %v2455_v34  ;;  %vm2425_vm13 = vcmp.gt.f32.partialorder %v2393_v50, 0.0  ;;  %v2456_v18 = vmul.f32 0.2, %v2392_v37  ;;  %v2457_v20 = vmul.f32 0.2, %v2393_v50 }
 0x276   : > { %v2896_v32 = vpack.c.bf16 %v2487_v31, %v2486_v14  ;;  %2608 = vst [vmem:[%s4014_s4 + $0x20] sm:$0xff] %v2895_v12  ;;  %v2395_v38 = vadd.f32 %v3879_v28, %v3845_v27  ;;  %vm2426_vm14 = vcmp.gt.f32.partialorder %v2394_v16, 0.0  ;;  %v2458_v40 = vmul.f32 0.2, %v2394_v16 }
 0x277   : > { %v2488_v39 = vsel %vm2424_vm12, %v2392_v37, %v2456_v18  ;;  %v2396_v42 = vadd.f32 %v3877_v2, %v3848_v44  ;;  %v2397_v22 = vadd.f32 %v3879_v28, %v3851_v46  ;;  %v2398_v41 = vadd.f32 %v3877_v2, %v3854_v48 }
 0x278   : > { %2609 = vst [vmem:[%s4014_s4 + $0x28] sm:$0xff] %v2896_v32  ;;  %v2489_v43 = vsel %vm2425_vm13, %v2393_v50, %v2457_v20  ;;  %vm2427_vm15 = vcmp.gt.f32.partialorder %v2395_v38, 0.0  ;;  %v2459_v45 = vmul.f32 0.2, %v2395_v38  ;;  %v2490_v27 = vsel %vm2426_vm14, %v2394_v16, %v2458_v40 }
 0x279   : > { %v2897_v47 = vpack.c.bf16 %v2489_v43, %v2488_v39  ;;  %vm2428_vm0 = vcmp.gt.f32.partialorder %v2396_v42, 0.0  ;;  %vm2429_vm1 = vcmp.gt.f32.partialorder %v2397_v22, 0.0  ;;  %v2460_v49 = vmul.f32 0.2, %v2396_v42 }
 0x27a   : > { %v2491_v24 = vsel %vm2427_vm15, %v2395_v38, %v2459_v45  ;;  %v2461_v26 = vmul.f32 0.2, %v2397_v22  ;;  %v2399_v51 = vadd.f32 %v3879_v28, %v3857_v52  ;;  %vm2430_vm2 = vcmp.gt.f32.partialorder %v2398_v41, 0.0 }
 0x27b   : > { %2610 = vst [vmem:[%s4014_s4 + $0x30] sm:$0xff] %v2897_v47  ;;  %v2898_v44 = vpack.c.bf16 %v2491_v24, %v2490_v27  ;;  %v2492_v46 = vsel %vm2428_vm0, %v2396_v42, %v2460_v49  ;;  %v2462_v48 = vmul.f32 0.2, %v2398_v41  ;;  %v2400_v53 = vadd.f32 %v3877_v2, %v3860_v54 }
 0x27c   : > { %v2493_v55 = vsel %vm2429_vm1, %v2397_v22, %v2461_v26  ;;  %vm2431_vm3 = vcmp.gt.f32.partialorder %v2399_v51, 0.0  ;;  %v2463_v57 = vmul.f32 0.2, %v2399_v51  ;;  %v2401_v63 = vadd.f32 %v3879_v28, %v3863_v56 }
 0x27d   : > { %2611 = vst [vmem:[%s4014_s4 + $0x38] sm:$0xff] %v2898_v44  ;;  %v2899_v52 = vpack.c.bf16 %v2493_v55, %v2492_v46  ;;  %v2494_v1 = vsel %vm2430_vm2, %v2398_v41, %v2462_v48  ;;  %vm2432_vm4 = vcmp.gt.f32.partialorder %v2400_v53, 0.0  ;;  %v2464_v3 = vmul.f32 0.2, %v2400_v53 }
 0x27e   : > { %v2495_v5 = vsel %vm2431_vm3, %v2399_v51, %v2463_v57  ;;  %vm2433_vm5 = vcmp.gt.f32.partialorder %v2401_v63, 0.0  ;;  %v2465_v15 = vmul.f32 0.2, %v2401_v63  ;;  %v2402_v54 = vadd.f32 %v3877_v2, %v3866_v58 }
 0x27f   : > { %2612 = vst [vmem:[%s4014_s4 + $0x40] sm:$0xff] %v2899_v52  ;;  %v2900_v17 = vpack.c.bf16 %v2495_v5, %v2494_v1  ;;  %v2496_v56 = vsel %vm2432_vm4, %v2400_v53, %v2464_v3  ;;  %v2403_v7 = vadd.f32 %v3879_v28, %v3869_v60  ;;  %v2404_v9 = vadd.f32 %v3877_v2, %v3872_v62 }
 0x280   : > { %v2497_v11 = vsel %vm2433_vm5, %v2401_v63, %v2465_v15  ;;  %vm2434_vm6 = vcmp.gt.f32.partialorder %v2402_v54, 0.0  ;;  %v2466_v13 = vmul.f32 0.2, %v2402_v54  ;;  %v2405_v19 = vadd.f32 %v3879_v28, %v3875_v0 }
 0x281   : > { %2613 = vst [vmem:[%s4014_s4 + $0x48] sm:$0xff] %v2900_v17  ;;  %v2901_v58 = vpack.c.bf16 %v2497_v11, %v2496_v56  ;;  %vm2435_vm7 = vcmp.gt.f32.partialorder %v2403_v7, 0.0  ;;  %v2467_v21 = vmul.f32 0.2, %v2403_v7  ;;  %vm2436_vm8 = vcmp.gt.f32.partialorder %v2404_v9, 0.0 }
 0x282   : > { %v2498_v23 = vsel %vm2434_vm6, %v2402_v54, %v2466_v13  ;;  %vm2437_vm9 = vcmp.gt.f32.partialorder %v2405_v19, 0.0  ;;  %v2468_v60 = vmul.f32 0.2, %v2404_v9  ;;  %v2469_v25 = vmul.f32 0.2, %v2405_v19 }
 0x283   : > { %2614 = vst [vmem:[%s4014_s4 + $0x50] sm:$0xff] %v2901_v58  ;;  %v2499_v62 = vsel %vm2435_vm7, %v2403_v7, %v2467_v21  ;;  %v2406_v0 = vadd.f32 %v3877_v2, %v3882_v4  ;;  %v2407_v59 = vadd.f32 %v3879_v28, %v3885_v6  ;;  %v2408_v61 = vadd.f32 %v3877_v2, %v3888_v8 }
 0x284   : > { %v2902_v33 = vpack.c.bf16 %v2499_v62, %v2498_v23  ;;  %v2500_v34 = vsel %vm2436_vm8, %v2404_v9, %v2468_v60  ;;  %v2501_v35 = vsel %vm2437_vm9, %v2405_v19, %v2469_v25  ;;  %v2409_v36 = vadd.f32 %v3879_v28, %v3891_v10 }
 0x285   : > { %v2903_v37 = vpack.c.bf16 %v2501_v35, %v2500_v34  ;;  %vm2438_vm10 = vcmp.gt.f32.partialorder %v2406_v0, 0.0  ;;  %vm2439_vm11 = vcmp.gt.f32.partialorder %v2407_v59, 0.0  ;;  %v2470_v50 = vmul.f32 0.2, %v2406_v0 }
 0x286   : > { %2615 = vst [vmem:[%s4014_s4 + $0x58] sm:$0xff] %v2902_v33  ;;  %v2471_v4 = vmul.f32 0.2, %v2407_v59  ;;  %vm2440_vm12 = vcmp.gt.f32.partialorder %v2408_v61, 0.0  ;;  %vm2441_vm13 = vcmp.gt.f32.partialorder %v2409_v36, 0.0  ;;  %v2410_v10 = vadd.f32 %v3877_v2, %v3894_v29 }
 0x287   : > { %v2472_v6 = vmul.f32 0.2, %v2408_v61  ;;  %2616 = vst [vmem:[%s4014_s4 + $0x60] sm:$0xff] %v2903_v37  ;;  %v2502_v8 = vsel %vm2438_vm10, %v2406_v0, %v2470_v50  ;;  %v2473_v12 = vmul.f32 0.2, %v2409_v36  ;;  %v2411_v14 = vadd.f32 %v3879_v28, %v3897_v30 }
 0x288   : > { %v2503_v31 = vsel %vm2439_vm11, %v2407_v59, %v2471_v4  ;;  %vm2442_vm14 = vcmp.gt.f32.partialorder %v2410_v10, 0.0  ;;  %v2474_v38 = vmul.f32 0.2, %v2410_v10 }
 0x289   : > { %v2504_v16 = vsel %vm2440_vm12, %v2408_v61, %v2472_v6  ;;  %v2904_v32 = vpack.c.bf16 %v2503_v31, %v2502_v8  ;;  %v2505_v18 = vsel %vm2441_vm13, %v2409_v36, %v2473_v12  ;;  %vm2443_vm15 = vcmp.gt.f32.partialorder %v2411_v14, 0.0 }
 0x28a   : > { %v2905_v20 = vpack.c.bf16 %v2505_v18, %v2504_v16  ;;  %v2475_v40 = vmul.f32 0.2, %v2411_v14  ;;  %v2506_v2 = vsel %vm2442_vm14, %v2410_v10, %v2474_v38 }
 0x28b   : > { %2617 = vst [vmem:[%s4014_s4 + $0x68] sm:$0xff] %v2904_v32 }
 0x28c   : > { %2618 = vst [vmem:[%s4014_s4 + $0x70] sm:$0xff] %v2905_v20  ;;  %v2507_v29 = vsel %vm2443_vm15, %v2411_v14, %v2475_v40 }
 0x28d   : > { %v2906_v28 = vpack.c.bf16 %v2507_v29, %v2506_v2 }
 0x28f   : > { %2619 = vst [vmem:[%s4014_s4 + $0x78] sm:$0xff] %v2906_v28 }
 0x290 PF: > { %p11_p11 = scmp.ge.s32.totalorder %s3295_s19, 4   ;;  %s4021_s15 = smov %s3243_s16 }
 0x291   : > { %s4022_s16 = smov %s3304_s22  ;;  %s4023_s17 = smov %s3295_s19 }
 0x292   :  { %13 = sbr.rel (!%p11_p11) target bundleno = 2 (0x2), region = 101 }

// kernel: discriminator_forward.7
= control target key start
LH: loop header
LB: loop body
LE: loop exit
PB: predicated region body
PF: predicated region fallthrough
CT: control target
= control target key end

     0   :  { %s3636_s15 = smov 0   ;;  %s3638_s16 = smov 0   ;;  %s4168_s0 = inlined_call_operand.vmem [shape: bf16[32,4096], index: 0, kind: input, shape index: {}]   ;;  %s4169_s1 = inlined_call_operand.vmem [shape: bf16[4096,512], index: 1, kind: input, shape index: {}]   ;;  %s4170_s2 = inlined_call_operand.vmem [shape: f32[1,512], index: 2, kind: input, shape index: {}]   ;;  %s4171_s3 = inlined_call_operand.vmem [shape: f32[1,512], index: 3, kind: input, shape index: {}]   ;;  %s4172_s4 = inlined_call_operand.vmem [shape: bf16[32,512], index: 4, kind: output, shape index: {}]  }
   0x1   :  { %s3640_s17 = smov 0  }
   0x2 LB: > { %s3652_s18 = sadd.s32 4294967295, %s3607_s17   ;;  %s3655_s19 = sadd.s32 1, %s3607_s17   ;;  %s3607_s17 = sphi %s3640_s17, %s4175_s17   ;;  %s3603_s16 = sphi %s3638_s16, %s4174_s16   ;;  %s3599_s15 = sphi %s3636_s15, %s4173_s15  }
   0x3   : > { %s18_s20 = ssub.s32 %s3607_s17, %s3655_s19  ;;  %s21_s21 = sadd.s32 1, %s3603_s16 }
   0x4   : > { %p19_p0 = scmp.eq.s32.totalorder %s18_s20, 0  ;;  %p28_p1 = scmp.ne.s32.totalorder %s3603_s16, %s3599_s15 }
   0x5   : > { %p29_p2 = scmp.eq.s32.totalorder %s3607_s17, 0  ;;  %p2816_p4 = scmp.ge.s32.totalorder %s3607_s17, 4 }
   0x6   : > { %s3664_s22 = scalar_select %p19_p0, %s3603_s16, %s21_s21  }
   0x7   : > { %p30_p3 = por %p29_p2, %p28_p1  ;;  %149 = sbr.rel (%p2816_p4) target bundleno = 26 (0x1a), region = 24 }
   0xe   : > { %152 = sbr.rel (!%p30_p3) target bundleno = 26 (0x1a), region = 28  ;;  %s154_s23 = sand.u32 (%p30_p3), 1, %s3603_s16  }
   0xf   : > { %s3109_s24 = sshll.u32 (%p30_p3), %s3607_s17, 5  ;;  %s2817_s25 = sshll.u32 (%p30_p3), %s154_s23, 7 }
  0x10   : > { %s3672_s28 = scalar_lea.vmem (%p30_p3), %s4168_s0, %s3109_s24  ;;  %s156_s29 = scalar_lea.vmem (%p30_p3), [#allocation3], %s2817_s25 }
  0x11   : > { %v172_v0 = vld [vmem:[%s3672_s28] sm:$0xff] (%p30_p3)  ;;  %v174_v1 = vld [vmem:[%s3672_s28 + $0x8] sm:$0xff] (%p30_p3)  ;;  %v176_v2 = vld [vmem:[%s3672_s28 + $0x10] sm:$0xff] (%p30_p3) }
  0x12   : > { %173 = vst [vmem:[%s156_s29] sm:$0xff] (%p30_p3), %v172_v0  ;;  %175 = vst [vmem:[%s156_s29 + $0x8] sm:$0xff] (%p30_p3), %v174_v1  ;;  %v178_v3 = vld [vmem:[%s3672_s28 + $0x18] sm:$0xff] (%p30_p3)  ;;  %v180_v4 = vld [vmem:[%s3672_s28 + $0x80] sm:$0xff] (%p30_p3) }
  0x13   : > { %177 = vst [vmem:[%s156_s29 + $0x10] sm:$0xff] (%p30_p3), %v176_v2  ;;  %v182_v5 = vld [vmem:[%s3672_s28 + $0x88] sm:$0xff] (%p30_p3)  ;;  %179 = vst [vmem:[%s156_s29 + $0x18] sm:$0xff] (%p30_p3), %v178_v3  ;;  %v184_v6 = vld [vmem:[%s3672_s28 + $0x90] sm:$0xff] (%p30_p3) }
  0x14   : > { %181 = vst [vmem:[%s156_s29 + $0x20] sm:$0xff] (%p30_p3), %v180_v4  ;;  %183 = vst [vmem:[%s156_s29 + $0x28] sm:$0xff] (%p30_p3), %v182_v5  ;;  %v186_v7 = vld [vmem:[%s3672_s28 + $0x98] sm:$0xff] (%p30_p3)  ;;  %v188_v8 = vld [vmem:[%s3672_s28 + $0x100] sm:$0xff] (%p30_p3) }
  0x15   : > { %185 = vst [vmem:[%s156_s29 + $0x30] sm:$0xff] %v184_v6  ;;  %187 = vst [vmem:[%s156_s29 + $0x38] sm:$0xff] %v186_v7  ;;  %v190_v9 = vld [vmem:[%s3672_s28 + $0x108] sm:$0xff]  ;;  %v192_v10 = vld [vmem:[%s3672_s28 + $0x110] sm:$0xff] }
  0x16   : > { %189 = vst [vmem:[%s156_s29 + $0x40] sm:$0xff] %v188_v8  ;;  %v194_v11 = vld [vmem:[%s3672_s28 + $0x118] sm:$0xff]  ;;  %191 = vst [vmem:[%s156_s29 + $0x48] sm:$0xff] %v190_v9  ;;  %v196_v12 = vld [vmem:[%s3672_s28 + $0x180] sm:$0xff] }
  0x17   : > { %193 = vst [vmem:[%s156_s29 + $0x50] sm:$0xff] %v192_v10  ;;  %195 = vst [vmem:[%s156_s29 + $0x58] sm:$0xff] %v194_v11  ;;  %v198_v13 = vld [vmem:[%s3672_s28 + $0x188] sm:$0xff]  ;;  %v200_v14 = vld [vmem:[%s3672_s28 + $0x190] sm:$0xff] }
  0x18   : > { %197 = vst [vmem:[%s156_s29 + $0x60] sm:$0xff] %v196_v12  ;;  %199 = vst [vmem:[%s156_s29 + $0x68] sm:$0xff] %v198_v13  ;;  %v202_v15 = vld [vmem:[%s3672_s28 + $0x198] sm:$0xff] }
  0x19   : > { %201 = vst [vmem:[%s156_s29 + $0x70] sm:$0xff] %v200_v14  ;;  %203 = vst [vmem:[%s156_s29 + $0x78] sm:$0xff] %v202_v15 }
  0x1a PF: > { %p2820_p5 = scmp.ge.s32.totalorder %s3607_s17, 1  ;;  %p218_p6 = scmp.lt.s32.totalorder %s3607_s17, 5 }
  0x1c   : > { %p219_p7 = pnand %p2820_p5, %p218_p6 }
  0x1d   : > { %s225_s30 = sand.u32 (!%p219_p7), 1, %s3599_s15   ;;  %s2822_s5 = sshll.u32 (!%p219_p7), %s3652_s18, 7 }
  0x1e   : > { %222 = sbr.rel (%p219_p7) target bundleno = 645 (0x285), region = 55  ;;  %s2821_s6 = sshll.u32 (!%p219_p7), %s225_s30, 7 }
  0x1f   : > { %p253_p8 = scmp.lt.s32.totalorder (!%p219_p7), %s2822_s5, 511  ;;  %s3699_s11 = scalar_lea.vmem (!%p219_p7), [#allocation3], %s2821_s6 }
  0x20   : > { %p2825_p9 = scmp.ne.s32.totalorder (!%p219_p7), %s3652_s18, 0 }
  0x25   : > { %s4177_s5 = smov (!%p253_p8, %s2822_s5), 511  ;;  %262 = sbr.rel (%p2825_p9) target bundleno = 47 (0x2f), region = 63 }
  0x26   : > { %s3110_s7 = sshll.u32 %s4177_s5, 4  ;;  %v3609_v16 = vmov (!%p2825_p9), 0.0  }
  0x27   : > { %s3697_s10 = scalar_lea.vmem %s4169_s1, %s3110_s7  ;;  %263 = vst [vmem:[#allocation2] sm:$0xff] (!%p2825_p9), %v3609_v16  ;;  %264 = vst [vmem:[#allocation2 + $0x8] sm:$0xff] (!%p2825_p9), %v3609_v16 }
  0x28   : > { %265 = vst [vmem:[#allocation2 + $0x10] sm:$0xff] (!%p2825_p9), %v3609_v16  ;;  %266 = vst [vmem:[#allocation2 + $0x18] sm:$0xff] (!%p2825_p9), %v3609_v16 }
  0x29   : > { %267 = vst [vmem:[#allocation2 + $0x20] sm:$0xff] (!%p2825_p9), %v3609_v16  ;;  %268 = vst [vmem:[#allocation2 + $0x28] sm:$0xff] (!%p2825_p9), %v3609_v16 }
  0x2a   : > { %269 = vst [vmem:[#allocation2 + $0x30] sm:$0xff] (!%p2825_p9), %v3609_v16  ;;  %270 = vst [vmem:[#allocation2 + $0x38] sm:$0xff] (!%p2825_p9), %v3609_v16 }
  0x2b   : > { %271 = vst [vmem:[#allocation2 + $0x40] sm:$0xff] (!%p2825_p9), %v3609_v16  ;;  %272 = vst [vmem:[#allocation2 + $0x48] sm:$0xff] (!%p2825_p9), %v3609_v16 }
  0x2c   : > { %273 = vst [vmem:[#allocation2 + $0x50] sm:$0xff] %v3609_v16  ;;  %274 = vst [vmem:[#allocation2 + $0x58] sm:$0xff] %v3609_v16 }
  0x2d   : > { %275 = vst [vmem:[#allocation2 + $0x60] sm:$0xff] %v3609_v16  ;;  %276 = vst [vmem:[#allocation2 + $0x68] sm:$0xff] %v3609_v16 }
  0x2e   : > { %277 = vst [vmem:[#allocation2 + $0x70] sm:$0xff] %v3609_v16  ;;  %278 = vst [vmem:[#allocation2 + $0x78] sm:$0xff] %v3609_v16 }
  0x2f PF: > { %v3193_v17 = vld [vmem:[%s3697_s10 + $0x4] ss:$16 sps:$4 sm:$0xff]   ;;  %v3195_v18 = vld [vmem:[%s3697_s10 + $0xc] ss:$16 sps:$4 sm:$0xff]   ;;  %v3197_v19 = vld [vmem:[%s3697_s10] ss:$16 sps:$4 sm:$0xff]  }
  0x30   : > { %1927 = vmatprep.subr.bf16.mxu0 %v3193_v17  ;;  %v3198_v20 = vld [vmem:[%s3697_s10 + $0x8] ss:$16 sps:$4 sm:$0xff]   ;;  %2139 = vmatprep.subr.bf16.mxu1 %v3195_v18  ;;  %v3199_v21 = vld [vmem:[%s3697_s10 + $0x24] ss:$16 sps:$4 sm:$0xff]   ;;  %v3201_v22 = vld [vmem:[%s3697_s10 + $0x2c] ss:$16 sps:$4 sm:$0xff]  }
  0x31   : > { %1928 = vmatpush1.bf16.msra.mxu0 %v3197_v19  ;;  %2140 = vmatpush1.bf16.msra.mxu1 %v3198_v20  ;;  %v3203_v23 = vld [vmem:[%s3697_s10 + $0x20] ss:$16 sps:$4 sm:$0xff]   ;;  %v3204_v24 = vld [vmem:[%s3697_s10 + $0x28] ss:$16 sps:$4 sm:$0xff]   ;;  %v3205_v25 = vld [vmem:[%s3697_s10 + $0x44] ss:$16 sps:$4 sm:$0xff]  }
  0x32   : > { %1929 = vmatprep.subr.bf16.mxu0 %v3199_v21  ;;  %2141 = vmatprep.subr.bf16.mxu1 %v3201_v22  ;;  %v3207_v26 = vld [vmem:[%s3697_s10 + $0x4c] ss:$16 sps:$4 sm:$0xff]   ;;  %v3209_v27 = vld [vmem:[%s3697_s10 + $0x40] ss:$16 sps:$4 sm:$0xff]   ;;  %v3210_v28 = vld [vmem:[%s3697_s10 + $0x48] ss:$16 sps:$4 sm:$0xff]  }
  0x33   : > { %v3211_v29 = vld [vmem:[%s3697_s10 + $0x64] ss:$16 sps:$4 sm:$0xff]   ;;  %v3213_v30 = vld [vmem:[%s3697_s10 + $0x6c] ss:$16 sps:$4 sm:$0xff]   ;;  %v3215_v31 = vld [vmem:[%s3697_s10 + $0x60] ss:$16 sps:$4 sm:$0xff]  }
  0x34   : > { %v3216_v32 = vld [vmem:[%s3697_s10 + $0x68] ss:$16 sps:$4 sm:$0xff]   ;;  %v3217_v33 = vld [vmem:[%s3697_s10 + $0x84] ss:$16 sps:$4 sm:$0xff]   ;;  %v3219_v34 = vld [vmem:[%s3697_s10 + $0x8c] ss:$16 sps:$4 sm:$0xff]  }
  0x35   : > { %1930 = vmatpush1.bf16.msra.mxu0 %v3203_v23  ;;  %2142 = vmatpush1.bf16.msra.mxu1 %v3204_v24  ;;  %v3221_v35 = vld [vmem:[%s3697_s10 + $0x80] ss:$16 sps:$4 sm:$0xff]   ;;  %v3222_v36 = vld [vmem:[%s3697_s10 + $0x88] ss:$16 sps:$4 sm:$0xff]   ;;  %v3223_v37 = vld [vmem:[%s3697_s10 + $0xa4] ss:$16 sps:$4 sm:$0xff]  }
  0x36   : > { %1931 = vmatprep.subr.bf16.mxu0 %v3205_v25  ;;  %2143 = vmatprep.subr.bf16.mxu1 %v3207_v26  ;;  %v3225_v38 = vld [vmem:[%s3697_s10 + $0xac] ss:$16 sps:$4 sm:$0xff]   ;;  %v3227_v39 = vld [vmem:[%s3697_s10 + $0xa0] ss:$16 sps:$4 sm:$0xff]   ;;  %v3228_v40 = vld [vmem:[%s3697_s10 + $0xa8] ss:$16 sps:$4 sm:$0xff]  }
  0x37   : > { %v3229_v41 = vld [vmem:[%s3697_s10 + $0xc4] ss:$16 sps:$4 sm:$0xff]   ;;  %v3231_v42 = vld [vmem:[%s3697_s10 + $0xcc] ss:$16 sps:$4 sm:$0xff]   ;;  %v3233_v43 = vld [vmem:[%s3697_s10 + $0xc0] ss:$16 sps:$4 sm:$0xff]  }
  0x38   : > { %v3234_v44 = vld [vmem:[%s3697_s10 + $0xc8] ss:$16 sps:$4 sm:$0xff]   ;;  %v3235_v45 = vld [vmem:[%s3697_s10 + $0xe4] ss:$16 sps:$4 sm:$0xff]   ;;  %v3237_v46 = vld [vmem:[%s3697_s10 + $0xec] ss:$16 sps:$4 sm:$0xff]  }
  0x39   : > { %1932 = vmatpush1.bf16.msra.mxu0 %v3209_v27  ;;  %2144 = vmatpush1.bf16.msra.mxu1 %v3210_v28  ;;  %v3239_v47 = vld [vmem:[%s3697_s10 + $0xe0] ss:$16 sps:$4 sm:$0xff]   ;;  %v3240_v48 = vld [vmem:[%s3697_s10 + $0xe8] ss:$16 sps:$4 sm:$0xff]   ;;  %v3241_v49 = vld [vmem:[%s3697_s10 + $0x104] ss:$16 sps:$4 sm:$0xff]  }
  0x3a   : > { %1933 = vmatprep.subr.bf16.mxu0 %v3211_v29  ;;  %2145 = vmatprep.subr.bf16.mxu1 %v3213_v30  ;;  %v3243_v50 = vld [vmem:[%s3697_s10 + $0x10c] ss:$16 sps:$4 sm:$0xff]   ;;  %v3245_v51 = vld [vmem:[%s3697_s10 + $0x100] ss:$16 sps:$4 sm:$0xff]   ;;  %v3246_v52 = vld [vmem:[%s3697_s10 + $0x108] ss:$16 sps:$4 sm:$0xff]  }
  0x3b   : > { %v3247_v53 = vld [vmem:[%s3697_s10 + $0x124] ss:$16 sps:$4 sm:$0xff]   ;;  %v3249_v54 = vld [vmem:[%s3697_s10 + $0x12c] ss:$16 sps:$4 sm:$0xff]   ;;  %v3251_v55 = vld [vmem:[%s3697_s10 + $0x120] ss:$16 sps:$4 sm:$0xff]  }
  0x3c   : > { %v3252_v56 = vld [vmem:[%s3697_s10 + $0x128] ss:$16 sps:$4 sm:$0xff]   ;;  %v3253_v57 = vld [vmem:[%s3697_s10 + $0x144] ss:$16 sps:$4 sm:$0xff]   ;;  %v3255_v58 = vld [vmem:[%s3697_s10 + $0x14c] ss:$16 sps:$4 sm:$0xff]  }
  0x3d   : > { %1934 = vmatpush1.bf16.msra.mxu0 %v3215_v31  ;;  %2146 = vmatpush1.bf16.msra.mxu1 %v3216_v32  ;;  %v3257_v59 = vld [vmem:[%s3697_s10 + $0x140] ss:$16 sps:$4 sm:$0xff]   ;;  %v3258_v60 = vld [vmem:[%s3697_s10 + $0x148] ss:$16 sps:$4 sm:$0xff]   ;;  %v3259_v61 = vld [vmem:[%s3697_s10 + $0x164] ss:$16 sps:$4 sm:$0xff]  }
  0x3e   : > { %1935 = vmatprep.subr.bf16.mxu0 %v3217_v33  ;;  %2147 = vmatprep.subr.bf16.mxu1 %v3219_v34  ;;  %v3261_v62 = vld [vmem:[%s3697_s10 + $0x16c] ss:$16 sps:$4 sm:$0xff]   ;;  %v295_v63 = vld [vmem:[%s3699_s11] sm:$0xff]  ;;  %v3264_v2 = vld [vmem:[%s3697_s10 + $0x168] ss:$16 sps:$4 sm:$0xff]   ;;  %p3098_p10 = scmp.ne.s32.totalorder %s3652_s18, 3 }
  0x3f   : > { %v299_v0 = vld [vmem:[%s3699_s11 + $0x20] sm:$0xff]  ;;  %v3267_v5 = vld [vmem:[%s3697_s10 + $0x18c] ss:$16 sps:$4 sm:$0xff]   ;;  %v3270_v7 = vld [vmem:[%s3697_s10 + $0x188] ss:$16 sps:$4 sm:$0xff]  }
  0x40   : > { %v3263_v1 = vld [vmem:[%s3697_s10 + $0x160] ss:$16 sps:$4 sm:$0xff]   ;;  %v2827_v3 = vcombine.high %v295_v63, %v299_v0  ;;  %v3265_v4 = vld [vmem:[%s3697_s10 + $0x184] ss:$16 sps:$4 sm:$0xff]   ;;  %v3273_v9 = vld [vmem:[%s3697_s10 + $0x1ac] ss:$16 sps:$4 sm:$0xff]   ;;  %v2826_v22 = vcombine.low %v295_v63, %v299_v0 }
  0x41   : > { %1936 = vmatpush1.bf16.msra.mxu0 %v3221_v35  ;;  %2148 = vmatpush1.bf16.msra.mxu1 %v3222_v36  ;;  %v3269_v6 = vld [vmem:[%s3697_s10 + $0x180] ss:$16 sps:$4 sm:$0xff]   ;;  %v3271_v8 = vld [vmem:[%s3697_s10 + $0x1a4] ss:$16 sps:$4 sm:$0xff]   ;;  %v3276_v11 = vld [vmem:[%s3697_s10 + $0x1a8] ss:$16 sps:$4 sm:$0xff]  }
  0x42   : > { %1937 = vmatprep.subr.bf16.mxu0 %v3223_v37  ;;  %2149 = vmatprep.subr.bf16.mxu1 %v3225_v38  ;;  %v3275_v10 = vld [vmem:[%s3697_s10 + $0x1a0] ss:$16 sps:$4 sm:$0xff]   ;;  %v3277_v12 = vld [vmem:[%s3697_s10 + $0x1c4] ss:$16 sps:$4 sm:$0xff]   ;;  %v3279_v13 = vld [vmem:[%s3697_s10 + $0x1cc] ss:$16 sps:$4 sm:$0xff]  }
  0x43   : > { %1959 = vmatprep.mubr.bf16.mxu0 %v2827_v3  ;;  %2171 = vmatprep.mubr.bf16.mxu1 %v2827_v3  ;;  %v3281_v14 = vld [vmem:[%s3697_s10 + $0x1c0] ss:$16 sps:$4 sm:$0xff]   ;;  %v3282_v15 = vld [vmem:[%s3697_s10 + $0x1c8] ss:$16 sps:$4 sm:$0xff]   ;;  %v3283_v16 = vld [vmem:[%s3697_s10 + $0x1e4] ss:$16 sps:$4 sm:$0xff]  }
  0x44   : > { %v3285_v17 = vld [vmem:[%s3697_s10 + $0x1ec] ss:$16 sps:$4 sm:$0xff]   ;;  %v3287_v18 = vld [vmem:[%s3697_s10 + $0x1e0] ss:$16 sps:$4 sm:$0xff]   ;;  %v3288_v19 = vld [vmem:[%s3697_s10 + $0x1e8] ss:$16 sps:$4 sm:$0xff]  }
  0x45   : > { %1938 = vmatpush1.bf16.msra.mxu0 %v3227_v39  ;;  %2150 = vmatpush1.bf16.msra.mxu1 %v3228_v40  ;;  %v3291_v20 = vld [vmem:[%s3697_s10 + $0x204] ss:$16 sps:$4 sm:$0xff]   ;;  %v3294_v21 = vld [vmem:[%s3697_s10 + $0x20c] ss:$16 sps:$4 sm:$0xff]   ;;  %v3289_v23 = vld [vmem:[%s3697_s10 + $0x200] ss:$16 sps:$4 sm:$0xff]  }
  0x46   : > { %1939 = vmatprep.subr.bf16.mxu0 %v3229_v41  ;;  %2151 = vmatprep.subr.bf16.mxu1 %v3231_v42  ;;  %v3292_v24 = vld [vmem:[%s3697_s10 + $0x208] ss:$16 sps:$4 sm:$0xff]   ;;  %v3297_v25 = vld [vmem:[%s3697_s10 + $0x224] ss:$16 sps:$4 sm:$0xff]   ;;  %v3300_v26 = vld [vmem:[%s3697_s10 + $0x22c] ss:$16 sps:$4 sm:$0xff]  }
  0x47   : > { %v3295_v27 = vld [vmem:[%s3697_s10 + $0x220] ss:$16 sps:$4 sm:$0xff]   ;;  %v3298_v28 = vld [vmem:[%s3697_s10 + $0x228] ss:$16 sps:$4 sm:$0xff]   ;;  %v3303_v29 = vld [vmem:[%s3697_s10 + $0x244] ss:$16 sps:$4 sm:$0xff]  }
  0x48   : > { %v3306_v30 = vld [vmem:[%s3697_s10 + $0x24c] ss:$16 sps:$4 sm:$0xff]   ;;  %v3301_v31 = vld [vmem:[%s3697_s10 + $0x240] ss:$16 sps:$4 sm:$0xff]   ;;  %v3304_v32 = vld [vmem:[%s3697_s10 + $0x248] ss:$16 sps:$4 sm:$0xff]  }
  0x49   : > { %1940 = vmatpush1.bf16.msra.mxu0 %v3233_v43  ;;  %2152 = vmatpush1.bf16.msra.mxu1 %v3234_v44  ;;  %v3309_v33 = vld [vmem:[%s3697_s10 + $0x264] ss:$16 sps:$4 sm:$0xff]   ;;  %v3312_v34 = vld [vmem:[%s3697_s10 + $0x26c] ss:$16 sps:$4 sm:$0xff]   ;;  %v3307_v35 = vld [vmem:[%s3697_s10 + $0x260] ss:$16 sps:$4 sm:$0xff]  }
  0x4a   : > { %1941 = vmatprep.subr.bf16.mxu0 %v3235_v45  ;;  %2153 = vmatprep.subr.bf16.mxu1 %v3237_v46  ;;  %v3310_v36 = vld [vmem:[%s3697_s10 + $0x268] ss:$16 sps:$4 sm:$0xff]   ;;  %v3315_v37 = vld [vmem:[%s3697_s10 + $0x284] ss:$16 sps:$4 sm:$0xff]   ;;  %v3318_v38 = vld [vmem:[%s3697_s10 + $0x28c] ss:$16 sps:$4 sm:$0xff]  }
  0x4b   : > { %v3313_v39 = vld [vmem:[%s3697_s10 + $0x280] ss:$16 sps:$4 sm:$0xff]   ;;  %v3316_v40 = vld [vmem:[%s3697_s10 + $0x288] ss:$16 sps:$4 sm:$0xff]   ;;  %v3321_v41 = vld [vmem:[%s3697_s10 + $0x2a4] ss:$16 sps:$4 sm:$0xff]  }
  0x4c   : > { %v3324_v42 = vld [vmem:[%s3697_s10 + $0x2ac] ss:$16 sps:$4 sm:$0xff]   ;;  %v303_v43 = vld [vmem:[%s3699_s11 + $0x40] sm:$0xff]  ;;  %v3340_v63 = vld [vmem:[%s3697_s10 + $0x308] ss:$16 sps:$4 sm:$0xff]  }
  0x4d   : > { %1942 = vmatpush1.bf16.msra.mxu0 %v3239_v47  ;;  %2154 = vmatpush1.bf16.msra.mxu1 %v3240_v48  ;;  %v307_v44 = vld [vmem:[%s3699_s11 + $0x60] sm:$0xff]  ;;  %v3322_v47 = vld [vmem:[%s3697_s10 + $0x2a8] ss:$16 sps:$4 sm:$0xff]  }
  0x4e   : > { %1943 = vmatprep.subr.bf16.mxu0 %v3241_v49  ;;  %2155 = vmatprep.subr.bf16.mxu1 %v3243_v50  ;;  %v2835_v45 = vcombine.high %v303_v43, %v307_v44  ;;  %v3319_v46 = vld [vmem:[%s3697_s10 + $0x2a0] ss:$16 sps:$4 sm:$0xff]   ;;  %v2834_v48 = vcombine.low %v303_v43, %v307_v44  ;;  %v3327_v49 = vld [vmem:[%s3697_s10 + $0x2c4] ss:$16 sps:$4 sm:$0xff]   ;;  %v3330_v50 = vld [vmem:[%s3697_s10 + $0x2cc] ss:$16 sps:$4 sm:$0xff]  }
  0x4f   : > { %v3345_v0 = vld [vmem:[%s3697_s10 + $0x324] ss:$16 sps:$4 sm:$0xff]   ;;  %v3346_v3 = vld [vmem:[%s3697_s10 + $0x328] ss:$16 sps:$4 sm:$0xff]  }
  0x50   : > { %v3860_v44 = vld [vmem:[%s3699_s11 + $0x30] sm:$0xff] }
  0x51   : > { %1944 = vmatpush1.bf16.msra.mxu0 %v3245_v51  ;;  %2156 = vmatpush1.bf16.msra.mxu1 %v3246_v52  ;;  %v3797_v51 = vld [vmem:[%s3699_s11 + $0x8] sm:$0xff] }
  0x52   : > { %1945 = vmatprep.subr.bf16.mxu0 %v3247_v53  ;;  %2157 = vmatprep.subr.bf16.mxu1 %v3249_v54  ;;  %v3800_v52 = vld [vmem:[%s3699_s11 + $0x28] sm:$0xff]  ;;  %v3325_v53 = vld [vmem:[%s3697_s10 + $0x2c0] ss:$16 sps:$4 sm:$0xff]  }
  0x53   : > { %v3328_v54 = vld [vmem:[%s3697_s10 + $0x2c8] ss:$16 sps:$4 sm:$0xff]  }
  0x55   : > { %1946 = vmatpush1.bf16.msra.mxu0 %v3251_v55  ;;  %2158 = vmatpush1.bf16.msra.mxu1 %v3252_v56  ;;  %v2829_v55 = vcombine.high %v3797_v51, %v3800_v52  ;;  %v3333_v56 = vld [vmem:[%s3697_s10 + $0x2e4] ss:$16 sps:$4 sm:$0xff]  }
  0x56   : > { %1947 = vmatprep.subr.bf16.mxu0 %v3253_v57  ;;  %2159 = vmatprep.subr.bf16.mxu1 %v3255_v58  ;;  %v3336_v57 = vld [vmem:[%s3697_s10 + $0x2ec] ss:$16 sps:$4 sm:$0xff]   ;;  %v3331_v58 = vld [vmem:[%s3697_s10 + $0x2e0] ss:$16 sps:$4 sm:$0xff]  }
  0x59   : > { %1948 = vmatpush1.bf16.msra.mxu0 %v3257_v59  ;;  %2160 = vmatpush1.bf16.msra.mxu1 %v3258_v60  ;;  %v3334_v59 = vld [vmem:[%s3697_s10 + $0x2e8] ss:$16 sps:$4 sm:$0xff]   ;;  %v3339_v60 = vld [vmem:[%s3697_s10 + $0x304] ss:$16 sps:$4 sm:$0xff]  }
  0x5a   : > { %1949 = vmatprep.subr.bf16.mxu0 %v3259_v61  ;;  %2161 = vmatprep.subr.bf16.mxu1 %v3261_v62  ;;  %v3342_v61 = vld [vmem:[%s3697_s10 + $0x30c] ss:$16 sps:$4 sm:$0xff]   ;;  %v3337_v62 = vld [vmem:[%s3697_s10 + $0x300] ss:$16 sps:$4 sm:$0xff]  }
  0x5d   : > { %1950 = vmatpush1.bf16.msra.mxu0 %v3263_v1  ;;  %2162 = vmatpush1.bf16.msra.mxu1 %v3264_v2  ;;  %v3348_v1 = vld [vmem:[%s3697_s10 + $0x32c] ss:$16 sps:$4 sm:$0xff]   ;;  %v3343_v2 = vld [vmem:[%s3697_s10 + $0x320] ss:$16 sps:$4 sm:$0xff]  }
  0x5e   : > { %1951 = vmatprep.subr.bf16.mxu0 %v3265_v4  ;;  %2163 = vmatprep.subr.bf16.mxu1 %v3267_v5  ;;  %v3351_v4 = vld [vmem:[%s3697_s10 + $0x344] ss:$16 sps:$4 sm:$0xff]   ;;  %v3354_v5 = vld [vmem:[%s3697_s10 + $0x34c] ss:$16 sps:$4 sm:$0xff]  }
  0x61   : > { %1952 = vmatpush1.bf16.msra.mxu0 %v3269_v6  ;;  %2164 = vmatpush1.bf16.msra.mxu1 %v3270_v7  ;;  %v3349_v6 = vld [vmem:[%s3697_s10 + $0x340] ss:$16 sps:$4 sm:$0xff]   ;;  %v3352_v7 = vld [vmem:[%s3697_s10 + $0x348] ss:$16 sps:$4 sm:$0xff]  }
  0x62   : > { %1953 = vmatprep.subr.bf16.mxu0 %v3271_v8  ;;  %2165 = vmatprep.subr.bf16.mxu1 %v3273_v9  ;;  %v3357_v8 = vld [vmem:[%s3697_s10 + $0x364] ss:$16 sps:$4 sm:$0xff]   ;;  %v3360_v9 = vld [vmem:[%s3697_s10 + $0x36c] ss:$16 sps:$4 sm:$0xff]  }
  0x65   : > { %1954 = vmatpush1.bf16.msra.mxu0 %v3275_v10  ;;  %2166 = vmatpush1.bf16.msra.mxu1 %v3276_v11  ;;  %v3355_v10 = vld [vmem:[%s3697_s10 + $0x360] ss:$16 sps:$4 sm:$0xff]   ;;  %v3358_v11 = vld [vmem:[%s3697_s10 + $0x368] ss:$16 sps:$4 sm:$0xff]  }
  0x66   : > { %1955 = vmatprep.subr.bf16.mxu0 %v3277_v12  ;;  %2167 = vmatprep.subr.bf16.mxu1 %v3279_v13  ;;  %v3363_v12 = vld [vmem:[%s3697_s10 + $0x384] ss:$16 sps:$4 sm:$0xff]   ;;  %v3366_v13 = vld [vmem:[%s3697_s10 + $0x38c] ss:$16 sps:$4 sm:$0xff]  }
  0x69   : > { %1956 = vmatpush1.bf16.msra.mxu0 %v3281_v14  ;;  %2168 = vmatpush1.bf16.msra.mxu1 %v3282_v15  ;;  %v3361_v14 = vld [vmem:[%s3697_s10 + $0x380] ss:$16 sps:$4 sm:$0xff]   ;;  %v3364_v15 = vld [vmem:[%s3697_s10 + $0x388] ss:$16 sps:$4 sm:$0xff]  }
  0x6a   : > { %1957 = vmatprep.subr.bf16.mxu0 %v3283_v16  ;;  %2169 = vmatprep.subr.bf16.mxu1 %v3285_v17  ;;  %v3369_v16 = vld [vmem:[%s3697_s10 + $0x3a4] ss:$16 sps:$4 sm:$0xff]   ;;  %v3372_v17 = vld [vmem:[%s3697_s10 + $0x3ac] ss:$16 sps:$4 sm:$0xff]  }
  0x6d   : > { %1958 = vmatpush1.bf16.msra.mxu0 %v3287_v18  ;;  %2170 = vmatpush1.bf16.msra.mxu1 %v3288_v19  ;;  %v3367_v18 = vld [vmem:[%s3697_s10 + $0x3a0] ss:$16 sps:$4 sm:$0xff]   ;;  %v3370_v19 = vld [vmem:[%s3697_s10 + $0x3a8] ss:$16 sps:$4 sm:$0xff]  }
  0x6e   : > { %1980 = vmatprep.subr.bf16.mxu0 %v3291_v20  ;;  %2192 = vmatprep.subr.bf16.mxu1 %v3294_v21  ;;  %v3375_v20 = vld [vmem:[%s3697_s10 + $0x3c4] ss:$16 sps:$4 sm:$0xff]   ;;  %v3378_v21 = vld [vmem:[%s3697_s10 + $0x3cc] ss:$16 sps:$4 sm:$0xff]  }
  0x70   : > { %1960 = vmatmul.mubr.bf16.vlgmr.msra.gmra.mrb[0].mxu0 %v2826_v22  ;;  %2172 = vmatmul.mubr.bf16.vlgmr.msra.gmra.mrb[0].mxu1 %v2826_v22  ;;  %v3373_v22 = vld [vmem:[%s3697_s10 + $0x3c0] ss:$16 sps:$4 sm:$0xff]  }
  0x71   : > { %1981 = vmatpush1.bf16.msra.mxu0 %v3289_v23  ;;  %2193 = vmatpush1.bf16.msra.mxu1 %v3292_v24  ;;  %v3376_v23 = vld [vmem:[%s3697_s10 + $0x3c8] ss:$16 sps:$4 sm:$0xff]   ;;  %v3381_v24 = vld [vmem:[%s3697_s10 + $0x3e4] ss:$16 sps:$4 sm:$0xff]  }
  0x72   : > { %1982 = vmatprep.subr.bf16.mxu0 %v3297_v25  ;;  %2194 = vmatprep.subr.bf16.mxu1 %v3300_v26  ;;  %v3384_v25 = vld [vmem:[%s3697_s10 + $0x3ec] ss:$16 sps:$4 sm:$0xff]   ;;  %v3379_v26 = vld [vmem:[%s3697_s10 + $0x3e0] ss:$16 sps:$4 sm:$0xff]  }
  0x73   : > { %1969 = vmatprep.mubr.bf16.mxu0 %v2835_v45  ;;  %2181 = vmatprep.mubr.bf16.mxu1 %v2835_v45  ;;  %v3397_v45 = vld [vmem:[%s3697_s10 + $0x440] ss:$16 sps:$4 sm:$0xff]  }
  0x75   : > { %1983 = vmatpush1.bf16.msra.mxu0 %v3295_v27  ;;  %2195 = vmatpush1.bf16.msra.mxu1 %v3298_v28  ;;  %v3382_v27 = vld [vmem:[%s3697_s10 + $0x3e8] ss:$16 sps:$4 sm:$0xff]   ;;  %v3387_v28 = vld [vmem:[%s3697_s10 + $0x404] ss:$16 sps:$4 sm:$0xff]  }
  0x76   : > { %1984 = vmatprep.subr.bf16.mxu0 %v3303_v29  ;;  %2196 = vmatprep.subr.bf16.mxu1 %v3306_v30  ;;  %v3390_v29 = vld [vmem:[%s3697_s10 + $0x40c] ss:$16 sps:$4 sm:$0xff]   ;;  %v3385_v30 = vld [vmem:[%s3697_s10 + $0x400] ss:$16 sps:$4 sm:$0xff]  }
  0x78   : > { %1970 = vmatmul.mubr.bf16.gmra.mrb[4].mxu0 %v2834_v48  ;;  %2182 = vmatmul.mubr.bf16.gmra.mrb[4].mxu1 %v2834_v48  ;;  %v3408_v48 = vld [vmem:[%s3697_s10 + $0x46c] ss:$16 sps:$4 sm:$0xff]  }
  0x79   : > { %1985 = vmatpush1.bf16.msra.mxu0 %v3301_v31  ;;  %2197 = vmatpush1.bf16.msra.mxu1 %v3304_v32  ;;  %v3388_v31 = vld [vmem:[%s3697_s10 + $0x408] ss:$16 sps:$4 sm:$0xff]   ;;  %v2828_v32 = vcombine.low %v3797_v51, %v3800_v52  ;;  %v3411_v52 = vld [vmem:[%s3697_s10 + $0x484] ss:$16 sps:$4 sm:$0xff]  }
  0x7a   : > { %1986 = vmatprep.subr.bf16.mxu0 %v3309_v33  ;;  %2198 = vmatprep.subr.bf16.mxu1 %v3312_v34  ;;  %v304_v33 = vld [vmem:[%s3699_s11 + $0x48] sm:$0xff] }
  0x7b   : > { %2012 = vmatprep.mubr.bf16.mxu0 %v2829_v55  ;;  %2224 = vmatprep.mubr.bf16.mxu1 %v2829_v55  ;;  %v308_v34 = vld [vmem:[%s3699_s11 + $0x68] sm:$0xff] }
  0x7c   : > { %v2836_v43 = vcombine.low %v304_v33, %v308_v34  ;;  %v3406_v51 = vld [vmem:[%s3697_s10 + $0x468] ss:$16 sps:$4 sm:$0xff]  }
  0x7d   : > { %1987 = vmatpush1.bf16.msra.mxu0 %v3307_v35  ;;  %2199 = vmatpush1.bf16.msra.mxu1 %v3310_v36  ;;  %v3393_v35 = vld [vmem:[%s3697_s10 + $0x424] ss:$16 sps:$4 sm:$0xff]   ;;  %v3396_v36 = vld [vmem:[%s3697_s10 + $0x42c] ss:$16 sps:$4 sm:$0xff]   ;;  %v3412_v55 = vld [vmem:[%s3697_s10 + $0x488] ss:$16 sps:$4 sm:$0xff]  }
  0x7e   : > { %1988 = vmatprep.subr.bf16.mxu0 %v3315_v37  ;;  %2200 = vmatprep.subr.bf16.mxu1 %v3318_v38  ;;  %v2837_v37 = vcombine.high %v304_v33, %v308_v34  ;;  %v3391_v38 = vld [vmem:[%s3697_s10 + $0x420] ss:$16 sps:$4 sm:$0xff]   ;;  %v3480_v33 = vld [vmem:[%s3697_s10 + $0x5ec] ss:$16 sps:$4 sm:$0xff]  }
  0x7f   : > { %v3475_v34 = vld [vmem:[%s3697_s10 + $0x5e0] ss:$16 sps:$4 sm:$0xff]  }
  0x81   : > { %1989 = vmatpush1.bf16.msra.mxu0 %v3313_v39  ;;  %2201 = vmatpush1.bf16.msra.mxu1 %v3316_v40  ;;  %v3394_v39 = vld [vmem:[%s3697_s10 + $0x428] ss:$16 sps:$4 sm:$0xff]   ;;  %v3399_v40 = vld [vmem:[%s3697_s10 + $0x444] ss:$16 sps:$4 sm:$0xff]  }
  0x82   : > { %1990 = vmatprep.subr.bf16.mxu0 %v3321_v41  ;;  %2202 = vmatprep.subr.bf16.mxu1 %v3324_v42  ;;  %v3402_v41 = vld [vmem:[%s3697_s10 + $0x44c] ss:$16 sps:$4 sm:$0xff]   ;;  %v3857_v42 = vld [vmem:[%s3699_s11 + $0x10] sm:$0xff] }
  0x85   : > { %1991 = vmatpush1.bf16.msra.mxu0 %v3319_v46  ;;  %2203 = vmatpush1.bf16.msra.mxu1 %v3322_v47  ;;  %v3400_v46 = vld [vmem:[%s3697_s10 + $0x448] ss:$16 sps:$4 sm:$0xff]   ;;  %v3405_v47 = vld [vmem:[%s3697_s10 + $0x464] ss:$16 sps:$4 sm:$0xff]  }
  0x86   : > { %1992 = vmatprep.subr.bf16.mxu0 %v3327_v49  ;;  %2204 = vmatprep.subr.bf16.mxu1 %v3330_v50  ;;  %v2831_v49 = vcombine.high %v3857_v42, %v3860_v44  ;;  %v3403_v50 = vld [vmem:[%s3697_s10 + $0x460] ss:$16 sps:$4 sm:$0xff]  }
  0x89   : > { %1993 = vmatpush1.bf16.msra.mxu0 %v3325_v53  ;;  %2205 = vmatpush1.bf16.msra.mxu1 %v3328_v54  ;;  %v3414_v53 = vld [vmem:[%s3697_s10 + $0x48c] ss:$16 sps:$4 sm:$0xff]   ;;  %v3409_v54 = vld [vmem:[%s3697_s10 + $0x480] ss:$16 sps:$4 sm:$0xff]  }
  0x8a   : > { %1994 = vmatprep.subr.bf16.mxu0 %v3333_v56  ;;  %2206 = vmatprep.subr.bf16.mxu1 %v3336_v57  ;;  %v3417_v56 = vld [vmem:[%s3697_s10 + $0x4a4] ss:$16 sps:$4 sm:$0xff]   ;;  %v3420_v57 = vld [vmem:[%s3697_s10 + $0x4ac] ss:$16 sps:$4 sm:$0xff]  }
  0x8d   : > { %1995 = vmatpush1.bf16.msra.mxu0 %v3331_v58  ;;  %2207 = vmatpush1.bf16.msra.mxu1 %v3334_v59  ;;  %v3415_v58 = vld [vmem:[%s3697_s10 + $0x4a0] ss:$16 sps:$4 sm:$0xff]   ;;  %v3418_v59 = vld [vmem:[%s3697_s10 + $0x4a8] ss:$16 sps:$4 sm:$0xff]  }
  0x8e   : > { %1996 = vmatprep.subr.bf16.mxu0 %v3339_v60  ;;  %2208 = vmatprep.subr.bf16.mxu1 %v3342_v61  ;;  %v3423_v60 = vld [vmem:[%s3697_s10 + $0x4c4] ss:$16 sps:$4 sm:$0xff]   ;;  %v3426_v61 = vld [vmem:[%s3697_s10 + $0x4cc] ss:$16 sps:$4 sm:$0xff]  }
  0x91   : > { %1997 = vmatpush1.bf16.msra.mxu0 %v3337_v62  ;;  %2209 = vmatpush1.bf16.msra.mxu1 %v3340_v63  ;;  %v3421_v62 = vld [vmem:[%s3697_s10 + $0x4c0] ss:$16 sps:$4 sm:$0xff]   ;;  %v3424_v63 = vld [vmem:[%s3697_s10 + $0x4c8] ss:$16 sps:$4 sm:$0xff]  }
  0x92   : > { %1998 = vmatprep.subr.bf16.mxu0 %v3345_v0  ;;  %2210 = vmatprep.subr.bf16.mxu1 %v3348_v1  ;;  %v3429_v0 = vld [vmem:[%s3697_s10 + $0x4e4] ss:$16 sps:$4 sm:$0xff]   ;;  %v3432_v1 = vld [vmem:[%s3697_s10 + $0x4ec] ss:$16 sps:$4 sm:$0xff]  }
  0x95   : > { %1999 = vmatpush1.bf16.msra.mxu0 %v3343_v2  ;;  %2211 = vmatpush1.bf16.msra.mxu1 %v3346_v3  ;;  %v3427_v2 = vld [vmem:[%s3697_s10 + $0x4e0] ss:$16 sps:$4 sm:$0xff]   ;;  %v3430_v3 = vld [vmem:[%s3697_s10 + $0x4e8] ss:$16 sps:$4 sm:$0xff]  }
  0x96   : > { %2000 = vmatprep.subr.bf16.mxu0 %v3351_v4  ;;  %2212 = vmatprep.subr.bf16.mxu1 %v3354_v5  ;;  %v3435_v4 = vld [vmem:[%s3697_s10 + $0x504] ss:$16 sps:$4 sm:$0xff]   ;;  %v3438_v5 = vld [vmem:[%s3697_s10 + $0x50c] ss:$16 sps:$4 sm:$0xff]  }
  0x99   : > { %2001 = vmatpush1.bf16.msra.mxu0 %v3349_v6  ;;  %2213 = vmatpush1.bf16.msra.mxu1 %v3352_v7  ;;  %v3433_v6 = vld [vmem:[%s3697_s10 + $0x500] ss:$16 sps:$4 sm:$0xff]   ;;  %v3436_v7 = vld [vmem:[%s3697_s10 + $0x508] ss:$16 sps:$4 sm:$0xff]  }
  0x9a   : > { %2002 = vmatprep.subr.bf16.mxu0 %v3357_v8  ;;  %2214 = vmatprep.subr.bf16.mxu1 %v3360_v9  ;;  %v3441_v8 = vld [vmem:[%s3697_s10 + $0x524] ss:$16 sps:$4 sm:$0xff]   ;;  %v3444_v9 = vld [vmem:[%s3697_s10 + $0x52c] ss:$16 sps:$4 sm:$0xff]  }
  0x9d   : > { %2003 = vmatpush1.bf16.msra.mxu0 %v3355_v10  ;;  %2215 = vmatpush1.bf16.msra.mxu1 %v3358_v11  ;;  %v3439_v10 = vld [vmem:[%s3697_s10 + $0x520] ss:$16 sps:$4 sm:$0xff]   ;;  %v3442_v11 = vld [vmem:[%s3697_s10 + $0x528] ss:$16 sps:$4 sm:$0xff]  }
  0x9e   : > { %2004 = vmatprep.subr.bf16.mxu0 %v3363_v12  ;;  %2216 = vmatprep.subr.bf16.mxu1 %v3366_v13  ;;  %v3447_v12 = vld [vmem:[%s3697_s10 + $0x544] ss:$16 sps:$4 sm:$0xff]   ;;  %v3450_v13 = vld [vmem:[%s3697_s10 + $0x54c] ss:$16 sps:$4 sm:$0xff]  }
  0xa1   : > { %2005 = vmatpush1.bf16.msra.mxu0 %v3361_v14  ;;  %2217 = vmatpush1.bf16.msra.mxu1 %v3364_v15  ;;  %v3445_v14 = vld [vmem:[%s3697_s10 + $0x540] ss:$16 sps:$4 sm:$0xff]   ;;  %v3448_v15 = vld [vmem:[%s3697_s10 + $0x548] ss:$16 sps:$4 sm:$0xff]  }
  0xa2   : > { %2006 = vmatprep.subr.bf16.mxu0 %v3369_v16  ;;  %2218 = vmatprep.subr.bf16.mxu1 %v3372_v17  ;;  %v3453_v16 = vld [vmem:[%s3697_s10 + $0x564] ss:$16 sps:$4 sm:$0xff]   ;;  %v3456_v17 = vld [vmem:[%s3697_s10 + $0x56c] ss:$16 sps:$4 sm:$0xff]  }
  0xa5   : > { %2007 = vmatpush1.bf16.msra.mxu0 %v3367_v18  ;;  %2219 = vmatpush1.bf16.msra.mxu1 %v3370_v19  ;;  %v3451_v18 = vld [vmem:[%s3697_s10 + $0x560] ss:$16 sps:$4 sm:$0xff]   ;;  %v3454_v19 = vld [vmem:[%s3697_s10 + $0x568] ss:$16 sps:$4 sm:$0xff]  }
  0xa6   : > { %2008 = vmatprep.subr.bf16.mxu0 %v3375_v20  ;;  %2220 = vmatprep.subr.bf16.mxu1 %v3378_v21  ;;  %v3459_v20 = vld [vmem:[%s3697_s10 + $0x584] ss:$16 sps:$4 sm:$0xff]   ;;  %v3462_v21 = vld [vmem:[%s3697_s10 + $0x58c] ss:$16 sps:$4 sm:$0xff]  }
  0xa9   : > { %2009 = vmatpush1.bf16.msra.mxu0 %v3373_v22  ;;  %2221 = vmatpush1.bf16.msra.mxu1 %v3376_v23  ;;  %v3457_v22 = vld [vmem:[%s3697_s10 + $0x580] ss:$16 sps:$4 sm:$0xff]   ;;  %v3460_v23 = vld [vmem:[%s3697_s10 + $0x588] ss:$16 sps:$4 sm:$0xff]  }
  0xaa   : > { %2010 = vmatprep.subr.bf16.mxu0 %v3381_v24  ;;  %2222 = vmatprep.subr.bf16.mxu1 %v3384_v25  ;;  %v3465_v24 = vld [vmem:[%s3697_s10 + $0x5a4] ss:$16 sps:$4 sm:$0xff]   ;;  %v3468_v25 = vld [vmem:[%s3697_s10 + $0x5ac] ss:$16 sps:$4 sm:$0xff]  }
  0xad   : > { %2011 = vmatpush1.bf16.msra.mxu0 %v3379_v26  ;;  %2223 = vmatpush1.bf16.msra.mxu1 %v3382_v27  ;;  %v3463_v26 = vld [vmem:[%s3697_s10 + $0x5a0] ss:$16 sps:$4 sm:$0xff]   ;;  %v3466_v27 = vld [vmem:[%s3697_s10 + $0x5a8] ss:$16 sps:$4 sm:$0xff]  }
  0xae   : > { %2033 = vmatprep.subr.bf16.mxu0 %v3387_v28  ;;  %2245 = vmatprep.subr.bf16.mxu1 %v3390_v29  ;;  %v3471_v28 = vld [vmem:[%s3697_s10 + $0x5c4] ss:$16 sps:$4 sm:$0xff]   ;;  %v3474_v29 = vld [vmem:[%s3697_s10 + $0x5cc] ss:$16 sps:$4 sm:$0xff]  }
  0xb0   : > { %2013 = vmatmul.mubr.bf16.vlgmr.msra.gmra.mrb[0].mxu0 %v2828_v32  ;;  %2225 = vmatmul.mubr.bf16.vlgmr.msra.gmra.mrb[0].mxu1 %v2828_v32  ;;  %v3477_v32 = vld [vmem:[%s3697_s10 + $0x5e4] ss:$16 sps:$4 sm:$0xff]  }
  0xb1   : > { %2034 = vmatpush1.bf16.msra.mxu0 %v3385_v30  ;;  %2246 = vmatpush1.bf16.msra.mxu1 %v3388_v31  ;;  %v3469_v30 = vld [vmem:[%s3697_s10 + $0x5c0] ss:$16 sps:$4 sm:$0xff]   ;;  %v3472_v31 = vld [vmem:[%s3697_s10 + $0x5c8] ss:$16 sps:$4 sm:$0xff]  }
  0xb2   : > { %2035 = vmatprep.subr.bf16.mxu0 %v3393_v35  ;;  %2247 = vmatprep.subr.bf16.mxu1 %v3396_v36  ;;  %v3478_v35 = vld [vmem:[%s3697_s10 + $0x5e8] ss:$16 sps:$4 sm:$0xff]   ;;  %v3483_v36 = vld [vmem:[%s3697_s10 + $0x604] ss:$16 sps:$4 sm:$0xff]  }
  0xb3   : > { %2022 = vmatprep.mubr.bf16.mxu0 %v2837_v37  ;;  %2234 = vmatprep.mubr.bf16.mxu1 %v2837_v37  ;;  %v3486_v37 = vld [vmem:[%s3697_s10 + $0x60c] ss:$16 sps:$4 sm:$0xff]  }
  0xb5   : > { %2036 = vmatpush1.bf16.msra.mxu0 %v3391_v38  ;;  %2248 = vmatpush1.bf16.msra.mxu1 %v3394_v39  ;;  %v2830_v38 = vcombine.low %v3857_v42, %v3860_v44  ;;  %v305_v39 = vld [vmem:[%s3699_s11 + $0x50] sm:$0xff]  ;;  %v3490_v44 = vld [vmem:[%s3697_s10 + $0x628] ss:$16 sps:$4 sm:$0xff]  }
  0xb6   : > { %2037 = vmatprep.subr.bf16.mxu0 %v3399_v40  ;;  %2249 = vmatprep.subr.bf16.mxu1 %v3402_v41  ;;  %v309_v40 = vld [vmem:[%s3699_s11 + $0x70] sm:$0xff] }
  0xb7   : > { %v3481_v41 = vld [vmem:[%s3697_s10 + $0x600] ss:$16 sps:$4 sm:$0xff]  }
  0xb8   : > { %2023 = vmatmul.mubr.bf16.gmra.mrb[4].mxu0 %v2836_v43  ;;  %2235 = vmatmul.mubr.bf16.gmra.mrb[4].mxu1 %v2836_v43  ;;  %v3484_v43 = vld [vmem:[%s3697_s10 + $0x608] ss:$16 sps:$4 sm:$0xff]   ;;  %v3487_v42 = vld [vmem:[%s3697_s10 + $0x620] ss:$16 sps:$4 sm:$0xff]  }
  0xb9   : > { %2038 = vmatpush1.bf16.msra.mxu0 %v3397_v45  ;;  %2250 = vmatpush1.bf16.msra.mxu1 %v3400_v46  ;;  %v3489_v45 = vld [vmem:[%s3697_s10 + $0x624] ss:$16 sps:$4 sm:$0xff]   ;;  %v3492_v46 = vld [vmem:[%s3697_s10 + $0x62c] ss:$16 sps:$4 sm:$0xff]  }
  0xba   : > { %2039 = vmatprep.subr.bf16.mxu0 %v3405_v47  ;;  %2251 = vmatprep.subr.bf16.mxu1 %v3408_v48  ;;  %v2839_v47 = vcombine.high %v305_v39, %v309_v40  ;;  %v3495_v48 = vld [vmem:[%s3697_s10 + $0x644] ss:$16 sps:$4 sm:$0xff]  }
  0xbb   : > { %2065 = vmatprep.mubr.bf16.mxu0 %v2831_v49  ;;  %2277 = vmatprep.mubr.bf16.mxu1 %v2831_v49  ;;  %v3498_v49 = vld [vmem:[%s3697_s10 + $0x64c] ss:$16 sps:$4 sm:$0xff]  }
  0xbd   : > { %2040 = vmatpush1.bf16.msra.mxu0 %v3403_v50  ;;  %2252 = vmatpush1.bf16.msra.mxu1 %v3406_v51  ;;  %v2838_v50 = vcombine.low %v305_v39, %v309_v40  ;;  %v3933_v51 = vld [vmem:[%s3699_s11 + $0x18] sm:$0xff]  ;;  %v3573_v40 = vld [vmem:[%s3697_s10 + $0x7e4] ss:$16 sps:$4 sm:$0xff]  }
  0xbe   : > { %2041 = vmatprep.subr.bf16.mxu0 %v3411_v52  ;;  %2253 = vmatprep.subr.bf16.mxu1 %v3414_v53  ;;  %v3936_v52 = vld [vmem:[%s3699_s11 + $0x38] sm:$0xff]  ;;  %v3493_v53 = vld [vmem:[%s3697_s10 + $0x640] ss:$16 sps:$4 sm:$0xff]  }
  0xbf   : > { %v3568_v39 = vld [vmem:[%s3697_s10 + $0x7c8] ss:$16 sps:$4 sm:$0xff]  }
  0xc1   : > { %2042 = vmatpush1.bf16.msra.mxu0 %v3409_v54  ;;  %2254 = vmatpush1.bf16.msra.mxu1 %v3412_v55  ;;  %v3496_v54 = vld [vmem:[%s3697_s10 + $0x648] ss:$16 sps:$4 sm:$0xff]   ;;  %v3501_v55 = vld [vmem:[%s3697_s10 + $0x664] ss:$16 sps:$4 sm:$0xff]  }
  0xc2   : > { %2043 = vmatprep.subr.bf16.mxu0 %v3417_v56  ;;  %2255 = vmatprep.subr.bf16.mxu1 %v3420_v57  ;;  %v3504_v56 = vld [vmem:[%s3697_s10 + $0x66c] ss:$16 sps:$4 sm:$0xff]   ;;  %v2833_v57 = vcombine.high %v3933_v51, %v3936_v52 }
  0xc5   : > { %2044 = vmatpush1.bf16.msra.mxu0 %v3415_v58  ;;  %2256 = vmatpush1.bf16.msra.mxu1 %v3418_v59  ;;  %v3499_v58 = vld [vmem:[%s3697_s10 + $0x660] ss:$16 sps:$4 sm:$0xff]   ;;  %v3502_v59 = vld [vmem:[%s3697_s10 + $0x668] ss:$16 sps:$4 sm:$0xff]  }
  0xc6   : > { %2045 = vmatprep.subr.bf16.mxu0 %v3423_v60  ;;  %2257 = vmatprep.subr.bf16.mxu1 %v3426_v61  ;;  %v3507_v60 = vld [vmem:[%s3697_s10 + $0x684] ss:$16 sps:$4 sm:$0xff]   ;;  %v3510_v61 = vld [vmem:[%s3697_s10 + $0x68c] ss:$16 sps:$4 sm:$0xff]  }
  0xc9   : > { %2046 = vmatpush1.bf16.msra.mxu0 %v3421_v62  ;;  %2258 = vmatpush1.bf16.msra.mxu1 %v3424_v63  ;;  %v3505_v62 = vld [vmem:[%s3697_s10 + $0x680] ss:$16 sps:$4 sm:$0xff]   ;;  %v3508_v63 = vld [vmem:[%s3697_s10 + $0x688] ss:$16 sps:$4 sm:$0xff]  }
  0xca   : > { %2047 = vmatprep.subr.bf16.mxu0 %v3429_v0  ;;  %2259 = vmatprep.subr.bf16.mxu1 %v3432_v1  ;;  %v3513_v0 = vld [vmem:[%s3697_s10 + $0x6a4] ss:$16 sps:$4 sm:$0xff]   ;;  %v3516_v1 = vld [vmem:[%s3697_s10 + $0x6ac] ss:$16 sps:$4 sm:$0xff]  }
  0xcd   : > { %2048 = vmatpush1.bf16.msra.mxu0 %v3427_v2  ;;  %2260 = vmatpush1.bf16.msra.mxu1 %v3430_v3  ;;  %v3511_v2 = vld [vmem:[%s3697_s10 + $0x6a0] ss:$16 sps:$4 sm:$0xff]   ;;  %v3514_v3 = vld [vmem:[%s3697_s10 + $0x6a8] ss:$16 sps:$4 sm:$0xff]  }
  0xce   : > { %2049 = vmatprep.subr.bf16.mxu0 %v3435_v4  ;;  %2261 = vmatprep.subr.bf16.mxu1 %v3438_v5  ;;  %v3519_v4 = vld [vmem:[%s3697_s10 + $0x6c4] ss:$16 sps:$4 sm:$0xff]   ;;  %v3522_v5 = vld [vmem:[%s3697_s10 + $0x6cc] ss:$16 sps:$4 sm:$0xff]  }
  0xd1   : > { %2050 = vmatpush1.bf16.msra.mxu0 %v3433_v6  ;;  %2262 = vmatpush1.bf16.msra.mxu1 %v3436_v7  ;;  %v3517_v6 = vld [vmem:[%s3697_s10 + $0x6c0] ss:$16 sps:$4 sm:$0xff]   ;;  %v3520_v7 = vld [vmem:[%s3697_s10 + $0x6c8] ss:$16 sps:$4 sm:$0xff]  }
  0xd2   : > { %2051 = vmatprep.subr.bf16.mxu0 %v3441_v8  ;;  %2263 = vmatprep.subr.bf16.mxu1 %v3444_v9  ;;  %v3525_v8 = vld [vmem:[%s3697_s10 + $0x6e4] ss:$16 sps:$4 sm:$0xff]   ;;  %v3528_v9 = vld [vmem:[%s3697_s10 + $0x6ec] ss:$16 sps:$4 sm:$0xff]  }
  0xd5   : > { %2052 = vmatpush1.bf16.msra.mxu0 %v3439_v10  ;;  %2264 = vmatpush1.bf16.msra.mxu1 %v3442_v11  ;;  %v3523_v10 = vld [vmem:[%s3697_s10 + $0x6e0] ss:$16 sps:$4 sm:$0xff]   ;;  %v3526_v11 = vld [vmem:[%s3697_s10 + $0x6e8] ss:$16 sps:$4 sm:$0xff]  }
  0xd6   : > { %2053 = vmatprep.subr.bf16.mxu0 %v3447_v12  ;;  %2265 = vmatprep.subr.bf16.mxu1 %v3450_v13  ;;  %v3531_v12 = vld [vmem:[%s3697_s10 + $0x704] ss:$16 sps:$4 sm:$0xff]   ;;  %v3534_v13 = vld [vmem:[%s3697_s10 + $0x70c] ss:$16 sps:$4 sm:$0xff]  }
  0xd9   : > { %2054 = vmatpush1.bf16.msra.mxu0 %v3445_v14  ;;  %2266 = vmatpush1.bf16.msra.mxu1 %v3448_v15  ;;  %v3529_v14 = vld [vmem:[%s3697_s10 + $0x700] ss:$16 sps:$4 sm:$0xff]   ;;  %v3532_v15 = vld [vmem:[%s3697_s10 + $0x708] ss:$16 sps:$4 sm:$0xff]  }
  0xda   : > { %2055 = vmatprep.subr.bf16.mxu0 %v3453_v16  ;;  %2267 = vmatprep.subr.bf16.mxu1 %v3456_v17  ;;  %v3537_v16 = vld [vmem:[%s3697_s10 + $0x724] ss:$16 sps:$4 sm:$0xff]   ;;  %v3540_v17 = vld [vmem:[%s3697_s10 + $0x72c] ss:$16 sps:$4 sm:$0xff]  }
  0xdd   : > { %2056 = vmatpush1.bf16.msra.mxu0 %v3451_v18  ;;  %2268 = vmatpush1.bf16.msra.mxu1 %v3454_v19  ;;  %v3535_v18 = vld [vmem:[%s3697_s10 + $0x720] ss:$16 sps:$4 sm:$0xff]   ;;  %v3538_v19 = vld [vmem:[%s3697_s10 + $0x728] ss:$16 sps:$4 sm:$0xff]  }
  0xde   : > { %2057 = vmatprep.subr.bf16.mxu0 %v3459_v20  ;;  %2269 = vmatprep.subr.bf16.mxu1 %v3462_v21  ;;  %v3543_v20 = vld [vmem:[%s3697_s10 + $0x744] ss:$16 sps:$4 sm:$0xff]   ;;  %v3546_v21 = vld [vmem:[%s3697_s10 + $0x74c] ss:$16 sps:$4 sm:$0xff]  }
  0xe1   : > { %2058 = vmatpush1.bf16.msra.mxu0 %v3457_v22  ;;  %2270 = vmatpush1.bf16.msra.mxu1 %v3460_v23  ;;  %v3541_v22 = vld [vmem:[%s3697_s10 + $0x740] ss:$16 sps:$4 sm:$0xff]   ;;  %v3544_v23 = vld [vmem:[%s3697_s10 + $0x748] ss:$16 sps:$4 sm:$0xff]  }
  0xe2   : > { %2059 = vmatprep.subr.bf16.mxu0 %v3465_v24  ;;  %2271 = vmatprep.subr.bf16.mxu1 %v3468_v25  ;;  %v3549_v24 = vld [vmem:[%s3697_s10 + $0x764] ss:$16 sps:$4 sm:$0xff]   ;;  %v3552_v25 = vld [vmem:[%s3697_s10 + $0x76c] ss:$16 sps:$4 sm:$0xff]  }
  0xe5   : > { %2060 = vmatpush1.bf16.msra.mxu0 %v3463_v26  ;;  %2272 = vmatpush1.bf16.msra.mxu1 %v3466_v27  ;;  %v3547_v26 = vld [vmem:[%s3697_s10 + $0x760] ss:$16 sps:$4 sm:$0xff]   ;;  %v3550_v27 = vld [vmem:[%s3697_s10 + $0x768] ss:$16 sps:$4 sm:$0xff]  }
  0xe6   : > { %2061 = vmatprep.subr.bf16.mxu0 %v3471_v28  ;;  %2273 = vmatprep.subr.bf16.mxu1 %v3474_v29  ;;  %v3555_v28 = vld [vmem:[%s3697_s10 + $0x784] ss:$16 sps:$4 sm:$0xff]   ;;  %v3558_v29 = vld [vmem:[%s3697_s10 + $0x78c] ss:$16 sps:$4 sm:$0xff]  }
  0xe9   : > { %2062 = vmatpush1.bf16.msra.mxu0 %v3469_v30  ;;  %2274 = vmatpush1.bf16.msra.mxu1 %v3472_v31  ;;  %v3553_v30 = vld [vmem:[%s3697_s10 + $0x780] ss:$16 sps:$4 sm:$0xff]   ;;  %v3556_v31 = vld [vmem:[%s3697_s10 + $0x788] ss:$16 sps:$4 sm:$0xff]  }
  0xea   : > { %2063 = vmatprep.subr.bf16.mxu0 %v3477_v32  ;;  %2275 = vmatprep.subr.bf16.mxu1 %v3480_v33  ;;  %v3561_v32 = vld [vmem:[%s3697_s10 + $0x7a4] ss:$16 sps:$4 sm:$0xff]   ;;  %v3564_v33 = vld [vmem:[%s3697_s10 + $0x7ac] ss:$16 sps:$4 sm:$0xff]  }
  0xed   : > { %2064 = vmatpush1.bf16.msra.mxu0 %v3475_v34  ;;  %2276 = vmatpush1.bf16.msra.mxu1 %v3478_v35  ;;  %v3559_v34 = vld [vmem:[%s3697_s10 + $0x7a0] ss:$16 sps:$4 sm:$0xff]   ;;  %v3562_v35 = vld [vmem:[%s3697_s10 + $0x7a8] ss:$16 sps:$4 sm:$0xff]  }
  0xee   : > { %2086 = vmatprep.subr.bf16.mxu0 %v3483_v36  ;;  %2298 = vmatprep.subr.bf16.mxu1 %v3486_v37  ;;  %v3567_v36 = vld [vmem:[%s3697_s10 + $0x7c4] ss:$16 sps:$4 sm:$0xff]   ;;  %v3570_v37 = vld [vmem:[%s3697_s10 + $0x7cc] ss:$16 sps:$4 sm:$0xff]  }
  0xf0   : > { %2066 = vmatmul.mubr.bf16.vlgmr.msra.gmra.mrb[0].mxu0 %v2830_v38  ;;  %2278 = vmatmul.mubr.bf16.vlgmr.msra.gmra.mrb[0].mxu1 %v2830_v38  ;;  %v3565_v38 = vld [vmem:[%s3697_s10 + $0x7c0] ss:$16 sps:$4 sm:$0xff]  }
  0xf1   : > { %2087 = vmatpush1.bf16.msra.mxu0 %v3481_v41  ;;  %2299 = vmatpush1.bf16.msra.mxu1 %v3484_v43  ;;  %v3576_v41 = vld [vmem:[%s3697_s10 + $0x7ec] ss:$16 sps:$4 sm:$0xff]   ;;  %v3571_v43 = vld [vmem:[%s3697_s10 + $0x7e0] ss:$16 sps:$4 sm:$0xff]  }
  0xf2   : > { %2088 = vmatprep.subr.bf16.mxu0 %v3489_v45  ;;  %2300 = vmatprep.subr.bf16.mxu1 %v3492_v46  ;;  %v3574_v45 = vld [vmem:[%s3697_s10 + $0x7e8] ss:$16 sps:$4 sm:$0xff]  }
  0xf3   : > { %2075 = vmatprep.mubr.bf16.mxu0 %v2839_v47  ;;  %2287 = vmatprep.mubr.bf16.mxu1 %v2839_v47  ;;  %v306_v46 = vld [vmem:[%s3699_s11 + $0x58] sm:$0xff] }
  0xf4   : > { %v310_v47 = vld [vmem:[%s3699_s11 + $0x78] sm:$0xff] }
  0xf5   : > { %2089 = vmatpush1.bf16.msra.mxu0 %v3487_v42  ;;  %2301 = vmatpush1.bf16.msra.mxu1 %v3490_v44  ;;  %v2832_v42 = vcombine.low %v3933_v51, %v3936_v52  ;;  %v2841_v44 = vcombine.high %v306_v46, %v310_v47 }
  0xf6   : > { %2090 = vmatprep.subr.bf16.mxu0 %v3495_v48  ;;  %2302 = vmatprep.subr.bf16.mxu1 %v3498_v49  ;;  %v2840_v48 = vcombine.low %v306_v46, %v310_v47  ;;  %v279_v49 = vld [vmem:[#allocation2] sm:$0xff] }
  0xf8   : > { %2076 = vmatmul.mubr.bf16.gmra.mrb[4].mxu0 %v2838_v50  ;;  %2288 = vmatmul.mubr.bf16.gmra.mrb[4].mxu1 %v2838_v50  ;;  %v281_v50 = vld [vmem:[#allocation2 + $0x10] sm:$0xff] }
  0xf9   : > { %2091 = vmatpush1.bf16.msra.mxu0 %v3493_v53  ;;  %2303 = vmatpush1.bf16.msra.mxu1 %v3496_v54  ;;  %v280_v53 = vld [vmem:[#allocation2 + $0x8] sm:$0xff]  ;;  %v282_v54 = vld [vmem:[#allocation2 + $0x18] sm:$0xff] }
  0xfa   : > { %2092 = vmatprep.subr.bf16.mxu0 %v3501_v55  ;;  %2304 = vmatprep.subr.bf16.mxu1 %v3504_v56 }
  0xfb   : > { %2118 = vmatprep.mubr.bf16.mxu0 %v2833_v57  ;;  %2330 = vmatprep.mubr.bf16.mxu1 %v2833_v57  ;;  %v283_v57 = vld [vmem:[#allocation2 + $0x20] sm:$0xff] }
  0xfd   : > { %2093 = vmatpush1.bf16.msra.mxu0 %v3499_v58  ;;  %2305 = vmatpush1.bf16.msra.mxu1 %v3502_v59  ;;  %v285_v58 = vld [vmem:[#allocation2 + $0x30] sm:$0xff] }
  0xfe   : > { %2094 = vmatprep.subr.bf16.mxu0 %v3507_v60  ;;  %2306 = vmatprep.subr.bf16.mxu1 %v3510_v61  ;;  %v284_v61 = vld [vmem:[#allocation2 + $0x28] sm:$0xff] }
 0x101   : > { %2095 = vmatpush1.bf16.msra.mxu0 %v3505_v62  ;;  %2307 = vmatpush1.bf16.msra.mxu1 %v3508_v63  ;;  %v286_v62 = vld [vmem:[#allocation2 + $0x38] sm:$0xff] }
 0x102   : > { %2096 = vmatprep.subr.bf16.mxu0 %v3513_v0  ;;  %2308 = vmatprep.subr.bf16.mxu1 %v3516_v1 }
 0x105   : > { %2097 = vmatpush1.bf16.msra.mxu0 %v3511_v2  ;;  %2309 = vmatpush1.bf16.msra.mxu1 %v3514_v3 }
 0x106   : > { %2098 = vmatprep.subr.bf16.mxu0 %v3519_v4  ;;  %2310 = vmatprep.subr.bf16.mxu1 %v3522_v5 }
 0x109   : > { %2099 = vmatpush1.bf16.msra.mxu0 %v3517_v6  ;;  %2311 = vmatpush1.bf16.msra.mxu1 %v3520_v7 }
 0x10a   : > { %2100 = vmatprep.subr.bf16.mxu0 %v3525_v8  ;;  %2312 = vmatprep.subr.bf16.mxu1 %v3528_v9  ;;  %v287_v9 = vld [vmem:[#allocation2 + $0x40] sm:$0xff] }
 0x10d   : > { %2101 = vmatpush1.bf16.msra.mxu0 %v3523_v10  ;;  %2313 = vmatpush1.bf16.msra.mxu1 %v3526_v11  ;;  %v289_v10 = vld [vmem:[#allocation2 + $0x50] sm:$0xff]  ;;  %v288_v11 = vld [vmem:[#allocation2 + $0x48] sm:$0xff] }
 0x10e   : > { %2102 = vmatprep.subr.bf16.mxu0 %v3531_v12  ;;  %2314 = vmatprep.subr.bf16.mxu1 %v3534_v13  ;;  %v290_v12 = vld [vmem:[#allocation2 + $0x58] sm:$0xff] }
 0x111   : > { %2103 = vmatpush1.bf16.msra.mxu0 %v3529_v14  ;;  %2315 = vmatpush1.bf16.msra.mxu1 %v3532_v15  ;;  %v291_v15 = vld [vmem:[#allocation2 + $0x60] sm:$0xff] }
 0x112   : > { %2104 = vmatprep.subr.bf16.mxu0 %v3537_v16  ;;  %2316 = vmatprep.subr.bf16.mxu1 %v3540_v17  ;;  %v293_v16 = vld [vmem:[#allocation2 + $0x70] sm:$0xff] }
 0x115   : > { %2105 = vmatpush1.bf16.msra.mxu0 %v3535_v18  ;;  %2317 = vmatpush1.bf16.msra.mxu1 %v3538_v19 }
 0x116   : > { %2106 = vmatprep.subr.bf16.mxu0 %v3543_v20  ;;  %2318 = vmatprep.subr.bf16.mxu1 %v3546_v21  ;;  %v292_v21 = vld [vmem:[#allocation2 + $0x68] sm:$0xff] }
 0x119   : > { %2107 = vmatpush1.bf16.msra.mxu0 %v3541_v22  ;;  %2319 = vmatpush1.bf16.msra.mxu1 %v3544_v23  ;;  %v294_v22 = vld [vmem:[#allocation2 + $0x78] sm:$0xff] }
 0x11a   : > { %2108 = vmatprep.subr.bf16.mxu0 %v3549_v24  ;;  %2320 = vmatprep.subr.bf16.mxu1 %v3552_v25 }
 0x11d   : > { %2109 = vmatpush1.bf16.msra.mxu0 %v3547_v26  ;;  %2321 = vmatpush1.bf16.msra.mxu1 %v3550_v27 }
 0x11e   : > { %2110 = vmatprep.subr.bf16.mxu0 %v3555_v28  ;;  %2322 = vmatprep.subr.bf16.mxu1 %v3558_v29 }
 0x121   : > { %2111 = vmatpush1.bf16.msra.mxu0 %v3553_v30  ;;  %2323 = vmatpush1.bf16.msra.mxu1 %v3556_v31 }
 0x122   : > { %2112 = vmatprep.subr.bf16.mxu0 %v3561_v32  ;;  %2324 = vmatprep.subr.bf16.mxu1 %v3564_v33 }
 0x125   : > { %2113 = vmatpush1.bf16.msra.mxu0 %v3559_v34  ;;  %2325 = vmatpush1.bf16.msra.mxu1 %v3562_v35 }
 0x126   : > { %2114 = vmatprep.subr.bf16.mxu0 %v3567_v36  ;;  %2326 = vmatprep.subr.bf16.mxu1 %v3570_v37 }
 0x129   : > { %2115 = vmatpush1.bf16.msra.mxu0 %v3565_v38  ;;  %2327 = vmatpush1.bf16.msra.mxu1 %v3568_v39 }
 0x12a   : > { %2116 = vmatprep.subr.bf16.mxu0 %v3573_v40  ;;  %2328 = vmatprep.subr.bf16.mxu1 %v3576_v41 }
 0x12d   : > { %2117 = vmatpush1.bf16.msra.mxu0 %v3571_v43  ;;  %2329 = vmatpush1.bf16.msra.mxu1 %v3574_v45 }
 0x130   : > { %2119 = vmatmul.mubr.bf16.vlgmr.msra.gmra.mrb[0].mxu0 %v2832_v42  ;;  %2331 = vmatmul.mubr.bf16.vlgmr.msra.gmra.mrb[0].mxu1 %v2832_v42 }
 0x131   : > { %2128 = vmatprep.mubr.bf16.mxu0 %v2841_v44  ;;  %2340 = vmatprep.mubr.bf16.mxu1 %v2841_v44 }
 0x138   : > { %2129 = vmatmul.mubr.bf16.gmra.mrb[4].mxu0 %v2840_v48  ;;  %2341 = vmatmul.mubr.bf16.gmra.mrb[4].mxu1 %v2840_v48 }
 0x203   : > { %v2120_v55 = vpop.f32.mrb[0].mxu0  ;;  %v2332_v56 = vpop.f32.mrb[0].mxu1 }
 0x204   : > { %v2351_v59 = vadd.f32 %v2120_v55, %v279_v49  ;;  %v2353_v51 = vadd.f32 %v2332_v56, %v281_v50  ;;  %v2122_v52 = vpop.f32.mrb[1].mxu0  ;;  %v2334_v60 = vpop.f32.mrb[1].mxu1 }
 0x205   : > { %v2352_v63 = vadd.f32 %v2122_v52, %v280_v53  ;;  %v2354_v0 = vadd.f32 %v2334_v60, %v282_v54  ;;  %v2124_v1 = vpop.f32.mrb[2].mxu0  ;;  %v2336_v2 = vpop.f32.mrb[2].mxu1 }
 0x206   : > { %2367 = vst [vmem:[#allocation2] sm:$0xff] %v2351_v59  ;;  %2369 = vst [vmem:[#allocation2 + $0x10] sm:$0xff] %v2353_v51  ;;  %v2355_v3 = vadd.f32 %v2124_v1, %v283_v57  ;;  %v2357_v4 = vadd.f32 %v2336_v2, %v285_v58  ;;  %v2126_v5 = vpop.f32.mrb[3].mxu0  ;;  %v2338_v6 = vpop.f32.mrb[3].mxu1 }
 0x207   : > { %2368 = vst [vmem:[#allocation2 + $0x8] sm:$0xff] %v2352_v63  ;;  %2370 = vst [vmem:[#allocation2 + $0x18] sm:$0xff] %v2354_v0  ;;  %v2356_v7 = vadd.f32 %v2126_v5, %v284_v61  ;;  %v2358_v8 = vadd.f32 %v2338_v6, %v286_v62 }
 0x208   : > { %2371 = vst [vmem:[#allocation2 + $0x20] sm:$0xff] %v2355_v3  ;;  %2373 = vst [vmem:[#allocation2 + $0x30] sm:$0xff] %v2357_v4 }
 0x209   : > { %2372 = vst [vmem:[#allocation2 + $0x28] sm:$0xff] %v2356_v7  ;;  %2374 = vst [vmem:[#allocation2 + $0x38] sm:$0xff] %v2358_v8 }
 0x20b   : > { %v2130_v13 = vpop.f32.mrb[4].mxu0  ;;  %v2342_v14 = vpop.f32.mrb[4].mxu1  ;;  %2386 = sbr.rel (%p3098_p10) target bundleno = 645 (0x285), region = 67 }
 0x20c   : > { %v2359_v17 = vadd.f32 %v2130_v13, %v287_v9  ;;  %v2361_v18 = vadd.f32 %v2342_v14, %v289_v10  ;;  %v2132_v19 = vpop.f32.mrb[5].mxu0  ;;  %v2344_v20 = vpop.f32.mrb[5].mxu1 }
 0x20d   : > { %v2360_v23 = vadd.f32 %v2132_v19, %v288_v11  ;;  %v2362_v24 = vadd.f32 %v2344_v20, %v290_v12  ;;  %v2134_v25 = vpop.f32.mrb[6].mxu0  ;;  %v2346_v26 = vpop.f32.mrb[6].mxu1  ;;  %v3999_v33 = vld [vmem:[#allocation2] sm:$0xff] (!%p3098_p10)  ;;  %v4003_v35 = vld [vmem:[#allocation2 + $0x10] sm:$0xff] (!%p3098_p10) }
 0x20e   : > { %2375 = vst [vmem:[#allocation2 + $0x40] sm:$0xff] %v2359_v17  ;;  %2377 = vst [vmem:[#allocation2 + $0x50] sm:$0xff] %v2361_v18  ;;  %v2363_v27 = vadd.f32 %v2134_v25, %v291_v15  ;;  %v2365_v28 = vadd.f32 %v2346_v26, %v293_v16  ;;  %v2136_v29 = vpop.f32.mrb[7].mxu0  ;;  %v2348_v30 = vpop.f32.mrb[7].mxu1  ;;  %v4001_v34 = vld [vmem:[#allocation2 + $0x8] sm:$0xff] (!%p3098_p10)  ;;  %v4005_v36 = vld [vmem:[#allocation2 + $0x18] sm:$0xff] (!%p3098_p10) }
 0x20f   : > { %2376 = vst [vmem:[#allocation2 + $0x48] sm:$0xff] %v2360_v23  ;;  %2378 = vst [vmem:[#allocation2 + $0x58] sm:$0xff] %v2362_v24  ;;  %v2364_v31 = vadd.f32 %v2136_v29, %v292_v21  ;;  %v2366_v32 = vadd.f32 %v2348_v30, %v294_v22  ;;  %v4007_v37 = vld [vmem:[#allocation2 + $0x20] sm:$0xff] (!%p3098_p10)  ;;  %v4011_v39 = vld [vmem:[#allocation2 + $0x30] sm:$0xff] (!%p3098_p10) }
 0x210   : > { %2379 = vst [vmem:[#allocation2 + $0x60] sm:$0xff] %v2363_v27  ;;  %2381 = vst [vmem:[#allocation2 + $0x70] sm:$0xff] %v2365_v28  ;;  %v4009_v38 = vld [vmem:[#allocation2 + $0x28] sm:$0xff] (!%p3098_p10)  ;;  %v4013_v40 = vld [vmem:[#allocation2 + $0x38] sm:$0xff] (!%p3098_p10)  ;;  %v2403_v43 = vadd.f32 (!%p3098_p10), %v4007_v37, %v3999_v33  ;;  %v2421_v44 = vadd.f32 (!%p3098_p10), %v4011_v39, %v4003_v35 }
 0x211   : > { %2380 = vst [vmem:[#allocation2 + $0x68] sm:$0xff] %v2364_v31  ;;  %2382 = vst [vmem:[#allocation2 + $0x78] sm:$0xff] %v2366_v32  ;;  %v2412_v45 = vadd.f32 (!%p3098_p10), %v4009_v38, %v4001_v34  ;;  %v2430_v48 = vadd.f32 (!%p3098_p10), %v4013_v40, %v4005_v36 }
 0x215   : > { %v4015_v41 = vld [vmem:[#allocation2 + $0x40] sm:$0xff]  ;;  %v4023_v47 = vld [vmem:[#allocation2 + $0x50] sm:$0xff] }
 0x216   : > { %v4021_v46 = vld [vmem:[#allocation2 + $0x48] sm:$0xff]  ;;  %v4025_v42 = vld [vmem:[#allocation2 + $0x58] sm:$0xff]  ;;  %v2404_v54 = vadd.f32 %v2403_v43, %v4015_v41  ;;  %v2422_v57 = vadd.f32 %v2421_v44, %v4023_v47 }
 0x217   : > { %v4031_v49 = vld [vmem:[#allocation2 + $0x60] sm:$0xff]  ;;  %v4035_v53 = vld [vmem:[#allocation2 + $0x70] sm:$0xff]  ;;  %v2413_v55 = vadd.f32 %v2412_v45, %v4021_v46  ;;  %v2431_v58 = vadd.f32 %v2430_v48, %v4025_v42 }
 0x218   : > { %v4033_v50 = vld [vmem:[#allocation2 + $0x68] sm:$0xff]  ;;  %v4039_v56 = vld [vmem:[#allocation2 + $0x78] sm:$0xff]  ;;  %v2405_v59 = vadd.f32 %v2404_v54, %v4031_v49  ;;  %v2423_v52 = vadd.f32 %v2422_v57, %v4035_v53 }
 0x219   : > { %v2414_v51 = vadd.f32 %v2413_v55, %v4033_v50  ;;  %v2432_v60 = vadd.f32 %v2431_v58, %v4039_v56 }
 0x21a   : > { %v2406_v61 = vrot.slane %v2405_v59, 4  ;;  %v2424_v63 = vrot.slane %v2423_v52, 4 }
 0x21b   : > { %v2415_v62 = vrot.slane %v2414_v51, 4  ;;  %v2433_v0 = vrot.slane %v2432_v60, 4 }
 0x21c   : > { %v2407_v1 = vadd.f32 %v2406_v61, %v2405_v59  ;;  %v2425_v3 = vadd.f32 %v2424_v63, %v2423_v52 }
 0x21d   : > { %v2416_v2 = vadd.f32 %v2415_v62, %v2414_v51  ;;  %v2434_v4 = vadd.f32 %v2433_v0, %v2432_v60 }
 0x21e   : > { %v2408_v5 = vrot.slane %v2407_v1, 2  ;;  %v2426_v7 = vrot.slane %v2425_v3, 2 }
 0x21f   : > { %v2417_v6 = vrot.slane %v2416_v2, 2  ;;  %v2435_v8 = vrot.slane %v2434_v4, 2 }
 0x220   : > { %v2409_v9 = vadd.f32 %v2408_v5, %v2407_v1  ;;  %v2427_v11 = vadd.f32 %v2426_v7, %v2425_v3 }
 0x221   : > { %v2418_v10 = vadd.f32 %v2417_v6, %v2416_v2  ;;  %v2436_v12 = vadd.f32 %v2435_v8, %v2434_v4 }
 0x222   : > { %v2410_v13 = vrot.slane %v2409_v9, 1  ;;  %v2428_v15 = vrot.slane %v2427_v11, 1 }
 0x223   : > { %v2419_v14 = vrot.slane %v2418_v10, 1  ;;  %v2437_v16 = vrot.slane %v2436_v12, 1 }
 0x224   : > { %v2411_v17 = vadd.f32 %v2410_v13, %v2409_v9  ;;  %v2429_v19 = vadd.f32 %v2428_v15, %v2427_v11 }
 0x225   : > { %v2420_v18 = vadd.f32 %v2419_v14, %v2418_v10  ;;  %v2438_v20 = vadd.f32 %v2437_v16, %v2436_v12 }
 0x226   : > { %v4047_v21 = vmul.f32 0.03125, %v2411_v17  ;;  %v4051_v23 = vmul.f32 0.03125, %v2429_v19 }
 0x227   : > { %v4049_v22 = vmul.f32 0.03125, %v2420_v18  ;;  %v4053_v24 = vmul.f32 0.03125, %v2438_v20 }
 0x228   : > { %v2444_v25 = vsub.f32 %v3999_v33, %v4047_v21  ;;  %v2448_v27 = vsub.f32 %v4007_v37, %v4047_v21  ;;  %v2446_v29 = vsub.f32 %v4003_v35, %v4051_v23  ;;  %v2450_v31 = vsub.f32 %v4011_v39, %v4051_v23 }
 0x229   : > { %v2445_v26 = vsub.f32 %v4001_v34, %v4049_v22  ;;  %v2449_v28 = vsub.f32 %v4009_v38, %v4049_v22  ;;  %v2447_v30 = vsub.f32 %v4005_v36, %v4053_v24  ;;  %v2451_v32 = vsub.f32 %v4013_v40, %v4053_v24 }
 0x22a   : > { %v2452_v43 = vsub.f32 %v4015_v41, %v4047_v21  ;;  %v2453_v45 = vsub.f32 %v4021_v46, %v4049_v22  ;;  %v2454_v44 = vsub.f32 %v4023_v47, %v4051_v23  ;;  %v2455_v48 = vsub.f32 %v4025_v42, %v4053_v24 }
 0x22b   : > { %v2456_v54 = vsub.f32 %v4031_v49, %v4047_v21  ;;  %v2457_v55 = vsub.f32 %v4033_v50, %v4049_v22  ;;  %v2458_v57 = vsub.f32 %v4035_v53, %v4051_v23  ;;  %v2459_v58 = vsub.f32 %v4039_v56, %v4053_v24 }
 0x22c   : > { %v2460_v59 = vmul.f32 %v2444_v25, %v2444_v25  ;;  %v2461_v51 = vmul.f32 %v2445_v26, %v2445_v26  ;;  %v2462_v52 = vmul.f32 %v2446_v29, %v2446_v29  ;;  %v2463_v60 = vmul.f32 %v2447_v30, %v2447_v30 }
 0x22d   : > { %v2464_v61 = vmul.f32 %v2448_v27, %v2448_v27  ;;  %v2465_v62 = vmul.f32 %v2449_v28, %v2449_v28  ;;  %v2466_v63 = vmul.f32 %v2450_v31, %v2450_v31  ;;  %v2467_v0 = vmul.f32 %v2451_v32, %v2451_v32 }
 0x22e   : > { %v2468_v1 = vmul.f32 %v2452_v43, %v2452_v43  ;;  %v2469_v2 = vmul.f32 %v2453_v45, %v2453_v45  ;;  %v2470_v3 = vmul.f32 %v2454_v44, %v2454_v44  ;;  %v2471_v4 = vmul.f32 %v2455_v48, %v2455_v48 }
 0x22f   : > { %v2472_v5 = vmul.f32 %v2456_v54, %v2456_v54  ;;  %v2473_v6 = vmul.f32 %v2457_v55, %v2457_v55  ;;  %v2474_v7 = vmul.f32 %v2458_v57, %v2458_v57  ;;  %v2475_v8 = vmul.f32 %v2459_v58, %v2459_v58 }
 0x230   : > { %v2476_v9 = vadd.f32 %v2464_v61, %v2460_v59  ;;  %v2485_v10 = vadd.f32 %v2465_v62, %v2461_v51  ;;  %v2494_v11 = vadd.f32 %v2466_v63, %v2462_v52  ;;  %v2503_v12 = vadd.f32 %v2467_v0, %v2463_v60 }
 0x232   : > { %v2477_v13 = vadd.f32 %v2476_v9, %v2468_v1  ;;  %v2486_v14 = vadd.f32 %v2485_v10, %v2469_v2  ;;  %v2495_v15 = vadd.f32 %v2494_v11, %v2470_v3  ;;  %v2504_v16 = vadd.f32 %v2503_v12, %v2471_v4 }
 0x233   : > { %v3610_v9 = vmov 1966171168   ;;  %v2534_v11 = vlaneseq }
 0x234   : > { %v2478_v17 = vadd.f32 %v2477_v13, %v2472_v5  ;;  %v2487_v18 = vadd.f32 %v2486_v14, %v2473_v6  ;;  %v2496_v19 = vadd.f32 %v2495_v15, %v2474_v7  ;;  %v2505_v20 = vadd.f32 %v2504_v16, %v2475_v8 }
 0x235   : > { %v2532_v10 = vunpack.c.l.s4 %v3610_v9  ;;  %v2535_v13 = vshrl.u32 %v2534_v11, 7 }
 0x236   : > { %v2479_v25 = vrot.slane %v2478_v17, 4  ;;  %v2488_v26 = vrot.slane %v2487_v18, 4  ;;  %v2497_v27 = vrot.slane %v2496_v19, 4  ;;  %v2506_v28 = vrot.slane %v2505_v20, 4 }
 0x237   : > { %v2533_v12 = vunpack.c.0.s8 %v2532_v10 }
 0x238   : > { %v2480_v29 = vadd.f32 %v2479_v25, %v2478_v17  ;;  %v2489_v30 = vadd.f32 %v2488_v26, %v2487_v18  ;;  %v2498_v31 = vadd.f32 %v2497_v27, %v2496_v19  ;;  %v2507_v32 = vadd.f32 %v2506_v28, %v2505_v20  ;;  %v2516_v28 = vld [vmem:[%s4170_s2] sm:$0xf] }
 0x239   : > { %v2536_v15 = vsub.s32 %v2533_v12, %v2535_v13 }
 0x23a   : > { %v2481_v43 = vrot.slane %v2480_v29, 2  ;;  %v2490_v45 = vrot.slane %v2489_v30, 2  ;;  %v2499_v44 = vrot.slane %v2498_v31, 2  ;;  %v2508_v48 = vrot.slane %v2507_v32, 2 }
 0x23c   : > { %v2482_v54 = vadd.f32 %v2481_v43, %v2480_v29  ;;  %v2491_v55 = vadd.f32 %v2490_v45, %v2489_v30  ;;  %v2500_v57 = vadd.f32 %v2499_v44, %v2498_v31  ;;  %v2509_v58 = vadd.f32 %v2508_v48, %v2507_v32 }
 0x23d   : > { %v2559_v29 = vsub.s32 0, %v2535_v13  ;;  %v2563_v31 = vsub.s32 1, %v2535_v13  ;;  %v2567_v32 = vsub.s32 2, %v2535_v13  ;;  %v2571_v43 = vsub.s32 3, %v2535_v13 }
 0x23e   : > { %v2483_v59 = vrot.slane %v2482_v54, 1  ;;  %v2492_v51 = vrot.slane %v2491_v55, 1  ;;  %v2501_v52 = vrot.slane %v2500_v57, 1  ;;  %v2510_v60 = vrot.slane %v2509_v58, 1 }
 0x240   : > { %v2484_v61 = vadd.f32 %v2483_v59, %v2482_v54  ;;  %v2493_v62 = vadd.f32 %v2492_v51, %v2491_v55  ;;  %v2502_v63 = vadd.f32 %v2501_v52, %v2500_v57  ;;  %v2511_v0 = vadd.f32 %v2510_v60, %v2509_v58 }
 0x242   : > { %v2512_v1 = vmul.f32 0.03125, %v2484_v61  ;;  %v2513_v2 = vmul.f32 0.03125, %v2493_v62  ;;  %v2514_v3 = vmul.f32 0.03125, %v2502_v63  ;;  %v2515_v4 = vmul.f32 0.03125, %v2511_v0  ;;  %v2555_v0 = vld [vmem:[%s4171_s3] sm:$0xf] }
 0x244   : > { %v2517_v5 = vadd.f32 1e-05, %v2512_v1  ;;  %v2518_v6 = vadd.f32 1e-05, %v2513_v2  ;;  %v2519_v7 = vadd.f32 1e-05, %v2514_v3 }
 0x245   : > { %v2520_v8 = vadd.f32 1e-05, %v2515_v4 }
 0x246   : > { %3577 = vrsqrt.f32 %v2517_v5 }
 0x247   : > { %3579 = vrsqrt.f32 %v2518_v6 }
 0x248   : > { %3581 = vrsqrt.f32 %v2519_v7 }
 0x249   : > { %3583 = vrsqrt.f32 %v2520_v8 }
 0x250   : > { %v3578_v14 = vpop.eup %3577 }
 0x251   : > { %v3580_v16 = vpop.eup %3579 }
 0x252   : > { %v3582_v17 = vpop.eup %3581  ;;  %v2529_v18 = vcombine.low %v3578_v14, %v3580_v16 }
 0x253   : > { %v3584_v19 = vpop.eup %3583 }
 0x254   : > { %v2530_v20 = vcombine.low %v3582_v17, %v3584_v19  ;;  %v2537_v25 = vrot.slane %v2529_v18, %v2536_v15 }
 0x256   : > { %v2544_v26 = vrot.slane %v2530_v20, %v2536_v15 }
 0x258   : > { %v2545_v27 = vcombine.low %v2537_v25, %v2544_v26 }
 0x25a   : > { %v2552_v30 = vrot.slane %v2545_v27, %v2536_v15 }
 0x25c   : > { %v2554_v45 = vmul.f32 %v2552_v30, %v2516_v28 }
 0x25e   : > { %v2560_v44 = vrot.slane %v2554_v45, %v2559_v29  ;;  %v2564_v48 = vrot.slane %v2554_v45, %v2563_v31  ;;  %v2568_v54 = vrot.slane %v2554_v45, %v2567_v32  ;;  %v2572_v55 = vrot.slane %v2554_v45, %v2571_v43 }
 0x260   : > { %v2577_v57 = vmul.f32 %v2560_v44, %v4047_v21  ;;  %v2578_v58 = vmul.f32 %v2564_v48, %v4049_v22  ;;  %v2579_v59 = vmul.f32 %v2568_v54, %v4051_v23  ;;  %v2580_v51 = vmul.f32 %v2572_v55, %v4053_v24 }
 0x261   : > { %v2611_v2 = vmul.f32 %v2560_v44, %v3999_v33  ;;  %v2612_v21 = vmul.f32 %v2564_v48, %v4001_v34  ;;  %v2613_v22 = vmul.f32 %v2568_v54, %v4003_v35  ;;  %v2614_v23 = vmul.f32 %v2572_v55, %v4005_v36 }
 0x262   : > { %v2585_v52 = vcombine.low %v2577_v57, %v2578_v58  ;;  %v2586_v60 = vcombine.low %v2579_v59, %v2580_v51  ;;  %v2615_v24 = vmul.f32 %v2560_v44, %v4007_v37  ;;  %v2616_v4 = vmul.f32 %v2564_v48, %v4009_v38 }
 0x263   : > { %v2617_v5 = vmul.f32 %v2568_v54, %v4011_v39  ;;  %v2618_v6 = vmul.f32 %v2572_v55, %v4013_v40  ;;  %v2619_v7 = vmul.f32 %v2560_v44, %v4015_v41  ;;  %v2620_v8 = vmul.f32 %v2564_v48, %v4021_v46 }
 0x264   : > { %v2593_v61 = vrot.slane %v2585_v52, %v2536_v15  ;;  %v2600_v62 = vrot.slane %v2586_v60, %v2536_v15  ;;  %v2621_v33 = vmul.f32 %v2568_v54, %v4023_v47  ;;  %v2622_v34 = vmul.f32 %v2572_v55, %v4025_v42 }
 0x265   : > { %v2623_v38 = vmul.f32 %v2560_v44, %v4031_v49  ;;  %v2624_v39 = vmul.f32 %v2564_v48, %v4033_v50  ;;  %v2625_v40 = vmul.f32 %v2568_v54, %v4035_v53  ;;  %v4119_v41 = vmul.f32 %v2572_v55, %v4039_v56 }
 0x266   : > { %v2601_v63 = vcombine.low %v2593_v61, %v2600_v62 }
 0x268   : > { %v2608_v1 = vrot.slane %v2601_v63, %v2536_v15 }
 0x26a   : > { %v2610_v3 = vsub.f32 %v2555_v0, %v2608_v1 }
 0x26c   : > { %v4109_v35 = vrot.slane %v2610_v3, %v2559_v29  ;;  %v2635_v36 = vrot.slane %v2610_v3, %v2563_v31  ;;  %v4111_v9 = vrot.slane %v2610_v3, %v2567_v32  ;;  %v4113_v37 = vrot.slane %v2610_v3, %v2571_v43 }
 0x26e   : > { %v2648_v46 = vadd.f32 %v4109_v35, %v2611_v2  ;;  %v2649_v47 = vadd.f32 %v2635_v36, %v2612_v21  ;;  %v2650_v42 = vadd.f32 %v4111_v9, %v2613_v22  ;;  %v2651_v10 = vadd.f32 %v4113_v37, %v2614_v23 }
 0x26f   : > { %v2652_v11 = vadd.f32 %v4109_v35, %v2615_v24  ;;  %v2653_v12 = vadd.f32 %v2635_v36, %v2616_v4  ;;  %v2654_v13 = vadd.f32 %v4111_v9, %v2617_v5  ;;  %v2655_v49 = vadd.f32 %v4113_v37, %v2618_v6 }
 0x270   : > { %vm2664_vm0 = vcmp.gt.f32.partialorder %v2648_v46, 0.0  ;;  %vm2665_vm1 = vcmp.gt.f32.partialorder %v2649_v47, 0.0  ;;  %v2680_v50 = vmul.f32 0.2, %v2648_v46  ;;  %v2681_v53 = vmul.f32 0.2, %v2649_v47 }
 0x271   : > { %vm2666_vm2 = vcmp.gt.f32.partialorder %v2650_v42, 0.0  ;;  %vm2667_vm3 = vcmp.gt.f32.partialorder %v2651_v10, 0.0  ;;  %v2682_v56 = vmul.f32 0.2, %v2650_v42  ;;  %v2683_v14 = vmul.f32 0.2, %v2651_v10 }
 0x272   : > { %v2696_v15 = vsel %vm2664_vm0, %v2648_v46, %v2680_v50  ;;  %v2697_v16 = vsel %vm2665_vm1, %v2649_v47, %v2681_v53  ;;  %vm2668_vm4 = vcmp.gt.f32.partialorder %v2652_v11, 0.0  ;;  %vm2669_vm5 = vcmp.gt.f32.partialorder %v2653_v12, 0.0 }
 0x273   : > { %v3111_v17 = vpack.c.bf16 %v2697_v16, %v2696_v15  ;;  %v2698_v18 = vsel %vm2666_vm2, %v2650_v42, %v2682_v56  ;;  %v2699_v19 = vsel %vm2667_vm3, %v2651_v10, %v2683_v14  ;;  %v2684_v20 = vmul.f32 0.2, %v2652_v11 }
 0x274   : > { %v3112_v25 = vpack.c.bf16 %v2699_v19, %v2698_v18  ;;  %v2685_v26 = vmul.f32 0.2, %v2653_v12  ;;  %vm2670_vm6 = vcmp.gt.f32.partialorder %v2654_v13, 0.0  ;;  %vm2671_vm7 = vcmp.gt.f32.partialorder %v2655_v49, 0.0 }
 0x275   : > { %2760 = vst [vmem:[%s4172_s4] sm:$0xff] %v3111_v17  ;;  %v2700_v27 = vsel %vm2668_vm4, %v2652_v11, %v2684_v20  ;;  %v2686_v28 = vmul.f32 0.2, %v2654_v13  ;;  %v2687_v29 = vmul.f32 0.2, %v2655_v49  ;;  %v2656_v30 = vadd.f32 %v4109_v35, %v2619_v7 }
 0x276   : > { %2761 = vst [vmem:[%s4172_s4 + $0x8] sm:$0xff] %v3112_v25  ;;  %v2701_v31 = vsel %vm2669_vm5, %v2653_v12, %v2685_v26  ;;  %v2657_v32 = vadd.f32 %v2635_v36, %v2620_v8  ;;  %v2658_v43 = vadd.f32 %v4111_v9, %v2621_v33  ;;  %v2659_v45 = vadd.f32 %v4113_v37, %v2622_v34 }
 0x277   : > { %v3113_v44 = vpack.c.bf16 %v2701_v31, %v2700_v27  ;;  %v2702_v48 = vsel %vm2670_vm6, %v2654_v13, %v2686_v28  ;;  %v2703_v54 = vsel %vm2671_vm7, %v2655_v49, %v2687_v29  ;;  %vm2672_vm8 = vcmp.gt.f32.partialorder %v2656_v30, 0.0 }
 0x278   : > { %v3114_v55 = vpack.c.bf16 %v2703_v54, %v2702_v48  ;;  %vm2673_vm9 = vcmp.gt.f32.partialorder %v2657_v32, 0.0  ;;  %v2688_v57 = vmul.f32 0.2, %v2656_v30  ;;  %v2689_v58 = vmul.f32 0.2, %v2657_v32 }
 0x279   : > { %2762 = vst [vmem:[%s4172_s4 + $0x10] sm:$0xff] %v3113_v44  ;;  %vm2674_vm10 = vcmp.gt.f32.partialorder %v2658_v43, 0.0  ;;  %vm2675_vm11 = vcmp.gt.f32.partialorder %v2659_v45, 0.0  ;;  %v2690_v59 = vmul.f32 0.2, %v2658_v43  ;;  %v2660_v61 = vadd.f32 %v4109_v35, %v2623_v38 }
 0x27a   : > { %v2691_v51 = vmul.f32 0.2, %v2659_v45  ;;  %2763 = vst [vmem:[%s4172_s4 + $0x18] sm:$0xff] %v3114_v55  ;;  %v2704_v52 = vsel %vm2672_vm8, %v2656_v30, %v2688_v57  ;;  %v2705_v60 = vsel %vm2673_vm9, %v2657_v32, %v2689_v58  ;;  %v2661_v62 = vadd.f32 %v2635_v36, %v2624_v39 }
 0x27b   : > { %v3115_v63 = vpack.c.bf16 %v2705_v60, %v2704_v52  ;;  %v2706_v0 = vsel %vm2674_vm10, %v2658_v43, %v2690_v59  ;;  %v2662_v2 = vadd.f32 %v4111_v9, %v2625_v40  ;;  %vm2676_vm12 = vcmp.gt.f32.partialorder %v2660_v61, 0.0 }
 0x27c   : > { %v2707_v1 = vsel %vm2675_vm11, %v2659_v45, %v2691_v51  ;;  %vm2677_vm13 = vcmp.gt.f32.partialorder %v2661_v62, 0.0  ;;  %v2692_v22 = vmul.f32 0.2, %v2660_v61  ;;  %v2693_v23 = vmul.f32 0.2, %v2661_v62 }
 0x27d   : > { %v3116_v21 = vpack.c.bf16 %v2707_v1, %v2706_v0  ;;  %2764 = vst [vmem:[%s4172_s4 + $0x20] sm:$0xff] %v3115_v63  ;;  %v2663_v24 = vadd.f32 %v4113_v37, %v4119_v41  ;;  %vm2678_vm14 = vcmp.gt.f32.partialorder %v2662_v2, 0.0  ;;  %v2694_v3 = vmul.f32 0.2, %v2662_v2 }
 0x27e   : > { %v2708_v4 = vsel %vm2676_vm12, %v2660_v61, %v2692_v22  ;;  %v2709_v5 = vsel %vm2677_vm13, %v2661_v62, %v2693_v23 }
 0x27f   : > { %2765 = vst [vmem:[%s4172_s4 + $0x28] sm:$0xff] %v3116_v21  ;;  %vm2679_vm15 = vcmp.gt.f32.partialorder %v2663_v24, 0.0  ;;  %v2695_v6 = vmul.f32 0.2, %v2663_v24  ;;  %v2710_v7 = vsel %vm2678_vm14, %v2662_v2, %v2694_v3  ;;  %v3117_v8 = vpack.c.bf16 %v2709_v5, %v2708_v4 }
 0x281   : > { %v2711_v33 = vsel %vm2679_vm15, %v2663_v24, %v2695_v6  ;;  %2766 = vst [vmem:[%s4172_s4 + $0x30] sm:$0xff] %v3117_v8 }
 0x282   : > { %v3118_v34 = vpack.c.bf16 %v2711_v33, %v2710_v7 }
 0x284   : > { %2767 = vst [vmem:[%s4172_s4 + $0x38] sm:$0xff] %v3118_v34 }
 0x285 PF: > { %p11_p11 = scmp.ge.s32.totalorder %s3655_s19, 6   ;;  %s4173_s15 = smov %s3603_s16 }
 0x286   : > { %s4174_s16 = smov %s3664_s22  ;;  %s4175_s17 = smov %s3655_s19 }
 0x287   :  { %13 = sbr.rel (!%p11_p11) target bundleno = 2 (0x2), region = 101 }

</bundles_post_ra>
